<compile_context>
chip_gen: v7x
topology: tpu7x:2x2x1
jax: 0.10.0
libtpu: 0.0.40
codegen_flags: <defaults>
</compile_context>

<pallas_src>
import jax
import jax.numpy as jnp
import numpy as np
from jax import lax
from jax.experimental import pallas as pl
from jax.experimental.pallas import tpu as pltpu

CP = 128  # channel dim padded to a full f32 vreg lane width (lane dense)


def _make_fused_dw_kernel(H, W, n_mid):
    """Build the fused kernel for an HxW image with `n_mid` feature->feature layers."""
    HW = H * W
    FRONT = ((W + 1 + 7) // 8) * 8     # zero-halo rows, sublane aligned, >= W+1
    ROWS = FRONT + HW + FRONT

    def kernel(xp_ref, w0_ref, wm_ref, w4_ref, o_ref, buf_a, buf_b, pat):
        # dx = +-1 shifts in the flattened layout wrap across image rows; build
        # the two (HW,1) column-validity masks once (dy handled by zero halo).
        pidx = lax.broadcasted_iota(jnp.int32, (HW, 1), 0)
        wcol = pidx % W
        mask_l = (wcol > 0).astype(jnp.float32)        # tap dx=-1 needs w-1 >= 0
        mask_r = (wcol < W - 1).astype(jnp.float32)    # tap dx=+1 needs w+1 <  W

        # Zero the halos once per grid step (interiors are overwritten below).
        buf_a[...] = jnp.zeros_like(buf_a)
        buf_b[...] = jnp.zeros_like(buf_b)

        # ---- layer 0 (Cin=1): one small matmul over host-built im2col cols --
        xin = xp_ref[...]                                           # (HW, CP)
        a0 = jnp.dot(xin, w0_ref[...], preferred_element_type=jnp.float32)
        buf_a[FRONT:FRONT + HW, :] = jnp.maximum(a0, 0.0)

        bufs = (buf_a, buf_b)

        def shifted(src, tap):
            dy, dx = tap // 3, tap % 3
            off = (dy - 1) * W + (dx - 1)
            s = src[FRONT + off:FRONT + off + HW, :]                # (HW, CP)
            if dx == 0:
                s = s * mask_l
            elif dx == 2:
                s = s * mask_r
            return s

        # ---- middle layers: full im2col -> one fat MXU matmul per layer -----
        for l in range(n_mid):
            src = bufs[l % 2]
            dst = bufs[(l + 1) % 2]
            for tap in range(9):                 # stage patches in VMEM scratch
                pat[:, tap * CP:(tap + 1) * CP] = shifted(src, tap)
            acc = jnp.dot(pat[...], wm_ref[l],   # (HW, 9*CP) @ (9*CP, CP)
                          preferred_element_type=jnp.float32)
            dst[FRONT:FRONT + HW, :] = jnp.maximum(acc, 0.0)

        # ---- last layer (Cout=1): VPU broadcast-MAC + lane reduction --------
        src = bufs[n_mid % 2]
        w4 = w4_ref[...]                                            # (9, CP)
        acc = jnp.zeros((HW, CP), jnp.float32)
        for tap in range(9):
            acc = acc + shifted(src, tap) * w4[tap:tap + 1, :]
        y = jnp.maximum(jnp.sum(acc, axis=1, keepdims=True), 0.0)   # (HW, 1)

        # residual: original single-channel input == center im2col column
        y = y + xin[:, 4:5]
        o_ref[...] = y.astype(o_ref.dtype)

    return kernel, ROWS


def dw_pallas(x_nchw, weights):
    """Fused forward of `dw`; weights is a list of (3,3,cin,cout) f32 arrays."""
    N, C, H, W = x_nchw.shape
    n_layers = len(weights)
    feat = weights[0].shape[3]
    assert C == 1 and weights[-1].shape[3] == 1, "kernel assumes in_chl=out_chl=1"
    assert feat <= CP and n_layers >= 2
    n_mid = n_layers - 2
    HW = H * W

    # ---- tiny host-side layout prep (fused into the same jit) --------------
    # layer-0 im2col of the 1-channel input, zero-padded to 128 lanes
    xpad = jnp.pad(x_nchw[:, 0], ((0, 0), (1, 1), (1, 1)))
    cols = [xpad[:, dy:dy + H, dx:dx + W].reshape(N, HW)
            for dy in range(3) for dx in range(3)]
    x_patches = jnp.pad(jnp.stack(cols, axis=-1), ((0, 0), (0, 0), (0, CP - 9)))

    # weights packed lane dense (channels zero-padded to CP)
    w0p = jnp.zeros((CP, CP), jnp.float32).at[:9, :feat].set(
        weights[0].reshape(9, feat))
    if n_mid > 0:
        wm = jnp.stack([w.reshape(9, feat, feat) for w in weights[1:-1]])
        wmp = (jnp.zeros((n_mid, 9, CP, CP), jnp.float32)
               .at[:, :, :feat, :feat].set(wm).reshape(n_mid, 9 * CP, CP))
    else:
        wmp = jnp.zeros((1, 9 * CP, CP), jnp.float32)   # unused dummy
    w4p = jnp.zeros((9, CP), jnp.float32).at[:, :feat].set(
        weights[-1].reshape(9, feat))

    kernel, rows = _make_fused_dw_kernel(H, W, n_mid)
    out = pl.pallas_call(
        kernel,
        out_shape=jax.ShapeDtypeStruct((N, HW, 1), x_nchw.dtype),
        grid=(N,),
        in_specs=[
            pl.BlockSpec((None, HW, CP), lambda n: (n, 0, 0)),
            pl.BlockSpec((CP, CP), lambda n: (0, 0)),
            pl.BlockSpec((max(n_mid, 1), 9 * CP, CP), lambda n: (0, 0, 0)),
            pl.BlockSpec((9, CP), lambda n: (0, 0)),
        ],
        out_specs=pl.BlockSpec((None, HW, 1), lambda n: (n, 0, 0)),
        scratch_shapes=[
            pltpu.VMEM((rows, CP), jnp.float32),     # ping activation buffer
            pltpu.VMEM((rows, CP), jnp.float32),     # pong activation buffer
            pltpu.VMEM((HW, 9 * CP), jnp.float32),   # im2col staging
        ],
        compiler_params=pltpu.CompilerParams(
            dimension_semantics=("parallel",),
            vmem_limit_bytes=32 * 1024 * 1024),
    )(x_patches, w0p, wmp, w4p)
    return out.reshape(N, H, W)[:, None]             # back to NCHW (N,1,H,W)


dw_forward = jax.jit(dw_pallas)


def make_dw_weights(n_layers, in_chl, out_chl, features, key):
    """Deterministic synthetic weights, shape (3,3,Cin,Cout) per layer."""
    weights = []
    for it in range(n_layers):
        if it == 0:
            cin, cout = in_chl, features
        elif it < n_layers - 1:
            cin, cout = features, features
        else:
            cin, cout = features, out_chl
        key, sub = jax.random.split(key)
        scale = np.sqrt(2.0 / (9 * cin)).astype(np.float32)
        weights.append(scale * jax.random.normal(sub, (3, 3, cin, cout),
                                                 jnp.float32))
    return weights


def dw_forward_ref(x_nchw, weights):
    """Pure-JAX reference (lax.conv) matching dw.forward."""
    x = x_nchw
    x_in = x
    for w in weights:
        w_oihw = jnp.transpose(w, (3, 2, 0, 1))
        x = lax.conv_general_dilated(
            x, w_oihw, window_strides=(1, 1), padding="SAME",
            dimension_numbers=("NCHW", "OIHW", "NCHW"))
        x = jnp.maximum(x, 0.0)
    return x + x_in


if __name__ == "__main__":
    key = jax.random.PRNGKey(0)
    kx, kw = jax.random.split(key)
    x = jax.random.normal(kx, (2, 1, 16, 16), jnp.float32)   # N, C, H, W
    weights = make_dw_weights(n_layers=5, in_chl=1, out_chl=1,
                              features=64, key=kw)

    out = jax.block_until_ready(dw_forward(x, weights))
    ref = jax.block_until_ready(dw_forward_ref(x, weights))
    np.testing.assert_allclose(np.asarray(out), np.asarray(ref),
                               rtol=1e-3, atol=1e-3)
    print("KERNEL_OK")
</pallas_src>

<mosaic_0001>
module attributes {stable_mosaic.version = 11 : i64} {
  func.func @kernel(%arg0: i32, %arg1: memref<1x256x128xf32, #tpu.memory_space<vmem>>, %arg2: memref<128x128xf32, #tpu.memory_space<vmem>>, %arg3: memref<3x1152x128xf32, #tpu.memory_space<vmem>>, %arg4: memref<9x128xf32, #tpu.memory_space<vmem>>, %arg5: memref<1x256x1xf32, #tpu.memory_space<vmem>>, %arg6: memref<304x128xf32, #tpu.memory_space<vmem>>, %arg7: memref<304x128xf32, #tpu.memory_space<vmem>>, %arg8: memref<256x1152xf32, #tpu.memory_space<vmem>>) attributes {dimension_semantics = [#tpu.dimension_semantics<parallel>], iteration_bounds = array<i64: 2>, scalar_prefetch = 0 : i64, scratch_operands = 3 : i64, tpu.core_type = #tpu.core_type<tc>, window_params = [{transform_indices = @transform_0, window_bounds = array<i64: 1, 256, 128>}, {pipeline_mode = #tpu.pipeline_mode<synchronous>, transform_indices = @transform_1, window_bounds = array<i64: 128, 128>}, {pipeline_mode = #tpu.pipeline_mode<synchronous>, transform_indices = @transform_2, window_bounds = array<i64: 3, 1152, 128>}, {pipeline_mode = #tpu.pipeline_mode<synchronous>, transform_indices = @transform_3, window_bounds = array<i64: 9, 128>}, {transform_indices = @transform_4, window_bounds = array<i64: 1, 256, 1>}]} {
    %0 = tpu.iota {dimensions = array<i32: 0>} : vector<256x1xi32>
    %c16_i32 = arith.constant 16 : i32
    %c0_i32 = arith.constant 0 : i32
    %1 = arith.cmpi eq, %c16_i32, %c0_i32 : i32
    %c1_i32 = arith.constant 1 : i32
    %2 = arith.select %1, %c1_i32, %c16_i32 : i32
    %3 = vector.broadcast %2 : i32 to vector<256x1xi32>
    %4 = arith.remsi %0, %3 : vector<256x1xi32>
    %c0_i32_0 = arith.constant 0 : i32
    %5 = vector.broadcast %c0_i32_0 : i32 to vector<256x1xi32>
    %6 = arith.cmpi ne, %4, %5 : vector<256x1xi32>
    %c0_i32_1 = arith.constant 0 : i32
    %7 = vector.broadcast %c0_i32_1 : i32 to vector<256x1xi32>
    %8 = arith.cmpi slt, %4, %7 : vector<256x1xi32>
    %c0_i32_2 = arith.constant 0 : i32
    %9 = arith.cmpi slt, %2, %c0_i32_2 : i32
    %10 = vector.broadcast %9 : i1 to vector<256x1xi1>
    %11 = vector.broadcast %10 : vector<256x1xi1> to vector<256x1xi1>
    %12 = arith.xori %8, %11 : vector<256x1xi1>
    %13 = arith.andi %12, %6 : vector<256x1xi1>
    %14 = vector.broadcast %2 : i32 to vector<256x1xi32>
    %15 = arith.addi %4, %14 : vector<256x1xi32>
    %16 = arith.select %13, %15, %4 : vector<256x1xi1>, vector<256x1xi32>
    %c0_i32_3 = arith.constant 0 : i32
    %17 = vector.broadcast %c0_i32_3 : i32 to vector<256x1xi32>
    %18 = arith.cmpi sgt, %16, %17 : vector<256x1xi32>
    %19 = arith.extui %18 : vector<256x1xi1> to vector<256x1xi32>
    %20 = arith.sitofp %19 : vector<256x1xi32> to vector<256x1xf32>
    %c15_i32 = arith.constant 15 : i32
    %21 = vector.broadcast %c15_i32 : i32 to vector<256x1xi32>
    %22 = arith.cmpi slt, %16, %21 : vector<256x1xi32>
    %23 = arith.extui %22 : vector<256x1xi1> to vector<256x1xi32>
    %24 = arith.sitofp %23 : vector<256x1xi32> to vector<256x1xf32>
    %cst = arith.constant 0.000000e+00 : f32
    %25 = vector.broadcast %cst : f32 to vector<304x128xf32>
    %c0 = arith.constant 0 : index
    %c0_4 = arith.constant 0 : index
    %26 = vector.load %arg6[%c0, %c0_4] : memref<304x128xf32, #tpu.memory_space<vmem>>, vector<304x128xf32>
    tpu.vector_store %arg6[%c0, %c0_4], %25 {strides = array<i32>} : memref<304x128xf32, #tpu.memory_space<vmem>>, vector<304x128xf32>,
    %cst_5 = arith.constant 0.000000e+00 : f32
    %27 = vector.broadcast %cst_5 : f32 to vector<304x128xf32>
    %c0_6 = arith.constant 0 : index
    %c0_7 = arith.constant 0 : index
    %28 = vector.load %arg7[%c0_6, %c0_7] : memref<304x128xf32, #tpu.memory_space<vmem>>, vector<304x128xf32>
    tpu.vector_store %arg7[%c0_6, %c0_7], %27 {strides = array<i32>} : memref<304x128xf32, #tpu.memory_space<vmem>>, vector<304x128xf32>,
    %c0_8 = arith.constant 0 : index
    %c0_9 = arith.constant 0 : index
    %c0_10 = arith.constant 0 : index
    %29 = vector.load %arg1[%c0_8, %c0_9, %c0_10] : memref<1x256x128xf32, #tpu.memory_space<vmem>>, vector<1x256x128xf32>
    %30 = vector.shape_cast %29 : vector<1x256x128xf32> to vector<256x128xf32>
    %c0_11 = arith.constant 0 : index
    %c0_12 = arith.constant 0 : index
    %31 = vector.load %arg2[%c0_11, %c0_12] : memref<128x128xf32, #tpu.memory_space<vmem>>, vector<128x128xf32>
    %cst_13 = arith.constant dense<0.000000e+00> : vector<256x128xf32>
    %32 = tpu.matmul %30, %31, %cst_13 {dimension_numbers = #tpu.dot_dimension_numbers<[1], [0], [0], [1], [0, 0, 1, 1], [], []>} : vector<256x128xf32>, vector<128x128xf32>, vector<256x128xf32> -> vector<256x128xf32>
    %cst_14 = arith.constant 0.000000e+00 : f32
    %33 = vector.broadcast %cst_14 : f32 to vector<256x128xf32>
    %34 = arith.maximumf %32, %33 : vector<256x128xf32>
    %c24 = arith.constant 24 : index
    %c0_15 = arith.constant 0 : index
    %35 = vector.load %arg6[%c24, %c0_15] : memref<304x128xf32, #tpu.memory_space<vmem>>, vector<256x128xf32>
    tpu.vector_store %arg6[%c24, %c0_15], %34 {strides = array<i32>} : memref<304x128xf32, #tpu.memory_space<vmem>>, vector<256x128xf32>,
    %c7 = arith.constant 7 : index
    %c0_16 = arith.constant 0 : index
    %36 = vector.load %arg6[%c7, %c0_16] : memref<304x128xf32, #tpu.memory_space<vmem>>, vector<256x128xf32>
    %37 = vector.broadcast %20 : vector<256x1xf32> to vector<256x128xf32>
    %38 = arith.mulf %36, %37 : vector<256x128xf32>
    %c0_17 = arith.constant 0 : index
    %c0_18 = arith.constant 0 : index
    %39 = vector.load %arg8[%c0_17, %c0_18] : memref<256x1152xf32, #tpu.memory_space<vmem>>, vector<256x128xf32>
    tpu.vector_store %arg8[%c0_17, %c0_18], %38 {strides = array<i32>} : memref<256x1152xf32, #tpu.memory_space<vmem>>, vector<256x128xf32>,
    %c8 = arith.constant 8 : index
    %c0_19 = arith.constant 0 : index
    %40 = vector.load %arg6[%c8, %c0_19] : memref<304x128xf32, #tpu.memory_space<vmem>>, vector<256x128xf32>
    %c0_20 = arith.constant 0 : index
    %c128 = arith.constant 128 : index
    %41 = vector.load %arg8[%c0_20, %c128] : memref<256x1152xf32, #tpu.memory_space<vmem>>, vector<256x128xf32>
    tpu.vector_store %arg8[%c0_20, %c128], %40 {strides = array<i32>} : memref<256x1152xf32, #tpu.memory_space<vmem>>, vector<256x128xf32>,
    %c9 = arith.constant 9 : index
    %c0_21 = arith.constant 0 : index
    %42 = vector.load %arg6[%c9, %c0_21] : memref<304x128xf32, #tpu.memory_space<vmem>>, vector<256x128xf32>
    %43 = vector.broadcast %24 : vector<256x1xf32> to vector<256x128xf32>
    %44 = arith.mulf %42, %43 : vector<256x128xf32>
    %c0_22 = arith.constant 0 : index
    %c256 = arith.constant 256 : index
    %45 = vector.load %arg8[%c0_22, %c256] : memref<256x1152xf32, #tpu.memory_space<vmem>>, vector<256x128xf32>
    tpu.vector_store %arg8[%c0_22, %c256], %44 {strides = array<i32>} : memref<256x1152xf32, #tpu.memory_space<vmem>>, vector<256x128xf32>,
    %c23 = arith.constant 23 : index
    %c0_23 = arith.constant 0 : index
    %46 = vector.load %arg6[%c23, %c0_23] : memref<304x128xf32, #tpu.memory_space<vmem>>, vector<256x128xf32>
    %47 = vector.broadcast %20 : vector<256x1xf32> to vector<256x128xf32>
    %48 = arith.mulf %46, %47 : vector<256x128xf32>
    %c0_24 = arith.constant 0 : index
    %c384 = arith.constant 384 : index
    %49 = vector.load %arg8[%c0_24, %c384] : memref<256x1152xf32, #tpu.memory_space<vmem>>, vector<256x128xf32>
    tpu.vector_store %arg8[%c0_24, %c384], %48 {strides = array<i32>} : memref<256x1152xf32, #tpu.memory_space<vmem>>, vector<256x128xf32>,
    %c24_25 = arith.constant 24 : index
    %c0_26 = arith.constant 0 : index
    %50 = vector.load %arg6[%c24_25, %c0_26] : memref<304x128xf32, #tpu.memory_space<vmem>>, vector<256x128xf32>
    %c0_27 = arith.constant 0 : index
    %c512 = arith.constant 512 : index
    %51 = vector.load %arg8[%c0_27, %c512] : memref<256x1152xf32, #tpu.memory_space<vmem>>, vector<256x128xf32>
    tpu.vector_store %arg8[%c0_27, %c512], %50 {strides = array<i32>} : memref<256x1152xf32, #tpu.memory_space<vmem>>, vector<256x128xf32>,
    %c25 = arith.constant 25 : index
    %c0_28 = arith.constant 0 : index
    %52 = vector.load %arg6[%c25, %c0_28] : memref<304x128xf32, #tpu.memory_space<vmem>>, vector<256x128xf32>
    %53 = vector.broadcast %24 : vector<256x1xf32> to vector<256x128xf32>
    %54 = arith.mulf %52, %53 : vector<256x128xf32>
    %c0_29 = arith.constant 0 : index
    %c640 = arith.constant 640 : index
    %55 = vector.load %arg8[%c0_29, %c640] : memref<256x1152xf32, #tpu.memory_space<vmem>>, vector<256x128xf32>
    tpu.vector_store %arg8[%c0_29, %c640], %54 {strides = array<i32>} : memref<256x1152xf32, #tpu.memory_space<vmem>>, vector<256x128xf32>,
    %c39 = arith.constant 39 : index
    %c0_30 = arith.constant 0 : index
    %56 = vector.load %arg6[%c39, %c0_30] : memref<304x128xf32, #tpu.memory_space<vmem>>, vector<256x128xf32>
    %57 = vector.broadcast %20 : vector<256x1xf32> to vector<256x128xf32>
    %58 = arith.mulf %56, %57 : vector<256x128xf32>
    %c0_31 = arith.constant 0 : index
    %c768 = arith.constant 768 : index
    %59 = vector.load %arg8[%c0_31, %c768] : memref<256x1152xf32, #tpu.memory_space<vmem>>, vector<256x128xf32>
    tpu.vector_store %arg8[%c0_31, %c768], %58 {strides = array<i32>} : memref<256x1152xf32, #tpu.memory_space<vmem>>, vector<256x128xf32>,
    %c40 = arith.constant 40 : index
    %c0_32 = arith.constant 0 : index
    %60 = vector.load %arg6[%c40, %c0_32] : memref<304x128xf32, #tpu.memory_space<vmem>>, vector<256x128xf32>
    %c0_33 = arith.constant 0 : index
    %c896 = arith.constant 896 : index
    %61 = vector.load %arg8[%c0_33, %c896] : memref<256x1152xf32, #tpu.memory_space<vmem>>, vector<256x128xf32>
    tpu.vector_store %arg8[%c0_33, %c896], %60 {strides = array<i32>} : memref<256x1152xf32, #tpu.memory_space<vmem>>, vector<256x128xf32>,
    %c41 = arith.constant 41 : index
    %c0_34 = arith.constant 0 : index
    %62 = vector.load %arg6[%c41, %c0_34] : memref<304x128xf32, #tpu.memory_space<vmem>>, vector<256x128xf32>
    %63 = vector.broadcast %24 : vector<256x1xf32> to vector<256x128xf32>
    %64 = arith.mulf %62, %63 : vector<256x128xf32>
    %c0_35 = arith.constant 0 : index
    %c1024 = arith.constant 1024 : index
    %65 = vector.load %arg8[%c0_35, %c1024] : memref<256x1152xf32, #tpu.memory_space<vmem>>, vector<256x128xf32>
    tpu.vector_store %arg8[%c0_35, %c1024], %64 {strides = array<i32>} : memref<256x1152xf32, #tpu.memory_space<vmem>>, vector<256x128xf32>,
    %c0_36 = arith.constant 0 : index
    %c0_37 = arith.constant 0 : index
    %66 = vector.load %arg8[%c0_36, %c0_37] : memref<256x1152xf32, #tpu.memory_space<vmem>>, vector<256x1152xf32>
    %c0_38 = arith.constant 0 : index
    %c0_39 = arith.constant 0 : index
    %c0_40 = arith.constant 0 : index
    %67 = vector.load %arg3[%c0_38, %c0_39, %c0_40] : memref<3x1152x128xf32, #tpu.memory_space<vmem>>, vector<1x1152x128xf32>
    %68 = vector.shape_cast %67 : vector<1x1152x128xf32> to vector<1152x128xf32>
    %cst_41 = arith.constant dense<0.000000e+00> : vector<256x128xf32>
    %69 = tpu.matmul %66, %68, %cst_41 {dimension_numbers = #tpu.dot_dimension_numbers<[1], [0], [0], [1], [0, 0, 1, 1], [], []>} : vector<256x1152xf32>, vector<1152x128xf32>, vector<256x128xf32> -> vector<256x128xf32>
    %cst_42 = arith.constant 0.000000e+00 : f32
    %70 = vector.broadcast %cst_42 : f32 to vector<256x128xf32>
    %71 = arith.maximumf %69, %70 : vector<256x128xf32>
    %c24_43 = arith.constant 24 : index
    %c0_44 = arith.constant 0 : index
    %72 = vector.load %arg7[%c24_43, %c0_44] : memref<304x128xf32, #tpu.memory_space<vmem>>, vector<256x128xf32>
    tpu.vector_store %arg7[%c24_43, %c0_44], %71 {strides = array<i32>} : memref<304x128xf32, #tpu.memory_space<vmem>>, vector<256x128xf32>,
    %c7_45 = arith.constant 7 : index
    %c0_46 = arith.constant 0 : index
    %73 = vector.load %arg7[%c7_45, %c0_46] : memref<304x128xf32, #tpu.memory_space<vmem>>, vector<256x128xf32>
    %74 = vector.broadcast %20 : vector<256x1xf32> to vector<256x128xf32>
    %75 = arith.mulf %73, %74 : vector<256x128xf32>
    %c0_47 = arith.constant 0 : index
    %c0_48 = arith.constant 0 : index
    %76 = vector.load %arg8[%c0_47, %c0_48] : memref<256x1152xf32, #tpu.memory_space<vmem>>, vector<256x128xf32>
    tpu.vector_store %arg8[%c0_47, %c0_48], %75 {strides = array<i32>} : memref<256x1152xf32, #tpu.memory_space<vmem>>, vector<256x128xf32>,
    %c8_49 = arith.constant 8 : index
    %c0_50 = arith.constant 0 : index
    %77 = vector.load %arg7[%c8_49, %c0_50] : memref<304x128xf32, #tpu.memory_space<vmem>>, vector<256x128xf32>
    %c0_51 = arith.constant 0 : index
    %c128_52 = arith.constant 128 : index
    %78 = vector.load %arg8[%c0_51, %c128_52] : memref<256x1152xf32, #tpu.memory_space<vmem>>, vector<256x128xf32>
    tpu.vector_store %arg8[%c0_51, %c128_52], %77 {strides = array<i32>} : memref<256x1152xf32, #tpu.memory_space<vmem>>, vector<256x128xf32>,
    %c9_53 = arith.constant 9 : index
    %c0_54 = arith.constant 0 : index
    %79 = vector.load %arg7[%c9_53, %c0_54] : memref<304x128xf32, #tpu.memory_space<vmem>>, vector<256x128xf32>
    %80 = vector.broadcast %24 : vector<256x1xf32> to vector<256x128xf32>
    %81 = arith.mulf %79, %80 : vector<256x128xf32>
    %c0_55 = arith.constant 0 : index
    %c256_56 = arith.constant 256 : index
    %82 = vector.load %arg8[%c0_55, %c256_56] : memref<256x1152xf32, #tpu.memory_space<vmem>>, vector<256x128xf32>
    tpu.vector_store %arg8[%c0_55, %c256_56], %81 {strides = array<i32>} : memref<256x1152xf32, #tpu.memory_space<vmem>>, vector<256x128xf32>,
    %c23_57 = arith.constant 23 : index
    %c0_58 = arith.constant 0 : index
    %83 = vector.load %arg7[%c23_57, %c0_58] : memref<304x128xf32, #tpu.memory_space<vmem>>, vector<256x128xf32>
    %84 = vector.broadcast %20 : vector<256x1xf32> to vector<256x128xf32>
    %85 = arith.mulf %83, %84 : vector<256x128xf32>
    %c0_59 = arith.constant 0 : index
    %c384_60 = arith.constant 384 : index
    %86 = vector.load %arg8[%c0_59, %c384_60] : memref<256x1152xf32, #tpu.memory_space<vmem>>, vector<256x128xf32>
    tpu.vector_store %arg8[%c0_59, %c384_60], %85 {strides = array<i32>} : memref<256x1152xf32, #tpu.memory_space<vmem>>, vector<256x128xf32>,
    %c24_61 = arith.constant 24 : index
    %c0_62 = arith.constant 0 : index
    %87 = vector.load %arg7[%c24_61, %c0_62] : memref<304x128xf32, #tpu.memory_space<vmem>>, vector<256x128xf32>
    %c0_63 = arith.constant 0 : index
    %c512_64 = arith.constant 512 : index
    %88 = vector.load %arg8[%c0_63, %c512_64] : memref<256x1152xf32, #tpu.memory_space<vmem>>, vector<256x128xf32>
    tpu.vector_store %arg8[%c0_63, %c512_64], %87 {strides = array<i32>} : memref<256x1152xf32, #tpu.memory_space<vmem>>, vector<256x128xf32>,
    %c25_65 = arith.constant 25 : index
    %c0_66 = arith.constant 0 : index
    %89 = vector.load %arg7[%c25_65, %c0_66] : memref<304x128xf32, #tpu.memory_space<vmem>>, vector<256x128xf32>
    %90 = vector.broadcast %24 : vector<256x1xf32> to vector<256x128xf32>
    %91 = arith.mulf %89, %90 : vector<256x128xf32>
    %c0_67 = arith.constant 0 : index
    %c640_68 = arith.constant 640 : index
    %92 = vector.load %arg8[%c0_67, %c640_68] : memref<256x1152xf32, #tpu.memory_space<vmem>>, vector<256x128xf32>
    tpu.vector_store %arg8[%c0_67, %c640_68], %91 {strides = array<i32>} : memref<256x1152xf32, #tpu.memory_space<vmem>>, vector<256x128xf32>,
    %c39_69 = arith.constant 39 : index
    %c0_70 = arith.constant 0 : index
    %93 = vector.load %arg7[%c39_69, %c0_70] : memref<304x128xf32, #tpu.memory_space<vmem>>, vector<256x128xf32>
    %94 = vector.broadcast %20 : vector<256x1xf32> to vector<256x128xf32>
    %95 = arith.mulf %93, %94 : vector<256x128xf32>
    %c0_71 = arith.constant 0 : index
    %c768_72 = arith.constant 768 : index
    %96 = vector.load %arg8[%c0_71, %c768_72] : memref<256x1152xf32, #tpu.memory_space<vmem>>, vector<256x128xf32>
    tpu.vector_store %arg8[%c0_71, %c768_72], %95 {strides = array<i32>} : memref<256x1152xf32, #tpu.memory_space<vmem>>, vector<256x128xf32>,
    %c40_73 = arith.constant 40 : index
    %c0_74 = arith.constant 0 : index
    %97 = vector.load %arg7[%c40_73, %c0_74] : memref<304x128xf32, #tpu.memory_space<vmem>>, vector<256x128xf32>
    %c0_75 = arith.constant 0 : index
    %c896_76 = arith.constant 896 : index
    %98 = vector.load %arg8[%c0_75, %c896_76] : memref<256x1152xf32, #tpu.memory_space<vmem>>, vector<256x128xf32>
    tpu.vector_store %arg8[%c0_75, %c896_76], %97 {strides = array<i32>} : memref<256x1152xf32, #tpu.memory_space<vmem>>, vector<256x128xf32>,
    %c41_77 = arith.constant 41 : index
    %c0_78 = arith.constant 0 : index
    %99 = vector.load %arg7[%c41_77, %c0_78] : memref<304x128xf32, #tpu.memory_space<vmem>>, vector<256x128xf32>
    %100 = vector.broadcast %24 : vector<256x1xf32> to vector<256x128xf32>
    %101 = arith.mulf %99, %100 : vector<256x128xf32>
    %c0_79 = arith.constant 0 : index
    %c1024_80 = arith.constant 1024 : index
    %102 = vector.load %arg8[%c0_79, %c1024_80] : memref<256x1152xf32, #tpu.memory_space<vmem>>, vector<256x128xf32>
    tpu.vector_store %arg8[%c0_79, %c1024_80], %101 {strides = array<i32>} : memref<256x1152xf32, #tpu.memory_space<vmem>>, vector<256x128xf32>,
    %c0_81 = arith.constant 0 : index
    %c0_82 = arith.constant 0 : index
    %103 = vector.load %arg8[%c0_81, %c0_82] : memref<256x1152xf32, #tpu.memory_space<vmem>>, vector<256x1152xf32>
    %c1 = arith.constant 1 : index
    %c0_83 = arith.constant 0 : index
    %c0_84 = arith.constant 0 : index
    %104 = vector.load %arg3[%c1, %c0_83, %c0_84] : memref<3x1152x128xf32, #tpu.memory_space<vmem>>, vector<1x1152x128xf32>
    %105 = vector.shape_cast %104 : vector<1x1152x128xf32> to vector<1152x128xf32>
    %cst_85 = arith.constant dense<0.000000e+00> : vector<256x128xf32>
    %106 = tpu.matmul %103, %105, %cst_85 {dimension_numbers = #tpu.dot_dimension_numbers<[1], [0], [0], [1], [0, 0, 1, 1], [], []>} : vector<256x1152xf32>, vector<1152x128xf32>, vector<256x128xf32> -> vector<256x128xf32>
    %cst_86 = arith.constant 0.000000e+00 : f32
    %107 = vector.broadcast %cst_86 : f32 to vector<256x128xf32>
    %108 = arith.maximumf %106, %107 : vector<256x128xf32>
    %c24_87 = arith.constant 24 : index
    %c0_88 = arith.constant 0 : index
    %109 = vector.load %arg6[%c24_87, %c0_88] : memref<304x128xf32, #tpu.memory_space<vmem>>, vector<256x128xf32>
    tpu.vector_store %arg6[%c24_87, %c0_88], %108 {strides = array<i32>} : memref<304x128xf32, #tpu.memory_space<vmem>>, vector<256x128xf32>,
    %c7_89 = arith.constant 7 : index
    %c0_90 = arith.constant 0 : index
    %110 = vector.load %arg6[%c7_89, %c0_90] : memref<304x128xf32, #tpu.memory_space<vmem>>, vector<256x128xf32>
    %111 = vector.broadcast %20 : vector<256x1xf32> to vector<256x128xf32>
    %112 = arith.mulf %110, %111 : vector<256x128xf32>
    %c0_91 = arith.constant 0 : index
    %c0_92 = arith.constant 0 : index
    %113 = vector.load %arg8[%c0_91, %c0_92] : memref<256x1152xf32, #tpu.memory_space<vmem>>, vector<256x128xf32>
    tpu.vector_store %arg8[%c0_91, %c0_92], %112 {strides = array<i32>} : memref<256x1152xf32, #tpu.memory_space<vmem>>, vector<256x128xf32>,
    %c8_93 = arith.constant 8 : index
    %c0_94 = arith.constant 0 : index
    %114 = vector.load %arg6[%c8_93, %c0_94] : memref<304x128xf32, #tpu.memory_space<vmem>>, vector<256x128xf32>
    %c0_95 = arith.constant 0 : index
    %c128_96 = arith.constant 128 : index
    %115 = vector.load %arg8[%c0_95, %c128_96] : memref<256x1152xf32, #tpu.memory_space<vmem>>, vector<256x128xf32>
    tpu.vector_store %arg8[%c0_95, %c128_96], %114 {strides = array<i32>} : memref<256x1152xf32, #tpu.memory_space<vmem>>, vector<256x128xf32>,
    %c9_97 = arith.constant 9 : index
    %c0_98 = arith.constant 0 : index
    %116 = vector.load %arg6[%c9_97, %c0_98] : memref<304x128xf32, #tpu.memory_space<vmem>>, vector<256x128xf32>
    %117 = vector.broadcast %24 : vector<256x1xf32> to vector<256x128xf32>
    %118 = arith.mulf %116, %117 : vector<256x128xf32>
    %c0_99 = arith.constant 0 : index
    %c256_100 = arith.constant 256 : index
    %119 = vector.load %arg8[%c0_99, %c256_100] : memref<256x1152xf32, #tpu.memory_space<vmem>>, vector<256x128xf32>
    tpu.vector_store %arg8[%c0_99, %c256_100], %118 {strides = array<i32>} : memref<256x1152xf32, #tpu.memory_space<vmem>>, vector<256x128xf32>,
    %c23_101 = arith.constant 23 : index
    %c0_102 = arith.constant 0 : index
    %120 = vector.load %arg6[%c23_101, %c0_102] : memref<304x128xf32, #tpu.memory_space<vmem>>, vector<256x128xf32>
    %121 = vector.broadcast %20 : vector<256x1xf32> to vector<256x128xf32>
    %122 = arith.mulf %120, %121 : vector<256x128xf32>
    %c0_103 = arith.constant 0 : index
    %c384_104 = arith.constant 384 : index
    %123 = vector.load %arg8[%c0_103, %c384_104] : memref<256x1152xf32, #tpu.memory_space<vmem>>, vector<256x128xf32>
    tpu.vector_store %arg8[%c0_103, %c384_104], %122 {strides = array<i32>} : memref<256x1152xf32, #tpu.memory_space<vmem>>, vector<256x128xf32>,
    %c24_105 = arith.constant 24 : index
    %c0_106 = arith.constant 0 : index
    %124 = vector.load %arg6[%c24_105, %c0_106] : memref<304x128xf32, #tpu.memory_space<vmem>>, vector<256x128xf32>
    %c0_107 = arith.constant 0 : index
    %c512_108 = arith.constant 512 : index
    %125 = vector.load %arg8[%c0_107, %c512_108] : memref<256x1152xf32, #tpu.memory_space<vmem>>, vector<256x128xf32>
    tpu.vector_store %arg8[%c0_107, %c512_108], %124 {strides = array<i32>} : memref<256x1152xf32, #tpu.memory_space<vmem>>, vector<256x128xf32>,
    %c25_109 = arith.constant 25 : index
    %c0_110 = arith.constant 0 : index
    %126 = vector.load %arg6[%c25_109, %c0_110] : memref<304x128xf32, #tpu.memory_space<vmem>>, vector<256x128xf32>
    %127 = vector.broadcast %24 : vector<256x1xf32> to vector<256x128xf32>
    %128 = arith.mulf %126, %127 : vector<256x128xf32>
    %c0_111 = arith.constant 0 : index
    %c640_112 = arith.constant 640 : index
    %129 = vector.load %arg8[%c0_111, %c640_112] : memref<256x1152xf32, #tpu.memory_space<vmem>>, vector<256x128xf32>
    tpu.vector_store %arg8[%c0_111, %c640_112], %128 {strides = array<i32>} : memref<256x1152xf32, #tpu.memory_space<vmem>>, vector<256x128xf32>,
    %c39_113 = arith.constant 39 : index
    %c0_114 = arith.constant 0 : index
    %130 = vector.load %arg6[%c39_113, %c0_114] : memref<304x128xf32, #tpu.memory_space<vmem>>, vector<256x128xf32>
    %131 = vector.broadcast %20 : vector<256x1xf32> to vector<256x128xf32>
    %132 = arith.mulf %130, %131 : vector<256x128xf32>
    %c0_115 = arith.constant 0 : index
    %c768_116 = arith.constant 768 : index
    %133 = vector.load %arg8[%c0_115, %c768_116] : memref<256x1152xf32, #tpu.memory_space<vmem>>, vector<256x128xf32>
    tpu.vector_store %arg8[%c0_115, %c768_116], %132 {strides = array<i32>} : memref<256x1152xf32, #tpu.memory_space<vmem>>, vector<256x128xf32>,
    %c40_117 = arith.constant 40 : index
    %c0_118 = arith.constant 0 : index
    %134 = vector.load %arg6[%c40_117, %c0_118] : memref<304x128xf32, #tpu.memory_space<vmem>>, vector<256x128xf32>
    %c0_119 = arith.constant 0 : index
    %c896_120 = arith.constant 896 : index
    %135 = vector.load %arg8[%c0_119, %c896_120] : memref<256x1152xf32, #tpu.memory_space<vmem>>, vector<256x128xf32>
    tpu.vector_store %arg8[%c0_119, %c896_120], %134 {strides = array<i32>} : memref<256x1152xf32, #tpu.memory_space<vmem>>, vector<256x128xf32>,
    %c41_121 = arith.constant 41 : index
    %c0_122 = arith.constant 0 : index
    %136 = vector.load %arg6[%c41_121, %c0_122] : memref<304x128xf32, #tpu.memory_space<vmem>>, vector<256x128xf32>
    %137 = vector.broadcast %24 : vector<256x1xf32> to vector<256x128xf32>
    %138 = arith.mulf %136, %137 : vector<256x128xf32>
    %c0_123 = arith.constant 0 : index
    %c1024_124 = arith.constant 1024 : index
    %139 = vector.load %arg8[%c0_123, %c1024_124] : memref<256x1152xf32, #tpu.memory_space<vmem>>, vector<256x128xf32>
    tpu.vector_store %arg8[%c0_123, %c1024_124], %138 {strides = array<i32>} : memref<256x1152xf32, #tpu.memory_space<vmem>>, vector<256x128xf32>,
    %c0_125 = arith.constant 0 : index
    %c0_126 = arith.constant 0 : index
    %140 = vector.load %arg8[%c0_125, %c0_126] : memref<256x1152xf32, #tpu.memory_space<vmem>>, vector<256x1152xf32>
    %c2 = arith.constant 2 : index
    %c0_127 = arith.constant 0 : index
    %c0_128 = arith.constant 0 : index
    %141 = vector.load %arg3[%c2, %c0_127, %c0_128] : memref<3x1152x128xf32, #tpu.memory_space<vmem>>, vector<1x1152x128xf32>
    %142 = vector.shape_cast %141 : vector<1x1152x128xf32> to vector<1152x128xf32>
    %cst_129 = arith.constant dense<0.000000e+00> : vector<256x128xf32>
    %143 = tpu.matmul %140, %142, %cst_129 {dimension_numbers = #tpu.dot_dimension_numbers<[1], [0], [0], [1], [0, 0, 1, 1], [], []>} : vector<256x1152xf32>, vector<1152x128xf32>, vector<256x128xf32> -> vector<256x128xf32>
    %cst_130 = arith.constant 0.000000e+00 : f32
    %144 = vector.broadcast %cst_130 : f32 to vector<256x128xf32>
    %145 = arith.maximumf %143, %144 : vector<256x128xf32>
    %c24_131 = arith.constant 24 : index
    %c0_132 = arith.constant 0 : index
    %146 = vector.load %arg7[%c24_131, %c0_132] : memref<304x128xf32, #tpu.memory_space<vmem>>, vector<256x128xf32>
    tpu.vector_store %arg7[%c24_131, %c0_132], %145 {strides = array<i32>} : memref<304x128xf32, #tpu.memory_space<vmem>>, vector<256x128xf32>,
    %c0_133 = arith.constant 0 : index
    %c0_134 = arith.constant 0 : index
    %147 = vector.load %arg4[%c0_133, %c0_134] : memref<9x128xf32, #tpu.memory_space<vmem>>, vector<9x128xf32>
    %cst_135 = arith.constant 0.000000e+00 : f32
    %148 = vector.broadcast %cst_135 : f32 to vector<256x128xf32>
    %c7_136 = arith.constant 7 : index
    %c0_137 = arith.constant 0 : index
    %149 = vector.load %arg7[%c7_136, %c0_137] : memref<304x128xf32, #tpu.memory_space<vmem>>, vector<256x128xf32>
    %150 = vector.broadcast %20 : vector<256x1xf32> to vector<256x128xf32>
    %151 = arith.mulf %149, %150 : vector<256x128xf32>
    %152 = vector.extract_strided_slice %147 {offsets = [0, 0], sizes = [1, 128], strides = [1, 1]} : vector<9x128xf32> to vector<1x128xf32>
    %153 = vector.broadcast %152 : vector<1x128xf32> to vector<256x128xf32>
    %154 = arith.mulf %151, %153 : vector<256x128xf32>
    %155 = arith.addf %148, %154 : vector<256x128xf32>
    %c8_138 = arith.constant 8 : index
    %c0_139 = arith.constant 0 : index
    %156 = vector.load %arg7[%c8_138, %c0_139] : memref<304x128xf32, #tpu.memory_space<vmem>>, vector<256x128xf32>
    %157 = vector.extract_strided_slice %147 {offsets = [1, 0], sizes = [1, 128], strides = [1, 1]} : vector<9x128xf32> to vector<1x128xf32>
    %158 = vector.broadcast %157 : vector<1x128xf32> to vector<256x128xf32>
    %159 = arith.mulf %156, %158 : vector<256x128xf32>
    %160 = arith.addf %155, %159 : vector<256x128xf32>
    %c9_140 = arith.constant 9 : index
    %c0_141 = arith.constant 0 : index
    %161 = vector.load %arg7[%c9_140, %c0_141] : memref<304x128xf32, #tpu.memory_space<vmem>>, vector<256x128xf32>
    %162 = vector.broadcast %24 : vector<256x1xf32> to vector<256x128xf32>
    %163 = arith.mulf %161, %162 : vector<256x128xf32>
    %164 = vector.extract_strided_slice %147 {offsets = [2, 0], sizes = [1, 128], strides = [1, 1]} : vector<9x128xf32> to vector<1x128xf32>
    %165 = vector.broadcast %164 : vector<1x128xf32> to vector<256x128xf32>
    %166 = arith.mulf %163, %165 : vector<256x128xf32>
    %167 = arith.addf %160, %166 : vector<256x128xf32>
    %c23_142 = arith.constant 23 : index
    %c0_143 = arith.constant 0 : index
    %168 = vector.load %arg7[%c23_142, %c0_143] : memref<304x128xf32, #tpu.memory_space<vmem>>, vector<256x128xf32>
    %169 = vector.broadcast %20 : vector<256x1xf32> to vector<256x128xf32>
    %170 = arith.mulf %168, %169 : vector<256x128xf32>
    %171 = vector.extract_strided_slice %147 {offsets = [3, 0], sizes = [1, 128], strides = [1, 1]} : vector<9x128xf32> to vector<1x128xf32>
    %172 = vector.broadcast %171 : vector<1x128xf32> to vector<256x128xf32>
    %173 = arith.mulf %170, %172 : vector<256x128xf32>
    %174 = arith.addf %167, %173 : vector<256x128xf32>
    %c24_144 = arith.constant 24 : index
    %c0_145 = arith.constant 0 : index
    %175 = vector.load %arg7[%c24_144, %c0_145] : memref<304x128xf32, #tpu.memory_space<vmem>>, vector<256x128xf32>
    %176 = vector.extract_strided_slice %147 {offsets = [4, 0], sizes = [1, 128], strides = [1, 1]} : vector<9x128xf32> to vector<1x128xf32>
    %177 = vector.broadcast %176 : vector<1x128xf32> to vector<256x128xf32>
    %178 = arith.mulf %175, %177 : vector<256x128xf32>
    %179 = arith.addf %174, %178 : vector<256x128xf32>
    %c25_146 = arith.constant 25 : index
    %c0_147 = arith.constant 0 : index
    %180 = vector.load %arg7[%c25_146, %c0_147] : memref<304x128xf32, #tpu.memory_space<vmem>>, vector<256x128xf32>
    %181 = vector.broadcast %24 : vector<256x1xf32> to vector<256x128xf32>
    %182 = arith.mulf %180, %181 : vector<256x128xf32>
    %183 = vector.extract_strided_slice %147 {offsets = [5, 0], sizes = [1, 128], strides = [1, 1]} : vector<9x128xf32> to vector<1x128xf32>
    %184 = vector.broadcast %183 : vector<1x128xf32> to vector<256x128xf32>
    %185 = arith.mulf %182, %184 : vector<256x128xf32>
    %186 = arith.addf %179, %185 : vector<256x128xf32>
    %c39_148 = arith.constant 39 : index
    %c0_149 = arith.constant 0 : index
    %187 = vector.load %arg7[%c39_148, %c0_149] : memref<304x128xf32, #tpu.memory_space<vmem>>, vector<256x128xf32>
    %188 = vector.broadcast %20 : vector<256x1xf32> to vector<256x128xf32>
    %189 = arith.mulf %187, %188 : vector<256x128xf32>
    %190 = vector.extract_strided_slice %147 {offsets = [6, 0], sizes = [1, 128], strides = [1, 1]} : vector<9x128xf32> to vector<1x128xf32>
    %191 = vector.broadcast %190 : vector<1x128xf32> to vector<256x128xf32>
    %192 = arith.mulf %189, %191 : vector<256x128xf32>
    %193 = arith.addf %186, %192 : vector<256x128xf32>
    %c40_150 = arith.constant 40 : index
    %c0_151 = arith.constant 0 : index
    %194 = vector.load %arg7[%c40_150, %c0_151] : memref<304x128xf32, #tpu.memory_space<vmem>>, vector<256x128xf32>
    %195 = vector.extract_strided_slice %147 {offsets = [7, 0], sizes = [1, 128], strides = [1, 1]} : vector<9x128xf32> to vector<1x128xf32>
    %196 = vector.broadcast %195 : vector<1x128xf32> to vector<256x128xf32>
    %197 = arith.mulf %194, %196 : vector<256x128xf32>
    %198 = arith.addf %193, %197 : vector<256x128xf32>
    %c41_152 = arith.constant 41 : index
    %c0_153 = arith.constant 0 : index
    %199 = vector.load %arg7[%c41_152, %c0_153] : memref<304x128xf32, #tpu.memory_space<vmem>>, vector<256x128xf32>
    %200 = vector.broadcast %24 : vector<256x1xf32> to vector<256x128xf32>
    %201 = arith.mulf %199, %200 : vector<256x128xf32>
    %202 = vector.extract_strided_slice %147 {offsets = [8, 0], sizes = [1, 128], strides = [1, 1]} : vector<9x128xf32> to vector<1x128xf32>
    %203 = vector.broadcast %202 : vector<1x128xf32> to vector<256x128xf32>
    %204 = arith.mulf %201, %203 : vector<256x128xf32>
    %205 = arith.addf %198, %204 : vector<256x128xf32>
    %cst_154 = arith.constant dense<0.000000e+00> : vector<256xf32>
    %206 = vector.multi_reduction <add>, %205, %cst_154 [1] : vector<256x128xf32> to vector<256xf32>
    %207 = vector.shape_cast %206 : vector<256xf32> to vector<256x1xf32>
    %cst_155 = arith.constant 0.000000e+00 : f32
    %208 = vector.broadcast %cst_155 : f32 to vector<256x1xf32>
    %209 = arith.maximumf %207, %208 : vector<256x1xf32>
    %210 = vector.extract_strided_slice %30 {offsets = [0, 4], sizes = [256, 1], strides = [1, 1]} : vector<256x128xf32> to vector<256x1xf32>
    %211 = arith.addf %209, %210 : vector<256x1xf32>
    %c0_156 = arith.constant 0 : index
    %c0_157 = arith.constant 0 : index
    %c0_158 = arith.constant 0 : index
    %212 = vector.load %arg5[%c0_156, %c0_157, %c0_158] : memref<1x256x1xf32, #tpu.memory_space<vmem>>, vector<1x256x1xf32>
    %213 = vector.shape_cast %212 : vector<1x256x1xf32> to vector<256x1xf32>
    %214 = vector.shape_cast %211 : vector<256x1xf32> to vector<1x256x1xf32>
    tpu.vector_store %arg5[%c0_156, %c0_157, %c0_158], %214 {strides = array<i32>} : memref<1x256x1xf32, #tpu.memory_space<vmem>>, vector<1x256x1xf32>,
    return
  }
  func.func @transform_0(%arg0: i32) -> (i32, i32, i32) {
    %c0_i32 = arith.constant 0 : i32
    %c0_i32_0 = arith.constant 0 : i32
    %c0_i32_1 = arith.constant 0 : i32
    return %arg0, %c0_i32, %c0_i32_0 : i32, i32, i32
  }
  func.func @transform_1(%arg0: i32) -> (i32, i32) {
    %c0_i32 = arith.constant 0 : i32
    %c0_i32_0 = arith.constant 0 : i32
    %c0_i32_1 = arith.constant 0 : i32
    return %c0_i32, %c0_i32_0 : i32, i32
  }
  func.func @transform_2(%arg0: i32) -> (i32, i32, i32) {
    %c0_i32 = arith.constant 0 : i32
    %c0_i32_0 = arith.constant 0 : i32
    %c0_i32_1 = arith.constant 0 : i32
    %c0_i32_2 = arith.constant 0 : i32
    return %c0_i32, %c0_i32_0, %c0_i32_1 : i32, i32, i32
  }
  func.func @transform_3(%arg0: i32) -> (i32, i32) {
    %c0_i32 = arith.constant 0 : i32
    %c0_i32_0 = arith.constant 0 : i32
    %c0_i32_1 = arith.constant 0 : i32
    return %c0_i32, %c0_i32_0 : i32, i32
  }
  func.func @transform_4(%arg0: i32) -> (i32, i32, i32) {
    %c0_i32 = arith.constant 0 : i32
    %c0_i32_0 = arith.constant 0 : i32
    %c0_i32_1 = arith.constant 0 : i32
    return %arg0, %c0_i32, %c0_i32_0 : i32, i32, i32
  }
}

</mosaic_0001>

<bundles_post_ra>
// kernel: dw_pallas.1
= control target key start
LH: loop header
LB: loop body
LE: loop exit
PB: predicated region body
PF: predicated region fallthrough
CT: control target
= control target key end

     0   :  { %s11839_s15 = smov 0   ;;  %s16584_s0 = inlined_call_operand.vmem [shape: f32[2,256,128], index: 0, kind: input, shape index: {}]   ;;  %s16585_s1 = inlined_call_operand.vmem [shape: f32[128,128], index: 1, kind: input, shape index: {}]   ;;  %s16586_s2 = inlined_call_operand.vmem [shape: f32[3,1152,128], index: 2, kind: input, shape index: {}]   ;;  %s16587_s3 = inlined_call_operand.vmem [shape: f32[9,128], index: 3, kind: input, shape index: {}]   ;;  %s16588_s4 = inlined_call_operand.vmem [shape: f32[2,256,1], index: 4, kind: output, shape index: {}]  }
   0x1 LB: > { %s9647_s16 = sadd.s32 4294967295, %s11809_s15   ;;  %p9651_p0 = scmp.ge.s32.totalorder %s11809_s15, 1  ;;  %s11809_s15 = sphi %s11839_s15, %s14_s15  }
   0x2   : > { %p162_p1 = scmp.lt.s32.totalorder %s11809_s15, 3 }
   0x4   : > { %p163_p2 = pnand %p9651_p0, %p162_p1 }
   0x6   : > { %166 = sbr.rel (%p163_p2) target bundleno = 2344 (0x928), region = 36 }
   0xd   : > { %v915_v0 = vld [vmem:[%s16585_s1] sm:$0xff]  ;;  %v916_v1 = vld [vmem:[%s16585_s1 + $0x8] sm:$0xff]  ;;  %v917_v2 = vld [vmem:[%s16585_s1 + $0x10] sm:$0xff]  ;;  %p11856_p3 = scmp.lt.s32.totalorder %s9647_s16, 1  ;;  %v16603_v5 = vmov 0.0|0.0   ;;  %v11812_v6 = vmov 0.0  }
   0xe   : > { %v10493_v3 = vpack.c.bf16 %v916_v1, %v915_v0  ;;  %v918_v4 = vld [vmem:[%s16585_s1 + $0x18] sm:$0xff]  ;;  %10573 = vmatprep.subr.bf16.mxu1 %v16603_v5  ;;  %807 = vst [vmem:[#allocation2] sm:$0xff] %v11812_v6  ;;  %808 = vst [vmem:[#allocation2 + $0x8] sm:$0xff] %v11812_v6  ;;  %v919_v8 = vld [vmem:[%s16585_s1 + $0x20] sm:$0xff]  ;;  %s11813_s20 = smov 124  }
   0xf   : > { %809 = vst [vmem:[#allocation2 + $0x10] sm:$0xff] %v11812_v6  ;;  %842 = vst [vmem:[#allocation2 + $0x118] sm:$0xff] %v11812_v6  ;;  %v10497_v7 = vpack.c.bf16 %v918_v4, %v917_v2  ;;  %v920_v9 = vld [vmem:[%s16585_s1 + $0x28] sm:$0xff]  ;;  %s17239_s16 = smov (!%p11856_p3, %s9647_s16), 1  ;;  %v921_v11 = vld [vmem:[%s16585_s1 + $0x30] sm:$0xff] }
  0x10   : > { %843 = vst [vmem:[#allocation2 + $0x120] sm:$0xff] %v11812_v6  ;;  %844 = vst [vmem:[#allocation2 + $0x128] sm:$0xff] %v11812_v6  ;;  %10494 = vmatprep.subr.bf16.mxu0 %v10493_v3  ;;  %s9979_s30 = sshll.u32 %s17239_s16, 8  ;;  %v10501_v10 = vpack.c.bf16 %v920_v9, %v919_v8  ;;  %v922_v12 = vld [vmem:[%s16585_s1 + $0x38] sm:$0xff]  ;;  %v923_v15 = vld [vmem:[%s16585_s1 + $0x40] sm:$0xff] }
  0x11   : > { %845 = vst [vmem:[#allocation3] sm:$0xff] %v11812_v6  ;;  %846 = vst [vmem:[#allocation3 + $0x8] sm:$0xff] %v11812_v6  ;;  %10496 = vmatpush3.bf16.msra.mxu0 %v10493_v3  ;;  %s11892_s7 = scalar_lea.vmem %s16584_s0, %s9979_s30  ;;  %v10505_v14 = vpack.c.bf16 %v922_v12, %v921_v11  ;;  %v924_v16 = vld [vmem:[%s16585_s1 + $0x48] sm:$0xff]  ;;  %v925_v18 = vld [vmem:[%s16585_s1 + $0x50] sm:$0xff]  ;;  %s16511_s23 = scalar_lea.vmem %s16588_s4, %s9979_s30 }
  0x12   : > { %847 = vst [vmem:[#allocation3 + $0x10] sm:$0xff] %v11812_v6  ;;  %880 = vst [vmem:[#allocation3 + $0x118] sm:$0xff] %v11812_v6  ;;  %10498 = vmatprep.subr.bf16.mxu0 %v10497_v7  ;;  %v883_v13 = vld [vmem:[%s11892_s7] sm:$0xff]  ;;  %v10509_v17 = vpack.c.bf16 %v924_v16, %v923_v15  ;;  %v926_v19 = vld [vmem:[%s16585_s1 + $0x58] sm:$0xff] }
  0x13   : > { %881 = vst [vmem:[#allocation3 + $0x120] sm:$0xff] %v11812_v6  ;;  %882 = vst [vmem:[#allocation3 + $0x128] sm:$0xff] %v11812_v6  ;;  %10205 = vmatprep.mubr.f32.mxu0 %v883_v13  ;;  %v10513_v20 = vpack.c.bf16 %v926_v19, %v925_v18  ;;  %v927_v21 = vld [vmem:[%s16585_s1 + $0x60] sm:$0xff]  ;;  %v928_v22 = vld [vmem:[%s16585_s1 + $0x68] sm:$0xff] }
  0x14   : > { %v2308_v23 = vld [vmem:[%s16586_s2 + $0x100] sm:$0xff]  ;;  %v2309_v24 = vld [vmem:[%s16586_s2 + $0x108] sm:$0xff]  ;;  %v2310_v26 = vld [vmem:[%s16586_s2 + $0x110] sm:$0xff]  ;;  %v10517_v28 = vpack.c.bf16 %v928_v22, %v927_v21 }
  0x15   : > { %10500 = vmatpush3.bf16.msra.mxu0 %v10497_v7  ;;  %v10574_v25 = vpack.c.bf16 %v2309_v24, %v2308_v23  ;;  %v2311_v27 = vld [vmem:[%s16586_s2 + $0x118] sm:$0xff]  ;;  %v929_v29 = vld [vmem:[%s16585_s1 + $0x70] sm:$0xff]  ;;  %v2312_v32 = vld [vmem:[%s16586_s2 + $0x120] sm:$0xff] }
  0x16   : > { %10502 = vmatprep.subr.bf16.mxu0 %v10501_v10  ;;  %v10577_v30 = vpack.c.bf16 %v2311_v27, %v2310_v26  ;;  %v930_v31 = vld [vmem:[%s16585_s1 + $0x78] sm:$0xff]  ;;  %v2313_v33 = vld [vmem:[%s16586_s2 + $0x128] sm:$0xff]  ;;  %v2314_v36 = vld [vmem:[%s16586_s2 + $0x130] sm:$0xff] }
  0x17   : > { %10575 = vmatpush1.bf16.msra.mxu1 %v10574_v25  ;;  %v10521_v34 = vpack.c.bf16 %v930_v31, %v929_v29  ;;  %v10580_v35 = vpack.c.bf16 %v2313_v33, %v2312_v32  ;;  %v2315_v37 = vld [vmem:[%s16586_s2 + $0x138] sm:$0xff]  ;;  %v2276_v38 = vld [vmem:[%s16586_s2] sm:$0xff]  ;;  %v2277_v39 = vld [vmem:[%s16586_s2 + $0x8] sm:$0xff] }
  0x18   : > { %10576 = vmatprep.subr.bf16.mxu1 %v16603_v5  ;;  %v10583_v40 = vpack.c.bf16 %v2315_v37, %v2314_v36  ;;  %v2316_v41 = vld [vmem:[%s16586_s2 + $0x140] sm:$0xff]  ;;  %v2317_v42 = vld [vmem:[%s16586_s2 + $0x148] sm:$0xff]  ;;  %v10526_v44 = vpack.c.bf16 %v2277_v39, %v2276_v38  ;;  %v885_v45 = vld [vmem:[%s11892_s7 + $0x10] sm:$0xff] }
  0x19   : > { %10504 = vmatpush3.bf16.msra.mxu0 %v10501_v10  ;;  %v884_v43 = vld [vmem:[%s11892_s7 + $0x8] sm:$0xff]  ;;  %v2278_v46 = vld [vmem:[%s16586_s2 + $0x10] sm:$0xff]  ;;  %v2279_v47 = vld [vmem:[%s16586_s2 + $0x18] sm:$0xff]  ;;  %v10586_v48 = vpack.c.bf16 %v2317_v42, %v2316_v41 }
  0x1a   : > { %10506 = vmatprep.subr.bf16.mxu0 %v10505_v14  ;;  %v2318_v49 = vld [vmem:[%s16586_s2 + $0x150] sm:$0xff]  ;;  %v2319_v50 = vld [vmem:[%s16586_s2 + $0x158] sm:$0xff]  ;;  %v10529_v52 = vpack.c.bf16 %v2279_v47, %v2278_v46  ;;  %v887_v53 = vld [vmem:[%s11892_s7 + $0x20] sm:$0xff] }
  0x1b   : > { %10578 = vmatpush1.bf16.msra.mxu1 %v10577_v30  ;;  %v886_v51 = vld [vmem:[%s11892_s7 + $0x18] sm:$0xff]  ;;  %v2280_v54 = vld [vmem:[%s16586_s2 + $0x20] sm:$0xff]  ;;  %v2281_v55 = vld [vmem:[%s16586_s2 + $0x28] sm:$0xff]  ;;  %v10589_v56 = vpack.c.bf16 %v2319_v50, %v2318_v49 }
  0x1c   : > { %10579 = vmatprep.subr.bf16.mxu1 %v16603_v5  ;;  %v2320_v57 = vld [vmem:[%s16586_s2 + $0x160] sm:$0xff]  ;;  %v2321_v58 = vld [vmem:[%s16586_s2 + $0x168] sm:$0xff]  ;;  %v10532_v60 = vpack.c.bf16 %v2281_v55, %v2280_v54  ;;  %v889_v61 = vld [vmem:[%s11892_s7 + $0x30] sm:$0xff] }
  0x1d   : > { %10508 = vmatpush3.bf16.msra.mxu0 %v10505_v14  ;;  %v888_v59 = vld [vmem:[%s11892_s7 + $0x28] sm:$0xff]  ;;  %v2282_v62 = vld [vmem:[%s16586_s2 + $0x30] sm:$0xff]  ;;  %v2283_v63 = vld [vmem:[%s16586_s2 + $0x38] sm:$0xff]  ;;  %v10592_v0 = vpack.c.bf16 %v2321_v58, %v2320_v57 }
  0x1e   : > { %10510 = vmatprep.subr.bf16.mxu0 %v10509_v17  ;;  %v2322_v1 = vld [vmem:[%s16586_s2 + $0x170] sm:$0xff]  ;;  %v2323_v2 = vld [vmem:[%s16586_s2 + $0x178] sm:$0xff]  ;;  %v10535_v4 = vpack.c.bf16 %v2283_v63, %v2282_v62  ;;  %v891_v7 = vld [vmem:[%s11892_s7 + $0x40] sm:$0xff] }
  0x1f   : > { %10581 = vmatpush1.bf16.msra.mxu1 %v10580_v35  ;;  %v890_v3 = vld [vmem:[%s11892_s7 + $0x38] sm:$0xff]  ;;  %v2284_v8 = vld [vmem:[%s16586_s2 + $0x40] sm:$0xff]  ;;  %v2285_v9 = vld [vmem:[%s16586_s2 + $0x48] sm:$0xff]  ;;  %v10595_v10 = vpack.c.bf16 %v2323_v2, %v2322_v1 }
  0x20   : > { %10582 = vmatprep.subr.bf16.mxu1 %v16603_v5  ;;  %v2324_v11 = vld [vmem:[%s16586_s2 + $0x180] sm:$0xff]  ;;  %v2325_v12 = vld [vmem:[%s16586_s2 + $0x188] sm:$0xff]  ;;  %v10538_v14 = vpack.c.bf16 %v2285_v9, %v2284_v8  ;;  %v893_v15 = vld [vmem:[%s11892_s7 + $0x50] sm:$0xff] }
  0x21   : > { %10512 = vmatpush3.bf16.msra.mxu0 %v10509_v17  ;;  %v892_v13 = vld [vmem:[%s11892_s7 + $0x48] sm:$0xff]  ;;  %v2286_v16 = vld [vmem:[%s16586_s2 + $0x50] sm:$0xff]  ;;  %v2287_v17 = vld [vmem:[%s16586_s2 + $0x58] sm:$0xff]  ;;  %v10598_v18 = vpack.c.bf16 %v2325_v12, %v2324_v11 }
  0x22   : > { %10514 = vmatprep.subr.bf16.mxu0 %v10513_v20  ;;  %v2326_v19 = vld [vmem:[%s16586_s2 + $0x190] sm:$0xff]  ;;  %v894_v21 = vld [vmem:[%s11892_s7 + $0x58] sm:$0xff]  ;;  %v10541_v22 = vpack.c.bf16 %v2287_v17, %v2286_v16  ;;  %v895_v23 = vld [vmem:[%s11892_s7 + $0x60] sm:$0xff] }
  0x23   : > { %10584 = vmatpush1.bf16.msra.mxu1 %v10583_v40  ;;  %v2288_v24 = vld [vmem:[%s16586_s2 + $0x60] sm:$0xff]  ;;  %v2289_v25 = vld [vmem:[%s16586_s2 + $0x68] sm:$0xff]  ;;  %v897_v31 = vld [vmem:[%s11892_s7 + $0x70] sm:$0xff] }
  0x24   : > { %10585 = vmatprep.subr.bf16.mxu1 %v16603_v5  ;;  %v2328_v27 = vld [vmem:[%s16586_s2 + $0x1a0] sm:$0xff]  ;;  %v896_v29 = vld [vmem:[%s11892_s7 + $0x68] sm:$0xff]  ;;  %v10544_v30 = vpack.c.bf16 %v2289_v25, %v2288_v24  ;;  %v2290_v32 = vld [vmem:[%s16586_s2 + $0x70] sm:$0xff] }
  0x25   : > { %10516 = vmatpush3.bf16.msra.mxu0 %v10513_v20  ;;  %v2327_v20 = vld [vmem:[%s16586_s2 + $0x198] sm:$0xff]  ;;  %v2330_v35 = vld [vmem:[%s16586_s2 + $0x1b0] sm:$0xff]  ;;  %v899_v39 = vld [vmem:[%s11892_s7 + $0x80] sm:$0xff] }
  0x26   : > { %10518 = vmatprep.subr.bf16.mxu0 %v10517_v28  ;;  %v10601_v26 = vpack.c.bf16 %v2327_v20, %v2326_v19  ;;  %v2291_v33 = vld [vmem:[%s16586_s2 + $0x78] sm:$0xff]  ;;  %v2292_v40 = vld [vmem:[%s16586_s2 + $0x80] sm:$0xff]  ;;  %v2293_v41 = vld [vmem:[%s16586_s2 + $0x88] sm:$0xff] }
  0x27   : > { %10587 = vmatpush1.bf16.msra.mxu1 %v10586_v48  ;;  %v2331_v36 = vld [vmem:[%s16586_s2 + $0x1b8] sm:$0xff]  ;;  %v10547_v38 = vpack.c.bf16 %v2291_v33, %v2290_v32  ;;  %v2294_v46 = vld [vmem:[%s16586_s2 + $0x90] sm:$0xff]  ;;  %v903_v50 = vld [vmem:[%s11892_s7 + $0xa0] sm:$0xff] }
  0x28   : > { %10588 = vmatprep.subr.bf16.mxu1 %v16603_v5  ;;  %v898_v37 = vld [vmem:[%s11892_s7 + $0x78] sm:$0xff]  ;;  %v10607_v42 = vpack.c.bf16 %v2331_v36, %v2330_v35  ;;  %v905_v55 = vld [vmem:[%s11892_s7 + $0xb0] sm:$0xff]  ;;  %v2301_v62 = vld [vmem:[%s16586_s2 + $0xc8] sm:$0xff] }
  0x29   : > { %10520 = vmatpush3.bf16.msra.mxu0 %v10517_v28  ;;  %v2329_v28 = vld [vmem:[%s16586_s2 + $0x1a8] sm:$0xff]  ;;  %v2295_v47 = vld [vmem:[%s16586_s2 + $0x98] sm:$0xff]  ;;  %v909_v1 = vld [vmem:[%s11892_s7 + $0xd0] sm:$0xff] }
  0x2a   : > { %10522 = vmatprep.subr.bf16.mxu0 %v10521_v34  ;;  %v902_v48 = vld [vmem:[%s11892_s7 + $0x98] sm:$0xff]  ;;  %v10553_v49 = vpack.c.bf16 %v2295_v47, %v2294_v46  ;;  %v908_v63 = vld [vmem:[%s11892_s7 + $0xc8] sm:$0xff]  ;;  %v2302_v2 = vld [vmem:[%s16586_s2 + $0xd0] sm:$0xff] }
  0x2b   : > { %10590 = vmatpush1.bf16.msra.mxu1 %v10589_v56  ;;  %v2298_v56 = vld [vmem:[%s16586_s2 + $0xb0] sm:$0xff]  ;;  %v2299_v57 = vld [vmem:[%s16586_s2 + $0xb8] sm:$0xff]  ;;  %v911_v8 = vld [vmem:[%s11892_s7 + $0xe0] sm:$0xff] }
  0x2c   : > { %10591 = vmatprep.subr.bf16.mxu1 %v16603_v5  ;;  %v906_v58 = vld [vmem:[%s11892_s7 + $0xb8] sm:$0xff]  ;;  %v2304_v9 = vld [vmem:[%s16586_s2 + $0xe0] sm:$0xff]  ;;  %v912_v11 = vld [vmem:[%s11892_s7 + $0xe8] sm:$0xff] }
  0x2d   : > { %10524 = vmatpush3.bf16.msra.mxu0 %v10521_v34  ;;  %v10604_v34 = vpack.c.bf16 %v2329_v28, %v2328_v27  ;;  %v2306_v17 = vld [vmem:[%s16586_s2 + $0xf0] sm:$0xff]  ;;  %v2333_v24 = vld [vmem:[%s16586_s2 + $0x1c8] sm:$0xff]  ;;  %v2335_v28 = vld [vmem:[%s16586_s2 + $0x1d8] sm:$0xff] }
  0x2e   : > { %10525 = vmatprep.subr.bf16.mxu0 %v16603_v5  ;;  %v2334_v27 = vld [vmem:[%s16586_s2 + $0x1d0] sm:$0xff]  ;;  %v2337_v32 = vld [vmem:[%s16586_s2 + $0x1e8] sm:$0xff]  ;;  %v2379_v47 = vld [vmem:[%s16586_s2 + $0x338] sm:$0xff] }
  0x2f   : > { %10593 = vmatpush1.bf16.msra.mxu1 %v10592_v0  ;;  %v2373_v35 = vld [vmem:[%s16586_s2 + $0x308] sm:$0xff]  ;;  %v2378_v46 = vld [vmem:[%s16586_s2 + $0x330] sm:$0xff] }
  0x30   : > { %10206 = vmatmul.mubr.f32.vlgmr.msra.gmra.mrb[0].mxu0 %v884_v43  ;;  %10594 = vmatprep.subr.bf16.mxu1 %v16603_v5  ;;  %v900_v43 = vld [vmem:[%s11892_s7 + $0x88] sm:$0xff] }
  0x31   : > { %10208 = vmatprep.mubr.f32.mxu0 %v885_v45  ;;  %10527 = vmatpush1.bf16.msra.mxu0 %v10526_v44  ;;  %v10550_v44 = vpack.c.bf16 %v2293_v41, %v2292_v40  ;;  %v901_v45 = vld [vmem:[%s11892_s7 + $0x90] sm:$0xff]  ;;  %v2375_v41 = vld [vmem:[%s16586_s2 + $0x318] sm:$0xff] }
  0x32   : > { %10528 = vmatprep.subr.bf16.mxu0 %v16603_v5  ;;  %v2374_v40 = vld [vmem:[%s16586_s2 + $0x310] sm:$0xff] }
  0x33   : > { %10596 = vmatpush1.bf16.msra.mxu1 %v10595_v10  ;;  %v2305_v10 = vld [vmem:[%s16586_s2 + $0xe8] sm:$0xff] }
  0x34   : > { %10209 = vmatmul.mubr.f32.gmra.mrb[2].mxu0 %v886_v51  ;;  %10597 = vmatprep.subr.bf16.mxu1 %v16603_v5  ;;  %v2296_v51 = vld [vmem:[%s16586_s2 + $0xa0] sm:$0xff]  ;;  %v10568_v12 = vpack.c.bf16 %v2305_v10, %v2304_v9  ;;  %v2395_v9 = vld [vmem:[%s16586_s2 + $0x3b8] sm:$0xff] }
  0x35   : > { %10211 = vmatprep.mubr.f32.mxu0 %v887_v53  ;;  %10530 = vmatpush1.bf16.msra.mxu0 %v10529_v52  ;;  %v2297_v52 = vld [vmem:[%s16586_s2 + $0xa8] sm:$0xff] }
  0x36   : > { %10531 = vmatprep.subr.bf16.mxu0 %v16603_v5  ;;  %v904_v53 = vld [vmem:[%s11892_s7 + $0xa8] sm:$0xff]  ;;  %v10556_v54 = vpack.c.bf16 %v2297_v52, %v2296_v51  ;;  %v2382_v52 = vld [vmem:[%s16586_s2 + $0x350] sm:$0xff] }
  0x37   : > { %10599 = vmatpush1.bf16.msra.mxu1 %v10598_v18  ;;  %v2307_v18 = vld [vmem:[%s16586_s2 + $0xf8] sm:$0xff] }
  0x38   : > { %10212 = vmatmul.mubr.f32.gmra.mrb[4].mxu0 %v888_v59  ;;  %10600 = vmatprep.subr.bf16.mxu1 %v16603_v5  ;;  %v10559_v59 = vpack.c.bf16 %v2299_v57, %v2298_v56  ;;  %v10571_v20 = vpack.c.bf16 %v2307_v18, %v2306_v17  ;;  %v2385_v56 = vld [vmem:[%s16586_s2 + $0x368] sm:$0xff]  ;;  %v2400_v18 = vld [vmem:[%s16586_s2 + $0x3e0] sm:$0xff] }
  0x39   : > { %10214 = vmatprep.mubr.f32.mxu0 %v889_v61  ;;  %10533 = vmatpush1.bf16.msra.mxu0 %v10532_v60  ;;  %v907_v60 = vld [vmem:[%s11892_s7 + $0xc0] sm:$0xff] }
  0x3a   : > { %10534 = vmatprep.subr.bf16.mxu0 %v16603_v5  ;;  %v2300_v61 = vld [vmem:[%s16586_s2 + $0xc0] sm:$0xff] }
  0x3b   : > { %10602 = vmatpush1.bf16.msra.mxu1 %v10601_v26  ;;  %v10562_v0 = vpack.c.bf16 %v2301_v62, %v2300_v61  ;;  %v2388_v61 = vld [vmem:[%s16586_s2 + $0x380] sm:$0xff]  ;;  %v2389_v62 = vld [vmem:[%s16586_s2 + $0x388] sm:$0xff] }
  0x3c   : > { %10215 = vmatmul.mubr.f32.gmra.mrb[6].mxu0 %v890_v3  ;;  %10603 = vmatprep.subr.bf16.mxu1 %v16603_v5  ;;  %v2303_v3 = vld [vmem:[%s16586_s2 + $0xd8] sm:$0xff] }
  0x3d   : > { %10217 = vmatprep.mubr.f32.mxu0 %v891_v7  ;;  %10536 = vmatpush1.bf16.msra.mxu0 %v10535_v4  ;;  %v910_v4 = vld [vmem:[%s11892_s7 + $0xd8] sm:$0xff]  ;;  %v10565_v7 = vpack.c.bf16 %v2303_v3, %v2302_v2  ;;  %v2392_v3 = vld [vmem:[%s16586_s2 + $0x3a0] sm:$0xff] }
  0x3e   : > { %10537 = vmatprep.subr.bf16.mxu0 %v16603_v5 }
  0x3f   : > { %10605 = vmatpush1.bf16.msra.mxu1 %v10604_v34  ;;  %v2372_v34 = vld [vmem:[%s16586_s2 + $0x300] sm:$0xff] }
  0x40   : > { %10218 = vmatmul.mubr.f32.gmra.mrb[8].mxu0 %v892_v13  ;;  %10606 = vmatprep.subr.bf16.mxu1 %v16603_v5  ;;  %v913_v13 = vld [vmem:[%s11892_s7 + $0xf0] sm:$0xff]  ;;  %v12188_v36 = vpack.c.bf16 %v2373_v35, %v2372_v34  ;;  %v2405_v34 = vld [vmem:[%s16586_s2 + $0x408] sm:$0xff] }
  0x41   : > { %10220 = vmatprep.mubr.f32.mxu0 %v893_v15  ;;  %10539 = vmatpush1.bf16.msra.mxu0 %v10538_v14  ;;  %v914_v14 = vld [vmem:[%s11892_s7 + $0xf8] sm:$0xff]  ;;  %v198_v15 = vlaneseq }
  0x42   : > { %10540 = vmatprep.subr.bf16.mxu0 %v16603_v5 }
  0x43   : > { %10608 = vmatpush1.bf16.msra.mxu1 %v10607_v42  ;;  %v12147_v16 = vshrl.u32 %v198_v15, 7  ;;  %v12206_v42 = vpack.c.bf16 %v2375_v41, %v2374_v40  ;;  %v2399_v15 = vld [vmem:[%s16586_s2 + $0x3d8] sm:$0xff] }
  0x44   : > { %10221 = vmatmul.mubr.f32.gmra.mrb[10].mxu0 %v894_v21  ;;  %10609 = vmatprep.subr.bf16.mxu1 %v16603_v5 }
  0x45   : > { %10223 = vmatprep.mubr.f32.mxu0 %v895_v23  ;;  %10542 = vmatpush1.bf16.msra.mxu0 %v10541_v22  ;;  %16808 = vst [vmem:[#allocation5_spill] sm:$0xff] %v12147_v16  ;;  %v235_v19 = vand.u32 15, %v12147_v16  ;;  %v1220_v22 = vld [vmem:[#allocation2 + $0x7] sm:$0xff]  ;;  %v203_v40 = vadd.s32 32, %v12147_v16 }
  0x46   : > { %10543 = vmatprep.subr.bf16.mxu0 %v16603_v5  ;;  %v2332_v23 = vld [vmem:[%s16586_s2 + $0x1c0] sm:$0xff] }
  0x47   : > { %vm615_vm0 = vcmp.gt.s32.totalorder %v235_v19, 0  ;;  %v10610_v26 = vpack.c.bf16 %v2333_v24, %v2332_v23  ;;  %v2401_v19 = vld [vmem:[%s16586_s2 + $0x3e8] sm:$0xff]  ;;  %v2402_v23 = vld [vmem:[%s16586_s2 + $0x3f0] sm:$0xff]  ;;  %v2403_v24 = vld [vmem:[%s16586_s2 + $0x3f8] sm:$0xff] }
  0x48   : > { %10224 = vmatmul.mubr.f32.gmra.mrb[12].mxu0 %v896_v29  ;;  %v12157_v21 = vsel %vm615_vm0, 1.0, %v11812_v6  ;;  %v10613_v29 = vpack.c.bf16 %v2335_v28, %v2334_v27 }
  0x49   : > { %10226 = vmatprep.mubr.f32.mxu0 %v897_v31  ;;  %10545 = vmatpush1.bf16.msra.mxu0 %v10544_v30  ;;  %16809 = vst [vmem:[#allocation6_spill] sm:$0xff] %v12157_v21  ;;  %v1252_v25 = vmul.f32 %v12157_v21, %v1220_v22  ;;  %v1221_v30 = vld [vmem:[#allocation2 + $0xf] sm:$0xff]  ;;  %v2336_v31 = vld [vmem:[%s16586_s2 + $0x1e0] sm:$0xff]  ;;  %v201_v22 = vadd.s32 16, %v12147_v16 }
  0x4a   : > { %10546 = vmatprep.subr.bf16.mxu0 %v16603_v5  ;;  %10611 = vmatpush1.bf16.msra.mxu1 %v10610_v26  ;;  %v10616_v33 = vpack.c.bf16 %v2337_v32, %v2336_v31  ;;  %v200_v31 = vadd.s32 8, %v12147_v16 }
  0x4b   : > { %10612 = vmatprep.subr.bf16.mxu1 %v16603_v5 }
  0x4c   : > { %10227 = vmatmul.mubr.f32.gmra.mrb[14].mxu0 %v898_v37  ;;  %v2338_v37 = vld [vmem:[%s16586_s2 + $0x1f0] sm:$0xff]  ;;  %v242_v41 = vand.u32 15, %v200_v31 }
  0x4d   : > { %10229 = vmatprep.mubr.f32.mxu0 %v899_v39  ;;  %10548 = vmatpush1.bf16.msra.mxu0 %v10547_v38  ;;  %v2339_v38 = vld [vmem:[%s16586_s2 + $0x1f8] sm:$0xff] }
  0x4e   : > { %10549 = vmatprep.subr.bf16.mxu0 %v16603_v5  ;;  %10614 = vmatpush1.bf16.msra.mxu1 %v10613_v29  ;;  %v10619_v39 = vpack.c.bf16 %v2339_v38, %v2338_v37  ;;  %vm712_vm2 = vcmp.lt.s32.totalorder %v242_v41, 15 }
  0x4f   : > { %10615 = vmatprep.subr.bf16.mxu1 %v16603_v5 }
  0x50   : > { %10230 = vmatmul.mubr.f32.gmra.mrb[16].mxu0 %v900_v43  ;;  %v2376_v43 = vld [vmem:[%s16586_s2 + $0x320] sm:$0xff] }
  0x51   : > { %10232 = vmatprep.mubr.f32.mxu0 %v901_v45  ;;  %10551 = vmatpush1.bf16.msra.mxu0 %v10550_v44  ;;  %v2377_v44 = vld [vmem:[%s16586_s2 + $0x328] sm:$0xff] }
  0x52   : > { %10552 = vmatprep.subr.bf16.mxu0 %v16603_v5  ;;  %10617 = vmatpush1.bf16.msra.mxu1 %v10616_v33  ;;  %v12216_v45 = vpack.c.bf16 %v2377_v44, %v2376_v43  ;;  %v2404_v33 = vld [vmem:[%s16586_s2 + $0x400] sm:$0xff] }
  0x53   : > { %10618 = vmatprep.subr.bf16.mxu1 %v16603_v5  ;;  %v12360_v38 = vpack.c.bf16 %v2405_v34, %v2404_v33 }
  0x54   : > { %10233 = vmatmul.mubr.f32.gmra.mrb[18].mxu0 %v902_v48  ;;  %v12226_v48 = vpack.c.bf16 %v2379_v47, %v2378_v46 }
  0x55   : > { %10235 = vmatprep.mubr.f32.mxu0 %v903_v50  ;;  %10554 = vmatpush1.bf16.msra.mxu0 %v10553_v49  ;;  %v2380_v49 = vld [vmem:[%s16586_s2 + $0x340] sm:$0xff]  ;;  %v2381_v50 = vld [vmem:[%s16586_s2 + $0x348] sm:$0xff] }
  0x56   : > { %10555 = vmatprep.subr.bf16.mxu0 %v16603_v5  ;;  %10620 = vmatpush1.bf16.msra.mxu1 %v10619_v39  ;;  %v12236_v51 = vpack.c.bf16 %v2381_v50, %v2380_v49  ;;  %v2340_v49 = vld [vmem:[%s16586_s2 + $0x200] sm:$0xff]  ;;  %v2341_v50 = vld [vmem:[%s16586_s2 + $0x208] sm:$0xff] }
  0x57   : > { %10621 = vmatprep.subr.bf16.mxu1 %v16603_v5 }
  0x58   : > { %10236 = vmatmul.mubr.f32.gmra.mrb[20].mxu0 %v904_v53  ;;  %v2383_v53 = vld [vmem:[%s16586_s2 + $0x358] sm:$0xff] }
  0x59   : > { %10238 = vmatprep.mubr.f32.mxu0 %v905_v55  ;;  %10557 = vmatpush1.bf16.msra.mxu0 %v10556_v54  ;;  %v12246_v54 = vpack.c.bf16 %v2383_v53, %v2382_v52  ;;  %v2384_v55 = vld [vmem:[%s16586_s2 + $0x360] sm:$0xff]  ;;  %v263_v53 = vand.u32 15, %v203_v40 }
  0x5a   : > { %10558 = vmatprep.subr.bf16.mxu0 %v16603_v5  ;;  %v12256_v57 = vpack.c.bf16 %v2385_v56, %v2384_v55  ;;  %v202_v56 = vadd.s32 24, %v12147_v16 }
  0x5b   : > { %vm619_vm3 = vcmp.gt.s32.totalorder %v263_v53, 0  ;;  %v2346_v53 = vld [vmem:[%s16586_s2 + $0x230] sm:$0xff] }
  0x5c   : > { %10239 = vmatmul.mubr.f32.gmra.mrb[22].mxu0 %v906_v58  ;;  %v2386_v58 = vld [vmem:[%s16586_s2 + $0x370] sm:$0xff] }
  0x5d   : > { %10241 = vmatprep.mubr.f32.mxu0 %v907_v60  ;;  %10560 = vmatpush1.bf16.msra.mxu0 %v10559_v59  ;;  %v2387_v59 = vld [vmem:[%s16586_s2 + $0x378] sm:$0xff] }
  0x5e   : > { %10561 = vmatprep.subr.bf16.mxu0 %v16603_v5  ;;  %v12266_v60 = vpack.c.bf16 %v2387_v59, %v2386_v58 }
  0x60   : > { %10242 = vmatmul.mubr.f32.gmra.mrb[24].mxu0 %v908_v63  ;;  %v12276_v63 = vpack.c.bf16 %v2389_v62, %v2388_v61  ;;  %v1380_v62 = vld [vmem:[#allocation2 + $0x9] sm:$0xff] }
  0x61   : > { %10244 = vmatprep.mubr.f32.mxu0 %v909_v1  ;;  %10563 = vmatpush1.bf16.msra.mxu0 %v10562_v0  ;;  %v2390_v0 = vld [vmem:[%s16586_s2 + $0x390] sm:$0xff]  ;;  %v2391_v1 = vld [vmem:[%s16586_s2 + $0x398] sm:$0xff] }
  0x62   : > { %10564 = vmatprep.subr.bf16.mxu0 %v16603_v5  ;;  %v12286_v2 = vpack.c.bf16 %v2391_v1, %v2390_v0  ;;  %v10622_v0 = vpack.c.bf16 %v2341_v50, %v2340_v49 }
  0x64   : > { %10245 = vmatmul.mubr.f32.gmra.mrb[26].mxu0 %v910_v4  ;;  %v2393_v4 = vld [vmem:[%s16586_s2 + $0x3a8] sm:$0xff] }
  0x65   : > { %10247 = vmatprep.mubr.f32.mxu0 %v911_v8  ;;  %10566 = vmatpush1.bf16.msra.mxu0 %v10565_v7  ;;  %v12296_v7 = vpack.c.bf16 %v2393_v4, %v2392_v3  ;;  %v2394_v8 = vld [vmem:[%s16586_s2 + $0x3b0] sm:$0xff] }
  0x66   : > { %10567 = vmatprep.subr.bf16.mxu0 %v16603_v5  ;;  %v12306_v10 = vpack.c.bf16 %v2395_v9, %v2394_v8  ;;  %v2342_v4 = vld [vmem:[%s16586_s2 + $0x210] sm:$0xff]  ;;  %v2343_v8 = vld [vmem:[%s16586_s2 + $0x218] sm:$0xff] }
  0x68   : > { %10248 = vmatmul.mubr.f32.gmra.mrb[28].mxu0 %v912_v11  ;;  %16810 = vst [vmem:[#allocation7_spill] sm:$0xff] %v12306_v10  ;;  %v2396_v11 = vld [vmem:[%s16586_s2 + $0x3c0] sm:$0xff] }
  0x69   : > { %10250 = vmatprep.mubr.f32.mxu0 %v913_v13  ;;  %10569 = vmatpush1.bf16.msra.mxu0 %v10568_v12  ;;  %v2397_v12 = vld [vmem:[%s16586_s2 + $0x3c8] sm:$0xff] }
  0x6a   : > { %10570 = vmatprep.subr.bf16.mxu0 %v16603_v5  ;;  %v12316_v13 = vpack.c.bf16 %v2397_v12, %v2396_v11  ;;  %v12401_v11 = vsel %vm712_vm2, 1.0, %v11812_v6 }
  0x6b   : > { %16815 = vst [vmem:[#allocation12_spill] sm:$0xff] %v12401_v11 }
  0x6c   : > { %10251 = vmatmul.mubr.f32.gmra.mrb[30].mxu0 %v914_v14  ;;  %16811 = vst [vmem:[#allocation8_spill] sm:$0xff] %v12316_v13  ;;  %v2398_v14 = vld [vmem:[%s16586_s2 + $0x3d0] sm:$0xff] }
  0x6d   : > { %2484 = vmatprep.mubr.f32.mxu0 %v11812_v6  ;;  %10572 = vmatpush1.bf16.msra.mxu0 %v10571_v20  ;;  %v12326_v17 = vpack.c.bf16 %v2399_v15, %v2398_v14  ;;  %v12336_v20 = vpack.c.bf16 %v2401_v19, %v2400_v18  ;;  %v205_v14 = vadd.s32 48, %v12147_v16  ;;  %v256_v19 = vand.u32 15, %v202_v56 }
  0x6e   : > { %10669 = vmatprep.subr.bf16.mxu0 %v16603_v5 }
  0x6f   : > { %16812 = vst [vmem:[#allocation9_spill] sm:$0xff] %v12326_v17  ;;  %16813 = vst [vmem:[#allocation10_spill] sm:$0xff] %v12336_v20  ;;  %v277_v34 = vand.u32 15, %v205_v14  ;;  %vm714_vm4 = vcmp.lt.s32.totalorder %v256_v19, 15 }
  0x70   : > { %2485 = vmatmul.mubr.f32.vlgmr.msra.gmra.mrb[32].mxu0 %v1252_v25  ;;  %v12347_v25 = vpack.c.bf16 %v2403_v24, %v2402_v23  ;;  %v10625_v23 = vpack.c.bf16 %v2343_v8, %v2342_v4 }
  0x71   : > { %2489 = vmatprep.mubr.f32.mxu0 %v11812_v6  ;;  %10671 = vmatpush1.bf16.msra.mxu0 %v12188_v36  ;;  %vm621_vm5 = vcmp.gt.s32.totalorder %v277_v34, 0  ;;  %v12517_v34 = vld [vmem:[#allocation2] sm:$0xff] }
  0x72   : > { %10672 = vmatprep.subr.bf16.mxu0 %v16603_v5  ;;  %16814 = vst [vmem:[#allocation11_spill] sm:$0xff] %v12347_v25 }
  0x74   : > { %2490 = vmatmul.mubr.f32.gmra.mrb[34].mxu0 %v1221_v30  ;;  %v249_v30 = vand.u32 15, %v201_v22 }
  0x75   : > { %10674 = vmatpush1.bf16.msra.mxu0 %v12206_v42 }
  0x76   : > { %10675 = vmatprep.subr.bf16.mxu0 %v16603_v5  ;;  %vm617_vm1 = vcmp.gt.s32.totalorder %v249_v30, 0  ;;  %v2345_v30 = vld [vmem:[%s16586_s2 + $0x228] sm:$0xff] }
  0x77   : > { %v12372_v47 = vsel %vm617_vm1, 1.0, %v11812_v6 }
  0x79   : > { %10677 = vmatpush1.bf16.msra.mxu0 %v12216_v45 }
  0x7a   : > { %10678 = vmatprep.subr.bf16.mxu0 %v16603_v5 }
  0x7d   : > { %10680 = vmatpush1.bf16.msra.mxu0 %v12226_v48 }
  0x7e   : > { %10681 = vmatprep.subr.bf16.mxu0 %v16603_v5 }
  0x81   : > { %10683 = vmatpush1.bf16.msra.mxu0 %v12236_v51 }
  0x82   : > { %10684 = vmatprep.subr.bf16.mxu0 %v16603_v5 }
  0x85   : > { %10686 = vmatpush1.bf16.msra.mxu0 %v12246_v54 }
  0x86   : > { %10687 = vmatprep.subr.bf16.mxu0 %v16603_v5 }
  0x89   : > { %10689 = vmatpush1.bf16.msra.mxu0 %v12256_v57 }
  0x8a   : > { %10690 = vmatprep.subr.bf16.mxu0 %v16603_v5 }
  0x8d   : > { %10692 = vmatpush1.bf16.msra.mxu0 %v12266_v60 }
  0x8e   : > { %10693 = vmatprep.subr.bf16.mxu0 %v16603_v5 }
  0x91   : > { %10695 = vmatpush1.bf16.msra.mxu0 %v12276_v63 }
  0x92   : > { %10696 = vmatprep.subr.bf16.mxu0 %v16603_v5 }
  0x95   : > { %10698 = vmatpush1.bf16.msra.mxu0 %v12286_v2 }
  0x96   : > { %10699 = vmatprep.subr.bf16.mxu0 %v16603_v5 }
  0x99   : > { %10701 = vmatpush1.bf16.msra.mxu0 %v12296_v7 }
  0x9a   : > { %10702 = vmatprep.subr.bf16.mxu0 %v16603_v5 }
  0x9d   : > { %10704 = vmatpush1.bf16.msra.mxu0 %v12306_v10 }
  0x9e   : > { %10705 = vmatprep.subr.bf16.mxu0 %v16603_v5 }
  0xa1   : > { %10707 = vmatpush1.bf16.msra.mxu0 %v12316_v13 }
  0xa2   : > { %10708 = vmatprep.subr.bf16.mxu0 %v16603_v5 }
  0xa5   : > { %10710 = vmatpush1.bf16.msra.mxu0 %v12326_v17 }
  0xa6   : > { %10711 = vmatprep.subr.bf16.mxu0 %v16603_v5 }
  0xa9   : > { %10713 = vmatpush1.bf16.msra.mxu0 %v12336_v20  ;;  %v214_v20 = vadd.s32 120, %v12147_v16 }
  0xaa   : > { %10714 = vmatprep.subr.bf16.mxu0 %v16603_v5 }
  0xab   : > { %v340_v13 = vand.u32 15, %v214_v20  ;;  %v2369_v20 = vld [vmem:[%s16586_s2 + $0x2e8] sm:$0xff] }
  0xad   : > { %10716 = vmatpush1.bf16.msra.mxu0 %v12347_v25  ;;  %vm726_vm0 = vcmp.lt.s32.totalorder %v340_v13, 15 }
  0xae   : > { %10718 = vmatprep.subr.bf16.mxu0 %v12360_v38 }
 0x103   : > { %v10207_v26 = vpop.f32.mrb[0].mxu0 }
 0x104   : > { %v1157_v27 = vmax.f32 %v10207_v26, 0.0  ;;  %v997_v28 = vpop.f32.mrb[1].mxu0  ;;  %v12412_v26 = vsel %vm619_vm3, 1.0, %v11812_v6 }
 0x105   : > { %v1156_v29 = vmax.f32 %v997_v28, 0.0 }
 0x106   : > { %1189 = vst [vmem:[#allocation2 + $0x20] sm:$0xff] %v1157_v27 }
 0x107   : > { %1188 = vst [vmem:[#allocation2 + $0x18] sm:$0xff] %v1156_v29  ;;  %v12351_v32 = vpop.f32.mrb[2].mxu0  ;;  %2494 = vmatprep.mubr.f32.mxu0 %v1156_v29  ;;  %v2344_v29 = vld [vmem:[%s16586_s2 + $0x220] sm:$0xff] }
 0x108   : > { %v1159_v35 = vmax.f32 %v12351_v32, 0.0  ;;  %v1007_v37 = vpop.f32.mrb[3].mxu0  ;;  %v10628_v49 = vpack.c.bf16 %v2345_v30, %v2344_v29  ;;  %v12459_v32 = vsel %vm621_vm5, 1.0, %v11812_v6 }
 0x109   : > { %v1158_v39 = vmax.f32 %v1007_v37, 0.0  ;;  %v204_v37 = vadd.s32 40, %v12147_v16 }
 0x10a   : > { %1191 = vst [vmem:[#allocation2 + $0x30] sm:$0xff] %v1159_v35 }
 0x10b   : > { %1190 = vst [vmem:[#allocation2 + $0x28] sm:$0xff] %v1158_v39  ;;  %v12366_v43 = vpop.f32.mrb[4].mxu0 }
 0x10c   : > { %v1161_v44 = vmax.f32 %v12366_v43, 0.0  ;;  %v12369_v46 = vpop.f32.mrb[5].mxu0 }
 0x10d   : > { %v1160_v52 = vmax.f32 %v12369_v46, 0.0 }
 0x10e   : > { %1193 = vst [vmem:[#allocation2 + $0x40] sm:$0xff] %v1161_v44  ;;  %v1222_v55 = vld [vmem:[#allocation2 + $0x17] sm:$0xff]  ;;  %v1477_v15 = vld [vmem:[#allocation2 + $0x1f] sm:$0xff] }
 0x10f   : > { %1192 = vst [vmem:[#allocation2 + $0x38] sm:$0xff] %v1160_v52  ;;  %v1254_v58 = vmul.f32 %v12372_v47, %v1222_v55  ;;  %v1508_v59 = vmul.f32 %v12157_v21, %v1222_v55  ;;  %v12388_v61 = vpop.f32.mrb[6].mxu0  ;;  %v1381_v12 = vld [vmem:[#allocation2 + $0x11] sm:$0xff]  ;;  %v1382_v56 = vld [vmem:[#allocation2 + $0x19] sm:$0xff] }
 0x110   : > { %v1163_v1 = vmax.f32 %v12388_v61, 0.0  ;;  %v12391_v3 = vpop.f32.mrb[7].mxu0  ;;  %v1413_v24 = vmul.f32 %v12401_v11, %v1381_v12  ;;  %v2347_v55 = vld [vmem:[%s16586_s2 + $0x238] sm:$0xff]  ;;  %v270_v12 = vand.u32 15, %v204_v37  ;;  %v206_v37 = vadd.s32 56, %v12147_v16 }
 0x111   : > { %2495 = vmatmul.mubr.f32.gmra.mrb[36].mxu0 %v1254_v58  ;;  %2709 = vmatprep.mubr.f32.mxu1 %v1508_v59  ;;  %v1162_v9 = vmax.f32 %v12391_v3, 0.0  ;;  %v12445_v58 = vsel %vm714_vm4, 1.0, %v11812_v6 }
 0x112   : > { %1195 = vst [vmem:[#allocation2 + $0x50] sm:$0xff] %v1163_v1  ;;  %2499 = vmatprep.mubr.f32.mxu0 %v1157_v27  ;;  %2710 = vmatmul.mubr.f32.vlgmr.msra.gmra.mrb[0].mxu1 %v1380_v62  ;;  %v1478_v18 = vld [vmem:[#allocation2 + $0x27] sm:$0xff]  ;;  %16816 = vst [vmem:[#allocation13_spill] sm:$0xff] %v12445_v58  ;;  %v1479_v4 = vld [vmem:[#allocation2 + $0x2f] sm:$0xff]  ;;  %vm12475_vm6 = vcmp.lt.s32.totalorder %v270_v12, 15  ;;  %v209_v12 = vadd.s32 80, %v12147_v16 }
 0x113   : > { %1194 = vst [vmem:[#allocation2 + $0x48] sm:$0xff] %v1162_v9  ;;  %2714 = vmatprep.mubr.f32.mxu1 %v1477_v15  ;;  %v12408_v22 = vpop.f32.mrb[8].mxu0  ;;  %10623 = vmatpush1.bf16.msra.mxu1 %v10622_v0  ;;  %v1510_v31 = vmul.f32 %v12372_v47, %v1478_v18  ;;  %v1256_v40 = vmul.f32 %v12412_v26, %v1478_v18  ;;  %v1383_v59 = vld [vmem:[#allocation2 + $0x21] sm:$0xff]  ;;  %v207_v0 = vadd.s32 64, %v12147_v16 }
 0x114   : > { %v1165_v28 = vmax.f32 %v12408_v22, 0.0  ;;  %v12415_v27 = vpop.f32.mrb[9].mxu0  ;;  %10624 = vmatprep.subr.bf16.mxu1 %v16603_v5  ;;  %v1415_v18 = vmul.f32 %v12445_v58, %v1383_v59  ;;  %v1384_v59 = vld [vmem:[#allocation2 + $0x29] sm:$0xff] }
 0x115   : > { %2500 = vmatmul.mubr.f32.gmra.mrb[38].mxu0 %v1477_v15  ;;  %v1164_v33 = vmax.f32 %v12415_v27, 0.0  ;;  %v10631_v15 = vpack.c.bf16 %v2347_v55, %v2346_v53  ;;  %v291_v30 = vand.u32 15, %v207_v0  ;;  %v2350_v55 = vld [vmem:[%s16586_s2 + $0x250] sm:$0xff]  ;;  %v12500_v0 = vsel %vm12475_vm6, 1.0, %v11812_v6 }
 0x116   : > { %2504 = vmatprep.mubr.f32.mxu0 %v1158_v39  ;;  %2715 = vmatmul.mubr.f32.gmra.mrb[2].mxu1 %v1413_v24  ;;  %1197 = vst [vmem:[#allocation2 + $0x60] sm:$0xff] %v1165_v28  ;;  %v1480_v8 = vld [vmem:[#allocation2 + $0x37] sm:$0xff]  ;;  %v2349_v24 = vld [vmem:[%s16586_s2 + $0x248] sm:$0xff]  ;;  %16819 = vst [vmem:[#allocation14_spill] sm:$0xff] %v12500_v0 }
 0x117   : > { %2719 = vmatprep.mubr.f32.mxu1 %v1510_v31  ;;  %1196 = vst [vmem:[#allocation2 + $0x58] sm:$0xff] %v1164_v33  ;;  %v12432_v41 = vpop.f32.mrb[10].mxu0  ;;  %10626 = vmatpush1.bf16.msra.mxu1 %v10625_v23  ;;  %v2348_v23 = vld [vmem:[%s16586_s2 + $0x240] sm:$0xff]  ;;  %v1512_v29 = vmul.f32 %v12412_v26, %v1480_v8  ;;  %vm12502_vm7 = vcmp.gt.s32.totalorder %v291_v30, 0 }
 0x118   : > { %v1167_v50 = vmax.f32 %v12432_v41, 0.0  ;;  %v12435_v39 = vpop.f32.mrb[11].mxu0  ;;  %10627 = vmatprep.subr.bf16.mxu1 %v16603_v5  ;;  %v10634_v46 = vpack.c.bf16 %v2349_v24, %v2348_v23  ;;  %v284_v24 = vand.u32 15, %v206_v37  ;;  %v12522_v43 = vsel %vm12502_vm7, 1.0, %v12517_v34 }
 0x119   : > { %2505 = vmatmul.mubr.f32.gmra.mrb[40].mxu0 %v1256_v40  ;;  %v1166_v62 = vmax.f32 %v12435_v39, 0.0  ;;  %v1258_v40 = vmul.f32 %v12459_v32, %v1480_v8  ;;  %v208_v8 = vadd.s32 72, %v12147_v16 }
 0x11a   : > { %2509 = vmatprep.mubr.f32.mxu0 %v1159_v35  ;;  %2720 = vmatmul.mubr.f32.gmra.mrb[4].mxu1 %v1382_v56  ;;  %1199 = vst [vmem:[#allocation2 + $0x70] sm:$0xff] %v1167_v50  ;;  %v2351_v56 = vld [vmem:[%s16586_s2 + $0x258] sm:$0xff]  ;;  %v1482_v23 = vld [vmem:[#allocation2 + $0x47] sm:$0xff]  ;;  %vm12538_vm8 = vcmp.lt.s32.totalorder %v284_v24, 15 }
 0x11b   : > { %2724 = vmatprep.mubr.f32.mxu1 %v1479_v4  ;;  %1198 = vst [vmem:[#allocation2 + $0x68] sm:$0xff] %v1166_v62  ;;  %v12455_v14 = vpop.f32.mrb[12].mxu0  ;;  %10629 = vmatpush1.bf16.msra.mxu1 %v10628_v49 }
 0x11c   : > { %v16597_v35 = vmax.f32 %v12455_v14, 0.0  ;;  %v12462_v19 = vpop.f32.mrb[13].mxu0  ;;  %10630 = vmatprep.subr.bf16.mxu1 %v16603_v5 }
 0x11d   : > { %2510 = vmatmul.mubr.f32.gmra.mrb[42].mxu0 %v1479_v4  ;;  %v16598_v31 = vmax.f32 %v12462_v19, 0.0  ;;  %v1385_v4 = vld [vmem:[#allocation2 + $0x31] sm:$0xff] }
 0x11e   : > { %2514 = vmatprep.mubr.f32.mxu0 %v1160_v52  ;;  %2725 = vmatmul.mubr.f32.gmra.mrb[6].mxu1 %v1415_v18  ;;  %1201 = vst [vmem:[#allocation2 + $0x80] sm:$0xff] %v16597_v35  ;;  %v1481_v18 = vld [vmem:[#allocation2 + $0x3f] sm:$0xff]  ;;  %v1417_v30 = vmul.f32 %v12500_v0, %v1385_v4 }
 0x11f   : > { %2729 = vmatprep.mubr.f32.mxu1 %v1512_v29  ;;  %1200 = vst [vmem:[#allocation2 + $0x78] sm:$0xff] %v16598_v31  ;;  %v12485_v49 = vpop.f32.mrb[14].mxu0  ;;  %10632 = vmatpush1.bf16.msra.mxu1 %v10631_v15  ;;  %v10637_v29 = vpack.c.bf16 %v2351_v56, %v2350_v55  ;;  %v1514_v55 = vmul.f32 %v12459_v32, %v1482_v23  ;;  %v305_v56 = vand.u32 15, %v209_v12 }
 0x120   : > { %v16591_v52 = vmax.f32 %v12485_v49, 0.0  ;;  %v12488_v53 = vpop.f32.mrb[15].mxu0  ;;  %10633 = vmatprep.subr.bf16.mxu1 %v16603_v5 }
 0x121   : > { %2515 = vmatmul.mubr.f32.gmra.mrb[44].mxu0 %v1258_v40  ;;  %v16592_v15 = vmax.f32 %v12488_v53, 0.0  ;;  %v2352_v40 = vld [vmem:[%s16586_s2 + $0x260] sm:$0xff]  ;;  %vm625_vm9 = vcmp.gt.s32.totalorder %v305_v56, 0 }
 0x122   : > { %2519 = vmatprep.mubr.f32.mxu0 %v1161_v44  ;;  %2730 = vmatmul.mubr.f32.gmra.mrb[8].mxu1 %v1384_v59  ;;  %1203 = vst [vmem:[#allocation2 + $0x90] sm:$0xff] %v16591_v52  ;;  %v1484_v52 = vld [vmem:[#allocation2 + $0x57] sm:$0xff]  ;;  %v12577_v61 = vsel %vm625_vm9, 1.0, %v12517_v34  ;;  %v1486_v35 = vld [vmem:[#allocation2 + $0x67] sm:$0xff] }
 0x123   : > { %2734 = vmatprep.mubr.f32.mxu1 %v1481_v18  ;;  %1202 = vst [vmem:[#allocation2 + $0x88] sm:$0xff] %v16592_v15  ;;  %v12514_v6 = vpop.f32.mrb[16].mxu0  ;;  %10635 = vmatpush1.bf16.msra.mxu1 %v10634_v46  ;;  %v2353_v46 = vld [vmem:[%s16586_s2 + $0x268] sm:$0xff]  ;;  %v298_v15 = vand.u32 15, %v208_v8  ;;  %16825 = vst [vmem:[#allocation16_spill] sm:$0xff] %v12577_v61  ;;  %v2356_v8 = vld [vmem:[%s16586_s2 + $0x280] sm:$0xff] }
 0x124   : > { %v16589_v44 = vmax.f32 %v12514_v6, 0.0  ;;  %v12525_v37 = vpop.f32.mrb[17].mxu0  ;;  %10636 = vmatprep.subr.bf16.mxu1 %v16603_v5  ;;  %v10640_v3 = vpack.c.bf16 %v2353_v46, %v2352_v40  ;;  %v1387_v40 = vld [vmem:[#allocation2 + $0x41] sm:$0xff]  ;;  %v211_v46 = vadd.s32 96, %v12147_v16 }
 0x125   : > { %2520 = vmatmul.mubr.f32.gmra.mrb[46].mxu0 %v1481_v18  ;;  %v16590_v59 = vmax.f32 %v12525_v37, 0.0  ;;  %v1260_v18 = vmul.f32 %v12522_v43, %v1482_v23  ;;  %v2355_v23 = vld [vmem:[%s16586_s2 + $0x278] sm:$0xff]  ;;  %vm12593_vm10 = vcmp.lt.s32.totalorder %v298_v15, 15 }
 0x126   : > { %2524 = vmatprep.mubr.f32.mxu0 %v1162_v9  ;;  %2735 = vmatmul.mubr.f32.gmra.mrb[10].mxu1 %v1417_v30  ;;  %1205 = vst [vmem:[#allocation2 + $0xa0] sm:$0xff] %v16589_v44  ;;  %v2354_v30 = vld [vmem:[%s16586_s2 + $0x270] sm:$0xff]  ;;  %v12765_v13 = vld [vmem:[#allocation2 + $0x79] sm:$0xff] }
 0x127   : > { %2739 = vmatprep.mubr.f32.mxu1 %v1514_v55  ;;  %1204 = vst [vmem:[#allocation2 + $0x98] sm:$0xff] %v16590_v59  ;;  %v12548_v12 = vpop.f32.mrb[18].mxu0  ;;  %10638 = vmatpush1.bf16.msra.mxu1 %v10637_v29  ;;  %v1386_v55 = vld [vmem:[#allocation2 + $0x39] sm:$0xff]  ;;  %v12563_v29 = vsel %vm12538_vm8, 1.0, %v12517_v34  ;;  %v1483_v59 = vld [vmem:[#allocation2 + $0x4f] sm:$0xff]  ;;  %v10643_v56 = vpack.c.bf16 %v2355_v23, %v2354_v30  ;;  %v1516_v30 = vmul.f32 %v12522_v43, %v1484_v52  ;;  %v319_v23 = vand.u32 15, %v211_v46 }
 0x128   : > { %v16593_v9 = vmax.f32 %v12548_v12, 0.0  ;;  %v12551_v24 = vpop.f32.mrb[19].mxu0  ;;  %10639 = vmatprep.subr.bf16.mxu1 %v16603_v5  ;;  %16824 = vst [vmem:[#allocation15_spill] sm:$0xff] %v12563_v29 }
 0x129   : > { %2525 = vmatmul.mubr.f32.gmra.mrb[48].mxu0 %v1260_v18  ;;  %v16594_v44 = vmax.f32 %v12551_v24, 0.0  ;;  %v1419_v18 = vmul.f32 %v12563_v29, %v1387_v40  ;;  %vm627_vm11 = vcmp.gt.s32.totalorder %v319_v23, 0 }
 0x12a   : > { %2529 = vmatprep.mubr.f32.mxu0 %v1163_v1  ;;  %2740 = vmatmul.mubr.f32.gmra.mrb[12].mxu1 %v1386_v55  ;;  %1207 = vst [vmem:[#allocation2 + $0xb0] sm:$0xff] %v16593_v9  ;;  %v12632_v22 = vsel %vm627_vm11, 1.0, %v12517_v34 }
 0x12b   : > { %2744 = vmatprep.mubr.f32.mxu1 %v1483_v59  ;;  %1206 = vst [vmem:[#allocation2 + $0xa8] sm:$0xff] %v16594_v44  ;;  %v12573_v4 = vpop.f32.mrb[20].mxu0  ;;  %10641 = vmatpush1.bf16.msra.mxu1 %v10640_v3  ;;  %v2357_v3 = vld [vmem:[%s16586_s2 + $0x288] sm:$0xff]  ;;  %v210_v44 = vadd.s32 88, %v12147_v16  ;;  %16829 = vst [vmem:[#allocation18_spill] sm:$0xff] %v12632_v22 }
 0x12c   : > { %v16595_v1 = vmax.f32 %v12573_v4, 0.0  ;;  %v12580_v55 = vpop.f32.mrb[21].mxu0  ;;  %10642 = vmatprep.subr.bf16.mxu1 %v16603_v5  ;;  %v10646_v27 = vpack.c.bf16 %v2357_v3, %v2356_v8  ;;  %v1389_v8 = vld [vmem:[#allocation2 + $0x51] sm:$0xff]  ;;  %v213_v3 = vadd.s32 112, %v12147_v16 }
 0x12d   : > { %2530 = vmatmul.mubr.f32.gmra.mrb[50].mxu0 %v1483_v59  ;;  %v16596_v40 = vmax.f32 %v12580_v55, 0.0  ;;  %v1262_v59 = vmul.f32 %v12577_v61, %v1484_v52  ;;  %v2359_v52 = vld [vmem:[%s16586_s2 + $0x298] sm:$0xff]  ;;  %v312_v31 = vand.u32 15, %v210_v44  ;;  %v2360_v44 = vld [vmem:[%s16586_s2 + $0x2a0] sm:$0xff] }
 0x12e   : > { %2534 = vmatprep.mubr.f32.mxu0 %v1164_v33  ;;  %2745 = vmatmul.mubr.f32.gmra.mrb[14].mxu1 %v1419_v18  ;;  %1209 = vst [vmem:[#allocation2 + $0xc0] sm:$0xff] %v16595_v1  ;;  %v2358_v18 = vld [vmem:[%s16586_s2 + $0x290] sm:$0xff] }
 0x12f   : > { %2749 = vmatprep.mubr.f32.mxu1 %v1516_v30  ;;  %1208 = vst [vmem:[#allocation2 + $0xb8] sm:$0xff] %v16596_v40  ;;  %v12603_v46 = vpop.f32.mrb[22].mxu0  ;;  %10644 = vmatpush1.bf16.msra.mxu1 %v10643_v56  ;;  %v1388_v30 = vld [vmem:[#allocation2 + $0x49] sm:$0xff]  ;;  %v12618_v56 = vsel %vm12593_vm10, 1.0, %v12517_v34  ;;  %v1485_v40 = vld [vmem:[#allocation2 + $0x5f] sm:$0xff]  ;;  %v10649_v23 = vpack.c.bf16 %v2359_v52, %v2358_v18  ;;  %v1518_v18 = vmul.f32 %v12577_v61, %v1486_v35  ;;  %v333_v52 = vand.u32 15, %v213_v3 }
 0x130   : > { %v16599_v33 = vmax.f32 %v12603_v46, 0.0  ;;  %v12606_v15 = vpop.f32.mrb[23].mxu0  ;;  %10645 = vmatprep.subr.bf16.mxu1 %v16603_v5  ;;  %16828 = vst [vmem:[#allocation17_spill] sm:$0xff] %v12618_v56  ;;  %vm12648_vm12 = vcmp.lt.s32.totalorder %v312_v31, 15 }
 0x131   : > { %2535 = vmatmul.mubr.f32.gmra.mrb[52].mxu0 %v1262_v59  ;;  %v16600_v1 = vmax.f32 %v12606_v15, 0.0  ;;  %v1421_v59 = vmul.f32 %v12618_v56, %v1389_v8  ;;  %vm629_vm13 = vcmp.gt.s32.totalorder %v333_v52, 0 }
 0x132   : > { %2539 = vmatprep.mubr.f32.mxu0 %v1165_v28  ;;  %2750 = vmatmul.mubr.f32.gmra.mrb[16].mxu1 %v1388_v30  ;;  %1211 = vst [vmem:[#allocation2 + $0xd0] sm:$0xff] %v16599_v33  ;;  %v12687_v41 = vsel %vm629_vm13, 1.0, %v12517_v34 }
 0x133   : > { %2754 = vmatprep.mubr.f32.mxu1 %v1485_v40  ;;  %1210 = vst [vmem:[#allocation2 + $0xc8] sm:$0xff] %v16600_v1  ;;  %v12628_v9 = vpop.f32.mrb[24].mxu0  ;;  %10647 = vmatpush1.bf16.msra.mxu1 %v10646_v27  ;;  %v2361_v27 = vld [vmem:[%s16586_s2 + $0x2a8] sm:$0xff]  ;;  %v212_v1 = vadd.s32 104, %v12147_v16  ;;  %16834 = vst [vmem:[#allocation20_spill] sm:$0xff] %v12687_v41 }
 0x134   : > { %v16601_v28 = vmax.f32 %v12628_v9, 0.0  ;;  %v12635_v30 = vpop.f32.mrb[25].mxu0  ;;  %10648 = vmatprep.subr.bf16.mxu1 %v16603_v5  ;;  %v10652_v39 = vpack.c.bf16 %v2361_v27, %v2360_v44  ;;  %v1391_v44 = vld [vmem:[#allocation2 + $0x61] sm:$0xff]  ;;  %v215_v27 = vadd.s32 128, %v12147_v16 }
 0x135   : > { %2540 = vmatmul.mubr.f32.gmra.mrb[54].mxu0 %v1485_v40  ;;  %v16602_v8 = vmax.f32 %v12635_v30, 0.0  ;;  %v1264_v40 = vmul.f32 %v12632_v22, %v1486_v35  ;;  %v2363_v35 = vld [vmem:[%s16586_s2 + $0x2b8] sm:$0xff] }
 0x136   : > { %2544 = vmatprep.mubr.f32.mxu0 %v1166_v62  ;;  %2755 = vmatmul.mubr.f32.gmra.mrb[18].mxu1 %v1421_v59  ;;  %1213 = vst [vmem:[#allocation2 + $0xe0] sm:$0xff] %v16601_v28  ;;  %v2362_v59 = vld [vmem:[%s16586_s2 + $0x2b0] sm:$0xff]  ;;  %v326_v62 = vand.u32 15, %v212_v1  ;;  %v16835_v1 = vmov 0.0|0.0  }
 0x137   : > { %2759 = vmatprep.mubr.f32.mxu1 %v1518_v18  ;;  %1212 = vst [vmem:[#allocation2 + $0xd8] sm:$0xff] %v16602_v8  ;;  %v12658_v3 = vpop.f32.mrb[26].mxu0  ;;  %10650 = vmatpush1.bf16.msra.mxu1 %v10649_v23  ;;  %v1390_v18 = vld [vmem:[#allocation2 + $0x59] sm:$0xff]  ;;  %v12673_v23 = vsel %vm12648_vm12, 1.0, %v12517_v34  ;;  %v1487_v8 = vld [vmem:[#allocation2 + $0x6f] sm:$0xff]  ;;  %v10655_v52 = vpack.c.bf16 %v2363_v35, %v2362_v59  ;;  %v347_v35 = vand.u32 15, %v215_v27 }
 0x138   : > { %v12661_v31 = vpop.f32.mrb[27].mxu0  ;;  %10651 = vmatprep.subr.bf16.mxu1 %v16603_v5  ;;  %16832 = vst [vmem:[#allocation19_spill] sm:$0xff] %v12673_v23  ;;  %v1488_v5 = vld [vmem:[#allocation2 + $0x77] sm:$0xff]  ;;  %v1423_v25 = vmul.f32 %v12673_v23, %v1391_v44  ;;  %vm12703_vm14 = vcmp.lt.s32.totalorder %v326_v62, 15 }
 0x139   : > { %2545 = vmatmul.mubr.f32.gmra.mrb[56].mxu0 %v1264_v40  ;;  %v16606_v28 = vmax.f32 %v12661_v31, 0.0  ;;  %v16833_v40 = vmax.f32 %v12658_v3, 0.0  ;;  %v1520_v59 = vmul.f32 %v12632_v22, %v1488_v5  ;;  %v2366_v62 = vld [vmem:[%s16586_s2 + $0x2d0] sm:$0xff]  ;;  %vm631_vm15 = vcmp.gt.s32.totalorder %v347_v35, 0 }
 0x13a   : > { %2549 = vmatprep.mubr.f32.mxu0 %v1167_v50  ;;  %2760 = vmatmul.mubr.f32.gmra.mrb[20].mxu1 %v1390_v18 }
 0x13b   : > { %1215 = vst [vmem:[#allocation2 + $0xf0] sm:$0xff] %v16833_v40  ;;  %2764 = vmatprep.mubr.f32.mxu1 %v1487_v8  ;;  %1214 = vst [vmem:[#allocation2 + $0xe8] sm:$0xff] %v16606_v28  ;;  %v12683_v33 = vpop.f32.mrb[28].mxu0  ;;  %10653 = vmatpush1.bf16.msra.mxu1 %v10652_v39  ;;  %v2364_v40 = vld [vmem:[%s16586_s2 + $0x2c0] sm:$0xff]  ;;  %v2365_v39 = vld [vmem:[%s16586_s2 + $0x2c8] sm:$0xff]  ;;  %v16836_v28 = vmax.f32 %v12462_v19, 0.0 }
 0x13c   : > { %v12690_v18 = vpop.f32.mrb[29].mxu0  ;;  %10654 = vmatprep.subr.bf16.mxu1 %v16835_v1  ;;  %v16839_v17 = vmax.f32 %v12683_v33, 0.0  ;;  %v10658_v19 = vpack.c.bf16 %v2365_v39, %v2364_v40  ;;  %v12727_v40 = vld [vmem:[#allocation2 + $0x71] sm:$0xff]  ;;  %v217_v39 = vadd.s32 144, %v12147_v16 }
 0x13d   : > { %2550 = vmatmul.mubr.f32.gmra.mrb[58].mxu0 %v1487_v8  ;;  %v16609_v44 = vmax.f32 %v12690_v18, 0.0  ;;  %v1266_v8 = vmul.f32 %v12687_v41, %v1488_v5  ;;  %v12720_v5 = vld [vmem:[#allocation2 + $0x69] sm:$0xff] }
 0x13e   : > { %2554 = vmatprep.mubr.f32.mxu0 %v16836_v28  ;;  %2765 = vmatmul.mubr.f32.gmra.mrb[22].mxu1 %v1423_v25  ;;  %1217 = vst [vmem:[#allocation2 + $0x100] sm:$0xff] %v16839_v17  ;;  %v2367_v17 = vld [vmem:[%s16586_s2 + $0x2d8] sm:$0xff] }
 0x13f   : > { %2769 = vmatprep.mubr.f32.mxu1 %v1520_v59  ;;  %1216 = vst [vmem:[#allocation2 + $0xf8] sm:$0xff] %v16609_v44  ;;  %v10252_v27 = vpop.f32.mrb[30].mxu0  ;;  %10656 = vmatpush1.bf16.msra.mxu1 %v10655_v52  ;;  %v12725_v52 = vsel %vm12703_vm14, 1.0, %v12517_v34  ;;  %v12733_v44 = vld [vmem:[#allocation2 + $0x7f] sm:$0xff]  ;;  %v10661_v50 = vpack.c.bf16 %v2367_v17, %v2366_v62  ;;  %v16843_v62 = vmax.f32 %v12488_v53, 0.0  ;;  %v216_v17 = vadd.s32 136, %v12147_v16 }
 0x140   : > { %v1187_v28 = vmax.f32 %v10252_v27, 0.0  ;;  %v1147_v25 = vpop.f32.mrb[31].mxu0  ;;  %10657 = vmatprep.subr.bf16.mxu1 %v16835_v1  ;;  %16840 = vst [vmem:[#allocation21_spill] sm:$0xff] %v12725_v52  ;;  %v16841_v27 = vmax.f32 %v12455_v14, 0.0  ;;  %v1425_v35 = vmul.f32 %v12725_v52, %v12727_v40  ;;  %v2368_v14 = vld [vmem:[%s16586_s2 + $0x2e0] sm:$0xff]  ;;  %v2370_v52 = vld [vmem:[%s16586_s2 + $0x2f0] sm:$0xff] }
 0x141   : > { %2555 = vmatmul.mubr.f32.gmra.mrb[60].mxu0 %v1266_v8  ;;  %v1186_v59 = vmax.f32 %v1147_v25, 0.0  ;;  %v12735_v8 = vld [vmem:[#allocation2 + $0x87] sm:$0xff]  ;;  %v12741_v25 = vsel %vm631_vm15, 1.0, %v12517_v34  ;;  %v2371_v53 = vld [vmem:[%s16586_s2 + $0x2f8] sm:$0xff] }
 0x142   : > { %2559 = vmatprep.mubr.f32.mxu0 %v16841_v27  ;;  %2770 = vmatmul.mubr.f32.gmra.mrb[24].mxu1 %v12720_v5  ;;  %1219 = vst [vmem:[#allocation2 + $0x110] sm:$0xff] %v1187_v28  ;;  %16842 = vst [vmem:[#allocation22_spill] sm:$0xff] %v12741_v25  ;;  %v361_v28 = vand.u32 15, %v217_v39  ;;  %v10664_v27 = vpack.c.bf16 %v2369_v20, %v2368_v14  ;;  %v12768_v39 = vsel %vm726_vm0, 1.0, %v12517_v34  ;;  %v16845_v14 = vmax.f32 %v12485_v49, 0.0  ;;  %v12776_v20 = vld [vmem:[#allocation2 + $0x8f] sm:$0xff] }
 0x143   : > { %2774 = vmatprep.mubr.f32.mxu1 %v12733_v44  ;;  %1218 = vst [vmem:[#allocation2 + $0x108] sm:$0xff] %v1186_v59  ;;  %10659 = vmatpush1.bf16.msra.mxu1 %v10658_v19  ;;  %v1522_v19 = vmul.f32 %v12687_v41, %v12735_v8  ;;  %v1268_v59 = vmul.f32 %v12741_v25, %v12735_v8  ;;  %16844 = vst [vmem:[#allocation23_spill] sm:$0xff] %v12768_v39  ;;  %vm9559_vm0 = vcmask 7168  }
 0x144   : > { %10660 = vmatprep.subr.bf16.mxu1 %v16835_v1  ;;  %vm633_vm1 = vcmp.gt.s32.totalorder %v361_v28, 0 }
 0x145   : > { %2560 = vmatmul.mubr.f32.gmra.mrb[62].mxu0 %v12733_v44  ;;  %v12784_v28 = vsel %vm633_vm1, 1.0, %v12517_v34 }
 0x146   : > { %2564 = vmatprep.mubr.f32.mxu0 %v16843_v62  ;;  %2775 = vmatmul.mubr.f32.gmra.mrb[26].mxu1 %v1425_v35  ;;  %v12770_v35 = vld [vmem:[#allocation2 + $0x81] sm:$0xff]  ;;  %v354_v62 = vand.u32 15, %v216_v17  ;;  %16846 = vst [vmem:[#allocation24_spill] sm:$0xff] %v12784_v28  ;;  %v16847_v17 = vmax.f32 %v12525_v37, 0.0  ;;  %v16851_v37 = vmax.f32 %v12514_v6, 0.0 }
 0x147   : > { %2779 = vmatprep.mubr.f32.mxu1 %v1522_v19  ;;  %10662 = vmatpush1.bf16.msra.mxu1 %v10661_v50  ;;  %v219_v50 = vadd.s32 160, %v12147_v16  ;;  %v12778_v19 = vld [vmem:[#allocation2 + $0x97] sm:$0xff]  ;;  %v1427_v10 = vmul.f32 %v12768_v39, %v12770_v35 }
 0x148   : > { %10663 = vmatprep.subr.bf16.mxu1 %v16835_v1  ;;  %v1524_v49 = vmul.f32 %v12741_v25, %v12778_v19  ;;  %vm728_vm2 = vcmp.lt.s32.totalorder %v354_v62, 15  ;;  %v12807_v62 = vld [vmem:[#allocation2 + $0x9f] sm:$0xff] }
 0x149   : > { %2565 = vmatmul.mubr.f32.gmra.mrb[64].mxu0 %v1268_v59  ;;  %v10667_v59 = vpack.c.bf16 %v2371_v53, %v2370_v52  ;;  %v218_v52 = vadd.s32 152, %v12147_v16  ;;  %v12796_v53 = vld [vmem:[#allocation2 + $0x89] sm:$0xff]  ;;  %v12799_v39 = vsel %vm728_vm2, 1.0, %v12517_v34 }
 0x14a   : > { %2569 = vmatprep.mubr.f32.mxu0 %v16845_v14  ;;  %2780 = vmatmul.mubr.f32.gmra.mrb[28].mxu1 %v12765_v13  ;;  %v375_v14 = vand.u32 15, %v219_v50  ;;  %16848 = vst [vmem:[#allocation25_spill] sm:$0xff] %v12796_v53  ;;  %16849 = vst [vmem:[#allocation26_spill] sm:$0xff] %v12799_v39  ;;  %v12801_v50 = vld [vmem:[#allocation2 + $0x91] sm:$0xff] }
 0x14b   : > { %2784 = vmatprep.mubr.f32.mxu1 %v12776_v20  ;;  %10665 = vmatpush1.bf16.msra.mxu1 %v10664_v27  ;;  %v1270_v27 = vmul.f32 %v12784_v28, %v12778_v19  ;;  %16850 = vst [vmem:[#allocation27_spill] sm:$0xff] %v12801_v50 }
 0x14c   : > { %10666 = vmatprep.subr.bf16.mxu1 %v16835_v1  ;;  %vm635_vm3 = vcmp.gt.s32.totalorder %v375_v14, 0 }
 0x14d   : > { %2570 = vmatmul.mubr.f32.gmra.mrb[66].mxu0 %v12776_v20 }
 0x14e   : > { %2574 = vmatprep.mubr.f32.mxu0 %v16847_v17  ;;  %2785 = vmatmul.mubr.f32.gmra.mrb[30].mxu1 %v1427_v10  ;;  %v221_v10 = vadd.s32 176, %v12147_v16  ;;  %v1429_v17 = vmul.f32 %v12799_v39, %v12801_v50  ;;  %v12825_v50 = vld [vmem:[#allocation2 + $0x99] sm:$0xff] }
 0x14f   : > { %2789 = vmatprep.mubr.f32.mxu1 %v1524_v49  ;;  %10668 = vmatpush1.bf16.msra.mxu1 %v10667_v59  ;;  %v12809_v59 = vld [vmem:[#allocation2 + $0xa7] sm:$0xff]  ;;  %v368_v49 = vand.u32 15, %v218_v52  ;;  %v220_v52 = vadd.s32 168, %v12147_v16  ;;  %16854 = vst [vmem:[#allocation29_spill] sm:$0xff] %v12825_v50 }
 0x150   : > { %11197 = vmatprep.subr.bf16.mxu1 %v16835_v1  ;;  %v1526_v6 = vmul.f32 %v12784_v28, %v12809_v59  ;;  %v389_v14 = vand.u32 15, %v221_v10  ;;  %v16857_v10 = vmax.f32 %v12548_v12, 0.0 }
 0x151   : > { %2575 = vmatmul.mubr.f32.gmra.mrb[68].mxu0 %v1270_v27  ;;  %v12815_v27 = vsel %vm635_vm3, 1.0, %v12517_v34  ;;  %vm730_vm4 = vcmp.lt.s32.totalorder %v368_v49, 15  ;;  %v12836_v49 = vld [vmem:[#allocation2 + $0xaf] sm:$0xff] }
 0x152   : > { %2579 = vmatprep.mubr.f32.mxu0 %v16851_v37  ;;  %2790 = vmatmul.mubr.f32.gmra.mrb[32].mxu1 %v12796_v53  ;;  %16852 = vst [vmem:[#allocation28_spill] sm:$0xff] %v12815_v27  ;;  %v16853_v37 = vmax.f32 %v12551_v24, 0.0  ;;  %v1272_v39 = vmul.f32 %v12815_v27, %v12809_v59  ;;  %v12828_v25 = vsel %vm730_vm4, 1.0, %v12517_v34  ;;  %v12830_v53 = vld [vmem:[#allocation2 + $0xa1] sm:$0xff]  ;;  %vm637_vm5 = vcmp.gt.s32.totalorder %v389_v14, 0 }
 0x153   : > { %2794 = vmatprep.mubr.f32.mxu1 %v12807_v62  ;;  %16855 = vst [vmem:[#allocation30_spill] sm:$0xff] %v12828_v25  ;;  %16856 = vst [vmem:[#allocation31_spill] sm:$0xff] %v12830_v53  ;;  %v223_v24 = vadd.s32 192, %v12147_v16  ;;  %v1431_v14 = vmul.f32 %v12828_v25, %v12830_v53  ;;  %v12846_v28 = vsel %vm637_vm5, 1.0, %v12517_v34  ;;  %v12858_v53 = vld [vmem:[#allocation2 + $0xa9] sm:$0xff] }
 0x154   : > { %16859 = vst [vmem:[#allocation33_spill] sm:$0xff] %v12846_v28  ;;  %16862 = vst [vmem:[#allocation35_spill] sm:$0xff] %v12858_v53 }
 0x155   : > { %2580 = vmatmul.mubr.f32.gmra.mrb[70].mxu0 %v12807_v62 }
 0x156   : > { %2584 = vmatprep.mubr.f32.mxu0 %v16853_v37  ;;  %2795 = vmatmul.mubr.f32.gmra.mrb[34].mxu1 %v1429_v17  ;;  %v12838_v17 = vld [vmem:[#allocation2 + $0xb7] sm:$0xff] }
 0x157   : > { %2799 = vmatprep.mubr.f32.mxu1 %v1526_v6  ;;  %v12840_v6 = vpop.f32.mrb[32].mxu0  ;;  %v1528_v12 = vmul.f32 %v12815_v27, %v12838_v17 }
 0x158   : > { %16858 = vst [vmem:[#allocation32_spill] sm:$0xff] %v12840_v6  ;;  %v2488_v37 = vpop.f32.mrb[33].mxu0  ;;  %v1274_v6 = vmul.f32 %v12846_v28, %v12838_v17 }
 0x159   : > { %2585 = vmatmul.mubr.f32.gmra.mrb[72].mxu0 %v1272_v39  ;;  %v382_v39 = vand.u32 15, %v220_v52  ;;  %v222_v52 = vadd.s32 184, %v12147_v16  ;;  %v12854_v37 = vpop.f32.mrb[34].mxu0 }
 0x15a   : > { %2589 = vmatprep.mubr.f32.mxu0 %v16857_v10  ;;  %2800 = vmatmul.mubr.f32.gmra.mrb[36].mxu1 %v12825_v50  ;;  %v403_v10 = vand.u32 15, %v223_v24  ;;  %v16860_v50 = vmax.f32 %v12580_v55, 0.0  ;;  %16861 = vst [vmem:[#allocation34_spill] sm:$0xff] %v12854_v37  ;;  %v2493_v25 = vpop.f32.mrb[35].mxu0  ;;  %v12863_v24 = vld [vmem:[#allocation2 + $0xb1] sm:$0xff]  ;;  %v225_v55 = vadd.s32 208, %v12147_v16 }
 0x15b   : > { %2804 = vmatprep.mubr.f32.mxu1 %v12836_v49  ;;  %vm732_vm6 = vcmp.lt.s32.totalorder %v382_v39, 15  ;;  %16864 = vst [vmem:[#allocation37_spill] sm:$0xff] %v12863_v24  ;;  %v12869_v39 = vld [vmem:[#allocation2 + $0xbf] sm:$0xff]  ;;  %v396_v25 = vand.u32 15, %v222_v52  ;;  %v224_v52 = vadd.s32 200, %v12147_v16 }
 0x15c   : > { %v12861_v27 = vsel %vm732_vm6, 1.0, %v12517_v34  ;;  %vm639_vm7 = vcmp.gt.s32.totalorder %v403_v10, 0 }
 0x15d   : > { %2590 = vmatmul.mubr.f32.gmra.mrb[74].mxu0 %v12836_v49  ;;  %16863 = vst [vmem:[#allocation36_spill] sm:$0xff] %v12861_v27  ;;  %vm734_vm8 = vcmp.lt.s32.totalorder %v396_v25, 15  ;;  %v1499_v25 = vld [vmem:[#allocation2 + $0xcf] sm:$0xff] }
 0x15e   : > { %2594 = vmatprep.mubr.f32.mxu0 %v16860_v50  ;;  %2805 = vmatmul.mubr.f32.gmra.mrb[38].mxu1 %v1431_v14  ;;  %v16865_v50 = vmax.f32 %v12573_v4, 0.0  ;;  %v1498_v14 = vld [vmem:[#allocation2 + $0xc7] sm:$0xff]  ;;  %v417_v4 = vand.u32 15, %v225_v55  ;;  %v227_v55 = vadd.s32 224, %v12147_v16 }
 0x15f   : > { %2809 = vmatprep.mubr.f32.mxu1 %v1528_v12  ;;  %v12875_v12 = vsel %vm639_vm7, 1.0, %v12517_v34  ;;  %v1530_v10 = vmul.f32 %v12846_v28, %v1498_v14  ;;  %v16871_v28 = vmax.f32 %v12635_v30, 0.0  ;;  %v16873_v30 = vmax.f32 %v12628_v9, 0.0 }
 0x160   : > { %16866 = vst [vmem:[#allocation38_spill] sm:$0xff] %v12875_v12  ;;  %v1276_v37 = vmul.f32 %v12875_v12, %v1498_v14  ;;  %vm641_vm9 = vcmp.gt.s32.totalorder %v417_v4, 0  ;;  %v228_v9 = vadd.s32 232, %v12147_v16 }
 0x161   : > { %2595 = vmatmul.mubr.f32.gmra.mrb[76].mxu0 %v1274_v6  ;;  %v1433_v6 = vmul.f32 %v12861_v27, %v12863_v24  ;;  %v12883_v27 = vld [vmem:[#allocation2 + $0xb9] sm:$0xff]  ;;  %v12886_v24 = vsel %vm734_vm8, 1.0, %v12517_v34  ;;  %v12897_v14 = vsel %vm641_vm9, 1.0, %v12517_v34 }
 0x162   : > { %2599 = vmatprep.mubr.f32.mxu0 %v16865_v50  ;;  %2810 = vmatmul.mubr.f32.gmra.mrb[40].mxu1 %v12858_v53  ;;  %v16867_v50 = vmax.f32 %v12606_v15, 0.0  ;;  %16868 = vst [vmem:[#allocation39_spill] sm:$0xff] %v12886_v24  ;;  %v12888_v53 = vld [vmem:[#allocation2 + $0xc1] sm:$0xff]  ;;  %v16869_v15 = vmax.f32 %v12603_v46, 0.0  ;;  %16870 = vst [vmem:[#allocation40_spill] sm:$0xff] %v12897_v14  ;;  %v226_v46 = vadd.s32 216, %v12147_v16 }
 0x163   : > { %2814 = vmatprep.mubr.f32.mxu1 %v12869_v39 }
 0x165   : > { %2600 = vmatmul.mubr.f32.gmra.mrb[78].mxu0 %v12869_v39 }
 0x166   : > { %2604 = vmatprep.mubr.f32.mxu0 %v16867_v50  ;;  %2815 = vmatmul.mubr.f32.gmra.mrb[42].mxu1 %v1433_v6  ;;  %v1500_v6 = vld [vmem:[#allocation2 + $0xd7] sm:$0xff]  ;;  %v431_v50 = vand.u32 15, %v227_v55  ;;  %v229_v55 = vadd.s32 240, %v12147_v16 }
 0x167   : > { %2819 = vmatprep.mubr.f32.mxu1 %v1530_v10  ;;  %v410_v10 = vand.u32 15, %v224_v52  ;;  %v1532_v4 = vmul.f32 %v12875_v12, %v1500_v6  ;;  %v1278_v52 = vmul.f32 %v12897_v14, %v1500_v6  ;;  %v16875_v12 = vmax.f32 %v12661_v31, 0.0  ;;  %v1503_v31 = vld [vmem:[#allocation2 + $0xef] sm:$0xff] }
 0x168   : > { %vm643_vm11 = vcmp.gt.s32.totalorder %v431_v50, 0 }
 0x169   : > { %2605 = vmatmul.mubr.f32.gmra.mrb[80].mxu0 %v1276_v37  ;;  %v1435_v37 = vmul.f32 %v12886_v24, %v12888_v53  ;;  %vm736_vm10 = vcmp.lt.s32.totalorder %v410_v10, 15  ;;  %v1502_v10 = vld [vmem:[#allocation2 + $0xe7] sm:$0xff] }
 0x16a   : > { %2609 = vmatprep.mubr.f32.mxu0 %v16869_v15  ;;  %2820 = vmatmul.mubr.f32.gmra.mrb[44].mxu1 %v12883_v27  ;;  %v12904_v15 = vld [vmem:[#allocation2 + $0xc9] sm:$0xff]  ;;  %v12907_v24 = vsel %vm736_vm10, 1.0, %v12517_v34  ;;  %v1534_v50 = vmul.f32 %v12897_v14, %v1502_v10  ;;  %v12950_v14 = vld [vmem:[#allocation2 + $0xf1] sm:$0xff] }
 0x16b   : > { %2824 = vmatprep.mubr.f32.mxu1 %v1499_v25  ;;  %16872 = vst [vmem:[#allocation41_spill] sm:$0xff] %v12907_v24 }
 0x16d   : > { %2610 = vmatmul.mubr.f32.gmra.mrb[82].mxu0 %v1499_v25  ;;  %v12909_v25 = vld [vmem:[#allocation2 + $0xd1] sm:$0xff] }
 0x16e   : > { %2614 = vmatprep.mubr.f32.mxu0 %v16871_v28  ;;  %2825 = vmatmul.mubr.f32.gmra.mrb[46].mxu1 %v1435_v37  ;;  %v1501_v28 = vld [vmem:[#allocation2 + $0xdf] sm:$0xff]  ;;  %v424_v37 = vand.u32 15, %v226_v46  ;;  %v1437_v6 = vmul.f32 %v12907_v24, %v12909_v25 }
 0x16f   : > { %2829 = vmatprep.mubr.f32.mxu1 %v1532_v4  ;;  %v12918_v4 = vsel %vm643_vm11, 1.0, %v12517_v34 }
 0x170   : > { %16874 = vst [vmem:[#allocation42_spill] sm:$0xff] %v12918_v4  ;;  %vm738_vm12 = vcmp.lt.s32.totalorder %v424_v37, 15  ;;  %v1280_v46 = vmul.f32 %v12918_v4, %v1502_v10  ;;  %v438_v37 = vand.u32 15, %v228_v9 }
 0x171   : > { %2615 = vmatmul.mubr.f32.gmra.mrb[84].mxu0 %v1278_v52  ;;  %v445_v52 = vand.u32 15, %v229_v55  ;;  %v12928_v24 = vsel %vm738_vm12, 1.0, %v12517_v34  ;;  %v16877_v55 = vmax.f32 %v12658_v3, 0.0  ;;  %v230_v3 = vadd.s32 248, %v12147_v16  ;;  %v12975_v16 = vld [vmem:[#allocation2 + $0x10f] sm:$0xff] }
 0x172   : > { %2619 = vmatprep.mubr.f32.mxu0 %v16873_v30  ;;  %2830 = vmatmul.mubr.f32.gmra.mrb[48].mxu1 %v12904_v15  ;;  %v12925_v30 = vld [vmem:[#allocation2 + $0xd9] sm:$0xff]  ;;  %16876 = vst [vmem:[#allocation43_spill] sm:$0xff] %v12928_v24  ;;  %vm740_vm14 = vcmp.lt.s32.totalorder %v438_v37, 15  ;;  %v12957_v37 = vld [vmem:[#allocation2 + $0x107] sm:$0xff]  ;;  %16884 = vst [vmem:[#allocation48_spill] sm:$0xff] %v12975_v16 }
 0x173   : > { %2834 = vmatprep.mubr.f32.mxu1 %v1501_v28  ;;  %vm645_vm13 = vcmp.gt.s32.totalorder %v445_v52, 0  ;;  %v16879_v52 = vmax.f32 %v12690_v18, 0.0  ;;  %v12955_v18 = vld [vmem:[#allocation2 + $0xff] sm:$0xff]  ;;  %16883 = vst [vmem:[#allocation47_spill] sm:$0xff] %v12957_v37 }
 0x174   : > { %16882 = vst [vmem:[#allocation46_spill] sm:$0xff] %v12955_v18 }
 0x175   : > { %2620 = vmatmul.mubr.f32.gmra.mrb[86].mxu0 %v1501_v28  ;;  %v12930_v28 = vld [vmem:[#allocation2 + $0xe1] sm:$0xff] }
 0x176   : > { %2624 = vmatprep.mubr.f32.mxu0 %v16875_v12  ;;  %2835 = vmatmul.mubr.f32.gmra.mrb[50].mxu1 %v1437_v6  ;;  %v1504_v12 = vld [vmem:[#allocation2 + $0xf7] sm:$0xff]  ;;  %v1439_v10 = vmul.f32 %v12928_v24, %v12930_v28  ;;  %v12938_v6 = vsel %vm645_vm13, 1.0, %v12517_v34 }
 0x177   : > { %2839 = vmatprep.mubr.f32.mxu1 %v1534_v50  ;;  %16878 = vst [vmem:[#allocation44_spill] sm:$0xff] %v12938_v6  ;;  %v1536_v50 = vmul.f32 %v12918_v4, %v1504_v12  ;;  %v1282_v9 = vmul.f32 %v12938_v6, %v1504_v12 }
 0x179   : > { %2625 = vmatmul.mubr.f32.gmra.mrb[88].mxu0 %v1280_v46  ;;  %v12945_v46 = vld [vmem:[#allocation2 + $0xe9] sm:$0xff] }
 0x17a   : > { %2629 = vmatprep.mubr.f32.mxu0 %v16877_v55  ;;  %2840 = vmatmul.mubr.f32.gmra.mrb[52].mxu1 %v12925_v30  ;;  %v12948_v55 = vsel %vm740_vm14, 1.0, %v12517_v34 }
 0x17b   : > { %2844 = vmatprep.mubr.f32.mxu1 %v1503_v31  ;;  %16880 = vst [vmem:[#allocation45_spill] sm:$0xff] %v12948_v55  ;;  %v1441_v12 = vmul.f32 %v12948_v55, %v12950_v14  ;;  %v1637_v55 = vld [vmem:[#allocation2 + $0x21] sm:$0xff] }
 0x17d   : > { %2630 = vmatmul.mubr.f32.gmra.mrb[90].mxu0 %v1503_v31  ;;  %v16881_v31 = vmax.f32 %v12683_v33, 0.0  ;;  %v1538_v33 = vmul.f32 %v12938_v6, %v12957_v37  ;;  %v2408_v6 = vld [vmem:[%s16586_s2 + $0x420] sm:$0xff] }
 0x17e   : > { %2634 = vmatprep.mubr.f32.mxu0 %v16879_v52  ;;  %2845 = vmatmul.mubr.f32.gmra.mrb[54].mxu1 %v1439_v10  ;;  %v452_v10 = vand.u32 15, %v230_v3  ;;  %v12963_v52 = vld [vmem:[#allocation2 + $0x28] sm:$0xff]  ;;  %v2407_v3 = vld [vmem:[%s16586_s2 + $0x418] sm:$0xff] }
 0x17f   : > { %2849 = vmatprep.mubr.f32.mxu1 %v1536_v50  ;;  %v1732_v50 = vld [vmem:[#allocation2 + $0x27] sm:$0xff]  ;;  %v12980_v37 = vld [vmem:[#allocation2 + $0xf9] sm:$0xff] }
 0x180   : > { %vm742_vm15 = vcmp.lt.s32.totalorder %v452_v10, 15  ;;  %16885 = vst [vmem:[#allocation49_spill] sm:$0xff] %v12980_v37  ;;  %v2409_v10 = vld [vmem:[%s16586_s2 + $0x428] sm:$0xff] }
 0x181   : > { %2635 = vmatmul.mubr.f32.gmra.mrb[92].mxu0 %v1282_v9  ;;  %v2406_v9 = vld [vmem:[%s16586_s2 + $0x410] sm:$0xff] }
 0x182   : > { %2639 = vmatprep.mubr.f32.mxu0 %v16881_v31  ;;  %2850 = vmatmul.mubr.f32.gmra.mrb[56].mxu1 %v12945_v46  ;;  %v1764_v31 = vmul.f32 %v12157_v21, %v1732_v50  ;;  %v10721_v4 = vpack.c.bf16 %v2407_v3, %v2406_v9  ;;  %v12992_v50 = vld [vmem:[#allocation2 + $0x30] sm:$0xff]  ;;  %v10725_v3 = vpack.c.bf16 %v2409_v10, %v2408_v6  ;;  %v2411_v21 = vld [vmem:[%s16586_s2 + $0x438] sm:$0xff] }
 0x183   : > { %2854 = vmatprep.mubr.f32.mxu1 %v12955_v18  ;;  %v1734_v9 = vld [vmem:[#allocation2 + $0x37] sm:$0xff] }
 0x184   : > { %v1572_v6 = vld [vmem:[#allocation2 + $0x18] sm:$0xff] }
 0x185   : > { %2640 = vmatmul.mubr.f32.gmra.mrb[94].mxu0 %v12955_v18  ;;  %v12983_v18 = vsel %vm742_vm15, 1.0, %v12517_v34 }
 0x186   : > { %2855 = vmatmul.mubr.f32.gmra.mrb[58].mxu1 %v1441_v12  ;;  %3159 = vmatprep.mubr.f32.mxu0 %v12963_v52  ;;  %16886 = vst [vmem:[#allocation50_spill] sm:$0xff] %v12983_v18  ;;  %v12985_v12 = vld [vmem:[#allocation2 + $0x101] sm:$0xff] }
 0x187   : > { %2859 = vmatprep.mubr.f32.mxu1 %v1538_v33  ;;  %16887 = vst [vmem:[#allocation51_spill] sm:$0xff] %v12985_v12  ;;  %v1733_v33 = vld [vmem:[#allocation2 + $0x2f] sm:$0xff]  ;;  %v1443_v34 = vmul.f32 %v12983_v18, %v12985_v12  ;;  %v1766_v18 = vmul.f32 %v12372_v47, %v1734_v9  ;;  %v1669_v12 = vmul.f32 %v12401_v11, %v1637_v55 }
 0x188   : > { %v2414_v9 = vld [vmem:[%s16586_s2 + $0x450] sm:$0xff] }
 0x189   : > { %3160 = vmatmul.mubr.f32.vlgmr.msra.gmra.mrb[96].mxu0 %v1764_v31  ;;  %v12998_v31 = vld [vmem:[#allocation2 + $0x38] sm:$0xff] }
 0x18a   : > { %10720 = vmatpush3.bf16.msra.mxu0 %v12360_v38  ;;  %2860 = vmatmul.mubr.f32.gmra.mrb[60].mxu1 %v12980_v37  ;;  %v2410_v38 = vld [vmem:[%s16586_s2 + $0x430] sm:$0xff]  ;;  %v2413_v37 = vld [vmem:[%s16586_s2 + $0x448] sm:$0xff] }
 0x18b   : > { %3164 = vmatprep.mubr.f32.mxu0 %v12992_v50  ;;  %2864 = vmatprep.mubr.f32.mxu1 %v12975_v16  ;;  %v1636_v16 = vld [vmem:[#allocation2 + $0x19] sm:$0xff]  ;;  %v10729_v10 = vpack.c.bf16 %v2411_v21, %v2410_v38 }
 0x18c   : > { %10722 = vmatprep.subr.bf16.mxu0 %v10721_v4  ;;  %v1573_v21 = vld [vmem:[#allocation2 + $0x20] sm:$0xff] }
 0x18d   : > { %3165 = vmatmul.mubr.f32.gmra.mrb[98].mxu0 %v1733_v33  ;;  %v13008_v33 = vld [vmem:[#allocation2 + $0x40] sm:$0xff] }
 0x18e   : > { %2865 = vmatmul.mubr.f32.gmra.mrb[62].mxu1 %v1443_v34  ;;  %3169 = vmatprep.mubr.f32.mxu0 %v12998_v31  ;;  %v2412_v34 = vld [vmem:[%s16586_s2 + $0x440] sm:$0xff] }
 0x18f   : > { %2934 = vmatprep.mubr.f32.mxu1 %v1636_v16  ;;  %10724 = vmatpush3.bf16.msra.mxu0 %v10721_v4  ;;  %v1735_v16 = vld [vmem:[#allocation2 + $0x3f] sm:$0xff]  ;;  %v1736_v4 = vld [vmem:[#allocation2 + $0x47] sm:$0xff]  ;;  %v10733_v55 = vpack.c.bf16 %v2413_v37, %v2412_v34 }
 0x190   : > { %10726 = vmatprep.subr.bf16.mxu0 %v10725_v3  ;;  %v1768_v37 = vmul.f32 %v12412_v26, %v1736_v4 }
 0x191   : > { %3170 = vmatmul.mubr.f32.gmra.mrb[100].mxu0 %v1766_v18  ;;  %v13019_v18 = vld [vmem:[#allocation2 + $0x48] sm:$0xff] }
 0x192   : > { %2935 = vmatmul.mubr.f32.vlgmr.msra.gmra.mrb[0].mxu1 %v1572_v6  ;;  %3174 = vmatprep.mubr.f32.mxu0 %v13008_v33  ;;  %v13036_v6 = vld [vmem:[#allocation2 + $0x50] sm:$0xff] }
 0x193   : > { %2939 = vmatprep.mubr.f32.mxu1 %v1669_v12  ;;  %10728 = vmatpush3.bf16.msra.mxu0 %v10725_v3  ;;  %v2415_v12 = vld [vmem:[%s16586_s2 + $0x458] sm:$0xff]  ;;  %v13029_v3 = vld [vmem:[#allocation2 + $0x29] sm:$0xff] }
 0x194   : > { %10730 = vmatprep.subr.bf16.mxu0 %v10729_v10  ;;  %11213 = vmatpush1.bf16.msra.mxu1 %v12188_v36  ;;  %v13031_v36 = vld [vmem:[#allocation2 + $0x31] sm:$0xff]  ;;  %v10737_v38 = vpack.c.bf16 %v2415_v12, %v2414_v9 }
 0x195   : > { %3175 = vmatmul.mubr.f32.gmra.mrb[102].mxu0 %v1735_v16  ;;  %11198 = vmatprep.subr.bf16.mxu1 %v16835_v1  ;;  %v1671_v34 = vmul.f32 %v12445_v58, %v13031_v36  ;;  %v2416_v16 = vld [vmem:[%s16586_s2 + $0x460] sm:$0xff]  ;;  %v1834_v9 = vld [vmem:[#allocation2 + $0x58] sm:$0xff]  ;;  %v2418_v12 = vld [vmem:[%s16586_s2 + $0x470] sm:$0xff] }
 0x196   : > { %2940 = vmatmul.mubr.f32.gmra.mrb[2].mxu1 %v1573_v21  ;;  %3179 = vmatprep.mubr.f32.mxu0 %v13019_v18  ;;  %v1738_v21 = vld [vmem:[#allocation2 + $0x57] sm:$0xff] }
 0x197   : > { %2944 = vmatprep.mubr.f32.mxu1 %v13029_v3  ;;  %10732 = vmatpush3.bf16.msra.mxu0 %v10729_v10  ;;  %v2417_v10 = vld [vmem:[%s16586_s2 + $0x468] sm:$0xff] }
 0x198   : > { %11214 = vmatpush1.bf16.msra.mxu1 %v12206_v42  ;;  %10734 = vmatprep.subr.bf16.mxu0 %v10733_v55  ;;  %v1737_v42 = vld [vmem:[#allocation2 + $0x4f] sm:$0xff]  ;;  %v10741_v4 = vpack.c.bf16 %v2417_v10, %v2416_v16  ;;  %v1835_v16 = vld [vmem:[#allocation2 + $0x60] sm:$0xff] }
 0x199   : > { %3180 = vmatmul.mubr.f32.gmra.mrb[104].mxu0 %v1768_v37  ;;  %11199 = vmatprep.subr.bf16.mxu1 %v16835_v1  ;;  %v1770_v37 = vmul.f32 %v12459_v32, %v1738_v21  ;;  %v13074_v21 = vld [vmem:[#allocation2 + $0x51] sm:$0xff] }
 0x19a   : > { %2945 = vmatmul.mubr.f32.gmra.mrb[4].mxu1 %v12963_v52  ;;  %3184 = vmatprep.mubr.f32.mxu0 %v13036_v6  ;;  %v2419_v52 = vld [vmem:[%s16586_s2 + $0x478] sm:$0xff] }
 0x19b   : > { %2949 = vmatprep.mubr.f32.mxu1 %v1671_v34  ;;  %10736 = vmatpush3.bf16.msra.mxu0 %v10733_v55  ;;  %v13058_v55 = vld [vmem:[#allocation2 + $0x39] sm:$0xff]  ;;  %v10745_v34 = vpack.c.bf16 %v2419_v52, %v2418_v12 }
 0x19c   : > { %11215 = vmatpush1.bf16.msra.mxu1 %v12216_v45  ;;  %10738 = vmatprep.subr.bf16.mxu0 %v10737_v38  ;;  %v13060_v45 = vld [vmem:[#allocation2 + $0x41] sm:$0xff]  ;;  %v1742_v12 = vld [vmem:[#allocation2 + $0x77] sm:$0xff] }
 0x19d   : > { %3185 = vmatmul.mubr.f32.gmra.mrb[106].mxu0 %v1737_v42  ;;  %11200 = vmatprep.subr.bf16.mxu1 %v16835_v1  ;;  %v1673_v10 = vmul.f32 %v12500_v0, %v13060_v45  ;;  %v1740_v42 = vld [vmem:[#allocation2 + $0x67] sm:$0xff]  ;;  %v1838_v52 = vld [vmem:[#allocation2 + $0x78] sm:$0xff] }
 0x19e   : > { %2950 = vmatmul.mubr.f32.gmra.mrb[6].mxu1 %v12992_v50  ;;  %3189 = vmatprep.mubr.f32.mxu0 %v1834_v9  ;;  %v1739_v50 = vld [vmem:[#allocation2 + $0x5f] sm:$0xff] }
 0x19f   : > { %2954 = vmatprep.mubr.f32.mxu1 %v13058_v55  ;;  %10740 = vmatpush3.bf16.msra.mxu0 %v10737_v38  ;;  %v13072_v38 = vld [vmem:[#allocation2 + $0x49] sm:$0xff] }
 0x1a0   : > { %11216 = vmatpush1.bf16.msra.mxu1 %v12226_v48  ;;  %10742 = vmatprep.subr.bf16.mxu0 %v10741_v4  ;;  %v1836_v48 = vld [vmem:[#allocation2 + $0x68] sm:$0xff] }
 0x1a1   : > { %3190 = vmatmul.mubr.f32.gmra.mrb[108].mxu0 %v1770_v37  ;;  %11201 = vmatprep.subr.bf16.mxu1 %v16835_v1  ;;  %v13089_v37 = vld [vmem:[#allocation2 + $0x61] sm:$0xff] }
 0x1a2   : > { %2955 = vmatmul.mubr.f32.gmra.mrb[8].mxu1 %v12998_v31  ;;  %3194 = vmatprep.mubr.f32.mxu0 %v1835_v16  ;;  %v1772_v31 = vmul.f32 %v12522_v43, %v1740_v42  ;;  %v16894_v42 = vld [vmem:[#allocation27_spill] sm:$0xff] }
 0x1a3   : > { %2959 = vmatprep.mubr.f32.mxu1 %v1673_v10  ;;  %10744 = vmatpush3.bf16.msra.mxu0 %v10741_v4  ;;  %v1675_v4 = vmul.f32 %v12563_v29, %v13074_v21  ;;  %v1679_v10 = vmul.f32 %v12673_v23, %v12727_v40  ;;  %v16889_v40 = vld [vmem:[#allocation21_spill] sm:$0xff] }
 0x1a4   : > { %11217 = vmatpush1.bf16.msra.mxu1 %v12236_v51  ;;  %10746 = vmatprep.subr.bf16.mxu0 %v10745_v34  ;;  %v1837_v51 = vld [vmem:[#allocation2 + $0x70] sm:$0xff] }
 0x1a5   : > { %3195 = vmatmul.mubr.f32.gmra.mrb[110].mxu0 %v1739_v50  ;;  %11202 = vmatprep.subr.bf16.mxu1 %v16835_v1  ;;  %v1845_v50 = vld [vmem:[#allocation2 + $0xb0] sm:$0xff] }
 0x1a6   : > { %2960 = vmatmul.mubr.f32.gmra.mrb[10].mxu1 %v13008_v33  ;;  %3199 = vmatprep.mubr.f32.mxu0 %v1836_v48  ;;  %v1741_v33 = vld [vmem:[#allocation2 + $0x6f] sm:$0xff] }
 0x1a7   : > { %2964 = vmatprep.mubr.f32.mxu1 %v13072_v38  ;;  %10748 = vmatpush3.bf16.msra.mxu0 %v10745_v34  ;;  %v1839_v34 = vld [vmem:[#allocation2 + $0x80] sm:$0xff] }
 0x1a8   : > { %11218 = vmatpush1.bf16.msra.mxu1 %v12246_v54  ;;  %10749 = vmatprep.subr.bf16.mxu0 %v16835_v1  ;;  %v13087_v54 = vld [vmem:[#allocation2 + $0x59] sm:$0xff] }
 0x1a9   : > { %3200 = vmatmul.mubr.f32.gmra.mrb[112].mxu0 %v1772_v31  ;;  %11203 = vmatprep.subr.bf16.mxu1 %v16835_v1 }
 0x1aa   : > { %2965 = vmatmul.mubr.f32.gmra.mrb[12].mxu1 %v13019_v18  ;;  %3204 = vmatprep.mubr.f32.mxu0 %v1837_v51  ;;  %v1774_v18 = vmul.f32 %v12577_v61, %v1742_v12  ;;  %v16899_v12 = vld [vmem:[#allocation11_spill] sm:$0xff] }
 0x1ab   : > { %2969 = vmatprep.mubr.f32.mxu1 %v1675_v4  ;;  %v16898_v4 = vld [vmem:[#allocation24_spill] sm:$0xff] }
 0x1ac   : > { %11219 = vmatpush1.bf16.msra.mxu1 %v12256_v57  ;;  %v1677_v57 = vmul.f32 %v12618_v56, %v13089_v37 }
 0x1ad   : > { %3205 = vmatmul.mubr.f32.gmra.mrb[114].mxu0 %v1741_v33  ;;  %11204 = vmatprep.subr.bf16.mxu1 %v16835_v1  ;;  %v1782_v33 = vmul.f32 %v16898_v4, %v12838_v17  ;;  %v1925_v17 = vmul.f32 %v12401_v11, %v13031_v36 }
 0x1ae   : > { %2970 = vmatmul.mubr.f32.gmra.mrb[14].mxu1 %v13036_v6  ;;  %3209 = vmatprep.mubr.f32.mxu0 %v1838_v52  ;;  %v1840_v6 = vld [vmem:[#allocation2 + $0x88] sm:$0xff] }
 0x1af   : > { %2974 = vmatprep.mubr.f32.mxu1 %v13087_v54 }
 0x1b0   : > { %11220 = vmatpush1.bf16.msra.mxu1 %v12266_v60  ;;  %v1776_v60 = vmul.f32 %v12632_v22, %v12735_v8  ;;  %v1681_v8 = vmul.f32 %v16889_v40, %v12770_v35  ;;  %v16893_v35 = vld [vmem:[#allocation9_spill] sm:$0xff] }
 0x1b1   : > { %3210 = vmatmul.mubr.f32.gmra.mrb[116].mxu0 %v1774_v18  ;;  %11205 = vmatprep.subr.bf16.mxu1 %v16835_v1  ;;  %v16900_v18 = vld [vmem:[#allocation31_spill] sm:$0xff] }
 0x1b2   : > { %2975 = vmatmul.mubr.f32.gmra.mrb[16].mxu1 %v1834_v9  ;;  %3214 = vmatprep.mubr.f32.mxu0 %v1839_v34  ;;  %v1841_v9 = vld [vmem:[#allocation2 + $0x90] sm:$0xff] }
 0x1b3   : > { %2979 = vmatprep.mubr.f32.mxu1 %v1677_v57 }
 0x1b4   : > { %11221 = vmatpush1.bf16.msra.mxu1 %v12276_v63  ;;  %v1842_v63 = vld [vmem:[#allocation2 + $0x98] sm:$0xff] }
 0x1b5   : > { %3215 = vmatmul.mubr.f32.gmra.mrb[118].mxu0 %v12733_v44  ;;  %11206 = vmatprep.subr.bf16.mxu1 %v16835_v1  ;;  %v16888_v44 = vld [vmem:[#allocation7_spill] sm:$0xff] }
 0x1b6   : > { %2980 = vmatmul.mubr.f32.gmra.mrb[18].mxu1 %v1835_v16  ;;  %3219 = vmatprep.mubr.f32.mxu0 %v1840_v6 }
 0x1b7   : > { %2984 = vmatprep.mubr.f32.mxu1 %v12720_v5  ;;  %v1843_v5 = vld [vmem:[#allocation2 + $0xa0] sm:$0xff] }
 0x1b8   : > { %11222 = vmatpush1.bf16.msra.mxu1 %v12286_v2  ;;  %v1778_v2 = vmul.f32 %v12687_v41, %v12778_v19  ;;  %v16892_v19 = vld [vmem:[#allocation22_spill] sm:$0xff] }
 0x1b9   : > { %3220 = vmatmul.mubr.f32.gmra.mrb[120].mxu0 %v1776_v60  ;;  %11207 = vmatprep.subr.bf16.mxu1 %v16835_v1  ;;  %v1780_v16 = vmul.f32 %v16892_v19, %v12809_v59  ;;  %v16897_v59 = vld [vmem:[#allocation29_spill] sm:$0xff]  ;;  %v16904_v60 = vld [vmem:[#allocation30_spill] sm:$0xff] }
 0x1ba   : > { %2985 = vmatmul.mubr.f32.gmra.mrb[20].mxu1 %v1836_v48  ;;  %3224 = vmatprep.mubr.f32.mxu0 %v1841_v9  ;;  %v16895_v48 = vld [vmem:[#allocation23_spill] sm:$0xff] }
 0x1bb   : > { %2989 = vmatprep.mubr.f32.mxu1 %v1679_v10  ;;  %v1683_v31 = vmul.f32 %v16895_v48, %v16894_v42  ;;  %v1927_v10 = vmul.f32 %v12445_v58, %v13060_v45  ;;  %v13169_v42 = vld [vmem:[#allocation2 + $0xd0] sm:$0xff] }
 0x1bc   : > { %11223 = vmatpush1.bf16.msra.mxu1 %v12296_v7  ;;  %v16890_v7 = vld [vmem:[#allocation8_spill] sm:$0xff] }
 0x1bd   : > { %3225 = vmatmul.mubr.f32.gmra.mrb[122].mxu0 %v12776_v20  ;;  %11208 = vmatprep.subr.bf16.mxu1 %v16835_v1  ;;  %v16891_v20 = vld [vmem:[#allocation25_spill] sm:$0xff] }
 0x1be   : > { %2990 = vmatmul.mubr.f32.gmra.mrb[22].mxu1 %v1837_v51  ;;  %3229 = vmatprep.mubr.f32.mxu0 %v1842_v63  ;;  %v1846_v51 = vld [vmem:[#allocation2 + $0xb8] sm:$0xff] }
 0x1bf   : > { %2994 = vmatprep.mubr.f32.mxu1 %v12765_v13  ;;  %v1844_v13 = vld [vmem:[#allocation2 + $0xa8] sm:$0xff] }
 0x1c0   : > { %11224 = vmatpush1.bf16.msra.mxu1 %v16888_v44 }
 0x1c1   : > { %3230 = vmatmul.mubr.f32.gmra.mrb[124].mxu0 %v1778_v2  ;;  %11209 = vmatprep.subr.bf16.mxu1 %v16835_v1  ;;  %v1900_v2 = vld [vmem:[#allocation2 + $0x69] sm:$0xff] }
 0x1c2   : > { %2995 = vmatmul.mubr.f32.gmra.mrb[24].mxu1 %v1838_v52  ;;  %3234 = vmatprep.mubr.f32.mxu0 %v1843_v5  ;;  %v1847_v52 = vld [vmem:[#allocation2 + $0xc0] sm:$0xff] }
 0x1c3   : > { %2999 = vmatprep.mubr.f32.mxu1 %v1681_v8  ;;  %v13161_v8 = vld [vmem:[#allocation2 + $0xc8] sm:$0xff] }
 0x1c4   : > { %11225 = vmatpush1.bf16.msra.mxu1 %v16890_v7  ;;  %v16906_v7 = vld [vmem:[#allocation39_spill] sm:$0xff] }
 0x1c5   : > { %3235 = vmatmul.mubr.f32.gmra.mrb[126].mxu0 %v12807_v62  ;;  %11210 = vmatprep.subr.bf16.mxu1 %v16835_v1  ;;  %v16896_v62 = vld [vmem:[#allocation10_spill] sm:$0xff] }
 0x1c6   : > { %3000 = vmatmul.mubr.f32.gmra.mrb[26].mxu1 %v1839_v34  ;;  %3239 = vmatprep.mubr.f32.mxu0 %v1844_v13  ;;  %v16901_v34 = vld [vmem:[#allocation26_spill] sm:$0xff] }
 0x1c7   : > { %3004 = vmatprep.mubr.f32.mxu1 %v16891_v20  ;;  %v1685_v57 = vmul.f32 %v16901_v34, %v16900_v18 }
 0x1c8   : > { %11226 = vmatpush1.bf16.msra.mxu1 %v16893_v35  ;;  %v1905_v35 = vld [vmem:[#allocation2 + $0x91] sm:$0xff] }
 0x1c9   : > { %3240 = vmatmul.mubr.f32.gmra.mrb[128].mxu0 %v1780_v16  ;;  %11211 = vmatprep.subr.bf16.mxu1 %v16835_v1 }
 0x1ca   : > { %3005 = vmatmul.mubr.f32.gmra.mrb[28].mxu1 %v1840_v6  ;;  %3244 = vmatprep.mubr.f32.mxu0 %v1845_v50  ;;  %v16903_v6 = vld [vmem:[#allocation37_spill] sm:$0xff] }
 0x1cb   : > { %3009 = vmatprep.mubr.f32.mxu1 %v1683_v31  ;;  %v1904_v31 = vld [vmem:[#allocation2 + $0x89] sm:$0xff] }
 0x1cc   : > { %11227 = vmatpush1.bf16.msra.mxu1 %v16896_v62  ;;  %v9688_v62 = vld [vmem:[%s16586_s2 + $0x480] sm:$0xff] }
 0x1cd   : > { %3245 = vmatmul.mubr.f32.gmra.mrb[130].mxu0 %v12836_v49  ;;  %11212 = vmatprep.subr.bf16.mxu1 %v16835_v1  ;;  %v16902_v49 = vld [vmem:[#allocation35_spill] sm:$0xff] }
 0x1ce   : > { %3010 = vmatmul.mubr.f32.gmra.mrb[30].mxu1 %v1841_v9  ;;  %3249 = vmatprep.mubr.f32.mxu0 %v1846_v51  ;;  %v1687_v9 = vmul.f32 %v16904_v60, %v16903_v6 }
 0x1cf   : > { %3014 = vmatprep.mubr.f32.mxu1 %v16897_v59  ;;  %v1937_v59 = vmul.f32 %v16889_v40, %v1905_v35 }
 0x1d0   : > { %11228 = vmatpush1.bf16.msra.mxu1 %v16899_v12 }
 0x1d1   : > { %3250 = vmatmul.mubr.f32.gmra.mrb[132].mxu0 %v1782_v33 }
 0x1d2   : > { %3015 = vmatmul.mubr.f32.gmra.mrb[32].mxu1 %v1842_v63  ;;  %3254 = vmatprep.mubr.f32.mxu0 %v1847_v52  ;;  %v1901_v63 = vld [vmem:[#allocation2 + $0x71] sm:$0xff] }
 0x1d3   : > { %3019 = vmatprep.mubr.f32.mxu1 %v1685_v57  ;;  %v13182_v57 = vld [vmem:[#allocation2 + $0xd8] sm:$0xff] }
 0x1d5   : > { %3255 = vmatmul.mubr.f32.gmra.mrb[134].mxu0 %v12869_v39  ;;  %v1929_v39 = vmul.f32 %v12500_v0, %v13074_v21  ;;  %v1933_v21 = vmul.f32 %v12618_v56, %v1901_v63  ;;  %v1909_v63 = vld [vmem:[#allocation2 + $0xb1] sm:$0xff] }
 0x1d6   : > { %3020 = vmatmul.mubr.f32.gmra.mrb[34].mxu1 %v1843_v5  ;;  %10285 = vmatprep.mubr.f32.mxu0 %v13029_v3  ;;  %v16905_v3 = vld [vmem:[#allocation36_spill] sm:$0xff]  ;;  %v1903_v5 = vld [vmem:[#allocation2 + $0x81] sm:$0xff] }
 0x1d7   : > { %3024 = vmatprep.mubr.f32.mxu1 %v16902_v49  ;;  %v1689_v36 = vmul.f32 %v16905_v3, %v12888_v53  ;;  %v1935_v20 = vmul.f32 %v12673_v23, %v1903_v5  ;;  %v1906_v49 = vld [vmem:[#allocation2 + $0x99] sm:$0xff] }
 0x1d8   : > { %v9692_v5 = vld [vmem:[%s16586_s2 + $0x4a0] sm:$0xff] }
 0x1d9   : > { %10286 = vmatmul.mubr.f32.vlgmr.msra.gmra.mrb[136].mxu0 %v1925_v17  ;;  %v16907_v17 = vld [vmem:[#allocation41_spill] sm:$0xff] }
 0x1da   : > { %3025 = vmatmul.mubr.f32.gmra.mrb[36].mxu1 %v1844_v13  ;;  %10288 = vmatprep.mubr.f32.mxu0 %v13058_v55  ;;  %v1931_v55 = vmul.f32 %v12563_v29, %v13089_v37  ;;  %v1902_v37 = vld [vmem:[#allocation2 + $0x79] sm:$0xff]  ;;  %v1691_v13 = vmul.f32 %v16906_v7, %v12909_v25  ;;  %v1693_v6 = vmul.f32 %v16907_v17, %v12930_v28 }
 0x1db   : > { %3029 = vmatprep.mubr.f32.mxu1 %v1687_v9  ;;  %v9690_v9 = vld [vmem:[%s16586_s2 + $0x490] sm:$0xff] }
 0x1dd   : > { %10289 = vmatmul.mubr.f32.gmra.mrb[138].mxu0 %v1927_v10  ;;  %v9691_v10 = vld [vmem:[%s16586_s2 + $0x498] sm:$0xff] }
 0x1de   : > { %3030 = vmatmul.mubr.f32.gmra.mrb[38].mxu1 %v1845_v50  ;;  %10291 = vmatprep.mubr.f32.mxu0 %v13072_v38 }
 0x1df   : > { %3034 = vmatprep.mubr.f32.mxu1 %v12883_v27 }
 0x1e1   : > { %10292 = vmatmul.mubr.f32.gmra.mrb[140].mxu0 %v1929_v39 }
 0x1e2   : > { %3035 = vmatmul.mubr.f32.gmra.mrb[40].mxu1 %v1846_v51  ;;  %10294 = vmatprep.mubr.f32.mxu0 %v13087_v54  ;;  %v9689_v51 = vld [vmem:[%s16586_s2 + $0x488] sm:$0xff] }
 0x1e3   : > { %3039 = vmatprep.mubr.f32.mxu1 %v1689_v36  ;;  %v10750_v33 = vpack.c.bf16 %v9689_v51, %v9688_v62  ;;  %v10753_v36 = vpack.c.bf16 %v9691_v10, %v9690_v9  ;;  %v9694_v62 = vld [vmem:[%s16586_s2 + $0x4b0] sm:$0xff]  ;;  %v9695_v51 = vld [vmem:[%s16586_s2 + $0x4b8] sm:$0xff]  ;;  %v1945_v9 = vmul.f32 %v16905_v3, %v12909_v25 }
 0x1e4   : > { %v13155_v45 = vpop.f32.mrb[36].mxu0  ;;  %v9698_v25 = vld [vmem:[%s16586_s2 + $0x4d0] sm:$0xff] }
 0x1e5   : > { %v2498_v38 = vpop.f32.mrb[37].mxu0  ;;  %10295 = vmatmul.mubr.f32.gmra.mrb[142].mxu0 %v1931_v55 }
 0x1e6   : > { %3040 = vmatmul.mubr.f32.gmra.mrb[42].mxu1 %v1847_v52  ;;  %10297 = vmatprep.mubr.f32.mxu0 %v1900_v2  ;;  %v1907_v52 = vld [vmem:[#allocation2 + $0xa1] sm:$0xff] }
 0x1e7   : > { %3044 = vmatprep.mubr.f32.mxu1 %v12904_v15  ;;  %v1939_v39 = vmul.f32 %v16895_v48, %v1907_v52  ;;  %10751 = vmatpush1.bf16.msra.mxu0 %v10750_v33  ;;  %v13197_v2 = vld [vmem:[#allocation2 + $0xe0] sm:$0xff]  ;;  %v10759_v33 = vpack.c.bf16 %v9695_v51, %v9694_v62  ;;  %v1666_v62 = vld [vmem:[#allocation2 + $0x109] sm:$0xff] }
 0x1e8   : > { %v13159_v44 = vpop.f32.mrb[38].mxu0  ;;  %10752 = vmatprep.subr.bf16.mxu0 %v16835_v1  ;;  %v9701_v51 = vld [vmem:[%s16586_s2 + $0x4e8] sm:$0xff] }
 0x1e9   : > { %v2503_v54 = vpop.f32.mrb[39].mxu0  ;;  %10298 = vmatmul.mubr.f32.gmra.mrb[144].mxu0 %v1933_v21  ;;  %v1908_v21 = vld [vmem:[#allocation2 + $0xa9] sm:$0xff] }
 0x1ea   : > { %3045 = vmatmul.mubr.f32.gmra.mrb[44].mxu1 %v13161_v8  ;;  %10300 = vmatprep.mubr.f32.mxu0 %v1902_v37  ;;  %v9693_v54 = vld [vmem:[%s16586_s2 + $0x4a8] sm:$0xff]  ;;  %v1941_v37 = vmul.f32 %v16901_v34, %v1909_v63  ;;  %v16909_v63 = vld [vmem:[#allocation51_spill] sm:$0xff] }
 0x1eb   : > { %3049 = vmatprep.mubr.f32.mxu1 %v1691_v13  ;;  %10754 = vmatpush1.bf16.msra.mxu0 %v10753_v36  ;;  %v10756_v13 = vpack.c.bf16 %v9693_v54, %v9692_v5  ;;  %v13244_v36 = vld [vmem:[#allocation2 + $0xf8] sm:$0xff]  ;;  %v1947_v54 = vmul.f32 %v16906_v7, %v12930_v28  ;;  %v9700_v28 = vld [vmem:[%s16586_s2 + $0x4e0] sm:$0xff] }
 0x1ec   : > { %v13167_v16 = vpop.f32.mrb[40].mxu0  ;;  %10755 = vmatprep.subr.bf16.mxu0 %v16835_v1  ;;  %v9699_v5 = vld [vmem:[%s16586_s2 + $0x4d8] sm:$0xff] }
 0x1ed   : > { %v2508_v50 = vpop.f32.mrb[41].mxu0  ;;  %10301 = vmatmul.mubr.f32.gmra.mrb[146].mxu0 %v1935_v20 }
 0x1ee   : > { %3050 = vmatmul.mubr.f32.gmra.mrb[46].mxu1 %v13169_v42  ;;  %10303 = vmatprep.mubr.f32.mxu0 %v1904_v31  ;;  %v13211_v50 = vld [vmem:[#allocation2 + $0xe8] sm:$0xff]  ;;  %v1695_v31 = vmul.f32 %v12928_v24, %v12950_v14 }
 0x1ef   : > { %3054 = vmatprep.mubr.f32.mxu1 %v12925_v30  ;;  %10757 = vmatpush1.bf16.msra.mxu0 %v10756_v13 }
 0x1f0   : > { %v13180_v12 = vpop.f32.mrb[42].mxu0  ;;  %10758 = vmatprep.subr.bf16.mxu0 %v16835_v1 }
 0x1f1   : > { %v2513_v18 = vpop.f32.mrb[43].mxu0  ;;  %10304 = vmatmul.mubr.f32.gmra.mrb[148].mxu0 %v1937_v59  ;;  %v1943_v59 = vmul.f32 %v16904_v60, %v12888_v53  ;;  %v9697_v53 = vld [vmem:[%s16586_s2 + $0x4c8] sm:$0xff] }
 0x1f2   : > { %3055 = vmatmul.mubr.f32.gmra.mrb[48].mxu1 %v13182_v57  ;;  %10306 = vmatprep.mubr.f32.mxu0 %v1906_v49  ;;  %v9696_v49 = vld [vmem:[%s16586_s2 + $0x4c0] sm:$0xff] }
 0x1f3   : > { %3059 = vmatprep.mubr.f32.mxu1 %v1693_v6  ;;  %v16908_v6 = vld [vmem:[#allocation49_spill] sm:$0xff]  ;;  %10760 = vmatpush1.bf16.msra.mxu0 %v10759_v33  ;;  %v10762_v10 = vpack.c.bf16 %v9697_v53, %v9696_v49  ;;  %v10768_v33 = vpack.c.bf16 %v9701_v51, %v9700_v28  ;;  %v16911_v49 = vld [vmem:[#allocation50_spill] sm:$0xff] }
 0x1f4   : > { %v13194_v55 = vpop.f32.mrb[44].mxu0  ;;  %10761 = vmatprep.subr.bf16.mxu0 %v16835_v1  ;;  %v1922_v51 = vld [vmem:[#allocation2 + $0x119] sm:$0xff] }
 0x1f5   : > { %v2518_v38 = vpop.f32.mrb[45].mxu0  ;;  %10307 = vmatmul.mubr.f32.gmra.mrb[150].mxu0 %v1939_v39 }
 0x1f6   : > { %3060 = vmatmul.mubr.f32.gmra.mrb[50].mxu1 %v13197_v2  ;;  %10309 = vmatprep.mubr.f32.mxu0 %v1908_v21  ;;  %v16910_v38 = vld [vmem:[#allocation45_spill] sm:$0xff] }
 0x1f7   : > { %3064 = vmatprep.mubr.f32.mxu1 %v12945_v46  ;;  %v1697_v21 = vmul.f32 %v16910_v38, %v16909_v63  ;;  %10763 = vmatpush1.bf16.msra.mxu0 %v10762_v10  ;;  %v9702_v10 = vld [vmem:[%s16586_s2 + $0x4f0] sm:$0xff] }
 0x1f8   : > { %v13208_v20 = vpop.f32.mrb[46].mxu0  ;;  %10764 = vmatprep.subr.bf16.mxu0 %v16835_v1 }
 0x1f9   : > { %v2523_v35 = vpop.f32.mrb[47].mxu0  ;;  %10310 = vmatmul.mubr.f32.gmra.mrb[152].mxu0 %v1941_v37  ;;  %v10765_v37 = vpack.c.bf16 %v9699_v5, %v9698_v25 }
 0x1fa   : > { %3065 = vmatmul.mubr.f32.gmra.mrb[52].mxu1 %v13211_v50  ;;  %10312 = vmatprep.mubr.f32.mxu0 %v12883_v27  ;;  %v13228_v27 = vld [vmem:[#allocation2 + $0xf0] sm:$0xff] }
 0x1fb   : > { %3069 = vmatprep.mubr.f32.mxu1 %v1695_v31  ;;  %v1667_v31 = vld [vmem:[#allocation2 + $0x111] sm:$0xff]  ;;  %10766 = vmatpush1.bf16.msra.mxu0 %v10765_v37  ;;  %v1923_v37 = vld [vmem:[#allocation2 + $0x121] sm:$0xff] }
 0x1fc   : > { %v13225_v52 = vpop.f32.mrb[48].mxu0  ;;  %10767 = vmatprep.subr.bf16.mxu0 %v16835_v1  ;;  %v1699_v53 = vmul.f32 %v16911_v49, %v1667_v31  ;;  %v1953_v28 = vmul.f32 %v16910_v38, %v1667_v31  ;;  %v9707_v31 = vld [vmem:[%s16586_s2 + $0x518] sm:$0xff] }
 0x1fd   : > { %v2528_v18 = vpop.f32.mrb[49].mxu0  ;;  %10313 = vmatmul.mubr.f32.gmra.mrb[154].mxu0 %v1943_v59  ;;  %v1949_v59 = vmul.f32 %v16907_v17, %v12950_v14  ;;  %v9703_v14 = vld [vmem:[%s16586_s2 + $0x4f8] sm:$0xff] }
 0x1fe   : > { %3070 = vmatmul.mubr.f32.gmra.mrb[54].mxu1 %v13228_v27  ;;  %10315 = vmatprep.mubr.f32.mxu0 %v12904_v15 }
 0x1ff   : > { %3074 = vmatprep.mubr.f32.mxu1 %v16908_v6  ;;  %10769 = vmatpush1.bf16.msra.mxu0 %v10768_v33 }
 0x200   : > { %v13241_v39 = vpop.f32.mrb[50].mxu0  ;;  %10770 = vmatprep.subr.bf16.mxu0 %v16835_v1 }
 0x201   : > { %v2533_v15 = vpop.f32.mrb[51].mxu0  ;;  %10316 = vmatmul.mubr.f32.gmra.mrb[156].mxu0 %v1945_v9  ;;  %v11765_v9 = vld [vmem:[#allocation2 + $0x108] sm:$0xff] }
 0x202   : > { %3075 = vmatmul.mubr.f32.gmra.mrb[56].mxu1 %v13244_v36  ;;  %10318 = vmatprep.mubr.f32.mxu0 %v12925_v30  ;;  %v13261_v30 = vld [vmem:[#allocation2 + $0x100] sm:$0xff]  ;;  %v1951_v15 = vmul.f32 %v12928_v24, %v16909_v63  ;;  %v9705_v63 = vld [vmem:[%s16586_s2 + $0x508] sm:$0xff] }
 0x203   : > { %3079 = vmatprep.mubr.f32.mxu1 %v1697_v21  ;;  %v10771_v21 = vpack.c.bf16 %v9703_v14, %v9702_v10 }
 0x204   : > { %v13258_v13 = vpop.f32.mrb[52].mxu0 }
 0x205   : > { %v2538_v35 = vpop.f32.mrb[53].mxu0  ;;  %10319 = vmatmul.mubr.f32.gmra.mrb[158].mxu0 %v1947_v54  ;;  %v1752_v54 = vld [vmem:[#allocation2 + $0xc7] sm:$0xff] }
 0x206   : > { %3080 = vmatmul.mubr.f32.gmra.mrb[58].mxu1 %v13261_v30  ;;  %10321 = vmatprep.mubr.f32.mxu0 %v12945_v46  ;;  %v9704_v35 = vld [vmem:[%s16586_s2 + $0x500] sm:$0xff] }
 0x207   : > { %3084 = vmatprep.mubr.f32.mxu1 %v1666_v62  ;;  %10772 = vmatpush1.bf16.msra.mxu0 %v10771_v21  ;;  %v1753_v21 = vld [vmem:[#allocation2 + $0xcf] sm:$0xff] }
 0x208   : > { %v13273_v18 = vpop.f32.mrb[54].mxu0  ;;  %10773 = vmatprep.subr.bf16.mxu0 %v16835_v1 }
 0x209   : > { %v2543_v46 = vpop.f32.mrb[55].mxu0  ;;  %10322 = vmatmul.mubr.f32.gmra.mrb[160].mxu0 %v1949_v59  ;;  %v10774_v59 = vpack.c.bf16 %v9705_v63, %v9704_v35 }
 0x20a   : > { %3085 = vmatmul.mubr.f32.gmra.mrb[60].mxu1 %v11765_v9  ;;  %10324 = vmatprep.mubr.f32.mxu0 %v16908_v6  ;;  %v13289_v6 = vld [vmem:[#allocation2 + $0x110] sm:$0xff]  ;;  %v16912_v46 = vld [vmem:[#allocation28_spill] sm:$0xff]  ;;  %v1955_v9 = vmul.f32 %v16911_v49, %v1923_v37  ;;  %v9709_v37 = vld [vmem:[%s16586_s2 + $0x528] sm:$0xff] }
 0x20b   : > { %3089 = vmatprep.mubr.f32.mxu1 %v1699_v53  ;;  %10775 = vmatpush1.bf16.msra.mxu0 %v10774_v59 }
 0x20c   : > { %v13286_v25 = vpop.f32.mrb[56].mxu0  ;;  %10776 = vmatprep.subr.bf16.mxu0 %v16835_v1 }
 0x20d   : > { %v2548_v5 = vpop.f32.mrb[57].mxu0  ;;  %10325 = vmatmul.mubr.f32.gmra.mrb[162].mxu0 %v1951_v15 }
 0x20e   : > { %3090 = vmatmul.mubr.f32.gmra.mrb[62].mxu1 %v13289_v6  ;;  %10327 = vmatprep.mubr.f32.mxu0 %v1666_v62  ;;  %v1784_v62 = vmul.f32 %v16912_v46, %v1752_v54  ;;  %v1754_v5 = vld [vmem:[#allocation2 + $0xd7] sm:$0xff]  ;;  %v9708_v54 = vld [vmem:[%s16586_s2 + $0x520] sm:$0xff] }
 0x20f   : > { %3259 = vmatprep.mubr.f32.mxu1 %v13161_v8  ;;  %v9706_v8 = vld [vmem:[%s16586_s2 + $0x510] sm:$0xff]  ;;  %v10780_v35 = vpack.c.bf16 %v9709_v37, %v9708_v54  ;;  %v16914_v54 = vld [vmem:[#allocation38_spill] sm:$0xff] }
 0x210   : > { %v13300_v33 = vpop.f32.mrb[58].mxu0  ;;  %v10777_v10 = vpack.c.bf16 %v9707_v31, %v9706_v8  ;;  %v1755_v31 = vld [vmem:[#allocation2 + $0xdf] sm:$0xff] }
 0x211   : > { %v2553_v53 = vpop.f32.mrb[59].mxu0  ;;  %10328 = vmatmul.mubr.f32.gmra.mrb[164].mxu0 %v1953_v28  ;;  %v16913_v28 = vld [vmem:[#allocation33_spill] sm:$0xff] }
 0x212   : > { %3260 = vmatmul.mubr.f32.vlgmr.msra.gmra.mrb[40].mxu1 %v1784_v62  ;;  %10330 = vmatprep.mubr.f32.mxu0 %v1922_v51  ;;  %v1786_v51 = vmul.f32 %v16913_v28, %v1754_v5  ;;  %v9710_v62 = vld [vmem:[%s16586_s2 + $0x530] sm:$0xff]  ;;  %v9711_v53 = vld [vmem:[%s16586_s2 + $0x538] sm:$0xff] }
 0x213   : > { %3264 = vmatprep.mubr.f32.mxu1 %v13169_v42  ;;  %v13321_v42 = vld [vmem:[#allocation2] sm:$0xff]  ;;  %10778 = vmatpush1.bf16.msra.mxu0 %v10777_v10  ;;  %v16928_v28 = vld [vmem:[#allocation32_spill] sm:$0xff] }
 0x214   : > { %v13312_v14 = vpop.f32.mrb[60].mxu0  ;;  %10779 = vmatprep.subr.bf16.mxu0 %v16835_v1  ;;  %v1756_v10 = vld [vmem:[#allocation2 + $0xe7] sm:$0xff] }
 0x215   : > { %v2558_v15 = vpop.f32.mrb[61].mxu0  ;;  %10331 = vmatmul.mubr.f32.gmra.mrb[166].mxu0 %v1955_v9  ;;  %v1788_v37 = vmul.f32 %v16914_v54, %v1756_v10  ;;  %v1758_v10 = vld [vmem:[#allocation2 + $0xf7] sm:$0xff] }
 0x216   : > { %3265 = vmatmul.mubr.f32.gmra.mrb[42].mxu1 %v1753_v21  ;;  %4874 = vmatprep.mubr.f32.mxu0 %v13321_v42  ;;  %v9712_v15 = vld [vmem:[%s16586_s2 + $0x540] sm:$0xff]  ;;  %v9713_v21 = vld [vmem:[%s16586_s2 + $0x548] sm:$0xff] }
 0x217   : > { %3269 = vmatprep.mubr.f32.mxu1 %v13182_v57  ;;  %10781 = vmatpush1.bf16.msra.mxu0 %v10780_v35  ;;  %v10783_v57 = vpack.c.bf16 %v9711_v53, %v9710_v62  ;;  %v9816_v62 = vld [vmem:[%s16586_s2 + $0x880] sm:$0xff]  ;;  %v9817_v53 = vld [vmem:[%s16586_s2 + $0x888] sm:$0xff] }
 0x218   : > { %v13325_v63 = vpop.f32.mrb[62].mxu0  ;;  %10782 = vmatprep.subr.bf16.mxu0 %v16835_v1 }
 0x219   : > { %v2563_v59 = vpop.f32.mrb[63].mxu0 }
 0x21a   : > { %3270 = vmatmul.mubr.f32.gmra.mrb[44].mxu1 %v1786_v51  ;;  %v9714_v51 = vld [vmem:[%s16586_s2 + $0x550] sm:$0xff]  ;;  %v9715_v59 = vld [vmem:[%s16586_s2 + $0x558] sm:$0xff] }
 0x21b   : > { %3274 = vmatprep.mubr.f32.mxu1 %v13197_v2  ;;  %10784 = vmatpush1.bf16.msra.mxu0 %v10783_v57  ;;  %v10786_v2 = vpack.c.bf16 %v9713_v21, %v9712_v15  ;;  %v10789_v57 = vpack.c.bf16 %v9715_v59, %v9714_v51  ;;  %v10941_v15 = vpack.c.bf16 %v9817_v53, %v9816_v62  ;;  %v9717_v21 = vld [vmem:[%s16586_s2 + $0x568] sm:$0xff]  ;;  %v9818_v51 = vld [vmem:[%s16586_s2 + $0x890] sm:$0xff]  ;;  %v9819_v59 = vld [vmem:[%s16586_s2 + $0x898] sm:$0xff] }
 0x21c   : > { %v13336_v9 = vpop.f32.mrb[64].mxu0  ;;  %10785 = vmatprep.subr.bf16.mxu0 %v16835_v1 }
 0x21d   : > { %v2568_v8 = vpop.f32.mrb[65].mxu0  ;;  %10942 = vmatprep.subr.bf16.mxu1 %v10941_v15 }
 0x21e   : > { %3275 = vmatmul.mubr.f32.gmra.mrb[46].mxu1 %v1755_v31  ;;  %v1757_v31 = vld [vmem:[#allocation2 + $0xef] sm:$0xff] }
 0x21f   : > { %3279 = vmatprep.mubr.f32.mxu1 %v13211_v50  ;;  %10787 = vmatpush1.bf16.msra.mxu0 %v10786_v2 }
 0x220   : > { %v13346_v5 = vpop.f32.mrb[66].mxu0  ;;  %10788 = vmatprep.subr.bf16.mxu0 %v16835_v1  ;;  %10944 = vmatpush3.bf16.msra.mxu1 %v10941_v15  ;;  %v9821_v15 = vld [vmem:[%s16586_s2 + $0x8a8] sm:$0xff] }
 0x221   : > { %v2573_v35 = vpop.f32.mrb[67].mxu0 }
 0x222   : > { %3280 = vmatmul.mubr.f32.gmra.mrb[48].mxu1 %v1788_v37  ;;  %v16915_v37 = vld [vmem:[#allocation40_spill] sm:$0xff] }
 0x223   : > { %3284 = vmatprep.mubr.f32.mxu1 %v13228_v27  ;;  %v9716_v27 = vld [vmem:[%s16586_s2 + $0x560] sm:$0xff]  ;;  %v1790_v35 = vmul.f32 %v16915_v37, %v1758_v10  ;;  %10790 = vmatpush1.bf16.msra.mxu0 %v10789_v57  ;;  %v9719_v57 = vld [vmem:[%s16586_s2 + $0x578] sm:$0xff] }
 0x224   : > { %v13357_v50 = vpop.f32.mrb[68].mxu0  ;;  %v10792_v62 = vpack.c.bf16 %v9717_v21, %v9716_v27  ;;  %10791 = vmatprep.subr.bf16.mxu0 %v16835_v1  ;;  %v9820_v10 = vld [vmem:[%s16586_s2 + $0x8a0] sm:$0xff] }
 0x225   : > { %v2578_v8 = vpop.f32.mrb[69].mxu0 }
 0x226   : > { %3285 = vmatmul.mubr.f32.gmra.mrb[50].mxu1 %v1757_v31  ;;  %v10945_v8 = vpack.c.bf16 %v9819_v59, %v9818_v51  ;;  %v3609_v51 = vld [vmem:[#allocation3 + $0x7] sm:$0xff]  ;;  %v1856_v59 = vld [vmem:[#allocation2 + $0x108] sm:$0xff] }
 0x227   : > { %3289 = vmatprep.mubr.f32.mxu1 %v13244_v36  ;;  %v9718_v36 = vld [vmem:[%s16586_s2 + $0x570] sm:$0xff]  ;;  %10793 = vmatpush1.bf16.msra.mxu0 %v10792_v62 }
 0x228   : > { %v13373_v2 = vpop.f32.mrb[70].mxu0  ;;  %10946 = vmatprep.subr.bf16.mxu1 %v10945_v8  ;;  %v10795_v27 = vpack.c.bf16 %v9719_v57, %v9718_v36  ;;  %10794 = vmatprep.subr.bf16.mxu0 %v16835_v1  ;;  %v9822_v36 = vld [vmem:[%s16586_s2 + $0x8b0] sm:$0xff]  ;;  %v9823_v57 = vld [vmem:[%s16586_s2 + $0x8b8] sm:$0xff] }
 0x229   : > { %v2583_v53 = vpop.f32.mrb[71].mxu0  ;;  %10948 = vmatpush3.bf16.msra.mxu1 %v10945_v8  ;;  %v16918_v8 = vld [vmem:[#allocation42_spill] sm:$0xff] }
 0x22a   : > { %3290 = vmatmul.mubr.f32.gmra.mrb[52].mxu1 %v1790_v35  ;;  %v10949_v35 = vpack.c.bf16 %v9821_v15, %v9820_v10  ;;  %v16917_v53 = vld [vmem:[#allocation47_spill] sm:$0xff]  ;;  %v16919_v10 = vld [vmem:[#allocation6_spill] sm:$0xff] }
 0x22b   : > { %3294 = vmatprep.mubr.f32.mxu1 %v13261_v30  ;;  %v16916_v30 = vld [vmem:[#allocation46_spill] sm:$0xff]  ;;  %v1792_v49 = vmul.f32 %v16918_v8, %v16917_v53  ;;  %10796 = vmatpush1.bf16.msra.mxu0 %v10795_v27  ;;  %v3641_v15 = vmul.f32 %v16919_v10, %v3609_v51  ;;  %v9824_v27 = vld [vmem:[%s16586_s2 + $0x8c0] sm:$0xff]  ;;  %v1762_v53 = vld [vmem:[#allocation2 + $0x117] sm:$0xff] }
 0x22c   : > { %v13390_v31 = vpop.f32.mrb[72].mxu0  ;;  %10950 = vmatprep.subr.bf16.mxu1 %v10949_v35  ;;  %10797 = vmatprep.subr.bf16.mxu0 %v16835_v1  ;;  %v9825_v51 = vld [vmem:[%s16586_s2 + $0x8c8] sm:$0xff] }
 0x22d   : > { %v2588_v21 = vpop.f32.mrb[73].mxu0  ;;  %10952 = vmatpush3.bf16.msra.mxu1 %v10949_v35 }
 0x22e   : > { %3295 = vmatmul.mubr.f32.gmra.mrb[54].mxu1 %v16916_v30  ;;  %v10953_v30 = vpack.c.bf16 %v9823_v57, %v9822_v36  ;;  %4875 = vmatmul.mubr.f32.vlgmr.msra.gmra.mrb[168].mxu0 %v3641_v15  ;;  %v10957_v36 = vpack.c.bf16 %v9825_v51, %v9824_v27  ;;  %v16921_v15 = vld [vmem:[#allocation44_spill] sm:$0xff] }
 0x22f   : > { %3299 = vmatprep.mubr.f32.mxu1 %v1856_v59  ;;  %4879 = vmatprep.mubr.f32.mxu0 %v13321_v42  ;;  %v9827_v27 = vld [vmem:[%s16586_s2 + $0x8d8] sm:$0xff] }
 0x230   : > { %v13400_v62 = vpop.f32.mrb[74].mxu0  ;;  %10954 = vmatprep.subr.bf16.mxu1 %v10953_v30 }
 0x231   : > { %v2593_v21 = vpop.f32.mrb[75].mxu0  ;;  %10956 = vmatpush3.bf16.msra.mxu1 %v10953_v30  ;;  %v9826_v30 = vld [vmem:[%s16586_s2 + $0x8d0] sm:$0xff] }
 0x232   : > { %3300 = vmatmul.mubr.f32.gmra.mrb[56].mxu1 %v1792_v49  ;;  %v3610_v49 = vld [vmem:[#allocation3 + $0xf] sm:$0xff]  ;;  %10958 = vmatprep.subr.bf16.mxu1 %v10957_v36  ;;  %v1794_v21 = vmul.f32 %v16921_v15, %v1762_v53  ;;  %v10961_v53 = vpack.c.bf16 %v9827_v27, %v9826_v30  ;;  %v9829_v15 = vld [vmem:[%s16586_s2 + $0x8e8] sm:$0xff]  ;;  %v9830_v30 = vld [vmem:[%s16586_s2 + $0x8f0] sm:$0xff] }
 0x233   : > { %3304 = vmatprep.mubr.f32.mxu1 %v13289_v6  ;;  %v16920_v6 = vld [vmem:[#allocation48_spill] sm:$0xff]  ;;  %4880 = vmatmul.mubr.f32.gmra.mrb[170].mxu0 %v3610_v49 }
 0x234   : > { %v13413_v35 = vpop.f32.mrb[76].mxu0  ;;  %v1763_v49 = vld [vmem:[#allocation2 + $0x11f] sm:$0xff] }
 0x235   : > { %v2598_v59 = vpop.f32.mrb[77].mxu0  ;;  %10960 = vmatpush3.bf16.msra.mxu1 %v10957_v36  ;;  %v9831_v27 = vld [vmem:[%s16586_s2 + $0x8f8] sm:$0xff] }
 0x236   : > { %3305 = vmatmul.mubr.f32.gmra.mrb[58].mxu1 %v16920_v6  ;;  %v9720_v59 = vld [vmem:[%s16586_s2 + $0x580] sm:$0xff]  ;;  %v9721_v6 = vld [vmem:[%s16586_s2 + $0x588] sm:$0xff]  ;;  %10962 = vmatprep.subr.bf16.mxu1 %v10961_v53 }
 0x237   : > { %3309 = vmatprep.mubr.f32.mxu1 %v13321_v42  ;;  %v10798_v36 = vpack.c.bf16 %v9721_v6, %v9720_v59  ;;  %v10969_v6 = vpack.c.bf16 %v9831_v27, %v9830_v30  ;;  %v9725_v30 = vld [vmem:[%s16586_s2 + $0x5a8] sm:$0xff] }
 0x238   : > { %v13424_v57 = vpop.f32.mrb[78].mxu0 }
 0x239   : > { %v2603_v51 = vpop.f32.mrb[79].mxu0  ;;  %10799 = vmatpush1.bf16.msra.mxu0 %v10798_v36  ;;  %10964 = vmatpush3.bf16.msra.mxu1 %v10961_v53 }
 0x23a   : > { %3310 = vmatmul.mubr.f32.gmra.mrb[60].mxu1 %v1794_v21  ;;  %v9828_v51 = vld [vmem:[%s16586_s2 + $0x8e0] sm:$0xff]  ;;  %10800 = vmatprep.subr.bf16.mxu0 %v16835_v1 }
 0x23b   : > { %3314 = vmatprep.mubr.f32.mxu1 %v13321_v42  ;;  %v10965_v21 = vpack.c.bf16 %v9829_v15, %v9828_v51  ;;  %v9723_v15 = vld [vmem:[%s16586_s2 + $0x598] sm:$0xff] }
 0x23c   : > { %v13440_v10 = vpop.f32.mrb[80].mxu0 }
 0x23d   : > { %v2608_v8 = vpop.f32.mrb[81].mxu0  ;;  %10966 = vmatprep.subr.bf16.mxu1 %v10965_v21 }
 0x23e   : > { %3315 = vmatmul.mubr.f32.gmra.mrb[62].mxu1 %v1763_v49  ;;  %v9722_v8 = vld [vmem:[%s16586_s2 + $0x590] sm:$0xff] }
 0x23f   : > { %10968 = vmatpush3.bf16.msra.mxu1 %v10965_v21  ;;  %v10801_v53 = vpack.c.bf16 %v9723_v15, %v9722_v8 }
 0x240   : > { %v13449_v42 = vpop.f32.mrb[82].mxu0  ;;  %10970 = vmatprep.subr.bf16.mxu1 %v10969_v6 }
 0x241   : > { %v2613_v59 = vpop.f32.mrb[83].mxu0  ;;  %10802 = vmatpush1.bf16.msra.mxu0 %v10801_v53 }
 0x242   : > { %10803 = vmatprep.subr.bf16.mxu0 %v16835_v1  ;;  %v9724_v59 = vld [vmem:[%s16586_s2 + $0x5a0] sm:$0xff] }
 0x243   : > { %10972 = vmatpush3.bf16.msra.mxu1 %v10969_v6  ;;  %v10804_v27 = vpack.c.bf16 %v9725_v30, %v9724_v59  ;;  %v9728_v30 = vld [vmem:[%s16586_s2 + $0x5c0] sm:$0xff] }
 0x244   : > { %v13463_v36 = vpop.f32.mrb[84].mxu0  ;;  %10973 = vmatprep.subr.bf16.mxu1 %v16835_v1 }
 0x245   : > { %16922 = vst [vmem:[#allocation7_spill] sm:$0xff] %v13463_v36  ;;  %v2618_v49 = vpop.f32.mrb[85].mxu0  ;;  %10805 = vmatpush1.bf16.msra.mxu0 %v10804_v27  ;;  %v9729_v27 = vld [vmem:[%s16586_s2 + $0x5c8] sm:$0xff] }
 0x246   : > { %10806 = vmatprep.subr.bf16.mxu0 %v16835_v1  ;;  %v9726_v49 = vld [vmem:[%s16586_s2 + $0x5b0] sm:$0xff] }
 0x248   : > { %v13467_v51 = vpop.f32.mrb[86].mxu0 }
 0x249   : > { %16923 = vst [vmem:[#allocation8_spill] sm:$0xff] %v13467_v51  ;;  %v2623_v21 = vpop.f32.mrb[87].mxu0 }
 0x24a   : > { %v9727_v21 = vld [vmem:[%s16586_s2 + $0x5b8] sm:$0xff] }
 0x24b   : > { %v10807_v38 = vpack.c.bf16 %v9727_v21, %v9726_v49  ;;  %v9731_v21 = vld [vmem:[%s16586_s2 + $0x5d8] sm:$0xff] }
 0x24c   : > { %v13475_v8 = vpop.f32.mrb[88].mxu0 }
 0x24d   : > { %16924 = vst [vmem:[#allocation25_spill] sm:$0xff] %v13475_v8  ;;  %v2628_v15 = vpop.f32.mrb[89].mxu0  ;;  %10808 = vmatpush1.bf16.msra.mxu0 %v10807_v38  ;;  %v9730_v38 = vld [vmem:[%s16586_s2 + $0x5d0] sm:$0xff]  ;;  %v16929_v8 = vld [vmem:[#allocation34_spill] sm:$0xff] }
 0x24e   : > { %10809 = vmatprep.subr.bf16.mxu0 %v16835_v1  ;;  %v10810_v15 = vpack.c.bf16 %v9729_v27, %v9728_v30  ;;  %v10813_v17 = vpack.c.bf16 %v9731_v21, %v9730_v38  ;;  %v9732_v27 = vld [vmem:[%s16586_s2 + $0x5e0] sm:$0xff] }
 0x250   : > { %v13478_v6 = vpop.f32.mrb[90].mxu0 }
 0x251   : > { %16925 = vst [vmem:[#allocation9_spill] sm:$0xff] %v13478_v6  ;;  %v2633_v53 = vpop.f32.mrb[91].mxu0  ;;  %10811 = vmatpush1.bf16.msra.mxu0 %v10810_v15  ;;  %v9733_v15 = vld [vmem:[%s16586_s2 + $0x5e8] sm:$0xff] }
 0x252   : > { %10812 = vmatprep.subr.bf16.mxu0 %v16835_v1  ;;  %v10816_v7 = vpack.c.bf16 %v9733_v15, %v9732_v27 }
 0x254   : > { %v13486_v24 = vpop.f32.mrb[92].mxu0 }
 0x255   : > { %16926 = vst [vmem:[#allocation27_spill] sm:$0xff] %v13486_v24  ;;  %v2638_v59 = vpop.f32.mrb[93].mxu0  ;;  %10814 = vmatpush1.bf16.msra.mxu0 %v10813_v17 }
 0x256   : > { %10815 = vmatprep.subr.bf16.mxu0 %v16835_v1 }
 0x258   : > { %v13495_v53 = vpop.f32.mrb[94].mxu0 }
 0x259   : > { %16927 = vst [vmem:[#allocation10_spill] sm:$0xff] %v13495_v53  ;;  %v2643_v37 = vpop.f32.mrb[95].mxu0  ;;  %10817 = vmatpush1.bf16.msra.mxu0 %v10816_v7 }
 0x25a   : > { %10818 = vmatprep.subr.bf16.mxu0 %v16835_v1 }
 0x25c   : > { %v3161_v49 = vpop.f32.mrb[96].mxu0 }
 0x25d   : > { %v3163_v59 = vpop.f32.mrb[97].mxu0 }
 0x260   : > { %v3166_v54 = vpop.f32.mrb[98].mxu0 }
 0x261   : > { %v3168_v30 = vpop.f32.mrb[99].mxu0 }
 0x264   : > { %v3171_v37 = vpop.f32.mrb[100].mxu0 }
 0x265   : > { %v2936_v53 = vpop.f32.mrb[0].mxu1  ;;  %v3173_v24 = vpop.f32.mrb[101].mxu0 }
 0x266   : > { %v11229_v59 = vadd.f32 %v2936_v53, %v16928_v28  ;;  %v2938_v38 = vpop.f32.mrb[1].mxu1 }
 0x268   : > { %v3176_v17 = vpop.f32.mrb[102].mxu0  ;;  %v13512_v21 = vadd.f32 %v11229_v59, %v3161_v49  ;;  %v9734_v49 = vld [vmem:[%s16586_s2 + $0x5f0] sm:$0xff] }
 0x269   : > { %v2941_v30 = vpop.f32.mrb[2].mxu1  ;;  %v3178_v6 = vpop.f32.mrb[103].mxu0 }
 0x26a   : > { %v11231_v3 = vadd.f32 %v2941_v30, %v16929_v8  ;;  %v2943_v46 = vpop.f32.mrb[3].mxu1  ;;  %v9735_v8 = vld [vmem:[%s16586_s2 + $0x5f8] sm:$0xff] }
 0x26c   : > { %v3181_v51 = vpop.f32.mrb[104].mxu0  ;;  %v13516_v36 = vadd.f32 %v11231_v3, %v3166_v54  ;;  %v10819_v3 = vpack.c.bf16 %v9735_v8, %v9734_v49 }
 0x26d   : > { %v2946_v60 = vpop.f32.mrb[4].mxu1  ;;  %v3183_v24 = vpop.f32.mrb[105].mxu0 }
 0x26e   : > { %v11233_v27 = vadd.f32 %v2946_v60, %v13155_v45  ;;  %v2948_v28 = vpop.f32.mrb[5].mxu1  ;;  %10820 = vmatpush1.bf16.msra.mxu0 %v10819_v3 }
 0x26f   : > { %10821 = vmatprep.subr.bf16.mxu0 %v16835_v1  ;;  %v9736_v28 = vld [vmem:[%s16586_s2 + $0x600] sm:$0xff] }
 0x270   : > { %v3186_v53 = vpop.f32.mrb[106].mxu0  ;;  %v13519_v7 = vadd.f32 %v11233_v27, %v3171_v37 }
 0x271   : > { %v2951_v46 = vpop.f32.mrb[6].mxu1  ;;  %v3188_v6 = vpop.f32.mrb[107].mxu0 }
 0x272   : > { %v11235_v54 = vadd.f32 %v2951_v46, %v13159_v44  ;;  %v2953_v15 = vpop.f32.mrb[7].mxu1  ;;  %v9737_v44 = vld [vmem:[%s16586_s2 + $0x608] sm:$0xff] }
 0x273   : > { %v10822_v8 = vpack.c.bf16 %v9737_v44, %v9736_v28 }
 0x274   : > { %v3191_v60 = vpop.f32.mrb[108].mxu0  ;;  %v13528_v45 = vadd.f32 %v11235_v54, %v3176_v17 }
 0x275   : > { %v2956_v37 = vpop.f32.mrb[8].mxu1  ;;  %v3193_v59 = vpop.f32.mrb[109].mxu0  ;;  %10823 = vmatpush1.bf16.msra.mxu0 %v10822_v8 }
 0x276   : > { %v11237_v38 = vadd.f32 %v2956_v37, %v13167_v16  ;;  %v2958_v30 = vpop.f32.mrb[9].mxu1  ;;  %10824 = vmatprep.subr.bf16.mxu0 %v16835_v1 }
 0x277   : > { %v9738_v30 = vld [vmem:[%s16586_s2 + $0x610] sm:$0xff] }
 0x278   : > { %v3196_v24 = vpop.f32.mrb[110].mxu0  ;;  %v13532_v27 = vadd.f32 %v11237_v38, %v3181_v51 }
 0x279   : > { %v2961_v17 = vpop.f32.mrb[10].mxu1  ;;  %v3198_v49 = vpop.f32.mrb[111].mxu0 }
 0x27a   : > { %v11239_v46 = vadd.f32 %v2961_v17, %v13180_v12  ;;  %v2963_v6 = vpop.f32.mrb[11].mxu1  ;;  %v9739_v12 = vld [vmem:[%s16586_s2 + $0x618] sm:$0xff] }
 0x27b   : > { %v10825_v44 = vpack.c.bf16 %v9739_v12, %v9738_v30 }
 0x27c   : > { %v3201_v16 = vpop.f32.mrb[112].mxu0  ;;  %v13541_v3 = vadd.f32 %v11239_v46, %v3186_v53 }
 0x27d   : > { %v2966_v51 = vpop.f32.mrb[12].mxu1  ;;  %v3203_v54 = vpop.f32.mrb[113].mxu0  ;;  %10826 = vmatpush1.bf16.msra.mxu0 %v10825_v44 }
 0x27e   : > { %v11241_v15 = vadd.f32 %v2966_v51, %v13194_v55  ;;  %v2968_v37 = vpop.f32.mrb[13].mxu1  ;;  %10827 = vmatprep.subr.bf16.mxu0 %v16835_v1 }
 0x27f   : > { %v9740_v37 = vld [vmem:[%s16586_s2 + $0x620] sm:$0xff] }
 0x280   : > { %v3206_v59 = vpop.f32.mrb[114].mxu0  ;;  %v13545_v38 = vadd.f32 %v11241_v15, %v3191_v60 }
 0x281   : > { %v2971_v53 = vpop.f32.mrb[14].mxu1  ;;  %v3208_v28 = vpop.f32.mrb[115].mxu0 }
 0x282   : > { %v11243_v17 = vadd.f32 %v2971_v53, %v13208_v20  ;;  %v2973_v49 = vpop.f32.mrb[15].mxu1  ;;  %v9741_v20 = vld [vmem:[%s16586_s2 + $0x628] sm:$0xff] }
 0x283   : > { %v10828_v12 = vpack.c.bf16 %v9741_v20, %v9740_v37 }
 0x284   : > { %v3211_v55 = vpop.f32.mrb[116].mxu0  ;;  %v13554_v8 = vadd.f32 %v11243_v17, %v3196_v24 }
 0x285   : > { %v2976_v60 = vpop.f32.mrb[16].mxu1  ;;  %v3213_v46 = vpop.f32.mrb[117].mxu0  ;;  %10829 = vmatpush1.bf16.msra.mxu0 %v10828_v12 }
 0x286   : > { %v11245_v6 = vadd.f32 %v2976_v60, %v13225_v52  ;;  %v2978_v51 = vpop.f32.mrb[17].mxu1  ;;  %10830 = vmatprep.subr.bf16.mxu0 %v16835_v1 }
 0x287   : > { %v9742_v51 = vld [vmem:[%s16586_s2 + $0x630] sm:$0xff] }
 0x288   : > { %v3216_v54 = vpop.f32.mrb[118].mxu0  ;;  %v13558_v15 = vadd.f32 %v11245_v6, %v3201_v16 }
 0x289   : > { %v2981_v24 = vpop.f32.mrb[18].mxu1  ;;  %v3218_v30 = vpop.f32.mrb[119].mxu0 }
 0x28a   : > { %v11247_v53 = vadd.f32 %v2981_v24, %v13241_v39  ;;  %v2983_v28 = vpop.f32.mrb[19].mxu1  ;;  %v9743_v39 = vld [vmem:[%s16586_s2 + $0x638] sm:$0xff] }
 0x28b   : > { %v10831_v20 = vpack.c.bf16 %v9743_v39, %v9742_v51 }
 0x28c   : > { %v3221_v52 = vpop.f32.mrb[120].mxu0  ;;  %v13567_v44 = vadd.f32 %v11247_v53, %v3206_v59 }
 0x28d   : > { %v2986_v16 = vpop.f32.mrb[20].mxu1  ;;  %v3223_v17 = vpop.f32.mrb[121].mxu0  ;;  %10832 = vmatpush1.bf16.msra.mxu0 %v10831_v20 }
 0x28e   : > { %v11249_v49 = vadd.f32 %v2986_v16, %v13258_v13  ;;  %v2988_v60 = vpop.f32.mrb[21].mxu1  ;;  %10833 = vmatprep.subr.bf16.mxu0 %v16835_v1 }
 0x28f   : > { %v9744_v60 = vld [vmem:[%s16586_s2 + $0x640] sm:$0xff] }
 0x290   : > { %v3226_v46 = vpop.f32.mrb[122].mxu0  ;;  %v13571_v6 = vadd.f32 %v11249_v49, %v3211_v55 }
 0x291   : > { %v2991_v59 = vpop.f32.mrb[22].mxu1  ;;  %v3228_v37 = vpop.f32.mrb[123].mxu0 }
 0x292   : > { %v11251_v24 = vadd.f32 %v2991_v59, %v13273_v18  ;;  %v2993_v30 = vpop.f32.mrb[23].mxu1  ;;  %v9745_v18 = vld [vmem:[%s16586_s2 + $0x648] sm:$0xff] }
 0x293   : > { %v10834_v39 = vpack.c.bf16 %v9745_v18, %v9744_v60 }
 0x294   : > { %v3231_v13 = vpop.f32.mrb[124].mxu0  ;;  %v13580_v12 = vadd.f32 %v11251_v24, %v3216_v54  ;;  %v9747_v24 = vld [vmem:[%s16586_s2 + $0x658] sm:$0xff] }
 0x295   : > { %v2996_v55 = vpop.f32.mrb[24].mxu1  ;;  %v3233_v53 = vpop.f32.mrb[125].mxu0  ;;  %10835 = vmatpush1.bf16.msra.mxu0 %v10834_v39 }
 0x296   : > { %v11253_v28 = vadd.f32 %v2996_v55, %v13286_v25  ;;  %v2998_v16 = vpop.f32.mrb[25].mxu1  ;;  %10836 = vmatprep.subr.bf16.mxu0 %v16835_v1 }
 0x298   : > { %v3236_v17 = vpop.f32.mrb[126].mxu0  ;;  %v13584_v49 = vadd.f32 %v11253_v28, %v3221_v52  ;;  %v9746_v52 = vld [vmem:[%s16586_s2 + $0x650] sm:$0xff] }
 0x299   : > { %v3001_v54 = vpop.f32.mrb[26].mxu1  ;;  %v3238_v51 = vpop.f32.mrb[127].mxu0  ;;  %v10837_v53 = vpack.c.bf16 %v9747_v24, %v9746_v52 }
 0x29a   : > { %v11255_v59 = vadd.f32 %v3001_v54, %v13300_v33  ;;  %v3003_v37 = vpop.f32.mrb[27].mxu1 }
 0x29b   : > { %10838 = vmatpush1.bf16.msra.mxu0 %v10837_v53  ;;  %v9748_v37 = vld [vmem:[%s16586_s2 + $0x660] sm:$0xff] }
 0x29c   : > { %v3241_v25 = vpop.f32.mrb[128].mxu0  ;;  %v13593_v20 = vadd.f32 %v11255_v59, %v3226_v46  ;;  %10839 = vmatprep.subr.bf16.mxu0 %v16835_v1 }
 0x29d   : > { %v3006_v30 = vpop.f32.mrb[28].mxu1  ;;  %v3243_v55 = vpop.f32.mrb[129].mxu0 }
 0x29e   : > { %v11257_v33 = vadd.f32 %v3006_v30, %v13312_v14  ;;  %v3008_v28 = vpop.f32.mrb[29].mxu1  ;;  %v9749_v14 = vld [vmem:[%s16586_s2 + $0x668] sm:$0xff] }
 0x29f   : > { %v10840_v24 = vpack.c.bf16 %v9749_v14, %v9748_v37 }
 0x2a0   : > { %v3246_v16 = vpop.f32.mrb[130].mxu0  ;;  %v13603_v46 = vadd.f32 %v11257_v33, %v3231_v13 }
 0x2a1   : > { %v3011_v60 = vpop.f32.mrb[30].mxu1  ;;  %v3248_v18 = vpop.f32.mrb[131].mxu0  ;;  %10841 = vmatpush1.bf16.msra.mxu0 %v10840_v24 }
 0x2a2   : > { %v11259_v54 = vadd.f32 %v3011_v60, %v13325_v63  ;;  %v3013_v51 = vpop.f32.mrb[31].mxu1  ;;  %10842 = vmatprep.subr.bf16.mxu0 %v16835_v1 }
 0x2a3   : > { %v9750_v51 = vld [vmem:[%s16586_s2 + $0x670] sm:$0xff] }
 0x2a4   : > { %v3251_v39 = vpop.f32.mrb[132].mxu0  ;;  %v13607_v59 = vadd.f32 %v11259_v54, %v3236_v17 }
 0x2a5   : > { %v3016_v13 = vpop.f32.mrb[32].mxu1  ;;  %v3253_v52 = vpop.f32.mrb[133].mxu0 }
 0x2a6   : > { %v11261_v30 = vadd.f32 %v3016_v13, %v13336_v9  ;;  %v3018_v55 = vpop.f32.mrb[33].mxu1  ;;  %v9751_v9 = vld [vmem:[%s16586_s2 + $0x678] sm:$0xff] }
 0x2a7   : > { %v10843_v13 = vpack.c.bf16 %v9751_v9, %v9750_v51 }
 0x2a8   : > { %v3256_v63 = vpop.f32.mrb[134].mxu0  ;;  %v13616_v53 = vadd.f32 %v11261_v30, %v3241_v25 }
 0x2a9   : > { %v3021_v17 = vpop.f32.mrb[34].mxu1  ;;  %v3258_v33 = vpop.f32.mrb[135].mxu0  ;;  %10844 = vmatpush1.bf16.msra.mxu0 %v10843_v13 }
 0x2aa   : > { %v11263_v28 = vadd.f32 %v3021_v17, %v13346_v5  ;;  %v3023_v60 = vpop.f32.mrb[35].mxu1  ;;  %10845 = vmatprep.subr.bf16.mxu0 %v16835_v1 }
 0x2ac   : > { %v10287_v18 = vpop.f32.mrb[136].mxu0  ;;  %v13620_v54 = vadd.f32 %v11263_v28, %v3246_v16 }
 0x2ad   : > { %v3392_v25 = vadd.f32 %v13516_v36, %v10287_v18  ;;  %v3026_v37 = vpop.f32.mrb[36].mxu1  ;;  %v3386_v14 = vpop.f32.mrb[137].mxu0 }
 0x2ae   : > { %v11265_v52 = vadd.f32 %v3026_v37, %v13357_v50  ;;  %v3387_v5 = vadd.f32 %v13512_v21, %v3386_v14  ;;  %v3028_v24 = vpop.f32.mrb[37].mxu1 }
 0x2af   : > { %v3546_v16 = vmax.f32 %v3392_v25, 0.0 }
 0x2b0   : > { %v3545_v30 = vmax.f32 %v3387_v5, 0.0  ;;  %v10290_v55 = vpop.f32.mrb[138].mxu0  ;;  %v13631_v17 = vadd.f32 %v11265_v52, %v3251_v39 }
 0x2b1   : > { %3578 = vst [vmem:[#allocation3 + $0x20] sm:$0xff] %v3546_v16  ;;  %v13635_v33 = vadd.f32 %v13528_v45, %v10290_v55  ;;  %v3031_v36 = vpop.f32.mrb[38].mxu1  ;;  %v3396_v28 = vpop.f32.mrb[139].mxu0 }
 0x2b2   : > { %3577 = vst [vmem:[#allocation3 + $0x18] sm:$0xff] %v3545_v30  ;;  %v11267_v50 = vadd.f32 %v3031_v36, %v13373_v2  ;;  %v3397_v21 = vadd.f32 %v13519_v7, %v3396_v28  ;;  %v3033_v60 = vpop.f32.mrb[39].mxu1  ;;  %4884 = vmatprep.mubr.f32.mxu0 %v3545_v30 }
 0x2b3   : > { %v3548_v18 = vmax.f32 %v13635_v33, 0.0 }
 0x2b4   : > { %v3547_v51 = vmax.f32 %v3397_v21, 0.0  ;;  %v10293_v39 = vpop.f32.mrb[140].mxu0  ;;  %v13640_v9 = vadd.f32 %v11267_v50, %v3256_v63 }
 0x2b5   : > { %3580 = vst [vmem:[#allocation3 + $0x30] sm:$0xff] %v3548_v18  ;;  %v13643_v25 = vadd.f32 %v13541_v3, %v10293_v39  ;;  %v3406_v45 = vpop.f32.mrb[141].mxu0 }
 0x2b6   : > { %3579 = vst [vmem:[#allocation3 + $0x28] sm:$0xff] %v3547_v51  ;;  %v13646_v37 = vadd.f32 %v13532_v27, %v3406_v45 }
 0x2b7   : > { %v3550_v2 = vmax.f32 %v13643_v25, 0.0 }
 0x2b8   : > { %v3549_v7 = vmax.f32 %v13646_v37, 0.0  ;;  %v10296_v14 = vpop.f32.mrb[142].mxu0 }
 0x2b9   : > { %3582 = vst [vmem:[#allocation3 + $0x40] sm:$0xff] %v3550_v2  ;;  %v13653_v63 = vadd.f32 %v13554_v8, %v10296_v14  ;;  %v3416_v13 = vpop.f32.mrb[143].mxu0  ;;  %v13655_v52 = vld [vmem:[#allocation3 + $0x17] sm:$0xff]  ;;  %v13678_v28 = vld [vmem:[#allocation3 + $0x1f] sm:$0xff] }
 0x2ba   : > { %3581 = vst [vmem:[#allocation3 + $0x38] sm:$0xff] %v3549_v7  ;;  %v13658_v3 = vadd.f32 %v13545_v38, %v3416_v13  ;;  %v3643_v27 = vmul.f32 %v12372_v47, %v13655_v52 }
 0x2bb   : > { %v16680_v5 = vmax.f32 %v13653_v63, 0.0 }
 0x2bc   : > { %v3551_v24 = vmax.f32 %v13658_v3, 0.0  ;;  %v10299_v30 = vpop.f32.mrb[144].mxu0  ;;  %4885 = vmatmul.mubr.f32.gmra.mrb[172].mxu0 %v3643_v27 }
 0x2bd   : > { %3584 = vst [vmem:[#allocation3 + $0x50] sm:$0xff] %v16680_v5  ;;  %v13667_v8 = vadd.f32 %v13567_v44, %v10299_v30  ;;  %v3426_v55 = vpop.f32.mrb[145].mxu0  ;;  %4889 = vmatprep.mubr.f32.mxu0 %v3546_v16  ;;  %v13669_v33 = vld [vmem:[#allocation3 + $0x29] sm:$0xff] }
 0x2be   : > { %3583 = vst [vmem:[#allocation3 + $0x48] sm:$0xff] %v3551_v24  ;;  %v13674_v38 = vadd.f32 %v13558_v15, %v3426_v55  ;;  %10365 = vmatprep.mubr.f32.mxu1 %v13669_v33  ;;  %v13680_v50 = vld [vmem:[#allocation3 + $0x27] sm:$0xff] }
 0x2bf   : > { %v16674_v36 = vmax.f32 %v13667_v8, 0.0  ;;  %v3645_v45 = vmul.f32 %v12412_v26, %v13680_v50 }
 0x2c0   : > { %v16677_v44 = vmax.f32 %v13674_v38, 0.0  ;;  %v10302_v21 = vpop.f32.mrb[146].mxu0  ;;  %4890 = vmatmul.mubr.f32.gmra.mrb[174].mxu0 %v13678_v28 }
 0x2c1   : > { %3586 = vst [vmem:[#allocation3 + $0x60] sm:$0xff] %v16674_v36  ;;  %v13687_v16 = vadd.f32 %v13580_v12, %v10302_v21  ;;  %v3436_v15 = vpop.f32.mrb[147].mxu0  ;;  %4894 = vmatprep.mubr.f32.mxu0 %v3547_v51  ;;  %v13689_v60 = vld [vmem:[#allocation3 + $0x31] sm:$0xff]  ;;  %v13702_v51 = vld [vmem:[#allocation3 + $0x39] sm:$0xff] }
 0x2c2   : > { %3585 = vst [vmem:[#allocation3 + $0x58] sm:$0xff] %v16677_v44  ;;  %v13694_v39 = vadd.f32 %v13571_v6, %v3436_v15  ;;  %v4314_v37 = vmul.f32 %v12401_v11, %v13689_v60 }
 0x2c3   : > { %v16671_v14 = vmax.f32 %v13687_v16, 0.0 }
 0x2c4   : > { %v16672_v12 = vmax.f32 %v13694_v39, 0.0  ;;  %v10305_v13 = vpop.f32.mrb[148].mxu0  ;;  %4895 = vmatmul.mubr.f32.gmra.mrb[176].mxu0 %v3645_v45  ;;  %10366 = vmatmul.mubr.f32.vlgmr.msra.gmra.mrb[64].mxu1 %v4314_v37  ;;  %v13720_v45 = vld [vmem:[#allocation3 + $0x2f] sm:$0xff] }
 0x2c5   : > { %3588 = vst [vmem:[#allocation3 + $0x70] sm:$0xff] %v16671_v14  ;;  %v13707_v6 = vadd.f32 %v13593_v20, %v10305_v13  ;;  %v3446_v27 = vpop.f32.mrb[149].mxu0  ;;  %4899 = vmatprep.mubr.f32.mxu0 %v3548_v18  ;;  %10368 = vmatprep.mubr.f32.mxu1 %v13702_v51  ;;  %v13710_v30 = vld [vmem:[#allocation3 + $0x41] sm:$0xff]  ;;  %v13722_v20 = vld [vmem:[#allocation3 + $0x37] sm:$0xff]  ;;  %v13726_v13 = vld [vmem:[#allocation3 + $0x49] sm:$0xff] }
 0x2c6   : > { %3587 = vst [vmem:[#allocation3 + $0x68] sm:$0xff] %v16672_v12  ;;  %v13715_v55 = vadd.f32 %v13584_v49, %v3446_v27  ;;  %v4316_v21 = vmul.f32 %v12445_v58, %v13710_v30 }
 0x2c7   : > { %v16673_v15 = vmax.f32 %v13707_v6, 0.0 }
 0x2c8   : > { %v16675_v18 = vmax.f32 %v13715_v55, 0.0  ;;  %v10308_v37 = vpop.f32.mrb[150].mxu0  ;;  %4900 = vmatmul.mubr.f32.gmra.mrb[178].mxu0 %v13720_v45  ;;  %10369 = vmatmul.mubr.f32.gmra.mrb[66].mxu1 %v4316_v21  ;;  %v3647_v21 = vmul.f32 %v12459_v32, %v13722_v20 }
 0x2c9   : > { %3590 = vst [vmem:[#allocation3 + $0x80] sm:$0xff] %v16673_v15  ;;  %v13731_v49 = vadd.f32 %v13607_v59, %v10308_v37  ;;  %v3456_v27 = vpop.f32.mrb[151].mxu0  ;;  %4904 = vmatprep.mubr.f32.mxu0 %v3549_v7  ;;  %10371 = vmatprep.mubr.f32.mxu1 %v13726_v13  ;;  %v13734_v14 = vld [vmem:[#allocation3 + $0x51] sm:$0xff]  ;;  %v13747_v36 = vld [vmem:[#allocation3 + $0x59] sm:$0xff] }
 0x2ca   : > { %16930 = vst [vmem:[#allocation29_spill] sm:$0xff] %v13734_v14  ;;  %3589 = vst [vmem:[#allocation3 + $0x78] sm:$0xff] %v16675_v18  ;;  %v13739_v12 = vadd.f32 %v13603_v46, %v3456_v27  ;;  %v4318_v15 = vmul.f32 %v12500_v0, %v13734_v14 }
 0x2cb   : > { %v16676_v59 = vmax.f32 %v13731_v49, 0.0  ;;  %16931 = vst [vmem:[#allocation11_spill] sm:$0xff] %v13747_v36 }
 0x2cc   : > { %v16678_v7 = vmax.f32 %v13739_v12, 0.0  ;;  %v10311_v37 = vpop.f32.mrb[152].mxu0  ;;  %4905 = vmatmul.mubr.f32.gmra.mrb[180].mxu0 %v3647_v21  ;;  %10372 = vmatmul.mubr.f32.gmra.mrb[68].mxu1 %v4318_v15 }
 0x2cd   : > { %3592 = vst [vmem:[#allocation3 + $0x90] sm:$0xff] %v16676_v59  ;;  %v13752_v46 = vadd.f32 %v13620_v54, %v10311_v37  ;;  %v3466_v27 = vpop.f32.mrb[153].mxu0  ;;  %4909 = vmatprep.mubr.f32.mxu0 %v3550_v2  ;;  %10374 = vmatprep.mubr.f32.mxu1 %v13747_v36  ;;  %v13757_v18 = vld [vmem:[#allocation3 + $0x61] sm:$0xff]  ;;  %v13773_v44 = vld [vmem:[#allocation3 + $0x69] sm:$0xff] }
 0x2ce   : > { %16932 = vst [vmem:[#allocation31_spill] sm:$0xff] %v13757_v18  ;;  %3591 = vst [vmem:[#allocation3 + $0x88] sm:$0xff] %v16678_v7  ;;  %v13762_v15 = vadd.f32 %v13616_v53, %v3466_v27  ;;  %v4320_v21 = vmul.f32 %v12563_v29, %v13757_v18  ;;  %v13767_v37 = vld [vmem:[#allocation3 + $0x3f] sm:$0xff]  ;;  %v13769_v59 = vld [vmem:[#allocation3 + $0x47] sm:$0xff] }
 0x2cf   : > { %v16679_v54 = vmax.f32 %v13752_v46, 0.0  ;;  %16933 = vst [vmem:[#allocation35_spill] sm:$0xff] %v13773_v44  ;;  %v13840_v36 = vld [vmem:[#allocation3 + $0x5f] sm:$0xff]  ;;  %v13863_v14 = vld [vmem:[#allocation3 + $0x6f] sm:$0xff] }
 0x2d0   : > { %v16681_v25 = vmax.f32 %v13762_v15, 0.0  ;;  %v10314_v2 = vpop.f32.mrb[154].mxu0  ;;  %4910 = vmatmul.mubr.f32.gmra.mrb[182].mxu0 %v13767_v37  ;;  %10375 = vmatmul.mubr.f32.gmra.mrb[70].mxu1 %v4320_v21  ;;  %16948 = vst [vmem:[#allocation53_spill] sm:$0xff] %v13863_v14 }
 0x2d1   : > { %3594 = vst [vmem:[#allocation3 + $0xa0] sm:$0xff] %v16679_v54  ;;  %v13778_v53 = vadd.f32 %v13640_v9, %v10314_v2  ;;  %v3476_v27 = vpop.f32.mrb[155].mxu0  ;;  %4914 = vmatprep.mubr.f32.mxu0 %v3551_v24  ;;  %10377 = vmatprep.mubr.f32.mxu1 %v13773_v44  ;;  %v13783_v7 = vld [vmem:[#allocation3 + $0x71] sm:$0xff]  ;;  %v3649_v54 = vmul.f32 %v12522_v43, %v13769_v59  ;;  %v13796_v5 = vld [vmem:[#allocation3 + $0x79] sm:$0xff] }
 0x2d2   : > { %16934 = vst [vmem:[#allocation37_spill] sm:$0xff] %v13783_v7  ;;  %3593 = vst [vmem:[#allocation3 + $0x98] sm:$0xff] %v16681_v25  ;;  %v13788_v21 = vadd.f32 %v13631_v17, %v3476_v27  ;;  %v4322_v9 = vmul.f32 %v12618_v56, %v13783_v7  ;;  %v16936_v27 = vmax.f32 %v13653_v63, 0.0  ;;  %v13811_v7 = vld [vmem:[#allocation3 + $0x57] sm:$0xff] }
 0x2d3   : > { %v16684_v2 = vmax.f32 %v13778_v53, 0.0  ;;  %16935 = vst [vmem:[#allocation49_spill] sm:$0xff] %v13796_v5 }
 0x2d4   : > { %v16685_v3 = vmax.f32 %v13788_v21, 0.0  ;;  %v10317_v24 = vpop.f32.mrb[156].mxu0  ;;  %4915 = vmatmul.mubr.f32.gmra.mrb[184].mxu0 %v3649_v54  ;;  %10378 = vmatmul.mubr.f32.gmra.mrb[72].mxu1 %v4322_v9  ;;  %v13809_v9 = vld [vmem:[#allocation3 + $0x4f] sm:$0xff] }
 0x2d5   : > { %3596 = vst [vmem:[#allocation3 + $0xb0] sm:$0xff] %v16684_v2  ;;  %v3486_v17 = vpop.f32.mrb[157].mxu0  ;;  %4919 = vmatprep.mubr.f32.mxu0 %v16936_v27  ;;  %10380 = vmatprep.mubr.f32.mxu1 %v13796_v5  ;;  %v13803_v25 = vld [vmem:[#allocation3 + $0x81] sm:$0xff]  ;;  %v13816_v63 = vld [vmem:[#allocation3 + $0x89] sm:$0xff]  ;;  %v16939_v2 = vmax.f32 %v13674_v38, 0.0  ;;  %v16942_v38 = vmax.f32 %v13667_v8, 0.0 }
 0x2d6   : > { %16937 = vst [vmem:[#allocation51_spill] sm:$0xff] %v13803_v25  ;;  %3595 = vst [vmem:[#allocation3 + $0xa8] sm:$0xff] %v16685_v3  ;;  %v4324_v54 = vmul.f32 %v12673_v23, %v13803_v25  ;;  %v3651_v25 = vmul.f32 %v12577_v61, %v13811_v7 }
 0x2d7   : > { %16938 = vst [vmem:[#allocation46_spill] sm:$0xff] %v13816_v63 }
 0x2d8   : > { %v13813_v44 = vpop.f32.mrb[158].mxu0  ;;  %4920 = vmatmul.mubr.f32.gmra.mrb[186].mxu0 %v13809_v9  ;;  %10381 = vmatmul.mubr.f32.gmra.mrb[74].mxu1 %v4324_v54 }
 0x2d9   : > { %v3496_v27 = vpop.f32.mrb[159].mxu0  ;;  %4924 = vmatprep.mubr.f32.mxu0 %v16939_v2  ;;  %10383 = vmatprep.mubr.f32.mxu1 %v13816_v63  ;;  %v13821_v3 = vld [vmem:[#allocation3 + $0x91] sm:$0xff]  ;;  %v13829_v54 = vld [vmem:[#allocation3 + $0x99] sm:$0xff] }
 0x2da   : > { %16940 = vst [vmem:[#allocation47_spill] sm:$0xff] %v13821_v3  ;;  %v4326_v5 = vmul.f32 %v16889_v40, %v13821_v3  ;;  %16941 = vst [vmem:[#allocation48_spill] sm:$0xff] %v13829_v54  ;;  %v13842_v3 = vld [vmem:[#allocation3 + $0x67] sm:$0xff] }
 0x2db   : > { %16944 = vst [vmem:[#allocation34_spill] sm:$0xff] %v13842_v3 }
 0x2dc   : > { %v13827_v23 = vpop.f32.mrb[160].mxu0  ;;  %4925 = vmatmul.mubr.f32.gmra.mrb[188].mxu0 %v3651_v25  ;;  %10384 = vmatmul.mubr.f32.gmra.mrb[76].mxu1 %v4326_v5 }
 0x2dd   : > { %v13831_v18 = vpop.f32.mrb[161].mxu0  ;;  %4929 = vmatprep.mubr.f32.mxu0 %v16942_v38  ;;  %10386 = vmatprep.mubr.f32.mxu1 %v13829_v54  ;;  %v13836_v2 = vld [vmem:[#allocation3 + $0xa1] sm:$0xff]  ;;  %v13847_v5 = vld [vmem:[#allocation3 + $0xa9] sm:$0xff]  ;;  %v16946_v38 = vmax.f32 %v13694_v39, 0.0  ;;  %v13865_v39 = vld [vmem:[#allocation3 + $0x77] sm:$0xff] }
 0x2de   : > { %16943 = vst [vmem:[#allocation32_spill] sm:$0xff] %v13836_v2  ;;  %v4328_v63 = vmul.f32 %v16895_v48, %v13836_v2  ;;  %16945 = vst [vmem:[#allocation52_spill] sm:$0xff] %v13847_v5  ;;  %v3653_v2 = vmul.f32 %v12632_v22, %v13842_v3  ;;  %v16949_v22 = vmax.f32 %v13715_v55, 0.0  ;;  %v16950_v55 = vmax.f32 %v13707_v6, 0.0 }
 0x2df   : > { %v16951_v6 = vmax.f32 %v13739_v12, 0.0 }
 0x2e0   : > { %v13844_v25 = vpop.f32.mrb[162].mxu0  ;;  %4930 = vmatmul.mubr.f32.gmra.mrb[190].mxu0 %v13840_v36  ;;  %10387 = vmatmul.mubr.f32.gmra.mrb[78].mxu1 %v4328_v63  ;;  %v16947_v63 = vmax.f32 %v13687_v16, 0.0 }
 0x2e1   : > { %v13849_v8 = vpop.f32.mrb[163].mxu0  ;;  %4934 = vmatprep.mubr.f32.mxu0 %v16946_v38  ;;  %10389 = vmatprep.mubr.f32.mxu1 %v13847_v5 }
 0x2e4   : > { %v13856_v54 = vpop.f32.mrb[164].mxu0  ;;  %4935 = vmatmul.mubr.f32.gmra.mrb[192].mxu0 %v3653_v2 }
 0x2e5   : > { %v3261_v48 = vpop.f32.mrb[40].mxu1  ;;  %v13858_v40 = vpop.f32.mrb[165].mxu0  ;;  %4939 = vmatprep.mubr.f32.mxu0 %v16947_v63 }
 0x2e6   : > { %v11269_v61 = vadd.f32 %v3261_v48, %v13390_v31  ;;  %v3263_v56 = vpop.f32.mrb[41].mxu1  ;;  %v3655_v31 = vmul.f32 %v12687_v41, %v13865_v39 }
 0x2e8   : > { %v13867_v38 = vadd.f32 %v11269_v61, %v3486_v17  ;;  %4940 = vmatmul.mubr.f32.gmra.mrb[194].mxu0 %v13863_v14  ;;  %v13870_v5 = vpop.f32.mrb[166].mxu0 }
 0x2e9   : > { %v3266_v2 = vpop.f32.mrb[42].mxu1  ;;  %4944 = vmatprep.mubr.f32.mxu0 %v16949_v22  ;;  %v13874_v3 = vpop.f32.mrb[167].mxu0 }
 0x2ea   : > { %v16711_v16 = vmax.f32 %v13867_v38, 0.0  ;;  %v11270_v56 = vadd.f32 %v3266_v2, %v13400_v62  ;;  %v3268_v48 = vpop.f32.mrb[43].mxu1  ;;  %v13888_v62 = vld [vmem:[#allocation3 + $0x7f] sm:$0xff]  ;;  %v13890_v2 = vld [vmem:[#allocation3 + $0x87] sm:$0xff] }
 0x2ec   : > { %3597 = vst [vmem:[#allocation3 + $0xb8] sm:$0xff] %v16711_v16  ;;  %v13882_v61 = vadd.f32 %v11270_v56, %v10317_v24  ;;  %4945 = vmatmul.mubr.f32.gmra.mrb[196].mxu0 %v3655_v31  ;;  %v3657_v31 = vmul.f32 %v16892_v19, %v13890_v2  ;;  %v13948_v16 = vld [vmem:[#allocation3 + $0x9f] sm:$0xff] }
 0x2ed   : > { %v3271_v17 = vpop.f32.mrb[44].mxu1  ;;  %4949 = vmatprep.mubr.f32.mxu0 %v16950_v55 }
 0x2ee   : > { %v16710_v22 = vmax.f32 %v13882_v61, 0.0  ;;  %v11271_v63 = vadd.f32 %v3271_v17, %v13413_v35  ;;  %v3273_v14 = vpop.f32.mrb[45].mxu1 }
 0x2f0   : > { %3598 = vst [vmem:[#allocation3 + $0xc0] sm:$0xff] %v16710_v22  ;;  %v13894_v48 = vadd.f32 %v11271_v63, %v3496_v27  ;;  %4950 = vmatmul.mubr.f32.gmra.mrb[198].mxu0 %v13888_v62  ;;  %v16953_v63 = vmax.f32 %v13731_v49, 0.0 }
 0x2f1   : > { %v3276_v24 = vpop.f32.mrb[46].mxu1  ;;  %4954 = vmatprep.mubr.f32.mxu0 %v16951_v6 }
 0x2f2   : > { %v16708_v56 = vmax.f32 %v13894_v48, 0.0  ;;  %v11272_v35 = vadd.f32 %v3276_v24, %v13424_v57  ;;  %v3278_v14 = vpop.f32.mrb[47].mxu1 }
 0x2f3   : > { %v13903_v17 = vld [vmem:[#allocation3 + $0xb1] sm:$0xff] }
 0x2f4   : > { %16952 = vst [vmem:[#allocation54_spill] sm:$0xff] %v13903_v17  ;;  %3599 = vst [vmem:[#allocation3 + $0xc8] sm:$0xff] %v16708_v56  ;;  %v13908_v27 = vadd.f32 %v11272_v35, %v13813_v44  ;;  %4955 = vmatmul.mubr.f32.gmra.mrb[200].mxu0 %v3657_v31  ;;  %v4330_v12 = vmul.f32 %v16901_v34, %v13903_v17  ;;  %v13916_v14 = vld [vmem:[#allocation3 + $0x8f] sm:$0xff]  ;;  %v13920_v44 = vld [vmem:[#allocation3 + $0x97] sm:$0xff] }
 0x2f5   : > { %v3281_v55 = vpop.f32.mrb[48].mxu1  ;;  %4959 = vmatprep.mubr.f32.mxu0 %v16953_v63  ;;  %v3659_v63 = vmul.f32 %v16898_v4, %v13920_v44  ;;  %v13980_v17 = vld [vmem:[#allocation3 + $0xaf] sm:$0xff] }
 0x2f6   : > { %v16709_v57 = vmax.f32 %v13908_v27, 0.0  ;;  %v11273_v24 = vadd.f32 %v3281_v55, %v13440_v10  ;;  %v3283_v6 = vpop.f32.mrb[49].mxu1  ;;  %10390 = vmatmul.mubr.f32.gmra.mrb[80].mxu1 %v4330_v12  ;;  %v16955_v10 = vmax.f32 %v13762_v15, 0.0  ;;  %v16957_v15 = vld [vmem:[#allocation30_spill] sm:$0xff] }
 0x2f7   : > { %v13918_v56 = vld [vmem:[#allocation3 + $0xb9] sm:$0xff] }
 0x2f8   : > { %16954 = vst [vmem:[#allocation55_spill] sm:$0xff] %v13918_v56  ;;  %3600 = vst [vmem:[#allocation3 + $0xd0] sm:$0xff] %v16709_v57  ;;  %v13925_v35 = vadd.f32 %v11273_v24, %v13831_v18  ;;  %4960 = vmatmul.mubr.f32.gmra.mrb[202].mxu0 %v13916_v14  ;;  %10392 = vmatprep.mubr.f32.mxu1 %v13918_v56  ;;  %v16958_v57 = vmax.f32 %v13752_v46, 0.0 }
 0x2f9   : > { %v3286_v49 = vpop.f32.mrb[50].mxu1  ;;  %4964 = vmatprep.mubr.f32.mxu0 %v16955_v10 }
 0x2fa   : > { %v16712_v31 = vmax.f32 %v13925_v35, 0.0  ;;  %v11274_v12 = vadd.f32 %v3286_v49, %v13449_v42  ;;  %v3288_v55 = vpop.f32.mrb[51].mxu1  ;;  %v16959_v49 = vld [vmem:[#allocation7_spill] sm:$0xff] }
 0x2fb   : > { %v13935_v6 = vld [vmem:[#allocation3 + $0xc1] sm:$0xff] }
 0x2fc   : > { %16956 = vst [vmem:[#allocation56_spill] sm:$0xff] %v13935_v6  ;;  %3601 = vst [vmem:[#allocation3 + $0xd8] sm:$0xff] %v16712_v31  ;;  %v13940_v18 = vadd.f32 %v11274_v12, %v13827_v23  ;;  %4965 = vmatmul.mubr.f32.gmra.mrb[204].mxu0 %v3659_v63  ;;  %v4332_v24 = vmul.f32 %v16957_v15, %v13935_v6  ;;  %v13952_v23 = vld [vmem:[#allocation3 + $0xa7] sm:$0xff] }
 0x2fd   : > { %v3291_v10 = vpop.f32.mrb[52].mxu1  ;;  %4969 = vmatprep.mubr.f32.mxu0 %v16958_v57  ;;  %v16962_v63 = vld [vmem:[#allocation8_spill] sm:$0xff] }
 0x2fe   : > { %v16714_v42 = vmax.f32 %v13940_v18, 0.0  ;;  %v11275_v55 = vadd.f32 %v3291_v10, %v16959_v49  ;;  %v3293_v22 = vpop.f32.mrb[53].mxu1  ;;  %10393 = vmatmul.mubr.f32.gmra.mrb[82].mxu1 %v4332_v24  ;;  %v16963_v49 = vld [vmem:[#allocation28_spill] sm:$0xff] }
 0x2ff   : > { %v13950_v31 = vld [vmem:[#allocation3 + $0xc9] sm:$0xff]  ;;  %v16961_v22 = vmax.f32 %v13788_v21, 0.0  ;;  %v3661_v6 = vmul.f32 %v16963_v49, %v13952_v23 }
 0x300   : > { %16960 = vst [vmem:[#allocation7_spill] sm:$0xff] %v13950_v31  ;;  %3602 = vst [vmem:[#allocation3 + $0xe0] sm:$0xff] %v16714_v42  ;;  %v13957_v12 = vadd.f32 %v11275_v55, %v13849_v8  ;;  %4970 = vmatmul.mubr.f32.gmra.mrb[206].mxu0 %v13948_v16  ;;  %10395 = vmatprep.mubr.f32.mxu1 %v13950_v31  ;;  %v16965_v21 = vld [vmem:[#allocation36_spill] sm:$0xff]  ;;  %v16966_v31 = vmax.f32 %v13778_v53, 0.0 }
 0x301   : > { %v3296_v46 = vpop.f32.mrb[54].mxu1  ;;  %4974 = vmatprep.mubr.f32.mxu0 %v16961_v22 }
 0x302   : > { %v16718_v57 = vmax.f32 %v13957_v12, 0.0  ;;  %v11276_v24 = vadd.f32 %v3296_v46, %v16962_v63  ;;  %v3298_v10 = vpop.f32.mrb[55].mxu1  ;;  %v16967_v63 = vld [vmem:[#allocation25_spill] sm:$0xff] }
 0x303   : > { %v13967_v42 = vld [vmem:[#allocation3 + $0xd1] sm:$0xff] }
 0x304   : > { %16964 = vst [vmem:[#allocation8_spill] sm:$0xff] %v13967_v42  ;;  %3603 = vst [vmem:[#allocation3 + $0xe8] sm:$0xff] %v16718_v57  ;;  %v13972_v8 = vadd.f32 %v11276_v24, %v13844_v25  ;;  %4975 = vmatmul.mubr.f32.gmra.mrb[208].mxu0 %v3661_v6  ;;  %v4334_v55 = vmul.f32 %v16965_v21, %v13967_v42  ;;  %v13984_v25 = vld [vmem:[#allocation3 + $0xb7] sm:$0xff] }
 0x305   : > { %v3301_v22 = vpop.f32.mrb[56].mxu1  ;;  %4979 = vmatprep.mubr.f32.mxu0 %v16966_v31  ;;  %v16970_v24 = vld [vmem:[#allocation9_spill] sm:$0xff] }
 0x306   : > { %v16720_v46 = vmax.f32 %v13972_v8, 0.0  ;;  %v11277_v10 = vadd.f32 %v3301_v22, %v16967_v63  ;;  %v3303_v56 = vpop.f32.mrb[57].mxu1  ;;  %10396 = vmatmul.mubr.f32.gmra.mrb[84].mxu1 %v4334_v55  ;;  %v16971_v63 = vld [vmem:[#allocation33_spill] sm:$0xff] }
 0x307   : > { %v13982_v57 = vld [vmem:[#allocation3 + $0xd9] sm:$0xff]  ;;  %v16969_v56 = vmax.f32 %v13867_v38, 0.0  ;;  %v3663_v42 = vmul.f32 %v16971_v63, %v13984_v25 }
 0x308   : > { %16968 = vst [vmem:[#allocation25_spill] sm:$0xff] %v13982_v57  ;;  %3604 = vst [vmem:[#allocation3 + $0xf0] sm:$0xff] %v16720_v46  ;;  %v13989_v6 = vadd.f32 %v11277_v10, %v13858_v40  ;;  %4980 = vmatmul.mubr.f32.gmra.mrb[210].mxu0 %v13980_v17  ;;  %10398 = vmatprep.mubr.f32.mxu1 %v13982_v57  ;;  %v16973_v10 = vld [vmem:[#allocation39_spill] sm:$0xff]  ;;  %v16974_v57 = vmax.f32 %v13882_v61, 0.0 }
 0x309   : > { %v3306_v53 = vpop.f32.mrb[58].mxu1  ;;  %4984 = vmatprep.mubr.f32.mxu0 %v16969_v56  ;;  %v14009_v63 = vld [vmem:[#allocation3 + $0xbf] sm:$0xff] }
 0x30a   : > { %v16722_v31 = vmax.f32 %v13989_v6, 0.0  ;;  %v11278_v55 = vadd.f32 %v3306_v53, %v16970_v24  ;;  %v3308_v22 = vpop.f32.mrb[59].mxu1  ;;  %v16975_v24 = vld [vmem:[#allocation27_spill] sm:$0xff] }
 0x30b   : > { %v13999_v46 = vld [vmem:[#allocation3 + $0xe1] sm:$0xff] }
 0x30c   : > { %16972 = vst [vmem:[#allocation9_spill] sm:$0xff] %v13999_v46  ;;  %3605 = vst [vmem:[#allocation3 + $0xf8] sm:$0xff] %v16722_v31  ;;  %v3532_v40 = vadd.f32 %v11278_v55, %v13856_v54  ;;  %4985 = vmatmul.mubr.f32.gmra.mrb[212].mxu0 %v3663_v42  ;;  %v4336_v38 = vmul.f32 %v16973_v10, %v13999_v46  ;;  %v14013_v31 = vld [vmem:[#allocation3 + $0xc7] sm:$0xff]  ;;  %v16977_v42 = vmax.f32 %v13894_v48, 0.0  ;;  %v16981_v46 = vmax.f32 %v13908_v27, 0.0 }
 0x30d   : > { %v3311_v56 = vpop.f32.mrb[60].mxu1  ;;  %4989 = vmatprep.mubr.f32.mxu0 %v16974_v57 }
 0x30e   : > { %v3574_v53 = vmax.f32 %v3532_v40, 0.0  ;;  %v11279_v22 = vadd.f32 %v3311_v56, %v16975_v24  ;;  %v3313_v21 = vpop.f32.mrb[61].mxu1  ;;  %10399 = vmatmul.mubr.f32.gmra.mrb[86].mxu1 %v4336_v38  ;;  %v16979_v38 = vld [vmem:[#allocation38_spill] sm:$0xff] }
 0x30f   : > { %v14011_v49 = vld [vmem:[#allocation3 + $0xe9] sm:$0xff]  ;;  %v16978_v21 = vld [vmem:[#allocation10_spill] sm:$0xff]  ;;  %v3665_v56 = vmul.f32 %v16979_v38, %v14013_v31 }
 0x310   : > { %16976 = vst [vmem:[#allocation27_spill] sm:$0xff] %v14011_v49  ;;  %3606 = vst [vmem:[#allocation3 + $0x100] sm:$0xff] %v3574_v53  ;;  %v3537_v54 = vadd.f32 %v11279_v22, %v13874_v3  ;;  %4990 = vmatmul.mubr.f32.gmra.mrb[214].mxu0 %v14009_v63  ;;  %10401 = vmatprep.mubr.f32.mxu1 %v14011_v49  ;;  %v16980_v22 = vld [vmem:[#allocation41_spill] sm:$0xff] }
 0x311   : > { %v3316_v61 = vpop.f32.mrb[62].mxu1  ;;  %4994 = vmatprep.mubr.f32.mxu0 %v16977_v42  ;;  %v14034_v42 = vld [vmem:[#allocation3 + $0xd7] sm:$0xff] }
 0x312   : > { %v3575_v57 = vmax.f32 %v3537_v54, 0.0  ;;  %v11280_v55 = vadd.f32 %v3316_v61, %v16978_v21  ;;  %v3318_v40 = vpop.f32.mrb[63].mxu1  ;;  %v14030_v54 = vld [vmem:[#allocation3 + $0xcf] sm:$0xff] }
 0x313   : > { %v14023_v24 = vld [vmem:[#allocation3 + $0xf1] sm:$0xff]  ;;  %v14048_v40 = vld [vmem:[#allocation3 + $0xdf] sm:$0xff] }
 0x314   : > { %3607 = vst [vmem:[#allocation3 + $0x108] sm:$0xff] %v3575_v57  ;;  %v3542_v3 = vadd.f32 %v11280_v55, %v13870_v5  ;;  %4995 = vmatmul.mubr.f32.gmra.mrb[216].mxu0 %v3665_v56  ;;  %v4338_v49 = vmul.f32 %v16980_v22, %v14023_v24  ;;  %v16983_v5 = vmax.f32 %v13925_v35, 0.0  ;;  %v16984_v57 = vld [vmem:[#allocation40_spill] sm:$0xff]  ;;  %v16987_v55 = vmax.f32 %v13940_v18, 0.0  ;;  %v16988_v35 = vld [vmem:[#allocation45_spill] sm:$0xff] }
 0x315   : > { %4999 = vmatprep.mubr.f32.mxu0 %v16981_v46  ;;  %v3667_v27 = vmul.f32 %v16984_v57, %v14034_v42 }
 0x316   : > { %v3576_v48 = vmax.f32 %v3542_v3, 0.0  ;;  %10402 = vmatmul.mubr.f32.gmra.mrb[88].mxu1 %v4338_v49  ;;  %v16986_v49 = vld [vmem:[#allocation43_spill] sm:$0xff] }
 0x317   : > { %v14032_v61 = vld [vmem:[#allocation3 + $0xf9] sm:$0xff] }
 0x318   : > { %16982 = vst [vmem:[#allocation10_spill] sm:$0xff] %v14032_v61  ;;  %3608 = vst [vmem:[#allocation3 + $0x110] sm:$0xff] %v3576_v48  ;;  %5000 = vmatmul.mubr.f32.gmra.mrb[218].mxu0 %v14030_v54  ;;  %10404 = vmatprep.mubr.f32.mxu1 %v14032_v61  ;;  %v14050_v48 = vld [vmem:[#allocation3 + $0xe7] sm:$0xff]  ;;  %v14062_v61 = vld [vmem:[#allocation3 + $0xf7] sm:$0xff] }
 0x319   : > { %5004 = vmatprep.mubr.f32.mxu0 %v16983_v5 }
 0x31b   : > { %v14042_v46 = vld [vmem:[#allocation3 + $0x101] sm:$0xff] }
 0x31c   : > { %16985 = vst [vmem:[#allocation57_spill] sm:$0xff] %v14042_v46  ;;  %5005 = vmatmul.mubr.f32.gmra.mrb[220].mxu0 %v3667_v27  ;;  %v4340_v21 = vmul.f32 %v16986_v49, %v14042_v46  ;;  %v16989_v27 = vmax.f32 %v13957_v12, 0.0  ;;  %v16990_v46 = vld [vmem:[#allocation42_spill] sm:$0xff]  ;;  %v16993_v12 = vld [vmem:[#allocation44_spill] sm:$0xff] }
 0x31d   : > { %5009 = vmatprep.mubr.f32.mxu0 %v16987_v55  ;;  %v3669_v18 = vmul.f32 %v16990_v46, %v14050_v48  ;;  %v14060_v55 = vld [vmem:[#allocation3 + $0xef] sm:$0xff] }
 0x31e   : > { %10405 = vmatmul.mubr.f32.gmra.mrb[90].mxu1 %v4340_v21  ;;  %v16991_v21 = vmax.f32 %v13972_v8, 0.0  ;;  %v9753_v8 = vld [vmem:[%s16586_s2 + $0x688] sm:$0xff] }
 0x31f   : > { %v4309_v56 = vld [vmem:[#allocation3 + $0x109] sm:$0xff]  ;;  %v4310_v3 = vld [vmem:[#allocation3 + $0x111] sm:$0xff] }
 0x320   : > { %5010 = vmatmul.mubr.f32.gmra.mrb[222].mxu0 %v14048_v40  ;;  %10407 = vmatprep.mubr.f32.mxu1 %v4309_v56  ;;  %v4342_v5 = vmul.f32 %v16988_v35, %v4310_v3  ;;  %v16992_v56 = vmax.f32 %v13989_v6, 0.0  ;;  %v3671_v3 = vmul.f32 %v16993_v12, %v14062_v61  ;;  %v3769_v6 = vld [vmem:[#allocation3 + $0x9] sm:$0xff]  ;;  %v3770_v12 = vld [vmem:[#allocation3 + $0x11] sm:$0xff] }
 0x321   : > { %5014 = vmatprep.mubr.f32.mxu0 %v16989_v27  ;;  %v14075_v27 = vld [vmem:[#allocation3 + $0xff] sm:$0xff] }
 0x322   : > { %10408 = vmatmul.mubr.f32.gmra.mrb[92].mxu1 %v4342_v5  ;;  %v9752_v5 = vld [vmem:[%s16586_s2 + $0x680] sm:$0xff] }
 0x324   : > { %5015 = vmatmul.mubr.f32.gmra.mrb[224].mxu0 %v3669_v18  ;;  %v16994_v18 = vld [vmem:[#allocation6_spill] sm:$0xff] }
 0x325   : > { %5019 = vmatprep.mubr.f32.mxu0 %v16991_v21  ;;  %v3897_v21 = vmul.f32 %v16994_v18, %v13655_v52  ;;  %v3802_v52 = vmul.f32 %v12401_v11, %v3770_v12  ;;  %v9758_v12 = vld [vmem:[%s16586_s2 + $0x6b0] sm:$0xff] }
 0x328   : > { %5020 = vmatmul.mubr.f32.gmra.mrb[226].mxu0 %v14060_v55 }
 0x329   : > { %5024 = vmatprep.mubr.f32.mxu0 %v16992_v56  ;;  %v10846_v56 = vpack.c.bf16 %v9753_v8, %v9752_v5  ;;  %v9756_v5 = vld [vmem:[%s16586_s2 + $0x6a0] sm:$0xff]  ;;  %v9757_v8 = vld [vmem:[%s16586_s2 + $0x6a8] sm:$0xff] }
 0x32c   : > { %5025 = vmatmul.mubr.f32.gmra.mrb[228].mxu0 %v3671_v3  ;;  %v9755_v3 = vld [vmem:[%s16586_s2 + $0x698] sm:$0xff] }
 0x32d   : > { %5029 = vmatprep.mubr.f32.mxu0 %v3574_v53  ;;  %v9754_v53 = vld [vmem:[%s16586_s2 + $0x690] sm:$0xff] }
 0x32e   : > { %v10849_v35 = vpack.c.bf16 %v9755_v3, %v9754_v53  ;;  %v14106_v53 = vld [vmem:[#allocation3 + $0x21] sm:$0xff]  ;;  %v9760_v3 = vld [vmem:[%s16586_s2 + $0x6c0] sm:$0xff] }
 0x330   : > { %5030 = vmatmul.mubr.f32.gmra.mrb[230].mxu0 %v14075_v27 }
 0x331   : > { %5099 = vmatprep.mubr.f32.mxu0 %v3897_v21  ;;  %v3899_v21 = vmul.f32 %v12372_v47, %v13680_v50 }
 0x334   : > { %5100 = vmatmul.mubr.f32.vlgmr.msra.gmra.mrb[168].mxu0 %v3769_v6  ;;  %v9759_v6 = vld [vmem:[%s16586_s2 + $0x6b8] sm:$0xff] }
 0x335   : > { %10847 = vmatpush1.bf16.msra.mxu0 %v10846_v56  ;;  %5104 = vmatprep.mubr.f32.mxu0 %v13678_v28  ;;  %v10852_v28 = vpack.c.bf16 %v9757_v8, %v9756_v5  ;;  %v14104_v56 = vld [vmem:[#allocation3 + $0x19] sm:$0xff]  ;;  %v10855_v50 = vpack.c.bf16 %v9759_v6, %v9758_v12  ;;  %v3901_v5 = vmul.f32 %v12412_v26, %v13722_v20  ;;  %v9764_v12 = vld [vmem:[%s16586_s2 + $0x6e0] sm:$0xff] }
 0x336   : > { %10848 = vmatprep.subr.bf16.mxu0 %v16835_v1  ;;  %v9762_v8 = vld [vmem:[%s16586_s2 + $0x6d0] sm:$0xff]  ;;  %v9765_v6 = vld [vmem:[%s16586_s2 + $0x6e8] sm:$0xff] }
 0x338   : > { %5105 = vmatmul.mubr.f32.gmra.mrb[170].mxu0 %v3802_v52  ;;  %v9761_v52 = vld [vmem:[%s16586_s2 + $0x6c8] sm:$0xff] }
 0x339   : > { %5109 = vmatprep.mubr.f32.mxu0 %v3899_v21  ;;  %10850 = vmatpush1.bf16.msra.mxu0 %v10849_v35  ;;  %v3804_v35 = vmul.f32 %v12445_v58, %v14106_v53  ;;  %v9763_v21 = vld [vmem:[%s16586_s2 + $0x6d8] sm:$0xff] }
 0x33a   : > { %10851 = vmatprep.subr.bf16.mxu0 %v16835_v1  ;;  %v10861_v20 = vpack.c.bf16 %v9763_v21, %v9762_v8  ;;  %v16996_v8 = vld [vmem:[#allocation17_spill] sm:$0xff] }
 0x33c   : > { %5110 = vmatmul.mubr.f32.gmra.mrb[172].mxu0 %v14104_v56 }
 0x33d   : > { %5114 = vmatprep.mubr.f32.mxu0 %v13720_v45  ;;  %10853 = vmatpush1.bf16.msra.mxu0 %v10852_v28  ;;  %v10858_v45 = vpack.c.bf16 %v9761_v52, %v9760_v3  ;;  %v3806_v28 = vmul.f32 %v12500_v0, %v13689_v60  ;;  %v9766_v60 = vld [vmem:[%s16586_s2 + $0x6f0] sm:$0xff]  ;;  %v9768_v3 = vld [vmem:[%s16586_s2 + $0x700] sm:$0xff]  ;;  %v9769_v52 = vld [vmem:[%s16586_s2 + $0x708] sm:$0xff] }
 0x33e   : > { %10854 = vmatprep.subr.bf16.mxu0 %v16835_v1 }
 0x340   : > { %5115 = vmatmul.mubr.f32.gmra.mrb[174].mxu0 %v3804_v35  ;;  %v3808_v35 = vmul.f32 %v12563_v29, %v13710_v30  ;;  %v9770_v30 = vld [vmem:[%s16586_s2 + $0x710] sm:$0xff] }
 0x341   : > { %5119 = vmatprep.mubr.f32.mxu0 %v3901_v5  ;;  %10856 = vmatpush1.bf16.msra.mxu0 %v10855_v50  ;;  %v9767_v50 = vld [vmem:[%s16586_s2 + $0x6f8] sm:$0xff] }
 0x342   : > { %10857 = vmatprep.subr.bf16.mxu0 %v16835_v1  ;;  %v9771_v5 = vld [vmem:[%s16586_s2 + $0x718] sm:$0xff] }
 0x344   : > { %5120 = vmatmul.mubr.f32.gmra.mrb[176].mxu0 %v13669_v33  ;;  %v3903_v33 = vmul.f32 %v12459_v32, %v13769_v59  ;;  %v10867_v59 = vpack.c.bf16 %v9767_v50, %v9766_v60  ;;  %v16999_v60 = vld [vmem:[#allocation11_spill] sm:$0xff]  ;;  %v17000_v50 = vld [vmem:[#allocation53_spill] sm:$0xff] }
 0x345   : > { %5124 = vmatprep.mubr.f32.mxu0 %v13767_v37  ;;  %10859 = vmatpush1.bf16.msra.mxu0 %v10858_v45  ;;  %v10864_v37 = vpack.c.bf16 %v9765_v6, %v9764_v12  ;;  %v16995_v45 = vld [vmem:[#allocation29_spill] sm:$0xff]  ;;  %v16997_v12 = vld [vmem:[#allocation34_spill] sm:$0xff]  ;;  %v16998_v6 = vld [vmem:[#allocation16_spill] sm:$0xff] }
 0x346   : > { %10860 = vmatprep.subr.bf16.mxu0 %v16835_v1  ;;  %v3810_v21 = vmul.f32 %v16996_v8, %v16995_v45  ;;  %v9778_v45 = vld [vmem:[%s16586_s2 + $0x750] sm:$0xff] }
 0x348   : > { %5125 = vmatmul.mubr.f32.gmra.mrb[178].mxu0 %v3806_v28  ;;  %v9773_v28 = vld [vmem:[%s16586_s2 + $0x728] sm:$0xff] }
 0x349   : > { %5129 = vmatprep.mubr.f32.mxu0 %v3903_v33  ;;  %10862 = vmatpush1.bf16.msra.mxu0 %v10861_v20  ;;  %v9772_v20 = vld [vmem:[%s16586_s2 + $0x720] sm:$0xff]  ;;  %v9774_v33 = vld [vmem:[%s16586_s2 + $0x730] sm:$0xff] }
 0x34a   : > { %10863 = vmatprep.subr.bf16.mxu0 %v16835_v1 }
 0x34c   : > { %5130 = vmatmul.mubr.f32.gmra.mrb[180].mxu0 %v13702_v51  ;;  %v3905_v51 = vmul.f32 %v12522_v43, %v13811_v7  ;;  %v10873_v7 = vpack.c.bf16 %v9771_v5, %v9770_v30  ;;  %v17003_v30 = vld [vmem:[#allocation18_spill] sm:$0xff] }
 0x34d   : > { %5134 = vmatprep.mubr.f32.mxu0 %v13809_v9  ;;  %10865 = vmatpush1.bf16.msra.mxu0 %v10864_v37  ;;  %v10870_v9 = vpack.c.bf16 %v9769_v52, %v9768_v3  ;;  %v9775_v37 = vld [vmem:[%s16586_s2 + $0x738] sm:$0xff]  ;;  %v17002_v3 = vld [vmem:[#allocation19_spill] sm:$0xff]  ;;  %v3909_v5 = vmul.f32 %v17003_v30, %v13865_v39 }
 0x34e   : > { %10866 = vmatprep.subr.bf16.mxu0 %v16835_v1 }
 0x350   : > { %5135 = vmatmul.mubr.f32.gmra.mrb[182].mxu0 %v3808_v35  ;;  %v17001_v35 = vld [vmem:[#allocation31_spill] sm:$0xff] }
 0x351   : > { %5139 = vmatprep.mubr.f32.mxu0 %v3905_v51  ;;  %10868 = vmatpush1.bf16.msra.mxu0 %v10867_v59  ;;  %v10879_v59 = vpack.c.bf16 %v9775_v37, %v9774_v33  ;;  %v3812_v52 = vmul.f32 %v17002_v3, %v17001_v35  ;;  %v9776_v51 = vld [vmem:[%s16586_s2 + $0x740] sm:$0xff]  ;;  %v9781_v33 = vld [vmem:[%s16586_s2 + $0x768] sm:$0xff]  ;;  %v3911_v37 = vmul.f32 %v12687_v41, %v13890_v2  ;;  %v17008_v35 = vld [vmem:[#allocation51_spill] sm:$0xff] }
 0x352   : > { %10869 = vmatprep.subr.bf16.mxu0 %v16835_v1 }
 0x354   : > { %5140 = vmatmul.mubr.f32.gmra.mrb[184].mxu0 %v13726_v13  ;;  %v3907_v13 = vmul.f32 %v16998_v6, %v16997_v12  ;;  %v17006_v12 = vld [vmem:[#allocation21_spill] sm:$0xff] }
 0x355   : > { %5144 = vmatprep.mubr.f32.mxu0 %v13840_v36  ;;  %10871 = vmatpush1.bf16.msra.mxu0 %v10870_v9  ;;  %v10876_v36 = vpack.c.bf16 %v9773_v28, %v9772_v20  ;;  %v9777_v9 = vld [vmem:[%s16586_s2 + $0x748] sm:$0xff]  ;;  %v17004_v20 = vld [vmem:[#allocation35_spill] sm:$0xff]  ;;  %v17005_v28 = vld [vmem:[#allocation37_spill] sm:$0xff] }
 0x356   : > { %10872 = vmatprep.subr.bf16.mxu0 %v16835_v1 }
 0x358   : > { %5145 = vmatmul.mubr.f32.gmra.mrb[186].mxu0 %v3810_v21  ;;  %v9779_v21 = vld [vmem:[%s16586_s2 + $0x758] sm:$0xff] }
 0x359   : > { %5149 = vmatprep.mubr.f32.mxu0 %v3907_v13  ;;  %10874 = vmatpush1.bf16.msra.mxu0 %v10873_v7  ;;  %v10882_v7 = vpack.c.bf16 %v9777_v9, %v9776_v51  ;;  %v10885_v39 = vpack.c.bf16 %v9779_v21, %v9778_v45  ;;  %v3814_v13 = vmul.f32 %v17006_v12, %v17005_v28  ;;  %v17012_v21 = vld [vmem:[#allocation48_spill] sm:$0xff] }
 0x35a   : > { %10875 = vmatprep.subr.bf16.mxu0 %v16835_v1  ;;  %v3913_v9 = vmul.f32 %v16892_v19, %v13920_v44  ;;  %v3915_v45 = vmul.f32 %v16898_v4, %v13952_v23  ;;  %v17013_v44 = vld [vmem:[#allocation32_spill] sm:$0xff] }
 0x35b   : > { %v17017_v23 = vld [vmem:[#allocation36_spill] sm:$0xff] }
 0x35c   : > { %5150 = vmatmul.mubr.f32.gmra.mrb[188].mxu0 %v16999_v60  ;;  %v9782_v60 = vld [vmem:[%s16586_s2 + $0x770] sm:$0xff] }
 0x35d   : > { %5154 = vmatprep.mubr.f32.mxu0 %v17000_v50  ;;  %10877 = vmatpush1.bf16.msra.mxu0 %v10876_v36  ;;  %v9780_v36 = vld [vmem:[%s16586_s2 + $0x760] sm:$0xff]  ;;  %v9783_v50 = vld [vmem:[%s16586_s2 + $0x778] sm:$0xff] }
 0x35e   : > { %10878 = vmatprep.subr.bf16.mxu0 %v16835_v1  ;;  %v10891_v2 = vpack.c.bf16 %v9783_v50, %v9782_v60  ;;  %v3921_v60 = vmul.f32 %v16979_v38, %v14034_v42  ;;  %v17022_v50 = vld [vmem:[#allocation8_spill] sm:$0xff]  ;;  %v17023_v42 = vld [vmem:[#allocation25_spill] sm:$0xff] }
 0x360   : > { %5155 = vmatmul.mubr.f32.gmra.mrb[190].mxu0 %v3812_v52  ;;  %v17009_v52 = vld [vmem:[#allocation23_spill] sm:$0xff] }
 0x361   : > { %5159 = vmatprep.mubr.f32.mxu0 %v3909_v5  ;;  %10880 = vmatpush1.bf16.msra.mxu0 %v10879_v59  ;;  %v17007_v59 = vld [vmem:[#allocation49_spill] sm:$0xff]  ;;  %v3816_v51 = vmul.f32 %v17009_v52, %v17008_v35  ;;  %v17010_v5 = vld [vmem:[#allocation46_spill] sm:$0xff] }
 0x362   : > { %10881 = vmatprep.subr.bf16.mxu0 %v16835_v1 }
 0x364   : > { %5160 = vmatmul.mubr.f32.gmra.mrb[192].mxu0 %v17004_v20  ;;  %v3820_v20 = vmul.f32 %v16957_v15, %v17013_v44  ;;  %v14289_v44 = vld [vmem:[#allocation3 + $0x107] sm:$0xff] }
 0x365   : > { %5164 = vmatprep.mubr.f32.mxu0 %v13888_v62  ;;  %10883 = vmatpush1.bf16.msra.mxu0 %v10882_v7  ;;  %v10888_v62 = vpack.c.bf16 %v9781_v33, %v9780_v36  ;;  %v17018_v33 = vld [vmem:[#allocation33_spill] sm:$0xff] }
 0x366   : > { %10884 = vmatprep.subr.bf16.mxu0 %v16835_v1 }
 0x368   : > { %5165 = vmatmul.mubr.f32.gmra.mrb[194].mxu0 %v3814_v13  ;;  %v17016_v13 = vld [vmem:[#allocation54_spill] sm:$0xff] }
 0x369   : > { %5169 = vmatprep.mubr.f32.mxu0 %v3911_v37  ;;  %10886 = vmatpush1.bf16.msra.mxu0 %v10885_v39  ;;  %v17014_v39 = vld [vmem:[#allocation28_spill] sm:$0xff]  ;;  %v3822_v36 = vmul.f32 %v17017_v23, %v17016_v13  ;;  %v3919_v37 = vmul.f32 %v17018_v33, %v14013_v31  ;;  %v3826_v31 = vmul.f32 %v16980_v22, %v17022_v50 }
 0x36a   : > { %10887 = vmatprep.subr.bf16.mxu0 %v16835_v1  ;;  %v3917_v28 = vmul.f32 %v17014_v39, %v13984_v25 }
 0x36c   : > { %5170 = vmatmul.mubr.f32.gmra.mrb[196].mxu0 %v17007_v59 }
 0x36d   : > { %5174 = vmatprep.mubr.f32.mxu0 %v13916_v14  ;;  %10889 = vmatpush1.bf16.msra.mxu0 %v10888_v62  ;;  %v17011_v14 = vld [vmem:[#allocation47_spill] sm:$0xff]  ;;  %v17020_v62 = vld [vmem:[#allocation56_spill] sm:$0xff] }
 0x36e   : > { %10890 = vmatprep.subr.bf16.mxu0 %v16835_v1  ;;  %v3818_v7 = vmul.f32 %v16901_v34, %v17011_v14  ;;  %v3824_v25 = vmul.f32 %v16973_v10, %v17020_v62  ;;  %v14305_v62 = vld [vmem:[#allocation3 + $0x10f] sm:$0xff] }
 0x370   : > { %5175 = vmatmul.mubr.f32.gmra.mrb[198].mxu0 %v3816_v51 }
 0x371   : > { %5179 = vmatprep.mubr.f32.mxu0 %v3913_v9  ;;  %10892 = vmatpush1.bf16.msra.mxu0 %v10891_v2 }
 0x372   : > { %10893 = vmatprep.subr.bf16.mxu0 %v16835_v1 }
 0x374   : > { %5180 = vmatmul.mubr.f32.gmra.mrb[200].mxu0 %v17010_v5 }
 0x375   : > { %5184 = vmatprep.mubr.f32.mxu0 %v13948_v16  ;;  %v17015_v16 = vld [vmem:[#allocation52_spill] sm:$0xff] }
 0x378   : > { %5185 = vmatmul.mubr.f32.gmra.mrb[202].mxu0 %v3818_v7 }
 0x379   : > { %5189 = vmatprep.mubr.f32.mxu0 %v3915_v45  ;;  %v17028_v45 = vld [vmem:[#allocation27_spill] sm:$0xff] }
 0x37c   : > { %5190 = vmatmul.mubr.f32.gmra.mrb[204].mxu0 %v17012_v21 }
 0x37d   : > { %5194 = vmatprep.mubr.f32.mxu0 %v13980_v17  ;;  %v17019_v17 = vld [vmem:[#allocation55_spill] sm:$0xff] }
 0x380   : > { %5195 = vmatmul.mubr.f32.gmra.mrb[206].mxu0 %v3820_v20 }
 0x381   : > { %5199 = vmatprep.mubr.f32.mxu0 %v3917_v28 }
 0x384   : > { %5200 = vmatmul.mubr.f32.gmra.mrb[208].mxu0 %v17015_v16 }
 0x385   : > { %5204 = vmatprep.mubr.f32.mxu0 %v14009_v63  ;;  %v17021_v63 = vld [vmem:[#allocation7_spill] sm:$0xff] }
 0x388   : > { %5205 = vmatmul.mubr.f32.gmra.mrb[210].mxu0 %v3822_v36 }
 0x389   : > { %5209 = vmatprep.mubr.f32.mxu0 %v3919_v37  ;;  %v17035_v37 = vld [vmem:[#allocation10_spill] sm:$0xff] }
 0x38c   : > { %5210 = vmatmul.mubr.f32.gmra.mrb[212].mxu0 %v17019_v17 }
 0x38d   : > { %5214 = vmatprep.mubr.f32.mxu0 %v14030_v54  ;;  %v3923_v54 = vmul.f32 %v16984_v57, %v14050_v48  ;;  %v3925_v48 = vmul.f32 %v16990_v46, %v14062_v61  ;;  %v17032_v61 = vld [vmem:[#allocation44_spill] sm:$0xff] }
 0x38e   : > { %v3927_v16 = vmul.f32 %v17032_v61, %v14289_v44 }
 0x390   : > { %5215 = vmatmul.mubr.f32.gmra.mrb[214].mxu0 %v3824_v25 }
 0x391   : > { %5219 = vmatprep.mubr.f32.mxu0 %v3921_v60  ;;  %v9784_v60 = vld [vmem:[%s16586_s2 + $0x780] sm:$0xff] }
 0x394   : > { %5220 = vmatmul.mubr.f32.gmra.mrb[216].mxu0 %v17021_v63  ;;  %v9785_v63 = vld [vmem:[%s16586_s2 + $0x788] sm:$0xff] }
 0x395   : > { %5224 = vmatprep.mubr.f32.mxu0 %v14048_v40  ;;  %v17024_v40 = vld [vmem:[#allocation9_spill] sm:$0xff] }
 0x396   : > { %v3828_v9 = vmul.f32 %v16986_v49, %v17024_v40  ;;  %v9787_v40 = vld [vmem:[%s16586_s2 + $0x798] sm:$0xff] }
 0x397   : > { %v14264_v59 = vpop.f32.mrb[64].mxu1 }
 0x398   : > { %5225 = vmatmul.mubr.f32.gmra.mrb[218].mxu0 %v3826_v31  ;;  %v14268_v2 = vpop.f32.mrb[65].mxu1 }
 0x399   : > { %5229 = vmatprep.mubr.f32.mxu0 %v3923_v54  ;;  %v10894_v54 = vpack.c.bf16 %v9785_v63, %v9784_v60  ;;  %v9790_v63 = vld [vmem:[%s16586_s2 + $0x7b0] sm:$0xff] }
 0x39b   : > { %v14270_v35 = vpop.f32.mrb[66].mxu1 }
 0x39c   : > { %5230 = vmatmul.mubr.f32.gmra.mrb[220].mxu0 %v17023_v42  ;;  %v14273_v51 = vpop.f32.mrb[67].mxu1  ;;  %v9786_v42 = vld [vmem:[%s16586_s2 + $0x790] sm:$0xff] }
 0x39d   : > { %5234 = vmatprep.mubr.f32.mxu0 %v14060_v55  ;;  %v17030_v55 = vld [vmem:[#allocation45_spill] sm:$0xff] }
 0x39e   : > { %v3830_v20 = vmul.f32 %v17030_v55, %v14023_v24  ;;  %v17037_v24 = vld [vmem:[#allocation57_spill] sm:$0xff] }
 0x39f   : > { %v14278_v5 = vpop.f32.mrb[68].mxu1 }
 0x3a0   : > { %17025 = vst [vmem:[#allocation29_spill] sm:$0xff] %v14278_v5  ;;  %5235 = vmatmul.mubr.f32.gmra.mrb[222].mxu0 %v3828_v9  ;;  %v14282_v14 = vpop.f32.mrb[69].mxu1  ;;  %v9836_v5 = vld [vmem:[%s16586_s2 + $0x920] sm:$0xff] }
 0x3a1   : > { %17026 = vst [vmem:[#allocation34_spill] sm:$0xff] %v14282_v14  ;;  %5239 = vmatprep.mubr.f32.mxu0 %v3925_v48  ;;  %v3961_v48 = vld [vmem:[#allocation3 + $0x18] sm:$0xff] }
 0x3a3   : > { %v14284_v7 = vpop.f32.mrb[70].mxu1 }
 0x3a4   : > { %17027 = vst [vmem:[#allocation16_spill] sm:$0xff] %v14284_v7  ;;  %5240 = vmatmul.mubr.f32.gmra.mrb[224].mxu0 %v17028_v45  ;;  %v14287_v21 = vpop.f32.mrb[71].mxu1  ;;  %v4058_v45 = vmul.f32 %v12401_v11, %v14106_v53  ;;  %v4028_v53 = vld [vmem:[#allocation3 + $0x31] sm:$0xff]  ;;  %v4312_v11 = vld [vmem:[#allocation3 + $0x121] sm:$0xff] }
 0x3a5   : > { %17029 = vst [vmem:[#allocation11_spill] sm:$0xff] %v14287_v21  ;;  %5244 = vmatprep.mubr.f32.mxu0 %v14075_v27  ;;  %v17038_v27 = vld [vmem:[#allocation50_spill] sm:$0xff] }
 0x3a6   : > { %v3832_v25 = vmul.f32 %v17038_v27, %v17037_v24  ;;  %v3962_v24 = vld [vmem:[#allocation3 + $0x20] sm:$0xff]  ;;  %v4344_v7 = vmul.f32 %v17038_v27, %v4312_v11  ;;  %v9832_v11 = vld [vmem:[%s16586_s2 + $0x900] sm:$0xff] }
 0x3a7   : > { %v14294_v28 = vpop.f32.mrb[72].mxu1 }
 0x3a8   : > { %17031 = vst [vmem:[#allocation53_spill] sm:$0xff] %v14294_v28  ;;  %5245 = vmatmul.mubr.f32.gmra.mrb[226].mxu0 %v3830_v20  ;;  %v14298_v13 = vpop.f32.mrb[73].mxu1 }
 0x3a9   : > { %17033 = vst [vmem:[#allocation31_spill] sm:$0xff] %v14298_v13  ;;  %5249 = vmatprep.mubr.f32.mxu0 %v3927_v16  ;;  %v9788_v16 = vld [vmem:[%s16586_s2 + $0x7a0] sm:$0xff] }
 0x3ab   : > { %v14300_v36 = vpop.f32.mrb[74].mxu1 }
 0x3ac   : > { %17034 = vst [vmem:[#allocation18_spill] sm:$0xff] %v14300_v36  ;;  %5250 = vmatmul.mubr.f32.gmra.mrb[228].mxu0 %v17035_v37  ;;  %v14303_v17 = vpop.f32.mrb[75].mxu1  ;;  %v9789_v37 = vld [vmem:[%s16586_s2 + $0x7a8] sm:$0xff]  ;;  %v14493_v36 = vld [vmem:[#allocation3 + $0x88] sm:$0xff] }
 0x3ad   : > { %17036 = vst [vmem:[#allocation35_spill] sm:$0xff] %v14303_v17  ;;  %5254 = vmatprep.mubr.f32.mxu0 %v14305_v62  ;;  %v10900_v60 = vpack.c.bf16 %v9789_v37, %v9788_v16  ;;  %v14358_v16 = vld [vmem:[#allocation3 + $0x30] sm:$0xff]  ;;  %v4029_v37 = vld [vmem:[#allocation3 + $0x39] sm:$0xff] }
 0x3af   : > { %v14316_v50 = vpop.f32.mrb[76].mxu1 }
 0x3b0   : > { %17039 = vst [vmem:[#allocation37_spill] sm:$0xff] %v14316_v50  ;;  %5255 = vmatmul.mubr.f32.gmra.mrb[230].mxu0 %v3832_v25  ;;  %v14318_v31 = vpop.f32.mrb[77].mxu1  ;;  %v4027_v25 = vld [vmem:[#allocation3 + $0x29] sm:$0xff]  ;;  %v14418_v50 = vld [vmem:[#allocation3 + $0x58] sm:$0xff] }
 0x3b1   : > { %17040 = vst [vmem:[#allocation49_spill] sm:$0xff] %v14318_v31  ;;  %5324 = vmatprep.mubr.f32.mxu0 %v14104_v56  ;;  %v10897_v56 = vpack.c.bf16 %v9787_v40, %v9786_v42  ;;  %v14347_v42 = vld [vmem:[#allocation3 + $0x28] sm:$0xff]  ;;  %v4060_v40 = vmul.f32 %v12445_v58, %v4028_v53  ;;  %v9794_v53 = vld [vmem:[%s16586_s2 + $0x7d0] sm:$0xff] }
 0x3b2   : > { %v14443_v31 = vld [vmem:[#allocation3 + $0x68] sm:$0xff] }
 0x3b3   : > { %v14327_v9 = vpop.f32.mrb[78].mxu1 }
 0x3b4   : > { %17041 = vst [vmem:[#allocation51_spill] sm:$0xff] %v14327_v9  ;;  %5325 = vmatmul.mubr.f32.vlgmr.msra.gmra.mrb[168].mxu0 %v3961_v48  ;;  %v14331_v20 = vpop.f32.mrb[79].mxu1  ;;  %v9799_v9 = vld [vmem:[%s16586_s2 + $0x7f8] sm:$0xff] }
 0x3b5   : > { %17042 = vst [vmem:[#allocation46_spill] sm:$0xff] %v14331_v20  ;;  %10895 = vmatpush1.bf16.msra.mxu0 %v10894_v54  ;;  %5329 = vmatprep.mubr.f32.mxu0 %v4058_v45  ;;  %v9791_v54 = vld [vmem:[%s16586_s2 + $0x7b8] sm:$0xff]  ;;  %v9792_v45 = vld [vmem:[%s16586_s2 + $0x7c0] sm:$0xff] }
 0x3b6   : > { %10896 = vmatprep.subr.bf16.mxu0 %v16835_v1  ;;  %v10903_v48 = vpack.c.bf16 %v9791_v54, %v9790_v63  ;;  %v14368_v63 = vld [vmem:[#allocation3 + $0x38] sm:$0xff]  ;;  %v14393_v20 = vld [vmem:[#allocation3 + $0x48] sm:$0xff] }
 0x3b8   : > { %5330 = vmatmul.mubr.f32.gmra.mrb[170].mxu0 %v3962_v24  ;;  %v4030_v24 = vld [vmem:[#allocation3 + $0x41] sm:$0xff] }
 0x3b9   : > { %5334 = vmatprep.mubr.f32.mxu0 %v4027_v25  ;;  %10898 = vmatpush1.bf16.msra.mxu0 %v10897_v56  ;;  %v9793_v56 = vld [vmem:[%s16586_s2 + $0x7c8] sm:$0xff]  ;;  %v4062_v54 = vmul.f32 %v12500_v0, %v4030_v24 }
 0x3ba   : > { %10899 = vmatprep.subr.bf16.mxu0 %v16835_v1  ;;  %v10906_v25 = vpack.c.bf16 %v9793_v56, %v9792_v45  ;;  %v9797_v45 = vld [vmem:[%s16586_s2 + $0x7e8] sm:$0xff]  ;;  %v14379_v56 = vld [vmem:[#allocation3 + $0x40] sm:$0xff] }
 0x3bb   : > { %v4032_v24 = vld [vmem:[#allocation3 + $0x51] sm:$0xff] }
 0x3bc   : > { %5335 = vmatmul.mubr.f32.gmra.mrb[172].mxu0 %v14347_v42  ;;  %v14468_v0 = vld [vmem:[#allocation3 + $0x78] sm:$0xff] }
 0x3bd   : > { %5339 = vmatprep.mubr.f32.mxu0 %v4060_v40  ;;  %10901 = vmatpush1.bf16.msra.mxu0 %v10900_v60  ;;  %v9795_v60 = vld [vmem:[%s16586_s2 + $0x7d8] sm:$0xff] }
 0x3be   : > { %10902 = vmatprep.subr.bf16.mxu0 %v16835_v1  ;;  %v10909_v40 = vpack.c.bf16 %v9795_v60, %v9794_v53  ;;  %v9798_v60 = vld [vmem:[%s16586_s2 + $0x7f0] sm:$0xff] }
 0x3c0   : > { %5340 = vmatmul.mubr.f32.gmra.mrb[174].mxu0 %v14358_v16 }
 0x3c1   : > { %5344 = vmatprep.mubr.f32.mxu0 %v4029_v37  ;;  %10904 = vmatpush1.bf16.msra.mxu0 %v10903_v48  ;;  %v9796_v48 = vld [vmem:[%s16586_s2 + $0x7e0] sm:$0xff] }
 0x3c2   : > { %10905 = vmatprep.subr.bf16.mxu0 %v16835_v1  ;;  %v4031_v37 = vld [vmem:[#allocation3 + $0x49] sm:$0xff] }
 0x3c4   : > { %5345 = vmatmul.mubr.f32.gmra.mrb[176].mxu0 %v14368_v63 }
 0x3c5   : > { %5349 = vmatprep.mubr.f32.mxu0 %v4062_v54  ;;  %10907 = vmatpush1.bf16.msra.mxu0 %v10906_v25  ;;  %v10912_v25 = vpack.c.bf16 %v9797_v45, %v9796_v48  ;;  %v9800_v48 = vld [vmem:[%s16586_s2 + $0x800] sm:$0xff]  ;;  %v9801_v45 = vld [vmem:[%s16586_s2 + $0x808] sm:$0xff] }
 0x3c6   : > { %10908 = vmatprep.subr.bf16.mxu0 %v16835_v1 }
 0x3c8   : > { %5350 = vmatmul.mubr.f32.gmra.mrb[178].mxu0 %v14379_v56 }
 0x3c9   : > { %5354 = vmatprep.mubr.f32.mxu0 %v4031_v37  ;;  %v14382_v54 = vpop.f32.mrb[80].mxu1  ;;  %10910 = vmatpush1.bf16.msra.mxu0 %v10909_v40  ;;  %v4064_v37 = vmul.f32 %v12563_v29, %v4032_v24  ;;  %v10915_v40 = vpack.c.bf16 %v9799_v9, %v9798_v60  ;;  %v4033_v24 = vld [vmem:[#allocation3 + $0x59] sm:$0xff]  ;;  %v10918_v9 = vpack.c.bf16 %v9801_v45, %v9800_v48  ;;  %v9803_v29 = vld [vmem:[%s16586_s2 + $0x818] sm:$0xff]  ;;  %v9804_v48 = vld [vmem:[%s16586_s2 + $0x820] sm:$0xff] }
 0x3ca   : > { %17043 = vst [vmem:[#allocation47_spill] sm:$0xff] %v14382_v54  ;;  %v14384_v53 = vpop.f32.mrb[81].mxu1  ;;  %10911 = vmatprep.subr.bf16.mxu0 %v16835_v1  ;;  %v14404_v54 = vld [vmem:[#allocation3 + $0x50] sm:$0xff]  ;;  %v9802_v60 = vld [vmem:[%s16586_s2 + $0x810] sm:$0xff]  ;;  %v9805_v45 = vld [vmem:[%s16586_s2 + $0x828] sm:$0xff] }
 0x3cb   : > { %17044 = vst [vmem:[#allocation48_spill] sm:$0xff] %v14384_v53  ;;  %v4034_v53 = vld [vmem:[#allocation3 + $0x61] sm:$0xff] }
 0x3cc   : > { %5355 = vmatmul.mubr.f32.gmra.mrb[180].mxu0 %v14393_v20 }
 0x3cd   : > { %5359 = vmatprep.mubr.f32.mxu0 %v4064_v37  ;;  %10913 = vmatpush1.bf16.msra.mxu0 %v10912_v25 }
 0x3ce   : > { %10914 = vmatprep.subr.bf16.mxu0 %v16835_v1 }
 0x3d0   : > { %5360 = vmatmul.mubr.f32.gmra.mrb[182].mxu0 %v14404_v54 }
 0x3d1   : > { %5364 = vmatprep.mubr.f32.mxu0 %v4033_v24  ;;  %v14407_v37 = vpop.f32.mrb[82].mxu1  ;;  %10916 = vmatpush1.bf16.msra.mxu0 %v10915_v40  ;;  %v4066_v24 = vmul.f32 %v16996_v8, %v4034_v53  ;;  %v10921_v40 = vpack.c.bf16 %v9803_v29, %v9802_v60  ;;  %v4035_v53 = vld [vmem:[#allocation3 + $0x69] sm:$0xff]  ;;  %v10924_v29 = vpack.c.bf16 %v9805_v45, %v9804_v48  ;;  %v9806_v60 = vld [vmem:[%s16586_s2 + $0x830] sm:$0xff]  ;;  %v9809_v45 = vld [vmem:[%s16586_s2 + $0x848] sm:$0xff] }
 0x3d2   : > { %17045 = vst [vmem:[#allocation32_spill] sm:$0xff] %v14407_v37  ;;  %v14409_v25 = vpop.f32.mrb[83].mxu1  ;;  %10917 = vmatprep.subr.bf16.mxu0 %v16835_v1  ;;  %v14429_v37 = vld [vmem:[#allocation3 + $0x60] sm:$0xff]  ;;  %v9807_v8 = vld [vmem:[%s16586_s2 + $0x838] sm:$0xff]  ;;  %v9808_v48 = vld [vmem:[%s16586_s2 + $0x840] sm:$0xff] }
 0x3d3   : > { %17046 = vst [vmem:[#allocation52_spill] sm:$0xff] %v14409_v25  ;;  %v4036_v25 = vld [vmem:[#allocation3 + $0x71] sm:$0xff] }
 0x3d4   : > { %5365 = vmatmul.mubr.f32.gmra.mrb[184].mxu0 %v14418_v50 }
 0x3d5   : > { %5369 = vmatprep.mubr.f32.mxu0 %v4066_v24  ;;  %10919 = vmatpush1.bf16.msra.mxu0 %v10918_v9 }
 0x3d6   : > { %10920 = vmatprep.subr.bf16.mxu0 %v16835_v1 }
 0x3d8   : > { %5370 = vmatmul.mubr.f32.gmra.mrb[186].mxu0 %v14429_v37 }
 0x3d9   : > { %5374 = vmatprep.mubr.f32.mxu0 %v4035_v53  ;;  %v14432_v24 = vpop.f32.mrb[84].mxu1  ;;  %10922 = vmatpush1.bf16.msra.mxu0 %v10921_v40  ;;  %v4068_v53 = vmul.f32 %v17002_v3, %v4036_v25  ;;  %v10927_v40 = vpack.c.bf16 %v9807_v8, %v9806_v60  ;;  %v4037_v25 = vld [vmem:[#allocation3 + $0x79] sm:$0xff]  ;;  %v10930_v8 = vpack.c.bf16 %v9809_v45, %v9808_v48  ;;  %v9811_v3 = vld [vmem:[%s16586_s2 + $0x858] sm:$0xff]  ;;  %v9812_v48 = vld [vmem:[%s16586_s2 + $0x860] sm:$0xff] }
 0x3da   : > { %17047 = vst [vmem:[#allocation54_spill] sm:$0xff] %v14432_v24  ;;  %v14434_v9 = vpop.f32.mrb[85].mxu1  ;;  %10923 = vmatprep.subr.bf16.mxu0 %v16835_v1  ;;  %v14454_v24 = vld [vmem:[#allocation3 + $0x70] sm:$0xff]  ;;  %v9810_v60 = vld [vmem:[%s16586_s2 + $0x850] sm:$0xff]  ;;  %v9813_v45 = vld [vmem:[%s16586_s2 + $0x868] sm:$0xff] }
 0x3db   : > { %17048 = vst [vmem:[#allocation55_spill] sm:$0xff] %v14434_v9  ;;  %v4038_v9 = vld [vmem:[#allocation3 + $0x81] sm:$0xff] }
 0x3dc   : > { %5375 = vmatmul.mubr.f32.gmra.mrb[188].mxu0 %v14443_v31 }
 0x3dd   : > { %5379 = vmatprep.mubr.f32.mxu0 %v4068_v53  ;;  %10925 = vmatpush1.bf16.msra.mxu0 %v10924_v29 }
 0x3de   : > { %10926 = vmatprep.subr.bf16.mxu0 %v16835_v1 }
 0x3e0   : > { %5380 = vmatmul.mubr.f32.gmra.mrb[190].mxu0 %v14454_v24 }
 0x3e1   : > { %5384 = vmatprep.mubr.f32.mxu0 %v4037_v25  ;;  %v14457_v53 = vpop.f32.mrb[86].mxu1  ;;  %10928 = vmatpush1.bf16.msra.mxu0 %v10927_v40  ;;  %v4070_v25 = vmul.f32 %v17006_v12, %v4038_v9  ;;  %v10933_v40 = vpack.c.bf16 %v9811_v3, %v9810_v60  ;;  %v4039_v9 = vld [vmem:[#allocation3 + $0x89] sm:$0xff]  ;;  %v10936_v3 = vpack.c.bf16 %v9813_v45, %v9812_v48  ;;  %v9814_v60 = vld [vmem:[%s16586_s2 + $0x870] sm:$0xff] }
 0x3e2   : > { %17049 = vst [vmem:[#allocation56_spill] sm:$0xff] %v14457_v53  ;;  %v14459_v29 = vpop.f32.mrb[87].mxu1  ;;  %10929 = vmatprep.subr.bf16.mxu0 %v16835_v1  ;;  %v14479_v53 = vld [vmem:[#allocation3 + $0x80] sm:$0xff]  ;;  %v9815_v12 = vld [vmem:[%s16586_s2 + $0x878] sm:$0xff]  ;;  %v14498_v48 = vld [vmem:[#allocation3 + $0x90] sm:$0xff] }
 0x3e3   : > { %17050 = vst [vmem:[#allocation7_spill] sm:$0xff] %v14459_v29  ;;  %v4040_v29 = vld [vmem:[#allocation3 + $0x91] sm:$0xff]  ;;  %v4041_v45 = vld [vmem:[#allocation3 + $0x99] sm:$0xff] }
 0x3e4   : > { %5385 = vmatmul.mubr.f32.gmra.mrb[192].mxu0 %v14468_v0 }
 0x3e5   : > { %5389 = vmatprep.mubr.f32.mxu0 %v4070_v25  ;;  %10931 = vmatpush1.bf16.msra.mxu0 %v10930_v8 }
 0x3e6   : > { %10932 = vmatprep.subr.bf16.mxu0 %v16835_v1 }
 0x3e8   : > { %5390 = vmatmul.mubr.f32.gmra.mrb[194].mxu0 %v14479_v53 }
 0x3e9   : > { %5394 = vmatprep.mubr.f32.mxu0 %v4039_v9  ;;  %v14482_v25 = vpop.f32.mrb[88].mxu1  ;;  %10934 = vmatpush1.bf16.msra.mxu0 %v10933_v40  ;;  %v4072_v9 = vmul.f32 %v17009_v52, %v4040_v29  ;;  %v10939_v40 = vpack.c.bf16 %v9815_v12, %v9814_v60  ;;  %v14505_v29 = vld [vmem:[#allocation3 + $0x98] sm:$0xff]  ;;  %v14513_v60 = vld [vmem:[#allocation3 + $0xa0] sm:$0xff] }
 0x3ea   : > { %17051 = vst [vmem:[#allocation8_spill] sm:$0xff] %v14482_v25  ;;  %v14484_v8 = vpop.f32.mrb[89].mxu1  ;;  %10935 = vmatprep.subr.bf16.mxu0 %v16835_v1  ;;  %v4042_v25 = vld [vmem:[#allocation3 + $0xa1] sm:$0xff] }
 0x3eb   : > { %17052 = vst [vmem:[#allocation25_spill] sm:$0xff] %v14484_v8 }
 0x3ec   : > { %5395 = vmatmul.mubr.f32.gmra.mrb[196].mxu0 %v14493_v36 }
 0x3ed   : > { %5399 = vmatprep.mubr.f32.mxu0 %v4072_v9  ;;  %10937 = vmatpush1.bf16.msra.mxu0 %v10936_v3  ;;  %v4074_v9 = vmul.f32 %v16901_v34, %v4042_v25  ;;  %v14520_v25 = vld [vmem:[#allocation3 + $0xb0] sm:$0xff] }
 0x3ee   : > { %10938 = vmatprep.subr.bf16.mxu0 %v16835_v1 }
 0x3f0   : > { %5400 = vmatmul.mubr.f32.gmra.mrb[198].mxu0 %v14498_v48 }
 0x3f1   : > { %5404 = vmatprep.mubr.f32.mxu0 %v4041_v45  ;;  %v14501_v8 = vpop.f32.mrb[90].mxu1  ;;  %10940 = vmatpush1.bf16.msra.mxu0 %v10939_v40  ;;  %v4043_v45 = vld [vmem:[#allocation3 + $0xa9] sm:$0xff] }
 0x3f2   : > { %17053 = vst [vmem:[#allocation9_spill] sm:$0xff] %v14501_v8  ;;  %v14503_v17 = vpop.f32.mrb[91].mxu1  ;;  %v4044_v8 = vld [vmem:[#allocation3 + $0xb1] sm:$0xff]  ;;  %v14516_v40 = vld [vmem:[#allocation3 + $0xa8] sm:$0xff] }
 0x3f3   : > { %17054 = vst [vmem:[#allocation27_spill] sm:$0xff] %v14503_v17  ;;  %v4076_v17 = vmul.f32 %v16957_v15, %v4044_v8  ;;  %v4047_v8 = vld [vmem:[#allocation3 + $0xc9] sm:$0xff] }
 0x3f4   : > { %5405 = vmatmul.mubr.f32.gmra.mrb[200].mxu0 %v14505_v29  ;;  %v14530_v15 = vld [vmem:[#allocation3 + $0xc8] sm:$0xff] }
 0x3f5   : > { %5409 = vmatprep.mubr.f32.mxu0 %v4074_v9  ;;  %v14509_v12 = vpop.f32.mrb[92].mxu1  ;;  %v4045_v9 = vld [vmem:[#allocation3 + $0xb9] sm:$0xff] }
 0x3f6   : > { %17055 = vst [vmem:[#allocation10_spill] sm:$0xff] %v14509_v12  ;;  %v14511_v3 = vpop.f32.mrb[93].mxu1  ;;  %v4046_v12 = vld [vmem:[#allocation3 + $0xc1] sm:$0xff] }
 0x3f7   : > { %17056 = vst [vmem:[#allocation57_spill] sm:$0xff] %v14511_v3  ;;  %v14523_v3 = vld [vmem:[#allocation3 + $0xb8] sm:$0xff]  ;;  %v4078_v34 = vmul.f32 %v17017_v23, %v4046_v12 }
 0x3f8   : > { %5410 = vmatmul.mubr.f32.gmra.mrb[202].mxu0 %v14513_v60  ;;  %v4049_v12 = vld [vmem:[#allocation3 + $0xd9] sm:$0xff] }
 0x3f9   : > { %5414 = vmatprep.mubr.f32.mxu0 %v4043_v45  ;;  %v14527_v45 = vld [vmem:[#allocation3 + $0xc0] sm:$0xff]  ;;  %v14537_v23 = vld [vmem:[#allocation3 + $0xd8] sm:$0xff] }
 0x3fc   : > { %5415 = vmatmul.mubr.f32.gmra.mrb[204].mxu0 %v14516_v40 }
 0x3fd   : > { %5419 = vmatprep.mubr.f32.mxu0 %v4076_v17  ;;  %v4048_v17 = vld [vmem:[#allocation3 + $0xd1] sm:$0xff] }
 0x3fe   : > { %v4080_v52 = vmul.f32 %v16973_v10, %v4048_v17  ;;  %v4051_v17 = vld [vmem:[#allocation3 + $0xe9] sm:$0xff] }
 0x3ff   : > { %v14544_v10 = vld [vmem:[#allocation3 + $0xe8] sm:$0xff] }
 0x400   : > { %5420 = vmatmul.mubr.f32.gmra.mrb[206].mxu0 %v14520_v25 }
 0x401   : > { %5424 = vmatprep.mubr.f32.mxu0 %v4045_v9  ;;  %v14534_v9 = vld [vmem:[#allocation3 + $0xd0] sm:$0xff] }
 0x404   : > { %5425 = vmatmul.mubr.f32.gmra.mrb[208].mxu0 %v14523_v3 }
 0x405   : > { %5429 = vmatprep.mubr.f32.mxu0 %v4078_v34  ;;  %v4050_v34 = vld [vmem:[#allocation3 + $0xe1] sm:$0xff] }
 0x406   : > { %v4082_v58 = vmul.f32 %v16980_v22, %v4050_v34  ;;  %v4053_v34 = vld [vmem:[#allocation3 + $0xf9] sm:$0xff] }
 0x407   : > { %v14551_v22 = vld [vmem:[#allocation3 + $0xf8] sm:$0xff] }
 0x408   : > { %5430 = vmatmul.mubr.f32.gmra.mrb[210].mxu0 %v14527_v45 }
 0x409   : > { %5434 = vmatprep.mubr.f32.mxu0 %v4047_v8  ;;  %v14541_v8 = vld [vmem:[#allocation3 + $0xe0] sm:$0xff] }
 0x40c   : > { %5435 = vmatmul.mubr.f32.gmra.mrb[212].mxu0 %v14530_v15 }
 0x40d   : > { %5439 = vmatprep.mubr.f32.mxu0 %v4080_v52  ;;  %v4052_v52 = vld [vmem:[#allocation3 + $0xf1] sm:$0xff] }
 0x40e   : > { %v4084_v28 = vmul.f32 %v16986_v49, %v4052_v52  ;;  %v4055_v52 = vld [vmem:[#allocation3 + $0x109] sm:$0xff]  ;;  %v4311_v49 = vld [vmem:[#allocation3 + $0x119] sm:$0xff] }
 0x40f   : > { %10410 = vmatprep.mubr.f32.mxu1 %v4311_v49  ;;  %v9833_v49 = vld [vmem:[%s16586_s2 + $0x908] sm:$0xff] }
 0x410   : > { %5440 = vmatmul.mubr.f32.gmra.mrb[214].mxu0 %v14534_v9  ;;  %10411 = vmatmul.mubr.f32.gmra.mrb[94].mxu1 %v4344_v7  ;;  %v9834_v7 = vld [vmem:[%s16586_s2 + $0x910] sm:$0xff] }
 0x411   : > { %5444 = vmatprep.mubr.f32.mxu0 %v4049_v12  ;;  %v14548_v12 = vld [vmem:[#allocation3 + $0xf0] sm:$0xff] }
 0x414   : > { %5445 = vmatmul.mubr.f32.gmra.mrb[216].mxu0 %v14537_v23 }
 0x415   : > { %5449 = vmatprep.mubr.f32.mxu0 %v4082_v58  ;;  %v4054_v58 = vld [vmem:[#allocation3 + $0x101] sm:$0xff] }
 0x416   : > { %v4086_v13 = vmul.f32 %v17030_v55, %v4054_v58  ;;  %v14566_v58 = vld [vmem:[#allocation3 + $0x110] sm:$0xff]  ;;  %v4121_v55 = vld [vmem:[#allocation3 + $0x27] sm:$0xff] }
 0x418   : > { %5450 = vmatmul.mubr.f32.gmra.mrb[218].mxu0 %v14541_v8 }
 0x419   : > { %5454 = vmatprep.mubr.f32.mxu0 %v4051_v17  ;;  %v14555_v17 = vld [vmem:[#allocation3 + $0x100] sm:$0xff] }
 0x41c   : > { %5455 = vmatmul.mubr.f32.gmra.mrb[220].mxu0 %v14544_v10 }
 0x41d   : > { %5459 = vmatprep.mubr.f32.mxu0 %v4084_v28  ;;  %v4056_v28 = vld [vmem:[#allocation3 + $0x111] sm:$0xff] }
 0x41e   : > { %v4088_v21 = vmul.f32 %v17038_v27, %v4056_v28  ;;  %v4153_v28 = vmul.f32 %v16994_v18, %v4121_v55  ;;  %v9838_v55 = vld [vmem:[%s16586_s2 + $0x930] sm:$0xff] }
 0x420   : > { %5460 = vmatmul.mubr.f32.gmra.mrb[222].mxu0 %v14548_v12 }
 0x421   : > { %5464 = vmatprep.mubr.f32.mxu0 %v4053_v34  ;;  %v14559_v34 = vld [vmem:[#allocation3 + $0x108] sm:$0xff] }
 0x424   : > { %5465 = vmatmul.mubr.f32.gmra.mrb[224].mxu0 %v14551_v22 }
 0x425   : > { %5469 = vmatprep.mubr.f32.mxu0 %v4086_v13  ;;  %v14563_v13 = vld [vmem:[#allocation2] sm:$0xff] }
 0x426   : > { %7264 = vmatprep.mubr.f32.mxu1 %v14563_v13 }
 0x428   : > { %5470 = vmatmul.mubr.f32.gmra.mrb[226].mxu0 %v14555_v17 }
 0x429   : > { %5474 = vmatprep.mubr.f32.mxu0 %v4055_v52  ;;  %v9835_v52 = vld [vmem:[%s16586_s2 + $0x918] sm:$0xff] }
 0x42a   : > { %v10977_v27 = vpack.c.bf16 %v9835_v52, %v9834_v7  ;;  %v9839_v7 = vld [vmem:[%s16586_s2 + $0x938] sm:$0xff] }
 0x42c   : > { %5475 = vmatmul.mubr.f32.gmra.mrb[228].mxu0 %v14559_v34 }
 0x42d   : > { %5479 = vmatprep.mubr.f32.mxu0 %v4088_v21  ;;  %v10974_v21 = vpack.c.bf16 %v9833_v49, %v9832_v11  ;;  %v4122_v11 = vld [vmem:[#allocation3 + $0x2f] sm:$0xff]  ;;  %v4123_v49 = vld [vmem:[#allocation3 + $0x37] sm:$0xff] }
 0x42f   : > { %10975 = vmatpush1.bf16.msra.mxu1 %v10974_v21  ;;  %v4155_v21 = vmul.f32 %v12372_v47, %v4123_v49  ;;  %v9842_v49 = vld [vmem:[%s16586_s2 + $0x950] sm:$0xff] }
 0x430   : > { %5480 = vmatmul.mubr.f32.gmra.mrb[230].mxu0 %v14566_v58  ;;  %10976 = vmatprep.subr.bf16.mxu1 %v16835_v1 }
 0x431   : > { %5549 = vmatprep.mubr.f32.mxu0 %v14347_v42  ;;  %v9837_v42 = vld [vmem:[%s16586_s2 + $0x928] sm:$0xff] }
 0x432   : > { %v10980_v14 = vpack.c.bf16 %v9837_v42, %v9836_v5  ;;  %v9961_v5 = vld [vmem:[%s16586_s2 + $0xd08] sm:$0xff] }
 0x433   : > { %10978 = vmatpush1.bf16.msra.mxu1 %v10977_v27  ;;  %v9960_v27 = vld [vmem:[%s16586_s2 + $0xd00] sm:$0xff]  ;;  %v4124_v42 = vld [vmem:[#allocation3 + $0x3f] sm:$0xff] }
 0x434   : > { %5550 = vmatmul.mubr.f32.vlgmr.msra.gmra.mrb[168].mxu0 %v4153_v28  ;;  %10979 = vmatprep.subr.bf16.mxu1 %v16835_v1  ;;  %v11165_v52 = vpack.c.bf16 %v9961_v5, %v9960_v27  ;;  %v9841_v28 = vld [vmem:[%s16586_s2 + $0x948] sm:$0xff]  ;;  %v4126_v5 = vld [vmem:[#allocation3 + $0x4f] sm:$0xff] }
 0x435   : > { %5554 = vmatprep.mubr.f32.mxu0 %v14358_v16  ;;  %v10983_v16 = vpack.c.bf16 %v9839_v7, %v9838_v55  ;;  %v9843_v55 = vld [vmem:[%s16586_s2 + $0x958] sm:$0xff]  ;;  %v9845_v27 = vld [vmem:[%s16586_s2 + $0x968] sm:$0xff] }
 0x436   : > { %11166 = vmatprep.subr.bf16.mxu0 %v11165_v52  ;;  %v10989_v7 = vpack.c.bf16 %v9843_v55, %v9842_v49  ;;  %v4129_v49 = vld [vmem:[#allocation3 + $0x67] sm:$0xff] }
 0x437   : > { %10981 = vmatpush1.bf16.msra.mxu1 %v10980_v14  ;;  %11168 = vmatpush3.bf16.msra.mxu0 %v11165_v52  ;;  %v9846_v52 = vld [vmem:[%s16586_s2 + $0x970] sm:$0xff] }
 0x438   : > { %5555 = vmatmul.mubr.f32.gmra.mrb[170].mxu0 %v4122_v11  ;;  %10982 = vmatprep.subr.bf16.mxu1 %v16835_v1  ;;  %v4125_v11 = vld [vmem:[#allocation3 + $0x47] sm:$0xff] }
 0x439   : > { %5559 = vmatprep.mubr.f32.mxu0 %v14368_v63  ;;  %v9840_v63 = vld [vmem:[%s16586_s2 + $0x940] sm:$0xff]  ;;  %v9850_v55 = vld [vmem:[%s16586_s2 + $0x990] sm:$0xff] }
 0x43a   : > { %v10986_v14 = vpack.c.bf16 %v9841_v28, %v9840_v63  ;;  %v9847_v63 = vld [vmem:[%s16586_s2 + $0x978] sm:$0xff] }
 0x43b   : > { %10984 = vmatpush1.bf16.msra.mxu1 %v10983_v16  ;;  %v4127_v16 = vld [vmem:[#allocation3 + $0x57] sm:$0xff] }
 0x43c   : > { %5560 = vmatmul.mubr.f32.gmra.mrb[172].mxu0 %v4155_v21  ;;  %10985 = vmatprep.subr.bf16.mxu1 %v16835_v1  ;;  %v9844_v21 = vld [vmem:[%s16586_s2 + $0x960] sm:$0xff]  ;;  %v4159_v28 = vmul.f32 %v12459_v32, %v4127_v16 }
 0x43d   : > { %5564 = vmatprep.mubr.f32.mxu0 %v14379_v56  ;;  %v4157_v56 = vmul.f32 %v12412_v26, %v4125_v11  ;;  %v9849_v11 = vld [vmem:[%s16586_s2 + $0x988] sm:$0xff] }
 0x43e   : > { %v4131_v16 = vld [vmem:[#allocation3 + $0x77] sm:$0xff] }
 0x43f   : > { %10987 = vmatpush1.bf16.msra.mxu1 %v10986_v14  ;;  %v4128_v14 = vld [vmem:[#allocation3 + $0x5f] sm:$0xff] }
 0x440   : > { %5565 = vmatmul.mubr.f32.gmra.mrb[174].mxu0 %v4124_v42  ;;  %10988 = vmatprep.subr.bf16.mxu1 %v16835_v1  ;;  %v9848_v42 = vld [vmem:[%s16586_s2 + $0x980] sm:$0xff] }
 0x441   : > { %5569 = vmatprep.mubr.f32.mxu0 %v14393_v20  ;;  %v10992_v20 = vpack.c.bf16 %v9845_v27, %v9844_v21  ;;  %v9852_v21 = vld [vmem:[%s16586_s2 + $0x9a0] sm:$0xff]  ;;  %v9853_v27 = vld [vmem:[%s16586_s2 + $0x9a8] sm:$0xff] }
 0x443   : > { %10990 = vmatpush1.bf16.msra.mxu1 %v10989_v7  ;;  %v4161_v7 = vmul.f32 %v12522_v43, %v4129_v49  ;;  %v9859_v49 = vld [vmem:[%s16586_s2 + $0x9d8] sm:$0xff] }
 0x444   : > { %5570 = vmatmul.mubr.f32.gmra.mrb[176].mxu0 %v4157_v56  ;;  %10991 = vmatprep.subr.bf16.mxu1 %v16835_v1  ;;  %v9851_v56 = vld [vmem:[%s16586_s2 + $0x998] sm:$0xff] }
 0x445   : > { %5574 = vmatprep.mubr.f32.mxu0 %v14404_v54  ;;  %v10995_v54 = vpack.c.bf16 %v9847_v63, %v9846_v52  ;;  %v9855_v52 = vld [vmem:[%s16586_s2 + $0x9b8] sm:$0xff]  ;;  %v4163_v63 = vmul.f32 %v16998_v6, %v4131_v16 }
 0x446   : > { %v4138_v16 = vld [vmem:[#allocation3 + $0xaf] sm:$0xff] }
 0x447   : > { %10993 = vmatpush1.bf16.msra.mxu1 %v10992_v20  ;;  %v9854_v20 = vld [vmem:[%s16586_s2 + $0x9b0] sm:$0xff] }
 0x448   : > { %5575 = vmatmul.mubr.f32.gmra.mrb[178].mxu0 %v4126_v5  ;;  %10994 = vmatprep.subr.bf16.mxu1 %v16835_v1  ;;  %v4130_v5 = vld [vmem:[#allocation3 + $0x6f] sm:$0xff] }
 0x449   : > { %5579 = vmatprep.mubr.f32.mxu0 %v14418_v50  ;;  %v10998_v50 = vpack.c.bf16 %v9849_v11, %v9848_v42  ;;  %v4132_v42 = vld [vmem:[#allocation3 + $0x7f] sm:$0xff]  ;;  %v4133_v11 = vld [vmem:[#allocation3 + $0x87] sm:$0xff] }
 0x44b   : > { %10996 = vmatpush1.bf16.msra.mxu1 %v10995_v54  ;;  %v9857_v54 = vld [vmem:[%s16586_s2 + $0x9c8] sm:$0xff] }
 0x44c   : > { %5580 = vmatmul.mubr.f32.gmra.mrb[180].mxu0 %v4159_v28  ;;  %10997 = vmatprep.subr.bf16.mxu1 %v16835_v1  ;;  %v9856_v28 = vld [vmem:[%s16586_s2 + $0x9c0] sm:$0xff] }
 0x44d   : > { %5584 = vmatprep.mubr.f32.mxu0 %v14429_v37  ;;  %v11001_v37 = vpack.c.bf16 %v9851_v56, %v9850_v55  ;;  %v9860_v55 = vld [vmem:[%s16586_s2 + $0x9e0] sm:$0xff]  ;;  %v9861_v56 = vld [vmem:[%s16586_s2 + $0x9e8] sm:$0xff] }
 0x44f   : > { %10999 = vmatpush1.bf16.msra.mxu1 %v10998_v50  ;;  %v4165_v50 = vmul.f32 %v17003_v30, %v4133_v11  ;;  %v6000_v11 = vld [vmem:[#allocation2 + $0xf] sm:$0xff] }
 0x450   : > { %5585 = vmatmul.mubr.f32.gmra.mrb[182].mxu0 %v4128_v14  ;;  %11000 = vmatprep.subr.bf16.mxu1 %v16835_v1  ;;  %v9858_v14 = vld [vmem:[%s16586_s2 + $0x9d0] sm:$0xff] }
 0x451   : > { %5589 = vmatprep.mubr.f32.mxu0 %v14443_v31  ;;  %v11004_v31 = vpack.c.bf16 %v9853_v27, %v9852_v21  ;;  %v4136_v27 = vld [vmem:[#allocation3 + $0x9f] sm:$0xff] }
 0x453   : > { %11002 = vmatpush1.bf16.msra.mxu1 %v11001_v37  ;;  %v4135_v37 = vld [vmem:[#allocation3 + $0x97] sm:$0xff] }
 0x454   : > { %5590 = vmatmul.mubr.f32.gmra.mrb[184].mxu0 %v4161_v7  ;;  %11003 = vmatprep.subr.bf16.mxu1 %v16835_v1  ;;  %v4134_v7 = vld [vmem:[#allocation3 + $0x8f] sm:$0xff]  ;;  %v4167_v21 = vmul.f32 %v12687_v41, %v4135_v37 }
 0x455   : > { %5594 = vmatprep.mubr.f32.mxu0 %v14454_v24  ;;  %v11007_v24 = vpack.c.bf16 %v9855_v52, %v9854_v20  ;;  %v4141_v20 = vld [vmem:[#allocation3 + $0xc7] sm:$0xff] }
 0x456   : > { %v9967_v37 = vld [vmem:[%s16586_s2 + $0xd38] sm:$0xff] }
 0x457   : > { %11005 = vmatpush1.bf16.msra.mxu1 %v11004_v31 }
 0x458   : > { %5595 = vmatmul.mubr.f32.gmra.mrb[186].mxu0 %v4130_v5  ;;  %11006 = vmatprep.subr.bf16.mxu1 %v16835_v1  ;;  %v4137_v5 = vld [vmem:[#allocation3 + $0xa7] sm:$0xff] }
 0x459   : > { %5599 = vmatprep.mubr.f32.mxu0 %v14468_v0  ;;  %v11010_v0 = vpack.c.bf16 %v9857_v54, %v9856_v28  ;;  %v9962_v54 = vld [vmem:[%s16586_s2 + $0xd10] sm:$0xff] }
 0x45b   : > { %11008 = vmatpush1.bf16.msra.mxu1 %v11007_v24  ;;  %v5999_v24 = vld [vmem:[#allocation2 + $0x7] sm:$0xff] }
 0x45c   : > { %5600 = vmatmul.mubr.f32.gmra.mrb[188].mxu0 %v4163_v63  ;;  %11009 = vmatprep.subr.bf16.mxu1 %v16835_v1  ;;  %v4143_v63 = vld [vmem:[#allocation3 + $0xd7] sm:$0xff] }
 0x45d   : > { %5604 = vmatprep.mubr.f32.mxu0 %v14479_v53  ;;  %v11013_v53 = vpack.c.bf16 %v9859_v49, %v9858_v14  ;;  %v4175_v28 = vmul.f32 %v17018_v33, %v4143_v63  ;;  %v4144_v14 = vld [vmem:[#allocation3 + $0xdf] sm:$0xff]  ;;  %v4145_v49 = vld [vmem:[#allocation3 + $0xe7] sm:$0xff] }
 0x45f   : > { %11011 = vmatpush1.bf16.msra.mxu1 %v11010_v0  ;;  %v9965_v0 = vld [vmem:[%s16586_s2 + $0xd28] sm:$0xff] }
 0x460   : > { %5605 = vmatmul.mubr.f32.gmra.mrb[190].mxu0 %v4132_v42  ;;  %11012 = vmatprep.subr.bf16.mxu1 %v16835_v1 }
 0x461   : > { %5609 = vmatprep.mubr.f32.mxu0 %v14493_v36  ;;  %v11016_v36 = vpack.c.bf16 %v9861_v56, %v9860_v55  ;;  %v4177_v56 = vmul.f32 %v16979_v38, %v4145_v49 }
 0x463   : > { %11014 = vmatpush1.bf16.msra.mxu1 %v11013_v53  ;;  %v9865_v53 = vld [vmem:[%s16586_s2 + $0xa08] sm:$0xff] }
 0x464   : > { %5610 = vmatmul.mubr.f32.gmra.mrb[192].mxu0 %v4165_v50  ;;  %11015 = vmatprep.subr.bf16.mxu1 %v16835_v1 }
 0x465   : > { %5614 = vmatprep.mubr.f32.mxu0 %v14498_v48  ;;  %v4169_v48 = vmul.f32 %v16892_v19, %v4137_v5  ;;  %v4147_v5 = vld [vmem:[#allocation3 + $0xf7] sm:$0xff] }
 0x467   : > { %11017 = vmatpush1.bf16.msra.mxu1 %v11016_v36 }
 0x468   : > { %5615 = vmatmul.mubr.f32.gmra.mrb[194].mxu0 %v4134_v7  ;;  %11018 = vmatprep.subr.bf16.mxu1 %v16835_v1  ;;  %v9966_v7 = vld [vmem:[%s16586_s2 + $0xd30] sm:$0xff] }
 0x469   : > { %5619 = vmatprep.mubr.f32.mxu0 %v14505_v29  ;;  %v4139_v29 = vld [vmem:[#allocation3 + $0xb7] sm:$0xff]  ;;  %v11177_v36 = vpack.c.bf16 %v9967_v37, %v9966_v7 }
 0x46a   : > { %v4171_v31 = vmul.f32 %v16898_v4, %v4139_v29  ;;  %v9880_v37 = vld [vmem:[%s16586_s2 + $0xa80] sm:$0xff] }
 0x46c   : > { %5620 = vmatmul.mubr.f32.gmra.mrb[196].mxu0 %v4167_v21  ;;  %v9969_v21 = vld [vmem:[%s16586_s2 + $0xd48] sm:$0xff] }
 0x46d   : > { %5624 = vmatprep.mubr.f32.mxu0 %v14513_v60  ;;  %v4140_v60 = vld [vmem:[#allocation3 + $0xbf] sm:$0xff] }
 0x470   : > { %5625 = vmatmul.mubr.f32.gmra.mrb[198].mxu0 %v4136_v27  ;;  %v4146_v27 = vld [vmem:[#allocation3 + $0xef] sm:$0xff] }
 0x471   : > { %5629 = vmatprep.mubr.f32.mxu0 %v14516_v40  ;;  %v4173_v40 = vmul.f32 %v17014_v39, %v4141_v20  ;;  %v9971_v20 = vld [vmem:[%s16586_s2 + $0xd58] sm:$0xff] }
 0x474   : > { %5630 = vmatmul.mubr.f32.gmra.mrb[200].mxu0 %v4169_v48 }
 0x475   : > { %5634 = vmatprep.mubr.f32.mxu0 %v14520_v25  ;;  %v9862_v25 = vld [vmem:[%s16586_s2 + $0x9f0] sm:$0xff] }
 0x478   : > { %5635 = vmatmul.mubr.f32.gmra.mrb[202].mxu0 %v4138_v16  ;;  %v9866_v16 = vld [vmem:[%s16586_s2 + $0xa10] sm:$0xff] }
 0x479   : > { %5639 = vmatprep.mubr.f32.mxu0 %v14523_v3  ;;  %v9863_v3 = vld [vmem:[%s16586_s2 + $0x9f8] sm:$0xff] }
 0x47a   : > { %v11019_v52 = vpack.c.bf16 %v9863_v3, %v9862_v25  ;;  %v9973_v25 = vld [vmem:[%s16586_s2 + $0xd68] sm:$0xff] }
 0x47b   : > { %v4148_v3 = vld [vmem:[#allocation3 + $0xff] sm:$0xff] }
 0x47c   : > { %5640 = vmatmul.mubr.f32.gmra.mrb[204].mxu0 %v4171_v31  ;;  %11020 = vmatpush1.bf16.msra.mxu1 %v11019_v52  ;;  %v4179_v31 = vmul.f32 %v16984_v57, %v4147_v5 }
 0x47d   : > { %5644 = vmatprep.mubr.f32.mxu0 %v14527_v45  ;;  %v4142_v45 = vld [vmem:[#allocation3 + $0xcf] sm:$0xff]  ;;  %11021 = vmatprep.subr.bf16.mxu1 %v16835_v1 }
 0x480   : > { %5645 = vmatmul.mubr.f32.gmra.mrb[206].mxu0 %v4140_v60  ;;  %v9970_v60 = vld [vmem:[%s16586_s2 + $0xd50] sm:$0xff] }
 0x481   : > { %5649 = vmatprep.mubr.f32.mxu0 %v14530_v15  ;;  %v6031_v15 = vmul.f32 %v16994_v18, %v5999_v24  ;;  %v4181_v24 = vmul.f32 %v16990_v46, %v14289_v44  ;;  %v9870_v44 = vld [vmem:[%s16586_s2 + $0xa30] sm:$0xff] }
 0x483   : > { %7265 = vmatmul.mubr.f32.vlgmr.msra.gmra.mrb[96].mxu1 %v6031_v15  ;;  %v9974_v15 = vld [vmem:[%s16586_s2 + $0xd70] sm:$0xff] }
 0x484   : > { %5650 = vmatmul.mubr.f32.gmra.mrb[208].mxu0 %v4173_v40  ;;  %7269 = vmatprep.mubr.f32.mxu1 %v14563_v13  ;;  %v11185_v40 = vpack.c.bf16 %v9971_v20, %v9970_v60  ;;  %v9888_v20 = vld [vmem:[%s16586_s2 + $0xac0] sm:$0xff] }
 0x485   : > { %5654 = vmatprep.mubr.f32.mxu0 %v14534_v9  ;;  %v9963_v9 = vld [vmem:[%s16586_s2 + $0xd18] sm:$0xff] }
 0x486   : > { %v11169_v42 = vpack.c.bf16 %v9963_v9, %v9962_v54  ;;  %v9871_v9 = vld [vmem:[%s16586_s2 + $0xa38] sm:$0xff] }
 0x487   : > { %7270 = vmatmul.mubr.f32.gmra.mrb[98].mxu1 %v6000_v11 }
 0x488   : > { %5655 = vmatmul.mubr.f32.gmra.mrb[210].mxu0 %v4142_v45  ;;  %11170 = vmatprep.subr.bf16.mxu0 %v11169_v42  ;;  %v9868_v45 = vld [vmem:[%s16586_s2 + $0xa20] sm:$0xff] }
 0x489   : > { %5659 = vmatprep.mubr.f32.mxu0 %v14537_v23  ;;  %11172 = vmatpush3.bf16.msra.mxu0 %v11169_v42  ;;  %v9964_v23 = vld [vmem:[%s16586_s2 + $0xd20] sm:$0xff]  ;;  %v11031_v42 = vpack.c.bf16 %v9871_v9, %v9870_v44  ;;  %v9894_v44 = vld [vmem:[%s16586_s2 + $0xaf0] sm:$0xff]  ;;  %v9895_v9 = vld [vmem:[%s16586_s2 + $0xaf8] sm:$0xff] }
 0x48a   : > { %v11173_v50 = vpack.c.bf16 %v9965_v0, %v9964_v23  ;;  %v9873_v23 = vld [vmem:[%s16586_s2 + $0xa48] sm:$0xff] }
 0x48c   : > { %5660 = vmatmul.mubr.f32.gmra.mrb[212].mxu0 %v4175_v28  ;;  %11174 = vmatprep.subr.bf16.mxu0 %v11173_v50  ;;  %v9975_v28 = vld [vmem:[%s16586_s2 + $0xd78] sm:$0xff] }
 0x48d   : > { %5664 = vmatprep.mubr.f32.mxu0 %v14541_v8  ;;  %v9864_v8 = vld [vmem:[%s16586_s2 + $0xa00] sm:$0xff]  ;;  %11176 = vmatpush3.bf16.msra.mxu0 %v11173_v50  ;;  %v11193_v54 = vpack.c.bf16 %v9975_v28, %v9974_v15 }
 0x48e   : > { %v11022_v55 = vpack.c.bf16 %v9865_v53, %v9864_v8  ;;  %11178 = vmatprep.subr.bf16.mxu0 %v11177_v36  ;;  %v9876_v50 = vld [vmem:[%s16586_s2 + $0xa60] sm:$0xff]  ;;  %v9877_v8 = vld [vmem:[%s16586_s2 + $0xa68] sm:$0xff] }
 0x48f   : > { %v11040_v53 = vpack.c.bf16 %v9877_v8, %v9876_v50 }
 0x490   : > { %5665 = vmatmul.mubr.f32.gmra.mrb[214].mxu0 %v4144_v14  ;;  %11023 = vmatpush1.bf16.msra.mxu1 %v11022_v55  ;;  %v9874_v14 = vld [vmem:[%s16586_s2 + $0xa50] sm:$0xff] }
 0x491   : > { %5669 = vmatprep.mubr.f32.mxu0 %v14544_v10  ;;  %11024 = vmatprep.subr.bf16.mxu1 %v16835_v1  ;;  %v9968_v10 = vld [vmem:[%s16586_s2 + $0xd40] sm:$0xff]  ;;  %v9878_v55 = vld [vmem:[%s16586_s2 + $0xa70] sm:$0xff] }
 0x492   : > { %11180 = vmatpush3.bf16.msra.mxu0 %v11177_v36  ;;  %v11181_v48 = vpack.c.bf16 %v9969_v21, %v9968_v10  ;;  %v9881_v36 = vld [vmem:[%s16586_s2 + $0xa88] sm:$0xff]  ;;  %v9882_v21 = vld [vmem:[%s16586_s2 + $0xa90] sm:$0xff] }
 0x493   : > { %v11046_v10 = vpack.c.bf16 %v9881_v36, %v9880_v37  ;;  %v17057_v37 = vld [vmem:[#allocation34_spill] sm:$0xff] }
 0x494   : > { %5670 = vmatmul.mubr.f32.gmra.mrb[216].mxu0 %v4177_v56  ;;  %11182 = vmatprep.subr.bf16.mxu0 %v11181_v48  ;;  %v9879_v56 = vld [vmem:[%s16586_s2 + $0xa78] sm:$0xff] }
 0x495   : > { %5674 = vmatprep.mubr.f32.mxu0 %v14548_v12  ;;  %v9867_v12 = vld [vmem:[%s16586_s2 + $0xa18] sm:$0xff]  ;;  %v11043_v7 = vpack.c.bf16 %v9879_v56, %v9878_v55 }
 0x496   : > { %v11025_v29 = vpack.c.bf16 %v9867_v12, %v9866_v16  ;;  %11184 = vmatpush3.bf16.msra.mxu0 %v11181_v48  ;;  %v9884_v48 = vld [vmem:[%s16586_s2 + $0xaa0] sm:$0xff]  ;;  %v9885_v16 = vld [vmem:[%s16586_s2 + $0xaa8] sm:$0xff] }
 0x497   : > { %11186 = vmatprep.subr.bf16.mxu0 %v11185_v40  ;;  %v11052_v12 = vpack.c.bf16 %v9885_v16, %v9884_v48 }
 0x498   : > { %5675 = vmatmul.mubr.f32.gmra.mrb[218].mxu0 %v4146_v27  ;;  %11026 = vmatpush1.bf16.msra.mxu1 %v11025_v29  ;;  %v9883_v27 = vld [vmem:[%s16586_s2 + $0xa98] sm:$0xff]  ;;  %v9886_v29 = vld [vmem:[%s16586_s2 + $0xab0] sm:$0xff] }
 0x499   : > { %5679 = vmatprep.mubr.f32.mxu0 %v14551_v22  ;;  %11027 = vmatprep.subr.bf16.mxu1 %v16835_v1  ;;  %v9972_v22 = vld [vmem:[%s16586_s2 + $0xd60] sm:$0xff]  ;;  %v11049_v5 = vpack.c.bf16 %v9883_v27, %v9882_v21 }
 0x49a   : > { %11188 = vmatpush3.bf16.msra.mxu0 %v11185_v40  ;;  %v11189_v52 = vpack.c.bf16 %v9973_v25, %v9972_v22  ;;  %v9889_v40 = vld [vmem:[%s16586_s2 + $0xac8] sm:$0xff]  ;;  %v9890_v25 = vld [vmem:[%s16586_s2 + $0xad0] sm:$0xff] }
 0x49b   : > { %v11058_v22 = vpack.c.bf16 %v9889_v40, %v9888_v20  ;;  %v17059_v20 = vld [vmem:[#allocation11_spill] sm:$0xff] }
 0x49c   : > { %5680 = vmatmul.mubr.f32.gmra.mrb[220].mxu0 %v4179_v31  ;;  %11190 = vmatprep.subr.bf16.mxu0 %v11189_v52  ;;  %v9887_v31 = vld [vmem:[%s16586_s2 + $0xab8] sm:$0xff] }
 0x49d   : > { %5684 = vmatprep.mubr.f32.mxu0 %v14555_v17  ;;  %v9869_v17 = vld [vmem:[%s16586_s2 + $0xa28] sm:$0xff]  ;;  %v11055_v60 = vpack.c.bf16 %v9887_v31, %v9886_v29 }
 0x49e   : > { %v11028_v63 = vpack.c.bf16 %v9869_v17, %v9868_v45  ;;  %11192 = vmatpush3.bf16.msra.mxu0 %v11189_v52  ;;  %v9892_v17 = vld [vmem:[%s16586_s2 + $0xae0] sm:$0xff] }
 0x49f   : > { %11194 = vmatprep.subr.bf16.mxu0 %v11193_v54 }
 0x4a0   : > { %5685 = vmatmul.mubr.f32.gmra.mrb[222].mxu0 %v4148_v3  ;;  %11029 = vmatpush1.bf16.msra.mxu1 %v11028_v63  ;;  %v9891_v3 = vld [vmem:[%s16586_s2 + $0xad8] sm:$0xff]  ;;  %v9893_v63 = vld [vmem:[%s16586_s2 + $0xae8] sm:$0xff] }
 0x4a1   : > { %5689 = vmatprep.mubr.f32.mxu0 %v14559_v34  ;;  %11030 = vmatprep.subr.bf16.mxu1 %v16835_v1  ;;  %v4151_v34 = vld [vmem:[#allocation3 + $0x117] sm:$0xff]  ;;  %v11061_v52 = vpack.c.bf16 %v9891_v3, %v9890_v25 }
 0x4a2   : > { %11196 = vmatpush3.bf16.msra.mxu0 %v11193_v54  ;;  %v4183_v11 = vmul.f32 %v17032_v61, %v4151_v34 }
 0x4a4   : > { %5690 = vmatmul.mubr.f32.gmra.mrb[224].mxu0 %v4181_v24  ;;  %11032 = vmatpush1.bf16.msra.mxu1 %v11031_v42  ;;  %v11064_v24 = vpack.c.bf16 %v9893_v63, %v9892_v17  ;;  %v11067_v42 = vpack.c.bf16 %v9895_v9, %v9894_v44  ;;  %v17061_v44 = vld [vmem:[#allocation12_spill] sm:$0xff] }
 0x4a5   : > { %5694 = vmatprep.mubr.f32.mxu0 %v14566_v58  ;;  %11033 = vmatprep.subr.bf16.mxu1 %v16835_v1  ;;  %v9872_v58 = vld [vmem:[%s16586_s2 + $0xa40] sm:$0xff] }
 0x4a6   : > { %v11034_v0 = vpack.c.bf16 %v9873_v23, %v9872_v58 }
 0x4a8   : > { %5695 = vmatmul.mubr.f32.gmra.mrb[226].mxu0 %v14305_v62  ;;  %v4152_v62 = vld [vmem:[#allocation3 + $0x11f] sm:$0xff]  ;;  %11035 = vmatpush1.bf16.msra.mxu1 %v11034_v0 }
 0x4a9   : > { %5699 = vmatprep.mubr.f32.mxu0 %v14563_v13  ;;  %11036 = vmatprep.subr.bf16.mxu1 %v16835_v1 }
 0x4ac   : > { %5700 = vmatmul.mubr.f32.gmra.mrb[228].mxu0 %v4183_v11 }
 0x4ad   : > { %5704 = vmatprep.mubr.f32.mxu0 %v14563_v13  ;;  %v9875_v13 = vld [vmem:[%s16586_s2 + $0xa58] sm:$0xff] }
 0x4ae   : > { %v11037_v49 = vpack.c.bf16 %v9875_v13, %v9874_v14 }
 0x4b0   : > { %5705 = vmatmul.mubr.f32.gmra.mrb[230].mxu0 %v4152_v62  ;;  %11038 = vmatpush1.bf16.msra.mxu1 %v11037_v49 }
 0x4b1   : > { %11039 = vmatprep.subr.bf16.mxu1 %v16835_v1 }
 0x4b4   : > { %11041 = vmatpush1.bf16.msra.mxu1 %v11040_v53 }
 0x4b5   : > { %11042 = vmatprep.subr.bf16.mxu1 %v16835_v1 }
 0x4b8   : > { %11044 = vmatpush1.bf16.msra.mxu1 %v11043_v7 }
 0x4b9   : > { %11045 = vmatprep.subr.bf16.mxu1 %v16835_v1 }
 0x4bc   : > { %11047 = vmatpush1.bf16.msra.mxu1 %v11046_v10 }
 0x4bd   : > { %11048 = vmatprep.subr.bf16.mxu1 %v16835_v1 }
 0x4c0   : > { %11050 = vmatpush1.bf16.msra.mxu1 %v11049_v5  ;;  %v17058_v5 = vld [vmem:[#allocation29_spill] sm:$0xff] }
 0x4c1   : > { %11051 = vmatprep.subr.bf16.mxu1 %v16835_v1 }
 0x4c4   : > { %11053 = vmatpush1.bf16.msra.mxu1 %v11052_v12 }
 0x4c5   : > { %11054 = vmatprep.subr.bf16.mxu1 %v16835_v1 }
 0x4c8   : > { %11056 = vmatpush1.bf16.msra.mxu1 %v11055_v60 }
 0x4c9   : > { %11057 = vmatprep.subr.bf16.mxu1 %v16835_v1 }
 0x4cc   : > { %11059 = vmatpush1.bf16.msra.mxu1 %v11058_v22 }
 0x4cd   : > { %11060 = vmatprep.subr.bf16.mxu1 %v16835_v1 }
 0x4d0   : > { %11062 = vmatpush1.bf16.msra.mxu1 %v11061_v52 }
 0x4d1   : > { %11063 = vmatprep.subr.bf16.mxu1 %v16835_v1 }
 0x4d4   : > { %11065 = vmatpush1.bf16.msra.mxu1 %v11064_v24  ;;  %v17060_v24 = vld [vmem:[#allocation16_spill] sm:$0xff] }
 0x4d5   : > { %11066 = vmatprep.subr.bf16.mxu1 %v16835_v1 }
 0x4d8   : > { %11068 = vmatpush1.bf16.msra.mxu1 %v11067_v42 }
 0x4d9   : > { %11069 = vmatprep.subr.bf16.mxu1 %v16835_v1 }
 0x4e3   : > { %v14879_v45 = vpop.f32.mrb[94].mxu1 }
 0x4e4   : > { %v14887_v15 = vpop.f32.mrb[95].mxu1 }
 0x507   : > { %v5551_v28 = vpop.f32.mrb[168].mxu0 }
 0x508   : > { %v5777_v54 = vadd.f32 %v14268_v2, %v5551_v28  ;;  %v5553_v34 = vpop.f32.mrb[169].mxu0 }
 0x50a   : > { %v5935_v11 = vmax.f32 %v5777_v54, 0.0 }
 0x50b   : > { %v5556_v62 = vpop.f32.mrb[170].mxu0 }
 0x50c   : > { %5967 = vst [vmem:[#allocation2 + $0x18] sm:$0xff] %v5935_v11  ;;  %v5782_v58 = vadd.f32 %v14264_v59, %v5556_v62  ;;  %v5558_v23 = vpop.f32.mrb[171].mxu0  ;;  %7274 = vmatprep.mubr.f32.mxu1 %v5935_v11 }
 0x50e   : > { %v5936_v2 = vmax.f32 %v5782_v58, 0.0  ;;  %v17062_v58 = vld [vmem:[#allocation31_spill] sm:$0xff] }
 0x50f   : > { %v5561_v0 = vpop.f32.mrb[172].mxu0 }
 0x510   : > { %5968 = vst [vmem:[#allocation2 + $0x20] sm:$0xff] %v5936_v2  ;;  %v5787_v14 = vadd.f32 %v14273_v51, %v5561_v0  ;;  %v5563_v13 = vpop.f32.mrb[173].mxu0 }
 0x512   : > { %v5937_v49 = vmax.f32 %v5787_v14, 0.0 }
 0x513   : > { %v5566_v50 = vpop.f32.mrb[174].mxu0  ;;  %v14900_v8 = vld [vmem:[#allocation2 + $0x17] sm:$0xff] }
 0x514   : > { %5969 = vst [vmem:[#allocation2 + $0x28] sm:$0xff] %v5937_v49  ;;  %v5792_v53 = vadd.f32 %v14270_v35, %v5566_v50  ;;  %v5568_v55 = vpop.f32.mrb[175].mxu0  ;;  %v6033_v59 = vmul.f32 %v12372_v47, %v14900_v8 }
 0x516   : > { %v5938_v56 = vmax.f32 %v5792_v53, 0.0  ;;  %7275 = vmatmul.mubr.f32.gmra.mrb[100].mxu1 %v6033_v59  ;;  %v17063_v53 = vld [vmem:[#allocation53_spill] sm:$0xff] }
 0x517   : > { %v5571_v7 = vpop.f32.mrb[176].mxu0  ;;  %7279 = vmatprep.mubr.f32.mxu1 %v5936_v2  ;;  %v14906_v10 = vld [vmem:[#allocation2 + $0x1f] sm:$0xff] }
 0x518   : > { %5970 = vst [vmem:[#allocation2 + $0x30] sm:$0xff] %v5938_v56  ;;  %v5797_v36 = vadd.f32 %v17057_v37, %v5571_v7  ;;  %v5573_v51 = vpop.f32.mrb[177].mxu0  ;;  %v17064_v7 = vld [vmem:[#allocation13_spill] sm:$0xff] }
 0x51a   : > { %v5939_v21 = vmax.f32 %v5797_v36, 0.0  ;;  %7280 = vmatmul.mubr.f32.gmra.mrb[102].mxu1 %v14906_v10 }
 0x51b   : > { %v5576_v27 = vpop.f32.mrb[178].mxu0  ;;  %7284 = vmatprep.mubr.f32.mxu1 %v5937_v49  ;;  %v14909_v35 = vld [vmem:[#allocation2 + $0x27] sm:$0xff] }
 0x51c   : > { %5971 = vst [vmem:[#allocation2 + $0x38] sm:$0xff] %v5939_v21  ;;  %v5802_v48 = vadd.f32 %v17058_v5, %v5576_v27  ;;  %v5578_v16 = vpop.f32.mrb[179].mxu0  ;;  %v6035_v12 = vmul.f32 %v12412_v26, %v14909_v35  ;;  %v17065_v27 = vld [vmem:[#allocation35_spill] sm:$0xff] }
 0x51e   : > { %v5940_v29 = vmax.f32 %v5802_v48, 0.0  ;;  %7285 = vmatmul.mubr.f32.gmra.mrb[104].mxu1 %v6035_v12 }
 0x51f   : > { %v5581_v31 = vpop.f32.mrb[180].mxu0  ;;  %7289 = vmatprep.mubr.f32.mxu1 %v5938_v56  ;;  %v14914_v60 = vld [vmem:[#allocation2 + $0x29] sm:$0xff] }
 0x520   : > { %5972 = vst [vmem:[#allocation2 + $0x40] sm:$0xff] %v5940_v29  ;;  %v5807_v40 = vadd.f32 %v17059_v20, %v5581_v31  ;;  %v5583_v22 = vpop.f32.mrb[181].mxu0  ;;  %10445 = vmatprep.mubr.f32.mxu0 %v14914_v60  ;;  %v14918_v25 = vld [vmem:[#allocation2 + $0x2f] sm:$0xff] }
 0x522   : > { %v5941_v3 = vmax.f32 %v5807_v40, 0.0  ;;  %7290 = vmatmul.mubr.f32.gmra.mrb[106].mxu1 %v14918_v25  ;;  %v17066_v40 = vld [vmem:[#allocation18_spill] sm:$0xff] }
 0x523   : > { %v5586_v52 = vpop.f32.mrb[182].mxu0  ;;  %7294 = vmatprep.mubr.f32.mxu1 %v5939_v21  ;;  %v14921_v17 = vld [vmem:[#allocation2 + $0x37] sm:$0xff] }
 0x524   : > { %v14923_v63 = vld [vmem:[#allocation2 + $0x31] sm:$0xff]  ;;  %5973 = vst [vmem:[#allocation2 + $0x48] sm:$0xff] %v5941_v3  ;;  %v5812_v28 = vadd.f32 %v17060_v24, %v5586_v52  ;;  %v5588_v54 = vpop.f32.mrb[183].mxu0  ;;  %v6037_v34 = vmul.f32 %v12459_v32, %v14921_v17  ;;  %v17067_v24 = vld [vmem:[#allocation14_spill] sm:$0xff] }
 0x525   : > { %v6704_v9 = vmul.f32 %v17061_v44, %v14923_v63 }
 0x526   : > { %v5942_v42 = vmax.f32 %v5812_v28, 0.0  ;;  %7295 = vmatmul.mubr.f32.gmra.mrb[108].mxu1 %v6037_v34 }
 0x527   : > { %10446 = vmatmul.mubr.f32.vlgmr.msra.gmra.mrb[232].mxu0 %v6704_v9  ;;  %v5591_v11 = vpop.f32.mrb[184].mxu0  ;;  %7299 = vmatprep.mubr.f32.mxu1 %v5940_v29  ;;  %v14930_v62 = vld [vmem:[#allocation2 + $0x39] sm:$0xff] }
 0x528   : > { %5974 = vst [vmem:[#allocation2 + $0x50] sm:$0xff] %v5942_v42  ;;  %v5817_v23 = vadd.f32 %v17062_v58, %v5591_v11  ;;  %v5593_v2 = vpop.f32.mrb[185].mxu0  ;;  %10448 = vmatprep.mubr.f32.mxu0 %v14930_v62  ;;  %v14934_v0 = vld [vmem:[#allocation2 + $0x3f] sm:$0xff] }
 0x52a   : > { %v5943_v14 = vmax.f32 %v5817_v23, 0.0  ;;  %7300 = vmatmul.mubr.f32.gmra.mrb[110].mxu1 %v14934_v0 }
 0x52b   : > { %v5596_v13 = vpop.f32.mrb[186].mxu0  ;;  %7304 = vmatprep.mubr.f32.mxu1 %v5941_v3  ;;  %v14937_v49 = vld [vmem:[#allocation2 + $0x47] sm:$0xff] }
 0x52c   : > { %v14939_v50 = vld [vmem:[#allocation2 + $0x41] sm:$0xff]  ;;  %5975 = vst [vmem:[#allocation2 + $0x58] sm:$0xff] %v5943_v14  ;;  %v5822_v55 = vadd.f32 %v17063_v53, %v5596_v13  ;;  %v5598_v59 = vpop.f32.mrb[187].mxu0  ;;  %v6039_v56 = vmul.f32 %v12522_v43, %v14937_v49 }
 0x52d   : > { %v6706_v37 = vmul.f32 %v17064_v7, %v14939_v50 }
 0x52e   : > { %v5944_v36 = vmax.f32 %v5822_v55, 0.0  ;;  %7305 = vmatmul.mubr.f32.gmra.mrb[112].mxu1 %v6039_v56  ;;  %v17069_v55 = vld [vmem:[#allocation37_spill] sm:$0xff] }
 0x52f   : > { %10449 = vmatmul.mubr.f32.gmra.mrb[234].mxu0 %v6706_v37  ;;  %v5601_v51 = vpop.f32.mrb[188].mxu0  ;;  %7309 = vmatprep.mubr.f32.mxu1 %v5942_v42  ;;  %v14946_v21 = vld [vmem:[#allocation2 + $0x49] sm:$0xff]  ;;  %v17068_v42 = vld [vmem:[#allocation49_spill] sm:$0xff] }
 0x530   : > { %5976 = vst [vmem:[#allocation2 + $0x60] sm:$0xff] %v5944_v36  ;;  %v5827_v5 = vadd.f32 %v17065_v27, %v5601_v51  ;;  %v5603_v48 = vpop.f32.mrb[189].mxu0  ;;  %10451 = vmatprep.mubr.f32.mxu0 %v14946_v21  ;;  %v14950_v16 = vld [vmem:[#allocation2 + $0x4f] sm:$0xff] }
 0x532   : > { %v5945_v12 = vmax.f32 %v5827_v5, 0.0  ;;  %7310 = vmatmul.mubr.f32.gmra.mrb[114].mxu1 %v14950_v16 }
 0x533   : > { %v5606_v29 = vpop.f32.mrb[190].mxu0  ;;  %7314 = vmatprep.mubr.f32.mxu1 %v5943_v14  ;;  %v14953_v31 = vld [vmem:[#allocation2 + $0x57] sm:$0xff] }
 0x534   : > { %v14955_v20 = vld [vmem:[#allocation2 + $0x51] sm:$0xff]  ;;  %5977 = vst [vmem:[#allocation2 + $0x68] sm:$0xff] %v5945_v12  ;;  %v5832_v22 = vadd.f32 %v17066_v40, %v5606_v29  ;;  %v5608_v3 = vpop.f32.mrb[191].mxu0  ;;  %v6041_v52 = vmul.f32 %v16998_v6, %v14953_v31 }
 0x535   : > { %v6708_v28 = vmul.f32 %v17067_v24, %v14955_v20 }
 0x536   : > { %v5946_v54 = vmax.f32 %v5832_v22, 0.0  ;;  %7315 = vmatmul.mubr.f32.gmra.mrb[116].mxu1 %v6041_v52 }
 0x537   : > { %10452 = vmatmul.mubr.f32.gmra.mrb[236].mxu0 %v6708_v28  ;;  %v5611_v34 = vpop.f32.mrb[192].mxu0  ;;  %7319 = vmatprep.mubr.f32.mxu1 %v5944_v36  ;;  %v14962_v9 = vld [vmem:[#allocation2 + $0x59] sm:$0xff]  ;;  %v17070_v36 = vld [vmem:[#allocation15_spill] sm:$0xff] }
 0x538   : > { %5978 = vst [vmem:[#allocation2 + $0x70] sm:$0xff] %v5946_v54  ;;  %v5837_v11 = vadd.f32 %v17068_v42, %v5611_v34  ;;  %v5613_v58 = vpop.f32.mrb[193].mxu0  ;;  %10454 = vmatprep.mubr.f32.mxu0 %v14962_v9  ;;  %v14966_v23 = vld [vmem:[#allocation2 + $0x5f] sm:$0xff] }
 0x53a   : > { %v5947_v2 = vmax.f32 %v5837_v11, 0.0  ;;  %7320 = vmatmul.mubr.f32.gmra.mrb[118].mxu1 %v14966_v23 }
 0x53b   : > { %v5616_v14 = vpop.f32.mrb[194].mxu0  ;;  %7324 = vmatprep.mubr.f32.mxu1 %v5945_v12  ;;  %v14969_v13 = vld [vmem:[#allocation2 + $0x67] sm:$0xff] }
 0x53c   : > { %v14971_v53 = vld [vmem:[#allocation2 + $0x61] sm:$0xff]  ;;  %5979 = vst [vmem:[#allocation2 + $0x78] sm:$0xff] %v5947_v2  ;;  %v5842_v59 = vadd.f32 %v17069_v55, %v5616_v14  ;;  %v5618_v56 = vpop.f32.mrb[195].mxu0  ;;  %v6043_v37 = vmul.f32 %v17003_v30, %v14969_v13 }
 0x53d   : > { %v6710_v51 = vmul.f32 %v17070_v36, %v14971_v53  ;;  %v17071_v12 = vld [vmem:[#allocation46_spill] sm:$0xff]  ;;  %v17073_v14 = vld [vmem:[#allocation17_spill] sm:$0xff] }
 0x53e   : > { %v5948_v27 = vmax.f32 %v5842_v59, 0.0  ;;  %7325 = vmatmul.mubr.f32.gmra.mrb[120].mxu1 %v6043_v37  ;;  %v17075_v37 = vld [vmem:[#allocation48_spill] sm:$0xff] }
 0x53f   : > { %10455 = vmatmul.mubr.f32.gmra.mrb[238].mxu0 %v6710_v51  ;;  %v5621_v5 = vpop.f32.mrb[196].mxu0  ;;  %7329 = vmatprep.mubr.f32.mxu1 %v5946_v54  ;;  %v14978_v48 = vld [vmem:[#allocation2 + $0x69] sm:$0xff] }
 0x540   : > { %5980 = vst [vmem:[#allocation2 + $0x80] sm:$0xff] %v5948_v27  ;;  %v5847_v29 = vadd.f32 %v17071_v12, %v5621_v5  ;;  %v5623_v40 = vpop.f32.mrb[197].mxu0  ;;  %10457 = vmatprep.mubr.f32.mxu0 %v14978_v48  ;;  %v14982_v22 = vld [vmem:[#allocation2 + $0x6f] sm:$0xff] }
 0x541   : > { %v17072_v54 = vld [vmem:[#allocation51_spill] sm:$0xff] }
 0x542   : > { %v5949_v3 = vmax.f32 %v5847_v29, 0.0  ;;  %7330 = vmatmul.mubr.f32.gmra.mrb[122].mxu1 %v14982_v22 }
 0x543   : > { %v5626_v52 = vpop.f32.mrb[198].mxu0  ;;  %7334 = vmatprep.mubr.f32.mxu1 %v5947_v2  ;;  %v14985_v28 = vld [vmem:[#allocation2 + $0x77] sm:$0xff] }
 0x544   : > { %v14987_v34 = vld [vmem:[#allocation2 + $0x71] sm:$0xff]  ;;  %5981 = vst [vmem:[#allocation2 + $0x88] sm:$0xff] %v5949_v3  ;;  %v5852_v42 = vadd.f32 %v17072_v54, %v5626_v52  ;;  %v5628_v11 = vpop.f32.mrb[199].mxu0  ;;  %v6045_v58 = vmul.f32 %v12687_v41, %v14985_v28 }
 0x545   : > { %v6712_v55 = vmul.f32 %v17073_v14, %v14987_v34 }
 0x546   : > { %v5950_v59 = vmax.f32 %v5852_v42, 0.0  ;;  %7335 = vmatmul.mubr.f32.gmra.mrb[124].mxu1 %v6045_v58 }
 0x547   : > { %10458 = vmatmul.mubr.f32.gmra.mrb[240].mxu0 %v6712_v55  ;;  %v5631_v56 = vpop.f32.mrb[200].mxu0  ;;  %7339 = vmatprep.mubr.f32.mxu1 %v5948_v27  ;;  %v14994_v2 = vld [vmem:[#allocation2 + $0x79] sm:$0xff]  ;;  %v17078_v27 = vld [vmem:[#allocation47_spill] sm:$0xff] }
 0x548   : > { %17074 = vst [vmem:[#allocation34_spill] sm:$0xff] %v14994_v2  ;;  %5982 = vst [vmem:[#allocation2 + $0x90] sm:$0xff] %v5950_v59  ;;  %v5857_v51 = vadd.f32 %v17075_v37, %v5631_v56  ;;  %v5633_v5 = vpop.f32.mrb[201].mxu0  ;;  %10460 = vmatprep.mubr.f32.mxu0 %v14994_v2  ;;  %v14998_v12 = vld [vmem:[#allocation2 + $0x7f] sm:$0xff]  ;;  %v17079_v55 = vld [vmem:[#allocation19_spill] sm:$0xff] }
 0x549   : > { %v17081_v5 = vld [vmem:[#allocation52_spill] sm:$0xff] }
 0x54a   : > { %v5951_v29 = vmax.f32 %v5857_v51, 0.0  ;;  %7340 = vmatmul.mubr.f32.gmra.mrb[126].mxu1 %v14998_v12 }
 0x54b   : > { %v5636_v40 = vpop.f32.mrb[202].mxu0  ;;  %7344 = vmatprep.mubr.f32.mxu1 %v5949_v3  ;;  %v15001_v52 = vld [vmem:[#allocation2 + $0x87] sm:$0xff] }
 0x54c   : > { %17076 = vst [vmem:[#allocation29_spill] sm:$0xff] %v15001_v52  ;;  %v15003_v54 = vld [vmem:[#allocation2 + $0x81] sm:$0xff]  ;;  %5983 = vst [vmem:[#allocation2 + $0x98] sm:$0xff] %v5951_v29  ;;  %v5862_v42 = vadd.f32 %v17078_v27, %v5636_v40  ;;  %v5638_v11 = vpop.f32.mrb[203].mxu0  ;;  %v6047_v58 = vmul.f32 %v16892_v19, %v15001_v52 }
 0x54d   : > { %17077 = vst [vmem:[#allocation11_spill] sm:$0xff] %v15003_v54  ;;  %v6714_v56 = vmul.f32 %v17079_v55, %v15003_v54  ;;  %v17088_v54 = vld [vmem:[#allocation55_spill] sm:$0xff] }
 0x54e   : > { %v5952_v37 = vmax.f32 %v5862_v42, 0.0  ;;  %7345 = vmatmul.mubr.f32.gmra.mrb[128].mxu1 %v6047_v58 }
 0x54f   : > { %10461 = vmatmul.mubr.f32.gmra.mrb[242].mxu0 %v6714_v56  ;;  %v5641_v51 = vpop.f32.mrb[204].mxu0  ;;  %7349 = vmatprep.mubr.f32.mxu1 %v5950_v59  ;;  %v15010_v3 = vld [vmem:[#allocation2 + $0x89] sm:$0xff]  ;;  %v17085_v59 = vld [vmem:[#allocation32_spill] sm:$0xff] }
 0x550   : > { %17080 = vst [vmem:[#allocation16_spill] sm:$0xff] %v15010_v3  ;;  %5984 = vst [vmem:[#allocation2 + $0xa0] sm:$0xff] %v5952_v37  ;;  %v5867_v2 = vadd.f32 %v17081_v5, %v5641_v51  ;;  %v5643_v41 = vpop.f32.mrb[205].mxu0  ;;  %10463 = vmatprep.mubr.f32.mxu0 %v15010_v3  ;;  %v15014_v40 = vld [vmem:[#allocation2 + $0x8f] sm:$0xff]  ;;  %v17086_v51 = vld [vmem:[#allocation21_spill] sm:$0xff] }
 0x551   : > { %17082 = vst [vmem:[#allocation12_spill] sm:$0xff] %v15014_v40 }
 0x552   : > { %v5953_v27 = vmax.f32 %v5867_v2, 0.0  ;;  %7350 = vmatmul.mubr.f32.gmra.mrb[130].mxu1 %v15014_v40 }
 0x553   : > { %v5646_v11 = vpop.f32.mrb[206].mxu0  ;;  %7354 = vmatprep.mubr.f32.mxu1 %v5951_v29  ;;  %v15017_v42 = vld [vmem:[#allocation2 + $0x97] sm:$0xff] }
 0x554   : > { %17083 = vst [vmem:[#allocation31_spill] sm:$0xff] %v15017_v42  ;;  %v15019_v58 = vld [vmem:[#allocation2 + $0x91] sm:$0xff]  ;;  %5985 = vst [vmem:[#allocation2 + $0xa8] sm:$0xff] %v5953_v27  ;;  %v5872_v56 = vadd.f32 %v17085_v59, %v5646_v11  ;;  %v5648_v19 = vpop.f32.mrb[207].mxu0  ;;  %v6049_v41 = vmul.f32 %v16898_v4, %v15017_v42 }
 0x555   : > { %17084 = vst [vmem:[#allocation53_spill] sm:$0xff] %v15019_v58  ;;  %v6716_v5 = vmul.f32 %v17086_v51, %v15019_v58  ;;  %v17095_v58 = vld [vmem:[#allocation7_spill] sm:$0xff] }
 0x556   : > { %v5954_v3 = vmax.f32 %v5872_v56, 0.0  ;;  %7355 = vmatmul.mubr.f32.gmra.mrb[132].mxu1 %v6049_v41 }
 0x557   : > { %10464 = vmatmul.mubr.f32.gmra.mrb[244].mxu0 %v6716_v5  ;;  %v5651_v2 = vpop.f32.mrb[208].mxu0  ;;  %7359 = vmatprep.mubr.f32.mxu1 %v5952_v37  ;;  %v15026_v29 = vld [vmem:[#allocation2 + $0x99] sm:$0xff]  ;;  %v17092_v37 = vld [vmem:[#allocation54_spill] sm:$0xff] }
 0x558   : > { %17087 = vst [vmem:[#allocation35_spill] sm:$0xff] %v15026_v29  ;;  %5986 = vst [vmem:[#allocation2 + $0xb0] sm:$0xff] %v5954_v3  ;;  %v5877_v40 = vadd.f32 %v17088_v54, %v5651_v2  ;;  %v5653_v52 = vpop.f32.mrb[209].mxu0  ;;  %10466 = vmatprep.mubr.f32.mxu0 %v15026_v29  ;;  %v15030_v19 = vld [vmem:[#allocation2 + $0x9f] sm:$0xff]  ;;  %v17093_v54 = vld [vmem:[#allocation23_spill] sm:$0xff] }
 0x559   : > { %17089 = vst [vmem:[#allocation18_spill] sm:$0xff] %v15030_v19 }
 0x55a   : > { %v5955_v11 = vmax.f32 %v5877_v40, 0.0  ;;  %7360 = vmatmul.mubr.f32.gmra.mrb[134].mxu1 %v15030_v19 }
 0x55b   : > { %v5656_v59 = vpop.f32.mrb[210].mxu0  ;;  %7364 = vmatprep.mubr.f32.mxu1 %v5953_v27  ;;  %v15033_v56 = vld [vmem:[#allocation2 + $0xa7] sm:$0xff] }
 0x55c   : > { %17090 = vst [vmem:[#allocation49_spill] sm:$0xff] %v15033_v56  ;;  %v15035_v41 = vld [vmem:[#allocation2 + $0xa1] sm:$0xff]  ;;  %5987 = vst [vmem:[#allocation2 + $0xb8] sm:$0xff] %v5955_v11  ;;  %v5882_v5 = vadd.f32 %v17092_v37, %v5656_v59  ;;  %v5658_v4 = vpop.f32.mrb[211].mxu0  ;;  %v6051_v52 = vmul.f32 %v17014_v39, %v15033_v56 }
 0x55d   : > { %17091 = vst [vmem:[#allocation37_spill] sm:$0xff] %v15035_v41  ;;  %v6718_v2 = vmul.f32 %v17093_v54, %v15035_v41  ;;  %v17102_v41 = vld [vmem:[#allocation25_spill] sm:$0xff] }
 0x55e   : > { %v5956_v29 = vmax.f32 %v5882_v5, 0.0  ;;  %7365 = vmatmul.mubr.f32.gmra.mrb[136].mxu1 %v6051_v52 }
 0x55f   : > { %10467 = vmatmul.mubr.f32.gmra.mrb[246].mxu0 %v6718_v2  ;;  %v5661_v40 = vpop.f32.mrb[212].mxu0  ;;  %7369 = vmatprep.mubr.f32.mxu1 %v5954_v3  ;;  %v15042_v27 = vld [vmem:[#allocation2 + $0xa9] sm:$0xff]  ;;  %v17099_v3 = vld [vmem:[#allocation56_spill] sm:$0xff] }
 0x560   : > { %17094 = vst [vmem:[#allocation46_spill] sm:$0xff] %v15042_v27  ;;  %5988 = vst [vmem:[#allocation2 + $0xc0] sm:$0xff] %v5956_v29  ;;  %v5887_v19 = vadd.f32 %v17095_v58, %v5661_v40  ;;  %v5663_v42 = vpop.f32.mrb[213].mxu0  ;;  %10469 = vmatprep.mubr.f32.mxu0 %v15042_v27  ;;  %v15046_v4 = vld [vmem:[#allocation2 + $0xaf] sm:$0xff] }
 0x561   : > { %17096 = vst [vmem:[#allocation51_spill] sm:$0xff] %v15046_v4  ;;  %v17100_v58 = vld [vmem:[#allocation26_spill] sm:$0xff] }
 0x562   : > { %v5957_v59 = vmax.f32 %v5887_v19, 0.0  ;;  %7370 = vmatmul.mubr.f32.gmra.mrb[138].mxu1 %v15046_v4 }
 0x563   : > { %v5666_v37 = vpop.f32.mrb[214].mxu0  ;;  %7374 = vmatprep.mubr.f32.mxu1 %v5955_v11  ;;  %v15049_v5 = vld [vmem:[#allocation2 + $0xb7] sm:$0xff] }
 0x564   : > { %17097 = vst [vmem:[#allocation48_spill] sm:$0xff] %v15049_v5  ;;  %v15051_v52 = vld [vmem:[#allocation2 + $0xb1] sm:$0xff]  ;;  %5989 = vst [vmem:[#allocation2 + $0xc8] sm:$0xff] %v5957_v59  ;;  %v5892_v2 = vadd.f32 %v17099_v3, %v5666_v37  ;;  %v5668_v39 = vpop.f32.mrb[215].mxu0  ;;  %v6053_v42 = vmul.f32 %v17018_v33, %v15049_v5 }
 0x565   : > { %17098 = vst [vmem:[#allocation47_spill] sm:$0xff] %v15051_v52  ;;  %v6720_v40 = vmul.f32 %v17100_v58, %v15051_v52  ;;  %v17109_v52 = vld [vmem:[#allocation27_spill] sm:$0xff] }
 0x566   : > { %v5958_v27 = vmax.f32 %v5892_v2, 0.0  ;;  %7375 = vmatmul.mubr.f32.gmra.mrb[140].mxu1 %v6053_v42 }
 0x567   : > { %10470 = vmatmul.mubr.f32.gmra.mrb[248].mxu0 %v6720_v40  ;;  %v5671_v19 = vpop.f32.mrb[216].mxu0  ;;  %7379 = vmatprep.mubr.f32.mxu1 %v5956_v29  ;;  %v15058_v11 = vld [vmem:[#allocation2 + $0xb9] sm:$0xff] }
 0x568   : > { %17101 = vst [vmem:[#allocation52_spill] sm:$0xff] %v15058_v11  ;;  %5990 = vst [vmem:[#allocation2 + $0xd0] sm:$0xff] %v5958_v27  ;;  %v5897_v4 = vadd.f32 %v17102_v41, %v5671_v19  ;;  %v5673_v56 = vpop.f32.mrb[217].mxu0  ;;  %10472 = vmatprep.mubr.f32.mxu0 %v15058_v11  ;;  %v15062_v39 = vld [vmem:[#allocation2 + $0xbf] sm:$0xff]  ;;  %v17107_v41 = vld [vmem:[#allocation30_spill] sm:$0xff] }
 0x569   : > { %17103 = vst [vmem:[#allocation32_spill] sm:$0xff] %v15062_v39  ;;  %v17106_v29 = vld [vmem:[#allocation8_spill] sm:$0xff] }
 0x56a   : > { %v5959_v37 = vmax.f32 %v5897_v4, 0.0  ;;  %7380 = vmatmul.mubr.f32.gmra.mrb[142].mxu1 %v15062_v39 }
 0x56b   : > { %v5676_v3 = vpop.f32.mrb[218].mxu0  ;;  %7384 = vmatprep.mubr.f32.mxu1 %v5957_v59  ;;  %v15065_v2 = vld [vmem:[#allocation2 + $0xc7] sm:$0xff] }
 0x56c   : > { %17104 = vst [vmem:[#allocation55_spill] sm:$0xff] %v15065_v2  ;;  %v15067_v42 = vld [vmem:[#allocation2 + $0xc1] sm:$0xff]  ;;  %5991 = vst [vmem:[#allocation2 + $0xd8] sm:$0xff] %v5959_v37  ;;  %v5902_v40 = vadd.f32 %v17106_v29, %v5676_v3  ;;  %v5678_v33 = vpop.f32.mrb[219].mxu0  ;;  %v6055_v56 = vmul.f32 %v16979_v38, %v15065_v2 }
 0x56d   : > { %17105 = vst [vmem:[#allocation54_spill] sm:$0xff] %v15067_v42  ;;  %v6722_v19 = vmul.f32 %v17107_v41, %v15067_v42  ;;  %v17115_v42 = vld [vmem:[#allocation57_spill] sm:$0xff] }
 0x56e   : > { %v5960_v11 = vmax.f32 %v5902_v40, 0.0  ;;  %7385 = vmatmul.mubr.f32.gmra.mrb[144].mxu1 %v6055_v56 }
 0x56f   : > { %10473 = vmatmul.mubr.f32.gmra.mrb[250].mxu0 %v6722_v19  ;;  %v5681_v4 = vpop.f32.mrb[220].mxu0  ;;  %7389 = vmatprep.mubr.f32.mxu1 %v5958_v27  ;;  %v15074_v59 = vld [vmem:[#allocation2 + $0xc9] sm:$0xff]  ;;  %v17112_v27 = vld [vmem:[#allocation9_spill] sm:$0xff] }
 0x570   : > { %17108 = vst [vmem:[#allocation23_spill] sm:$0xff] %v15074_v59  ;;  %5992 = vst [vmem:[#allocation2 + $0xe0] sm:$0xff] %v5960_v11  ;;  %v5907_v39 = vadd.f32 %v17109_v52, %v5681_v4  ;;  %v5683_v5 = vpop.f32.mrb[221].mxu0  ;;  %10475 = vmatprep.mubr.f32.mxu0 %v15074_v59  ;;  %v15078_v33 = vld [vmem:[#allocation2 + $0xcf] sm:$0xff]  ;;  %v17113_v52 = vld [vmem:[#allocation36_spill] sm:$0xff] }
 0x571   : > { %17110 = vst [vmem:[#allocation7_spill] sm:$0xff] %v15078_v33 }
 0x572   : > { %v5961_v3 = vmax.f32 %v5907_v39, 0.0  ;;  %7390 = vmatmul.mubr.f32.gmra.mrb[146].mxu1 %v15078_v33 }
 0x573   : > { %v5686_v29 = vpop.f32.mrb[222].mxu0  ;;  %7394 = vmatprep.mubr.f32.mxu1 %v5959_v37  ;;  %v15081_v40 = vld [vmem:[#allocation2 + $0xd7] sm:$0xff] }
 0x574   : > { %v15083_v56 = vld [vmem:[#allocation2 + $0xd1] sm:$0xff]  ;;  %5993 = vst [vmem:[#allocation2 + $0xe8] sm:$0xff] %v5961_v3  ;;  %v5912_v19 = vadd.f32 %v17112_v27, %v5686_v29  ;;  %v5688_v38 = vpop.f32.mrb[223].mxu0  ;;  %v6057_v5 = vmul.f32 %v16984_v57, %v15081_v40 }
 0x575   : > { %17111 = vst [vmem:[#allocation56_spill] sm:$0xff] %v15083_v56  ;;  %v6724_v4 = vmul.f32 %v17113_v52, %v15083_v56 }
 0x576   : > { %v5962_v59 = vmax.f32 %v5912_v19, 0.0  ;;  %7395 = vmatmul.mubr.f32.gmra.mrb[148].mxu1 %v6057_v5 }
 0x577   : > { %10476 = vmatmul.mubr.f32.gmra.mrb[252].mxu0 %v6724_v4  ;;  %v5691_v39 = vpop.f32.mrb[224].mxu0  ;;  %7399 = vmatprep.mubr.f32.mxu1 %v5960_v11  ;;  %v15090_v37 = vld [vmem:[#allocation2 + $0xd9] sm:$0xff]  ;;  %v17117_v11 = vld [vmem:[#allocation10_spill] sm:$0xff] }
 0x578   : > { %17114 = vst [vmem:[#allocation25_spill] sm:$0xff] %v15090_v37  ;;  %5994 = vst [vmem:[#allocation2 + $0xf0] sm:$0xff] %v5962_v59  ;;  %v5917_v33 = vadd.f32 %v17115_v42, %v5691_v39  ;;  %v5693_v2 = vpop.f32.mrb[225].mxu0  ;;  %10478 = vmatprep.mubr.f32.mxu0 %v15090_v37  ;;  %v15094_v38 = vld [vmem:[#allocation2 + $0xdf] sm:$0xff]  ;;  %v17118_v42 = vld [vmem:[#allocation39_spill] sm:$0xff] }
 0x579   : > { %17116 = vst [vmem:[#allocation8_spill] sm:$0xff] %v15094_v38 }
 0x57a   : > { %v5963_v29 = vmax.f32 %v5917_v33, 0.0  ;;  %7400 = vmatmul.mubr.f32.gmra.mrb[150].mxu1 %v15094_v38 }
 0x57b   : > { %v5696_v27 = vpop.f32.mrb[226].mxu0  ;;  %7404 = vmatprep.mubr.f32.mxu1 %v5961_v3  ;;  %v15097_v19 = vld [vmem:[#allocation2 + $0xe7] sm:$0xff] }
 0x57c   : > { %v15099_v5 = vld [vmem:[#allocation2 + $0xe1] sm:$0xff]  ;;  %5995 = vst [vmem:[#allocation2 + $0xf8] sm:$0xff] %v5963_v29  ;;  %v5922_v4 = vadd.f32 %v17117_v11, %v5696_v27  ;;  %v5698_v57 = vpop.f32.mrb[227].mxu0  ;;  %v6059_v2 = vmul.f32 %v16990_v46, %v15097_v19 }
 0x57d   : > { %v6726_v39 = vmul.f32 %v17118_v42, %v15099_v5 }
 0x57e   : > { %v5964_v37 = vmax.f32 %v5922_v4, 0.0  ;;  %7405 = vmatmul.mubr.f32.gmra.mrb[152].mxu1 %v6059_v2 }
 0x57f   : > { %10479 = vmatmul.mubr.f32.gmra.mrb[254].mxu0 %v6726_v39  ;;  %v5701_v33 = vpop.f32.mrb[228].mxu0  ;;  %7409 = vmatprep.mubr.f32.mxu1 %v5962_v59  ;;  %v15106_v3 = vld [vmem:[#allocation2 + $0xe9] sm:$0xff] }
 0x580   : > { %17119 = vst [vmem:[#allocation27_spill] sm:$0xff] %v15106_v3  ;;  %5996 = vst [vmem:[#allocation2 + $0x100] sm:$0xff] %v5964_v37  ;;  %v5927_v56 = vadd.f32 %v14887_v15, %v5701_v33  ;;  %v5703_v38 = vpop.f32.mrb[229].mxu0  ;;  %10481 = vmatprep.mubr.f32.mxu0 %v15106_v3  ;;  %v15110_v57 = vld [vmem:[#allocation2 + $0xef] sm:$0xff] }
 0x581   : > { %v17120_v38 = vld [vmem:[#allocation41_spill] sm:$0xff] }
 0x582   : > { %v5965_v27 = vmax.f32 %v5927_v56, 0.0  ;;  %7410 = vmatmul.mubr.f32.gmra.mrb[154].mxu1 %v15110_v57 }
 0x583   : > { %v5706_v11 = vpop.f32.mrb[230].mxu0  ;;  %7414 = vmatprep.mubr.f32.mxu1 %v5963_v29  ;;  %v15113_v4 = vld [vmem:[#allocation2 + $0xf7] sm:$0xff]  ;;  %v9897_v29 = vld [vmem:[%s16586_s2 + $0xb08] sm:$0xff] }
 0x584   : > { %v15115_v2 = vld [vmem:[#allocation2 + $0xf1] sm:$0xff]  ;;  %5997 = vst [vmem:[#allocation2 + $0x108] sm:$0xff] %v5965_v27  ;;  %v5932_v59 = vadd.f32 %v14879_v45, %v5706_v11  ;;  %v5708_v39 = vpop.f32.mrb[231].mxu0  ;;  %v6061_v15 = vmul.f32 %v17032_v61, %v15113_v4  ;;  %v9896_v45 = vld [vmem:[%s16586_s2 + $0xb00] sm:$0xff]  ;;  %v6287_v11 = vmul.f32 %v16994_v18, %v14900_v8 }
 0x585   : > { %v6728_v33 = vmul.f32 %v17120_v38, %v15115_v2  ;;  %v17123_v39 = vld [vmem:[#allocation43_spill] sm:$0xff]  ;;  %v17125_v18 = vld [vmem:[#allocation45_spill] sm:$0xff] }
 0x586   : > { %v5966_v3 = vmax.f32 %v5932_v59, 0.0  ;;  %7415 = vmatmul.mubr.f32.gmra.mrb[156].mxu1 %v6061_v15  ;;  %v6160_v61 = vld [vmem:[#allocation2 + $0x11] sm:$0xff] }
 0x587   : > { %10482 = vmatmul.mubr.f32.gmra.mrb[0].mxu0 %v6728_v33  ;;  %7419 = vmatprep.mubr.f32.mxu1 %v5964_v37  ;;  %v15122_v56 = vld [vmem:[#allocation2 + $0xf9] sm:$0xff]  ;;  %v6159_v37 = vld [vmem:[#allocation2 + $0x9] sm:$0xff] }
 0x588   : > { %17121 = vst [vmem:[#allocation9_spill] sm:$0xff] %v15122_v56  ;;  %5998 = vst [vmem:[#allocation2 + $0x110] sm:$0xff] %v5966_v3  ;;  %10484 = vmatprep.mubr.f32.mxu0 %v15122_v56  ;;  %v15131_v27 = vld [vmem:[#allocation2 + $0xff] sm:$0xff]  ;;  %v11070_v3 = vpack.c.bf16 %v9897_v29, %v9896_v45  ;;  %v9898_v33 = vld [vmem:[%s16586_s2 + $0xb10] sm:$0xff] }
 0x589   : > { %v9899_v56 = vld [vmem:[%s16586_s2 + $0xb18] sm:$0xff] }
 0x58a   : > { %7420 = vmatmul.mubr.f32.gmra.mrb[158].mxu1 %v15131_v27  ;;  %v11073_v29 = vpack.c.bf16 %v9899_v56, %v9898_v33  ;;  %v6289_v56 = vmul.f32 %v12372_v47, %v14909_v35  ;;  %v15171_v33 = vld [vmem:[#allocation2 + $0x19] sm:$0xff] }
 0x58b   : > { %7489 = vmatprep.mubr.f32.mxu1 %v6287_v11  ;;  %v15136_v59 = vld [vmem:[#allocation2 + $0x101] sm:$0xff]  ;;  %v6192_v11 = vmul.f32 %v17061_v44, %v6160_v61 }
 0x58c   : > { %17122 = vst [vmem:[#allocation36_spill] sm:$0xff] %v15136_v59  ;;  %v6730_v15 = vmul.f32 %v17123_v39, %v15136_v59 }
 0x58e   : > { %7490 = vmatmul.mubr.f32.vlgmr.msra.gmra.mrb[96].mxu1 %v6159_v37  ;;  %10485 = vmatmul.mubr.f32.gmra.mrb[2].mxu0 %v6730_v15  ;;  %v9900_v37 = vld [vmem:[%s16586_s2 + $0xb20] sm:$0xff]  ;;  %v9903_v15 = vld [vmem:[%s16586_s2 + $0xb38] sm:$0xff] }
 0x58f   : > { %11071 = vmatpush1.bf16.msra.mxu1 %v11070_v3  ;;  %7494 = vmatprep.mubr.f32.mxu1 %v14906_v10  ;;  %v15147_v8 = vld [vmem:[#allocation2 + $0x109] sm:$0xff]  ;;  %v15149_v45 = vld [vmem:[#allocation2 + $0x111] sm:$0xff] }
 0x590   : > { %17124 = vst [vmem:[#allocation57_spill] sm:$0xff] %v15149_v45  ;;  %10487 = vmatprep.mubr.f32.mxu0 %v15147_v8  ;;  %v6732_v59 = vmul.f32 %v17125_v18, %v15149_v45  ;;  %11072 = vmatprep.subr.bf16.mxu1 %v16835_v1  ;;  %v9901_v10 = vld [vmem:[%s16586_s2 + $0xb28] sm:$0xff]  ;;  %v9902_v3 = vld [vmem:[%s16586_s2 + $0xb30] sm:$0xff] }
 0x591   : > { %v11076_v61 = vpack.c.bf16 %v9901_v10, %v9900_v37  ;;  %v15173_v45 = vld [vmem:[#allocation2 + $0x21] sm:$0xff]  ;;  %v11079_v35 = vpack.c.bf16 %v9903_v15, %v9902_v3  ;;  %v6291_v37 = vmul.f32 %v12412_v26, %v14921_v17  ;;  %v9906_v10 = vld [vmem:[%s16586_s2 + $0xb50] sm:$0xff] }
 0x592   : > { %7495 = vmatmul.mubr.f32.gmra.mrb[98].mxu1 %v6192_v11  ;;  %10488 = vmatmul.mubr.f32.gmra.mrb[4].mxu0 %v6732_v59  ;;  %v6194_v59 = vmul.f32 %v17064_v7, %v15173_v45  ;;  %v9905_v11 = vld [vmem:[%s16586_s2 + $0xb48] sm:$0xff]  ;;  %v9908_v3 = vld [vmem:[%s16586_s2 + $0xb60] sm:$0xff] }
 0x593   : > { %7499 = vmatprep.mubr.f32.mxu1 %v6289_v56  ;;  %11074 = vmatpush1.bf16.msra.mxu1 %v11073_v29  ;;  %v9904_v29 = vld [vmem:[%s16586_s2 + $0xb40] sm:$0xff]  ;;  %v9907_v56 = vld [vmem:[%s16586_s2 + $0xb58] sm:$0xff]  ;;  %v9909_v15 = vld [vmem:[%s16586_s2 + $0xb68] sm:$0xff] }
 0x594   : > { %11075 = vmatprep.subr.bf16.mxu1 %v16835_v1  ;;  %v11085_v17 = vpack.c.bf16 %v9907_v56, %v9906_v10  ;;  %v9916_v10 = vld [vmem:[%s16586_s2 + $0xba0] sm:$0xff]  ;;  %v9917_v56 = vld [vmem:[%s16586_s2 + $0xba8] sm:$0xff] }
 0x596   : > { %7500 = vmatmul.mubr.f32.gmra.mrb[100].mxu1 %v15171_v33 }
 0x597   : > { %7504 = vmatprep.mubr.f32.mxu1 %v14918_v25  ;;  %11077 = vmatpush1.bf16.msra.mxu1 %v11076_v61  ;;  %v11082_v25 = vpack.c.bf16 %v9905_v11, %v9904_v29  ;;  %v6196_v61 = vmul.f32 %v17067_v24, %v14923_v63  ;;  %v9910_v63 = vld [vmem:[%s16586_s2 + $0xb70] sm:$0xff]  ;;  %v9912_v29 = vld [vmem:[%s16586_s2 + $0xb80] sm:$0xff]  ;;  %v9913_v11 = vld [vmem:[%s16586_s2 + $0xb88] sm:$0xff] }
 0x598   : > { %11078 = vmatprep.subr.bf16.mxu1 %v16835_v1 }
 0x59a   : > { %7505 = vmatmul.mubr.f32.gmra.mrb[102].mxu1 %v6194_v59  ;;  %v6198_v59 = vmul.f32 %v17070_v36, %v14939_v50  ;;  %v9914_v50 = vld [vmem:[%s16586_s2 + $0xb90] sm:$0xff] }
 0x59b   : > { %7509 = vmatprep.mubr.f32.mxu1 %v6291_v37  ;;  %11080 = vmatpush1.bf16.msra.mxu1 %v11079_v35  ;;  %v9911_v35 = vld [vmem:[%s16586_s2 + $0xb78] sm:$0xff] }
 0x59c   : > { %11081 = vmatprep.subr.bf16.mxu1 %v16835_v1  ;;  %v9915_v37 = vld [vmem:[%s16586_s2 + $0xb98] sm:$0xff] }
 0x59e   : > { %7510 = vmatmul.mubr.f32.gmra.mrb[104].mxu1 %v14914_v60  ;;  %v6293_v60 = vmul.f32 %v12459_v32, %v14937_v49  ;;  %v11091_v49 = vpack.c.bf16 %v9911_v35, %v9910_v63  ;;  %v9924_v63 = vld [vmem:[%s16586_s2 + $0xbe0] sm:$0xff]  ;;  %v9925_v35 = vld [vmem:[%s16586_s2 + $0xbe8] sm:$0xff] }
 0x59f   : > { %7514 = vmatprep.mubr.f32.mxu1 %v14934_v0  ;;  %11083 = vmatpush1.bf16.msra.mxu1 %v11082_v25  ;;  %v11088_v0 = vpack.c.bf16 %v9909_v15, %v9908_v3  ;;  %v6200_v25 = vmul.f32 %v17073_v14, %v14955_v20  ;;  %v9918_v20 = vld [vmem:[%s16586_s2 + $0xbb0] sm:$0xff]  ;;  %v9920_v3 = vld [vmem:[%s16586_s2 + $0xbc0] sm:$0xff]  ;;  %v9921_v15 = vld [vmem:[%s16586_s2 + $0xbc8] sm:$0xff] }
 0x5a0   : > { %11084 = vmatprep.subr.bf16.mxu1 %v16835_v1 }
 0x5a2   : > { %7515 = vmatmul.mubr.f32.gmra.mrb[106].mxu1 %v6196_v61  ;;  %v6202_v61 = vmul.f32 %v17079_v55, %v14971_v53  ;;  %v9922_v53 = vld [vmem:[%s16586_s2 + $0xbd0] sm:$0xff] }
 0x5a3   : > { %7519 = vmatprep.mubr.f32.mxu1 %v6293_v60  ;;  %11086 = vmatpush1.bf16.msra.mxu1 %v11085_v17  ;;  %v9919_v17 = vld [vmem:[%s16586_s2 + $0xbb8] sm:$0xff] }
 0x5a4   : > { %11087 = vmatprep.subr.bf16.mxu1 %v16835_v1  ;;  %v9923_v60 = vld [vmem:[%s16586_s2 + $0xbd8] sm:$0xff] }
 0x5a6   : > { %7520 = vmatmul.mubr.f32.gmra.mrb[108].mxu1 %v14930_v62  ;;  %v6295_v62 = vmul.f32 %v12522_v43, %v14953_v31  ;;  %v11097_v31 = vpack.c.bf16 %v9915_v37, %v9914_v50  ;;  %v17130_v50 = vld [vmem:[#allocation11_spill] sm:$0xff] }
 0x5a7   : > { %7524 = vmatprep.mubr.f32.mxu1 %v14950_v16  ;;  %11089 = vmatpush1.bf16.msra.mxu1 %v11088_v0  ;;  %v11094_v16 = vpack.c.bf16 %v9913_v11, %v9912_v29  ;;  %v6204_v0 = vmul.f32 %v17086_v51, %v14987_v34  ;;  %v9926_v34 = vld [vmem:[%s16586_s2 + $0xbf0] sm:$0xff]  ;;  %v9927_v29 = vld [vmem:[%s16586_s2 + $0xbf8] sm:$0xff]  ;;  %v17128_v11 = vld [vmem:[#allocation34_spill] sm:$0xff]  ;;  %v6206_v37 = vmul.f32 %v17093_v54, %v17130_v50 }
 0x5a8   : > { %11090 = vmatprep.subr.bf16.mxu1 %v16835_v1  ;;  %v17151_v50 = vld [vmem:[#allocation38_spill] sm:$0xff] }
 0x5aa   : > { %7525 = vmatmul.mubr.f32.gmra.mrb[110].mxu1 %v6198_v59  ;;  %v17127_v59 = vld [vmem:[#allocation20_spill] sm:$0xff] }
 0x5ab   : > { %7529 = vmatprep.mubr.f32.mxu1 %v6295_v62  ;;  %11092 = vmatpush1.bf16.msra.mxu1 %v11091_v49  ;;  %v17126_v49 = vld [vmem:[#allocation29_spill] sm:$0xff]  ;;  %v17129_v62 = vld [vmem:[#allocation12_spill] sm:$0xff] }
 0x5ac   : > { %11093 = vmatprep.subr.bf16.mxu1 %v16835_v1 }
 0x5ae   : > { %7530 = vmatmul.mubr.f32.gmra.mrb[112].mxu1 %v14946_v21  ;;  %v6297_v21 = vmul.f32 %v16998_v6, %v14969_v13  ;;  %v11103_v13 = vpack.c.bf16 %v9919_v17, %v9918_v20  ;;  %v17136_v17 = vld [vmem:[#allocation49_spill] sm:$0xff] }
 0x5af   : > { %7534 = vmatprep.mubr.f32.mxu1 %v14966_v23  ;;  %11095 = vmatpush1.bf16.msra.mxu1 %v11094_v16  ;;  %v11100_v23 = vpack.c.bf16 %v9917_v56, %v9916_v10  ;;  %v11115_v16 = vpack.c.bf16 %v9927_v29, %v9926_v34  ;;  %v17133_v56 = vld [vmem:[#allocation16_spill] sm:$0xff] }
 0x5b0   : > { %11096 = vmatprep.subr.bf16.mxu1 %v16835_v1  ;;  %v17148_v29 = vld [vmem:[#allocation52_spill] sm:$0xff] }
 0x5b2   : > { %7535 = vmatmul.mubr.f32.gmra.mrb[114].mxu1 %v6200_v25  ;;  %v17132_v25 = vld [vmem:[#allocation22_spill] sm:$0xff] }
 0x5b3   : > { %7539 = vmatprep.mubr.f32.mxu1 %v6297_v21  ;;  %11098 = vmatpush1.bf16.msra.mxu1 %v11097_v31  ;;  %v17131_v31 = vld [vmem:[#allocation31_spill] sm:$0xff]  ;;  %v17134_v21 = vld [vmem:[#allocation18_spill] sm:$0xff] }
 0x5b4   : > { %11099 = vmatprep.subr.bf16.mxu1 %v16835_v1  ;;  %v6303_v10 = vmul.f32 %v17132_v25, %v17131_v31  ;;  %v17152_v31 = vld [vmem:[#allocation23_spill] sm:$0xff] }
 0x5b6   : > { %7540 = vmatmul.mubr.f32.gmra.mrb[116].mxu1 %v14962_v9  ;;  %v6299_v9 = vmul.f32 %v17003_v30, %v14985_v28  ;;  %v11109_v28 = vpack.c.bf16 %v9923_v60, %v9922_v53  ;;  %v17141_v53 = vld [vmem:[#allocation48_spill] sm:$0xff] }
 0x5b7   : > { %7544 = vmatprep.mubr.f32.mxu1 %v14982_v22  ;;  %11101 = vmatpush1.bf16.msra.mxu1 %v11100_v23  ;;  %v11106_v22 = vpack.c.bf16 %v9921_v15, %v9920_v3  ;;  %v17135_v23 = vld [vmem:[#allocation53_spill] sm:$0xff]  ;;  %v17138_v3 = vld [vmem:[#allocation35_spill] sm:$0xff]  ;;  %v17142_v60 = vld [vmem:[#allocation28_spill] sm:$0xff] }
 0x5b8   : > { %11102 = vmatprep.subr.bf16.mxu1 %v16835_v1  ;;  %v6208_v20 = vmul.f32 %v17100_v58, %v17135_v23  ;;  %v17139_v15 = vld [vmem:[#allocation51_spill] sm:$0xff]  ;;  %v17155_v23 = vld [vmem:[#allocation40_spill] sm:$0xff] }
 0x5ba   : > { %7545 = vmatmul.mubr.f32.gmra.mrb[118].mxu1 %v6202_v61 }
 0x5bb   : > { %7549 = vmatprep.mubr.f32.mxu1 %v6299_v9  ;;  %11104 = vmatpush1.bf16.msra.mxu1 %v11103_v13  ;;  %v17137_v13 = vld [vmem:[#allocation24_spill] sm:$0xff]  ;;  %v17140_v9 = vld [vmem:[#allocation37_spill] sm:$0xff] }
 0x5bc   : > { %11105 = vmatprep.subr.bf16.mxu1 %v16835_v1  ;;  %v6305_v61 = vmul.f32 %v17137_v13, %v17136_v17  ;;  %v17156_v17 = vld [vmem:[#allocation25_spill] sm:$0xff] }
 0x5be   : > { %7550 = vmatmul.mubr.f32.gmra.mrb[120].mxu1 %v14978_v48  ;;  %v6301_v48 = vmul.f32 %v17127_v59, %v17126_v49 }
 0x5bf   : > { %7554 = vmatprep.mubr.f32.mxu1 %v14998_v12  ;;  %11107 = vmatpush1.bf16.msra.mxu1 %v11106_v22  ;;  %v11112_v12 = vpack.c.bf16 %v9925_v35, %v9924_v63  ;;  %v6210_v22 = vmul.f32 %v17107_v41, %v17140_v9  ;;  %v17144_v63 = vld [vmem:[#allocation32_spill] sm:$0xff]  ;;  %v17145_v35 = vld [vmem:[#allocation47_spill] sm:$0xff] }
 0x5c0   : > { %11108 = vmatprep.subr.bf16.mxu1 %v16835_v1  ;;  %v6212_v49 = vmul.f32 %v17113_v52, %v17145_v35  ;;  %v17157_v9 = vld [vmem:[#allocation27_spill] sm:$0xff]  ;;  %v17160_v35 = vld [vmem:[#allocation36_spill] sm:$0xff] }
 0x5c2   : > { %7555 = vmatmul.mubr.f32.gmra.mrb[122].mxu1 %v6204_v0  ;;  %v17143_v0 = vld [vmem:[#allocation46_spill] sm:$0xff] }
 0x5c3   : > { %7559 = vmatprep.mubr.f32.mxu1 %v6301_v48  ;;  %11110 = vmatpush1.bf16.msra.mxu1 %v11109_v28  ;;  %v6307_v28 = vmul.f32 %v17142_v60, %v17141_v53  ;;  %v17146_v48 = vld [vmem:[#allocation55_spill] sm:$0xff]  ;;  %v17158_v53 = vld [vmem:[#allocation44_spill] sm:$0xff] }
 0x5c4   : > { %11111 = vmatprep.subr.bf16.mxu1 %v16835_v1 }
 0x5c6   : > { %7560 = vmatmul.mubr.f32.gmra.mrb[124].mxu1 %v17128_v11  ;;  %v17149_v11 = vld [vmem:[#allocation7_spill] sm:$0xff] }
 0x5c7   : > { %7564 = vmatprep.mubr.f32.mxu1 %v17129_v62  ;;  %11113 = vmatpush1.bf16.msra.mxu1 %v11112_v12  ;;  %v17147_v12 = vld [vmem:[#allocation33_spill] sm:$0xff]  ;;  %v17150_v62 = vld [vmem:[#allocation54_spill] sm:$0xff] }
 0x5c8   : > { %11114 = vmatprep.subr.bf16.mxu1 %v16835_v1  ;;  %v6309_v34 = vmul.f32 %v17147_v12, %v17146_v48  ;;  %v9928_v48 = vld [vmem:[%s16586_s2 + $0xc00] sm:$0xff] }
 0x5ca   : > { %7565 = vmatmul.mubr.f32.gmra.mrb[126].mxu1 %v6206_v37  ;;  %v6311_v37 = vmul.f32 %v17151_v50, %v15081_v40  ;;  %v6218_v40 = vmul.f32 %v17123_v39, %v15099_v5 }
 0x5cb   : > { %7569 = vmatprep.mubr.f32.mxu1 %v6303_v10  ;;  %11116 = vmatpush1.bf16.msra.mxu1 %v11115_v16  ;;  %v6214_v16 = vmul.f32 %v17118_v42, %v17150_v62  ;;  %v17153_v10 = vld [vmem:[#allocation8_spill] sm:$0xff] }
 0x5cc   : > { %11117 = vmatprep.subr.bf16.mxu1 %v16835_v1 }
 0x5ce   : > { %7570 = vmatmul.mubr.f32.gmra.mrb[128].mxu1 %v17133_v56  ;;  %v17154_v56 = vld [vmem:[#allocation56_spill] sm:$0xff] }
 0x5cf   : > { %7574 = vmatprep.mubr.f32.mxu1 %v17134_v21  ;;  %v6216_v21 = vmul.f32 %v17120_v38, %v17154_v56 }
 0x5d2   : > { %7575 = vmatmul.mubr.f32.gmra.mrb[130].mxu1 %v6208_v20  ;;  %v6313_v20 = vmul.f32 %v17155_v23, %v15097_v19  ;;  %v15344_v19 = vld [vmem:[#allocation2 + $0x107] sm:$0xff] }
 0x5d3   : > { %7579 = vmatprep.mubr.f32.mxu1 %v6305_v61 }
 0x5d6   : > { %7580 = vmatmul.mubr.f32.gmra.mrb[132].mxu1 %v17138_v3  ;;  %v6315_v3 = vmul.f32 %v16990_v46, %v15113_v4 }
 0x5d7   : > { %7584 = vmatprep.mubr.f32.mxu1 %v17139_v15 }
 0x5da   : > { %7585 = vmatmul.mubr.f32.gmra.mrb[134].mxu1 %v6210_v22 }
 0x5db   : > { %7589 = vmatprep.mubr.f32.mxu1 %v6307_v28  ;;  %v6317_v28 = vmul.f32 %v17158_v53, %v15344_v19 }
 0x5de   : > { %7590 = vmatmul.mubr.f32.gmra.mrb[136].mxu1 %v17143_v0  ;;  %v17159_v0 = vld [vmem:[#allocation9_spill] sm:$0xff] }
 0x5df   : > { %7594 = vmatprep.mubr.f32.mxu1 %v17144_v63  ;;  %v15356_v63 = vld [vmem:[#allocation2 + $0x10f] sm:$0xff] }
 0x5e2   : > { %7595 = vmatmul.mubr.f32.gmra.mrb[138].mxu1 %v6212_v49 }
 0x5e3   : > { %7599 = vmatprep.mubr.f32.mxu1 %v6309_v34  ;;  %v9929_v34 = vld [vmem:[%s16586_s2 + $0xc08] sm:$0xff] }
 0x5e4   : > { %v11118_v62 = vpack.c.bf16 %v9929_v34, %v9928_v48  ;;  %v9934_v48 = vld [vmem:[%s16586_s2 + $0xc30] sm:$0xff]  ;;  %v9935_v34 = vld [vmem:[%s16586_s2 + $0xc38] sm:$0xff] }
 0x5e6   : > { %7600 = vmatmul.mubr.f32.gmra.mrb[140].mxu1 %v17148_v29 }
 0x5e7   : > { %7604 = vmatprep.mubr.f32.mxu1 %v17149_v11 }
 0x5ea   : > { %7605 = vmatmul.mubr.f32.gmra.mrb[142].mxu1 %v6214_v16  ;;  %v9930_v16 = vld [vmem:[%s16586_s2 + $0xc10] sm:$0xff] }
 0x5eb   : > { %7609 = vmatprep.mubr.f32.mxu1 %v6311_v37  ;;  %v9931_v37 = vld [vmem:[%s16586_s2 + $0xc18] sm:$0xff] }
 0x5ee   : > { %7610 = vmatmul.mubr.f32.gmra.mrb[144].mxu1 %v17152_v31  ;;  %v6351_v31 = vld [vmem:[#allocation2 + $0x18] sm:$0xff] }
 0x5ef   : > { %7614 = vmatprep.mubr.f32.mxu1 %v17153_v10  ;;  %v6448_v10 = vmul.f32 %v17061_v44, %v15173_v45  ;;  %v6417_v45 = vld [vmem:[#allocation2 + $0x29] sm:$0xff] }
 0x5f2   : > { %7615 = vmatmul.mubr.f32.gmra.mrb[146].mxu1 %v6216_v21  ;;  %v11121_v21 = vpack.c.bf16 %v9931_v37, %v9930_v16  ;;  %v11127_v37 = vpack.c.bf16 %v9935_v34, %v9934_v48  ;;  %v9939_v48 = vld [vmem:[%s16586_s2 + $0xc58] sm:$0xff] }
 0x5f3   : > { %7619 = vmatprep.mubr.f32.mxu1 %v6313_v20  ;;  %v9933_v20 = vld [vmem:[%s16586_s2 + $0xc28] sm:$0xff]  ;;  %v15423_v34 = vld [vmem:[#allocation2 + $0x38] sm:$0xff] }
 0x5f6   : > { %7620 = vmatmul.mubr.f32.gmra.mrb[148].mxu1 %v17156_v17 }
 0x5f7   : > { %7624 = vmatprep.mubr.f32.mxu1 %v15110_v57  ;;  %v6220_v57 = vmul.f32 %v17125_v18, %v15115_v2 }
 0x5fa   : > { %v15337_v61 = vpop.f32.mrb[232].mxu0  ;;  %7625 = vmatmul.mubr.f32.gmra.mrb[150].mxu1 %v6218_v40 }
 0x5fb   : > { %v15341_v15 = vpop.f32.mrb[233].mxu0  ;;  %7629 = vmatprep.mubr.f32.mxu1 %v6315_v3  ;;  %v6352_v3 = vld [vmem:[#allocation2 + $0x20] sm:$0xff] }
 0x5fe   : > { %7630 = vmatmul.mubr.f32.gmra.mrb[152].mxu1 %v17157_v9 }
 0x5ff   : > { %7634 = vmatprep.mubr.f32.mxu1 %v15131_v27  ;;  %v17161_v27 = vld [vmem:[#allocation50_spill] sm:$0xff] }
 0x600   : > { %v6222_v49 = vmul.f32 %v17161_v27, %v17160_v35 }
 0x602   : > { %v15349_v22 = vpop.f32.mrb[234].mxu0  ;;  %7635 = vmatmul.mubr.f32.gmra.mrb[154].mxu1 %v6220_v57 }
 0x603   : > { %v15353_v4 = vpop.f32.mrb[235].mxu0  ;;  %7639 = vmatprep.mubr.f32.mxu1 %v6317_v28  ;;  %v6418_v28 = vld [vmem:[#allocation2 + $0x31] sm:$0xff] }
 0x604   : > { %v6450_v16 = vmul.f32 %v17064_v7, %v6418_v28 }
 0x606   : > { %7640 = vmatmul.mubr.f32.gmra.mrb[156].mxu1 %v17159_v0 }
 0x607   : > { %7644 = vmatprep.mubr.f32.mxu1 %v15356_v63 }
 0x60a   : > { %v15367_v29 = vpop.f32.mrb[236].mxu0  ;;  %7645 = vmatmul.mubr.f32.gmra.mrb[158].mxu1 %v6222_v49 }
 0x60b   : > { %17162 = vst [vmem:[#allocation10_spill] sm:$0xff] %v15367_v29  ;;  %v15369_v11 = vpop.f32.mrb[237].mxu0  ;;  %7714 = vmatprep.mubr.f32.mxu1 %v15171_v33  ;;  %v9932_v33 = vld [vmem:[%s16586_s2 + $0xc20] sm:$0xff] }
 0x60c   : > { %17163 = vst [vmem:[#allocation29_spill] sm:$0xff] %v15369_v11  ;;  %v11124_v49 = vpack.c.bf16 %v9933_v20, %v9932_v33  ;;  %v15411_v33 = vld [vmem:[#allocation2 + $0x30] sm:$0xff]  ;;  %v6432_v11 = vld [vmem:[#allocation2 + $0xa1] sm:$0xff] }
 0x60e   : > { %7715 = vmatmul.mubr.f32.vlgmr.msra.gmra.mrb[96].mxu1 %v6351_v31  ;;  %v9936_v31 = vld [vmem:[%s16586_s2 + $0xc40] sm:$0xff] }
 0x60f   : > { %11119 = vmatpush1.bf16.msra.mxu1 %v11118_v62  ;;  %7719 = vmatprep.mubr.f32.mxu1 %v6448_v10  ;;  %v15398_v62 = vld [vmem:[#allocation2 + $0x28] sm:$0xff] }
 0x610   : > { %11120 = vmatprep.subr.bf16.mxu1 %v16835_v1  ;;  %v9937_v10 = vld [vmem:[%s16586_s2 + $0xc48] sm:$0xff] }
 0x611   : > { %v11130_v28 = vpack.c.bf16 %v9937_v10, %v9936_v31  ;;  %v9940_v31 = vld [vmem:[%s16586_s2 + $0xc60] sm:$0xff]  ;;  %v9941_v10 = vld [vmem:[%s16586_s2 + $0xc68] sm:$0xff] }
 0x612   : > { %v15387_v40 = vpop.f32.mrb[238].mxu0  ;;  %7720 = vmatmul.mubr.f32.gmra.mrb[98].mxu1 %v6352_v3  ;;  %v6419_v3 = vld [vmem:[#allocation2 + $0x39] sm:$0xff] }
 0x613   : > { %17164 = vst [vmem:[#allocation20_spill] sm:$0xff] %v15387_v40  ;;  %v15389_v57 = vpop.f32.mrb[239].mxu0  ;;  %7724 = vmatprep.mubr.f32.mxu1 %v6417_v45  ;;  %11122 = vmatpush1.bf16.msra.mxu1 %v11121_v21  ;;  %v6420_v45 = vld [vmem:[#allocation2 + $0x41] sm:$0xff] }
 0x614   : > { %17165 = vst [vmem:[#allocation34_spill] sm:$0xff] %v15389_v57  ;;  %11123 = vmatprep.subr.bf16.mxu1 %v16835_v1 }
 0x616   : > { %7725 = vmatmul.mubr.f32.gmra.mrb[100].mxu1 %v15398_v62 }
 0x617   : > { %7729 = vmatprep.mubr.f32.mxu1 %v6450_v16  ;;  %11125 = vmatpush1.bf16.msra.mxu1 %v11124_v49  ;;  %v9938_v49 = vld [vmem:[%s16586_s2 + $0xc50] sm:$0xff]  ;;  %v6452_v16 = vmul.f32 %v17067_v24, %v6420_v45 }
 0x618   : > { %11126 = vmatprep.subr.bf16.mxu1 %v16835_v1 }
 0x61a   : > { %v15409_v21 = vpop.f32.mrb[240].mxu0  ;;  %7730 = vmatmul.mubr.f32.gmra.mrb[102].mxu1 %v15411_v33 }
 0x61b   : > { %17166 = vst [vmem:[#allocation12_spill] sm:$0xff] %v15409_v21  ;;  %v15414_v20 = vpop.f32.mrb[241].mxu0  ;;  %7734 = vmatprep.mubr.f32.mxu1 %v6419_v3  ;;  %11128 = vmatpush1.bf16.msra.mxu1 %v11127_v37  ;;  %v11133_v37 = vpack.c.bf16 %v9939_v48, %v9938_v49  ;;  %v15436_v21 = vld [vmem:[#allocation2 + $0x40] sm:$0xff]  ;;  %v6422_v49 = vld [vmem:[#allocation2 + $0x51] sm:$0xff]  ;;  %v11136_v48 = vpack.c.bf16 %v9941_v10, %v9940_v31  ;;  %v9945_v10 = vld [vmem:[%s16586_s2 + $0xc88] sm:$0xff] }
 0x61c   : > { %17167 = vst [vmem:[#allocation11_spill] sm:$0xff] %v15414_v20  ;;  %11129 = vmatprep.subr.bf16.mxu1 %v16835_v1  ;;  %v15448_v20 = vld [vmem:[#allocation2 + $0x48] sm:$0xff]  ;;  %v6454_v24 = vmul.f32 %v17070_v36, %v6422_v49  ;;  %v9944_v31 = vld [vmem:[%s16586_s2 + $0xc80] sm:$0xff]  ;;  %v15473_v36 = vld [vmem:[#allocation2 + $0x58] sm:$0xff] }
 0x61e   : > { %7735 = vmatmul.mubr.f32.gmra.mrb[104].mxu1 %v15423_v34 }
 0x61f   : > { %7739 = vmatprep.mubr.f32.mxu1 %v6452_v16  ;;  %11131 = vmatpush1.bf16.msra.mxu1 %v11130_v28  ;;  %v6421_v28 = vld [vmem:[#allocation2 + $0x49] sm:$0xff] }
 0x620   : > { %11132 = vmatprep.subr.bf16.mxu1 %v16835_v1  ;;  %v9942_v16 = vld [vmem:[%s16586_s2 + $0xc70] sm:$0xff] }
 0x622   : > { %v15434_v3 = vpop.f32.mrb[242].mxu0  ;;  %7740 = vmatmul.mubr.f32.gmra.mrb[106].mxu1 %v15436_v21 }
 0x623   : > { %17168 = vst [vmem:[#allocation31_spill] sm:$0xff] %v15434_v3  ;;  %v15439_v45 = vpop.f32.mrb[243].mxu0  ;;  %7744 = vmatprep.mubr.f32.mxu1 %v6421_v28  ;;  %11134 = vmatpush1.bf16.msra.mxu1 %v11133_v37  ;;  %v9943_v3 = vld [vmem:[%s16586_s2 + $0xc78] sm:$0xff] }
 0x624   : > { %17169 = vst [vmem:[#allocation22_spill] sm:$0xff] %v15439_v45  ;;  %11135 = vmatprep.subr.bf16.mxu1 %v16835_v1  ;;  %v11139_v37 = vpack.c.bf16 %v9943_v3, %v9942_v16  ;;  %v15461_v45 = vld [vmem:[#allocation2 + $0x50] sm:$0xff]  ;;  %v6424_v3 = vld [vmem:[#allocation2 + $0x61] sm:$0xff] }
 0x625   : > { %v9946_v16 = vld [vmem:[%s16586_s2 + $0xc90] sm:$0xff]  ;;  %v6456_v40 = vmul.f32 %v17073_v14, %v6424_v3  ;;  %v15498_v14 = vld [vmem:[#allocation2 + $0x68] sm:$0xff] }
 0x626   : > { %7745 = vmatmul.mubr.f32.gmra.mrb[108].mxu1 %v15448_v20 }
 0x627   : > { %7749 = vmatprep.mubr.f32.mxu1 %v6454_v24  ;;  %11137 = vmatpush1.bf16.msra.mxu1 %v11136_v48  ;;  %v6423_v24 = vld [vmem:[#allocation2 + $0x59] sm:$0xff]  ;;  %v11142_v48 = vpack.c.bf16 %v9945_v10, %v9944_v31  ;;  %v9949_v10 = vld [vmem:[%s16586_s2 + $0xca8] sm:$0xff] }
 0x628   : > { %11138 = vmatprep.subr.bf16.mxu1 %v16835_v1  ;;  %v9948_v31 = vld [vmem:[%s16586_s2 + $0xca0] sm:$0xff] }
 0x62a   : > { %v15459_v28 = vpop.f32.mrb[244].mxu0  ;;  %7750 = vmatmul.mubr.f32.gmra.mrb[110].mxu1 %v15461_v45 }
 0x62b   : > { %17170 = vst [vmem:[#allocation16_spill] sm:$0xff] %v15459_v28  ;;  %v15464_v49 = vpop.f32.mrb[245].mxu0  ;;  %7754 = vmatprep.mubr.f32.mxu1 %v6423_v24  ;;  %11140 = vmatpush1.bf16.msra.mxu1 %v11139_v37  ;;  %v9947_v28 = vld [vmem:[%s16586_s2 + $0xc98] sm:$0xff] }
 0x62c   : > { %17171 = vst [vmem:[#allocation18_spill] sm:$0xff] %v15464_v49  ;;  %11141 = vmatprep.subr.bf16.mxu1 %v16835_v1  ;;  %v11145_v37 = vpack.c.bf16 %v9947_v28, %v9946_v16  ;;  %v15486_v49 = vld [vmem:[#allocation2 + $0x60] sm:$0xff]  ;;  %v6426_v28 = vld [vmem:[#allocation2 + $0x71] sm:$0xff] }
 0x62d   : > { %v9950_v16 = vld [vmem:[%s16586_s2 + $0xcb0] sm:$0xff]  ;;  %v6458_v7 = vmul.f32 %v17079_v55, %v6426_v28  ;;  %v15523_v55 = vld [vmem:[#allocation2 + $0x78] sm:$0xff] }
 0x62e   : > { %7755 = vmatmul.mubr.f32.gmra.mrb[112].mxu1 %v15473_v36 }
 0x62f   : > { %7759 = vmatprep.mubr.f32.mxu1 %v6456_v40  ;;  %11143 = vmatpush1.bf16.msra.mxu1 %v11142_v48  ;;  %v6425_v40 = vld [vmem:[#allocation2 + $0x69] sm:$0xff]  ;;  %v11148_v48 = vpack.c.bf16 %v9949_v10, %v9948_v31  ;;  %v9952_v31 = vld [vmem:[%s16586_s2 + $0xcc0] sm:$0xff] }
 0x630   : > { %11144 = vmatprep.subr.bf16.mxu1 %v16835_v1  ;;  %v9953_v10 = vld [vmem:[%s16586_s2 + $0xcc8] sm:$0xff] }
 0x632   : > { %v15484_v24 = vpop.f32.mrb[246].mxu0  ;;  %7760 = vmatmul.mubr.f32.gmra.mrb[114].mxu1 %v15486_v49 }
 0x633   : > { %17172 = vst [vmem:[#allocation53_spill] sm:$0xff] %v15484_v24  ;;  %v15489_v3 = vpop.f32.mrb[247].mxu0  ;;  %7764 = vmatprep.mubr.f32.mxu1 %v6425_v40  ;;  %11146 = vmatpush1.bf16.msra.mxu1 %v11145_v37  ;;  %v9951_v24 = vld [vmem:[%s16586_s2 + $0xcb8] sm:$0xff] }
 0x634   : > { %17173 = vst [vmem:[#allocation49_spill] sm:$0xff] %v15489_v3  ;;  %11147 = vmatprep.subr.bf16.mxu1 %v16835_v1  ;;  %v11151_v37 = vpack.c.bf16 %v9951_v24, %v9950_v16  ;;  %v15511_v3 = vld [vmem:[#allocation2 + $0x70] sm:$0xff]  ;;  %v6428_v24 = vld [vmem:[#allocation2 + $0x81] sm:$0xff] }
 0x635   : > { %v9954_v16 = vld [vmem:[%s16586_s2 + $0xcd0] sm:$0xff]  ;;  %v6460_v57 = vmul.f32 %v17086_v51, %v6428_v24  ;;  %v15548_v51 = vld [vmem:[#allocation2 + $0x88] sm:$0xff] }
 0x636   : > { %7765 = vmatmul.mubr.f32.gmra.mrb[116].mxu1 %v15498_v14 }
 0x637   : > { %7769 = vmatprep.mubr.f32.mxu1 %v6458_v7  ;;  %11149 = vmatpush1.bf16.msra.mxu1 %v11148_v48  ;;  %v6427_v7 = vld [vmem:[#allocation2 + $0x79] sm:$0xff]  ;;  %v11154_v48 = vpack.c.bf16 %v9953_v10, %v9952_v31  ;;  %v9957_v10 = vld [vmem:[%s16586_s2 + $0xce8] sm:$0xff] }
 0x638   : > { %11150 = vmatprep.subr.bf16.mxu1 %v16835_v1  ;;  %v9956_v31 = vld [vmem:[%s16586_s2 + $0xce0] sm:$0xff] }
 0x63a   : > { %v15509_v40 = vpop.f32.mrb[248].mxu0  ;;  %7770 = vmatmul.mubr.f32.gmra.mrb[118].mxu1 %v15511_v3 }
 0x63b   : > { %17174 = vst [vmem:[#allocation24_spill] sm:$0xff] %v15509_v40  ;;  %v15514_v28 = vpop.f32.mrb[249].mxu0  ;;  %7774 = vmatprep.mubr.f32.mxu1 %v6427_v7  ;;  %11152 = vmatpush1.bf16.msra.mxu1 %v11151_v37  ;;  %v9955_v40 = vld [vmem:[%s16586_s2 + $0xcd8] sm:$0xff] }
 0x63c   : > { %17175 = vst [vmem:[#allocation35_spill] sm:$0xff] %v15514_v28  ;;  %11153 = vmatprep.subr.bf16.mxu1 %v16835_v1  ;;  %v11157_v37 = vpack.c.bf16 %v9955_v40, %v9954_v16  ;;  %v15536_v28 = vld [vmem:[#allocation2 + $0x80] sm:$0xff]  ;;  %v6430_v40 = vld [vmem:[#allocation2 + $0x91] sm:$0xff] }
 0x63d   : > { %v9958_v16 = vld [vmem:[%s16586_s2 + $0xcf0] sm:$0xff]  ;;  %v6462_v29 = vmul.f32 %v17093_v54, %v6430_v40  ;;  %v15560_v40 = vld [vmem:[#allocation2 + $0x98] sm:$0xff] }
 0x63e   : > { %7775 = vmatmul.mubr.f32.gmra.mrb[120].mxu1 %v15523_v55 }
 0x63f   : > { %7779 = vmatprep.mubr.f32.mxu1 %v6460_v57  ;;  %11155 = vmatpush1.bf16.msra.mxu1 %v11154_v48  ;;  %v6429_v57 = vld [vmem:[#allocation2 + $0x89] sm:$0xff]  ;;  %v11160_v48 = vpack.c.bf16 %v9957_v10, %v9956_v31 }
 0x640   : > { %11156 = vmatprep.subr.bf16.mxu1 %v16835_v1  ;;  %v15555_v10 = vld [vmem:[#allocation2 + $0x90] sm:$0xff] }
 0x642   : > { %v15534_v7 = vpop.f32.mrb[250].mxu0  ;;  %7780 = vmatmul.mubr.f32.gmra.mrb[122].mxu1 %v15536_v28 }
 0x643   : > { %17176 = vst [vmem:[#allocation51_spill] sm:$0xff] %v15534_v7  ;;  %v15539_v24 = vpop.f32.mrb[251].mxu0  ;;  %7784 = vmatprep.mubr.f32.mxu1 %v6429_v57  ;;  %11158 = vmatpush1.bf16.msra.mxu1 %v11157_v37  ;;  %v9959_v7 = vld [vmem:[%s16586_s2 + $0xcf8] sm:$0xff] }
 0x644   : > { %17177 = vst [vmem:[#allocation37_spill] sm:$0xff] %v15539_v24  ;;  %11159 = vmatprep.subr.bf16.mxu1 %v16835_v1  ;;  %v11163_v37 = vpack.c.bf16 %v9959_v7, %v9958_v16  ;;  %v6431_v24 = vld [vmem:[#allocation2 + $0x99] sm:$0xff]  ;;  %v6433_v16 = vld [vmem:[#allocation2 + $0xa9] sm:$0xff] }
 0x645   : > { %v15566_v7 = vld [vmem:[#allocation2 + $0xa0] sm:$0xff] }
 0x646   : > { %7785 = vmatmul.mubr.f32.gmra.mrb[124].mxu1 %v15548_v51 }
 0x647   : > { %7789 = vmatprep.mubr.f32.mxu1 %v6462_v29  ;;  %11161 = vmatpush1.bf16.msra.mxu1 %v11160_v48  ;;  %v6464_v29 = vmul.f32 %v17100_v58, %v6432_v11  ;;  %v6435_v58 = vld [vmem:[#allocation2 + $0xb9] sm:$0xff] }
 0x648   : > { %11162 = vmatprep.subr.bf16.mxu1 %v16835_v1 }
 0x64a   : > { %v15553_v31 = vpop.f32.mrb[252].mxu0  ;;  %7790 = vmatmul.mubr.f32.gmra.mrb[126].mxu1 %v15555_v10 }
 0x64b   : > { %17178 = vst [vmem:[#allocation48_spill] sm:$0xff] %v15553_v31  ;;  %v15558_v57 = vpop.f32.mrb[253].mxu0  ;;  %7794 = vmatprep.mubr.f32.mxu1 %v6431_v24  ;;  %11164 = vmatpush1.bf16.msra.mxu1 %v11163_v37  ;;  %v6434_v31 = vld [vmem:[#allocation2 + $0xb1] sm:$0xff]  ;;  %v15571_v24 = vld [vmem:[#allocation2 + $0xa8] sm:$0xff] }
 0x64c   : > { %17179 = vst [vmem:[#allocation28_spill] sm:$0xff] %v15558_v57  ;;  %v6466_v37 = vmul.f32 %v17107_v41, %v6434_v31  ;;  %v15582_v57 = vld [vmem:[#allocation2 + $0xb8] sm:$0xff]  ;;  %v6437_v41 = vld [vmem:[#allocation2 + $0xc9] sm:$0xff] }
 0x64e   : > { %7795 = vmatmul.mubr.f32.gmra.mrb[128].mxu1 %v15560_v40 }
 0x64f   : > { %7799 = vmatprep.mubr.f32.mxu1 %v6464_v29  ;;  %v15577_v29 = vld [vmem:[#allocation2 + $0xb0] sm:$0xff] }
 0x652   : > { %v15564_v1 = vpop.f32.mrb[254].mxu0  ;;  %7800 = vmatmul.mubr.f32.gmra.mrb[130].mxu1 %v15566_v7 }
 0x653   : > { %17180 = vst [vmem:[#allocation46_spill] sm:$0xff] %v15564_v1  ;;  %v15569_v48 = vpop.f32.mrb[255].mxu0  ;;  %7804 = vmatprep.mubr.f32.mxu1 %v6433_v16 }
 0x654   : > { %17181 = vst [vmem:[#allocation32_spill] sm:$0xff] %v15569_v48  ;;  %v6436_v48 = vld [vmem:[#allocation2 + $0xc1] sm:$0xff] }
 0x655   : > { %v6468_v16 = vmul.f32 %v17113_v52, %v6436_v48  ;;  %v6470_v48 = vmul.f32 %v17118_v42, %v17154_v56  ;;  %v15611_v56 = vld [vmem:[#allocation2 + $0xe0] sm:$0xff] }
 0x656   : > { %7805 = vmatmul.mubr.f32.gmra.mrb[132].mxu1 %v15571_v24 }
 0x657   : > { %7809 = vmatprep.mubr.f32.mxu1 %v6466_v37  ;;  %v15588_v37 = vld [vmem:[#allocation2 + $0xc0] sm:$0xff] }
 0x65a   : > { %v15575_v11 = vpop.f32.mrb[0].mxu0  ;;  %7810 = vmatmul.mubr.f32.gmra.mrb[134].mxu1 %v15577_v29 }
 0x65b   : > { %17182 = vst [vmem:[#allocation47_spill] sm:$0xff] %v15575_v11  ;;  %v15580_v1 = vpop.f32.mrb[1].mxu0  ;;  %7814 = vmatprep.mubr.f32.mxu1 %v6435_v58  ;;  %v15595_v58 = vld [vmem:[#allocation2 + $0xc8] sm:$0xff] }
 0x65c   : > { %17183 = vst [vmem:[#allocation55_spill] sm:$0xff] %v15580_v1 }
 0x65e   : > { %7815 = vmatmul.mubr.f32.gmra.mrb[136].mxu1 %v15582_v57 }
 0x65f   : > { %7819 = vmatprep.mubr.f32.mxu1 %v6468_v16 }
 0x661   : > { %v15586_v31 = vpop.f32.mrb[2].mxu0 }
 0x662   : > { %17184 = vst [vmem:[#allocation33_spill] sm:$0xff] %v15586_v31  ;;  %7820 = vmatmul.mubr.f32.gmra.mrb[138].mxu1 %v15588_v37  ;;  %v15591_v11 = vpop.f32.mrb[3].mxu0  ;;  %v15602_v31 = vld [vmem:[#allocation2 + $0xd0] sm:$0xff] }
 0x663   : > { %17185 = vst [vmem:[#allocation52_spill] sm:$0xff] %v15591_v11  ;;  %7824 = vmatprep.mubr.f32.mxu1 %v6437_v41  ;;  %v15606_v11 = vld [vmem:[#allocation2 + $0xd8] sm:$0xff]  ;;  %v6472_v41 = vmul.f32 %v17120_v38, %v15099_v5  ;;  %v17188_v38 = vld [vmem:[#allocation57_spill] sm:$0xff] }
 0x664   : > { %v15624_v5 = vld [vmem:[#allocation2 + $0xf8] sm:$0xff] }
 0x665   : > { %v15593_v1 = vpop.f32.mrb[4].mxu0 }
 0x666   : > { %17186 = vst [vmem:[#allocation7_spill] sm:$0xff] %v15593_v1  ;;  %7825 = vmatmul.mubr.f32.gmra.mrb[140].mxu1 %v15595_v58  ;;  %v15600_v16 = vpop.f32.mrb[5].mxu0  ;;  %v6474_v1 = vmul.f32 %v17123_v39, %v15115_v2  ;;  %v6701_v2 = vld [vmem:[#allocation2 + $0x119] sm:$0xff] }
 0x667   : > { %17187 = vst [vmem:[#allocation54_spill] sm:$0xff] %v15600_v16  ;;  %7829 = vmatprep.mubr.f32.mxu1 %v6470_v48  ;;  %v15615_v48 = vld [vmem:[#allocation2 + $0xe8] sm:$0xff]  ;;  %10490 = vmatprep.mubr.f32.mxu0 %v6701_v2  ;;  %v6478_v16 = vmul.f32 %v17161_v27, %v17188_v38 }
 0x66a   : > { %7830 = vmatmul.mubr.f32.gmra.mrb[142].mxu1 %v15602_v31 }
 0x66b   : > { %7834 = vmatprep.mubr.f32.mxu1 %v17156_v17  ;;  %v15620_v17 = vld [vmem:[#allocation2 + $0xf0] sm:$0xff] }
 0x66e   : > { %7835 = vmatmul.mubr.f32.gmra.mrb[144].mxu1 %v15606_v11 }
 0x66f   : > { %7839 = vmatprep.mubr.f32.mxu1 %v6472_v41  ;;  %v6476_v41 = vmul.f32 %v17125_v18, %v17160_v35  ;;  %v15639_v35 = vld [vmem:[#allocation2 + $0x110] sm:$0xff] }
 0x670   : > { %v6513_v18 = vld [vmem:[#allocation2 + $0x37] sm:$0xff] }
 0x671   : > { %v6545_v38 = vmul.f32 %v12372_v47, %v6513_v18 }
 0x672   : > { %7840 = vmatmul.mubr.f32.gmra.mrb[146].mxu1 %v15611_v56 }
 0x673   : > { %7844 = vmatprep.mubr.f32.mxu1 %v17157_v9  ;;  %v15629_v9 = vld [vmem:[#allocation2 + $0x100] sm:$0xff] }
 0x676   : > { %7845 = vmatmul.mubr.f32.gmra.mrb[148].mxu1 %v15615_v48 }
 0x677   : > { %7849 = vmatprep.mubr.f32.mxu1 %v6474_v1  ;;  %v6702_v1 = vld [vmem:[#allocation2 + $0x121] sm:$0xff] }
 0x678   : > { %v6734_v39 = vmul.f32 %v17161_v27, %v6702_v1  ;;  %v6512_v1 = vld [vmem:[#allocation2 + $0x2f] sm:$0xff] }
 0x67a   : > { %7850 = vmatmul.mubr.f32.gmra.mrb[150].mxu1 %v15620_v17  ;;  %10491 = vmatmul.mubr.f32.gmra.mrb[6].mxu0 %v6734_v39  ;;  %v6514_v39 = vld [vmem:[#allocation2 + $0x3f] sm:$0xff] }
 0x67b   : > { %7854 = vmatprep.mubr.f32.mxu1 %v17159_v0  ;;  %v15634_v0 = vld [vmem:[#allocation2 + $0x108] sm:$0xff] }
 0x67e   : > { %7855 = vmatmul.mubr.f32.gmra.mrb[152].mxu1 %v15624_v5 }
 0x67f   : > { %7859 = vmatprep.mubr.f32.mxu1 %v6476_v41  ;;  %v6511_v41 = vld [vmem:[#allocation2 + $0x27] sm:$0xff] }
 0x682   : > { %7860 = vmatmul.mubr.f32.gmra.mrb[154].mxu1 %v15629_v9 }
 0x683   : > { %7864 = vmatprep.mubr.f32.mxu1 %v15147_v8  ;;  %v17189_v8 = vld [vmem:[#allocation6_spill] sm:$0xff] }
 0x684   : > { %v6543_v2 = vmul.f32 %v17189_v8, %v6511_v41  ;;  %v6517_v41 = vld [vmem:[#allocation2 + $0x57] sm:$0xff] }
 0x685   : > { %v6549_v18 = vmul.f32 %v12459_v32, %v6517_v41  ;;  %v6535_v41 = vld [vmem:[#allocation2 + $0xe7] sm:$0xff] }
 0x686   : > { %7865 = vmatmul.mubr.f32.gmra.mrb[156].mxu1 %v15634_v0 }
 0x687   : > { %7869 = vmatprep.mubr.f32.mxu1 %v6478_v16  ;;  %v6515_v16 = vld [vmem:[#allocation2 + $0x47] sm:$0xff] }
 0x68a   : > { %7870 = vmatmul.mubr.f32.gmra.mrb[158].mxu1 %v15639_v35 }
 0x68b   : > { %7939 = vmatprep.mubr.f32.mxu1 %v15398_v62  ;;  %v6547_v62 = vmul.f32 %v12412_v26, %v6515_v16  ;;  %v6529_v16 = vld [vmem:[#allocation2 + $0xb7] sm:$0xff] }
 0x68e   : > { %7940 = vmatmul.mubr.f32.vlgmr.msra.gmra.mrb[96].mxu1 %v6543_v2  ;;  %v6521_v2 = vld [vmem:[#allocation2 + $0x77] sm:$0xff] }
 0x68f   : > { %7944 = vmatprep.mubr.f32.mxu1 %v15411_v33  ;;  %v6516_v33 = vld [vmem:[#allocation2 + $0x4f] sm:$0xff] }
 0x692   : > { %7945 = vmatmul.mubr.f32.gmra.mrb[98].mxu1 %v6512_v1  ;;  %v6523_v1 = vld [vmem:[#allocation2 + $0x87] sm:$0xff] }
 0x693   : > { %7949 = vmatprep.mubr.f32.mxu1 %v15423_v34  ;;  %v6519_v34 = vld [vmem:[#allocation2 + $0x67] sm:$0xff] }
 0x696   : > { %7950 = vmatmul.mubr.f32.gmra.mrb[100].mxu1 %v6545_v38  ;;  %v6525_v38 = vld [vmem:[#allocation2 + $0x97] sm:$0xff] }
 0x697   : > { %7954 = vmatprep.mubr.f32.mxu1 %v15436_v21  ;;  %v6518_v21 = vld [vmem:[#allocation2 + $0x5f] sm:$0xff] }
 0x69a   : > { %7955 = vmatmul.mubr.f32.gmra.mrb[102].mxu1 %v6514_v39  ;;  %v6527_v39 = vld [vmem:[#allocation2 + $0xa7] sm:$0xff] }
 0x69b   : > { %7959 = vmatprep.mubr.f32.mxu1 %v15448_v20  ;;  %v6551_v20 = vmul.f32 %v12522_v43, %v6519_v34  ;;  %v17190_v34 = vld [vmem:[#allocation5_spill] sm:$0xff] }
 0x69e   : > { %7960 = vmatmul.mubr.f32.gmra.mrb[104].mxu1 %v6547_v62  ;;  %v6531_v62 = vld [vmem:[#allocation2 + $0xc7] sm:$0xff] }
 0x69f   : > { %7964 = vmatprep.mubr.f32.mxu1 %v15461_v45  ;;  %v6520_v45 = vld [vmem:[#allocation2 + $0x6f] sm:$0xff] }
 0x6a2   : > { %7965 = vmatmul.mubr.f32.gmra.mrb[106].mxu1 %v6516_v33  ;;  %v6533_v33 = vld [vmem:[#allocation2 + $0xd7] sm:$0xff] }
 0x6a3   : > { %7969 = vmatprep.mubr.f32.mxu1 %v15473_v36  ;;  %v6553_v36 = vmul.f32 %v16998_v6, %v6521_v2 }
 0x6a6   : > { %7970 = vmatmul.mubr.f32.gmra.mrb[108].mxu1 %v6549_v18  ;;  %v6537_v18 = vld [vmem:[#allocation2 + $0xf7] sm:$0xff] }
 0x6a7   : > { %7974 = vmatprep.mubr.f32.mxu1 %v15486_v49  ;;  %v6522_v49 = vld [vmem:[#allocation2 + $0x7f] sm:$0xff] }
 0x6aa   : > { %7975 = vmatmul.mubr.f32.gmra.mrb[110].mxu1 %v6518_v21  ;;  %v11768_v21 = vld [vmem:[#allocation2] sm:$0xff] }
 0x6ab   : > { %7979 = vmatprep.mubr.f32.mxu1 %v15498_v14  ;;  %v6555_v14 = vmul.f32 %v17003_v30, %v6523_v1  ;;  %v8689_v1 = vsub.s32 2, %v17190_v34 }
 0x6ae   : > { %7980 = vmatmul.mubr.f32.gmra.mrb[112].mxu1 %v6551_v20  ;;  %v8457_v20 = vsub.s32 0, %v17190_v34 }
 0x6af   : > { %7984 = vmatprep.mubr.f32.mxu1 %v15511_v3  ;;  %v6524_v3 = vld [vmem:[#allocation2 + $0x8f] sm:$0xff] }
 0x6b2   : > { %7985 = vmatmul.mubr.f32.gmra.mrb[114].mxu1 %v6520_v45  ;;  %v8557_v45 = vsub.s32 1, %v17190_v34 }
 0x6b3   : > { %7989 = vmatprep.mubr.f32.mxu1 %v15523_v55  ;;  %v6557_v55 = vmul.f32 %v17127_v59, %v6525_v38 }
 0x6b6   : > { %7990 = vmatmul.mubr.f32.gmra.mrb[116].mxu1 %v6553_v36 }
 0x6b7   : > { %7994 = vmatprep.mubr.f32.mxu1 %v15536_v28  ;;  %v6526_v28 = vld [vmem:[#allocation2 + $0x9f] sm:$0xff] }
 0x6ba   : > { %7995 = vmatmul.mubr.f32.gmra.mrb[118].mxu1 %v6522_v49 }
 0x6bb   : > { %7999 = vmatprep.mubr.f32.mxu1 %v15548_v51  ;;  %v6559_v51 = vmul.f32 %v17132_v25, %v6527_v39 }
 0x6be   : > { %8000 = vmatmul.mubr.f32.gmra.mrb[120].mxu1 %v6555_v14 }
 0x6bf   : > { %8004 = vmatprep.mubr.f32.mxu1 %v15555_v10  ;;  %v6528_v10 = vld [vmem:[#allocation2 + $0xaf] sm:$0xff] }
 0x6c2   : > { %8005 = vmatmul.mubr.f32.gmra.mrb[122].mxu1 %v6524_v3 }
 0x6c3   : > { %8009 = vmatprep.mubr.f32.mxu1 %v15560_v40  ;;  %v6561_v40 = vmul.f32 %v17137_v13, %v6529_v16 }
 0x6c6   : > { %8010 = vmatmul.mubr.f32.gmra.mrb[124].mxu1 %v6557_v55 }
 0x6c7   : > { %8014 = vmatprep.mubr.f32.mxu1 %v15566_v7  ;;  %v6530_v7 = vld [vmem:[#allocation2 + $0xbf] sm:$0xff] }
 0x6ca   : > { %8015 = vmatmul.mubr.f32.gmra.mrb[126].mxu1 %v6526_v28 }
 0x6cb   : > { %8019 = vmatprep.mubr.f32.mxu1 %v15571_v24  ;;  %v6563_v24 = vmul.f32 %v17142_v60, %v6531_v62 }
 0x6ce   : > { %8020 = vmatmul.mubr.f32.gmra.mrb[128].mxu1 %v6559_v51 }
 0x6cf   : > { %8024 = vmatprep.mubr.f32.mxu1 %v15577_v29  ;;  %v6532_v29 = vld [vmem:[#allocation2 + $0xcf] sm:$0xff] }
 0x6d2   : > { %8025 = vmatmul.mubr.f32.gmra.mrb[130].mxu1 %v6528_v10  ;;  %v8623_v10 = vld [vmem:[#allocation3 + $0x9] sm:$0xff] }
 0x6d3   : > { %8029 = vmatprep.mubr.f32.mxu1 %v15582_v57  ;;  %v6565_v57 = vmul.f32 %v17147_v12, %v6533_v33 }
 0x6d6   : > { %8030 = vmatmul.mubr.f32.gmra.mrb[132].mxu1 %v6561_v40  ;;  %v8791_v40 = vsub.s32 3, %v17190_v34 }
 0x6d7   : > { %8034 = vmatprep.mubr.f32.mxu1 %v15588_v37  ;;  %v6534_v37 = vld [vmem:[#allocation2 + $0xdf] sm:$0xff] }
 0x6da   : > { %8035 = vmatmul.mubr.f32.gmra.mrb[134].mxu1 %v6530_v7  ;;  %v8392_v7 = vld [vmem:[#allocation3 + $0xf] sm:$0xff] }
 0x6db   : > { %8039 = vmatprep.mubr.f32.mxu1 %v15595_v58  ;;  %v6567_v58 = vmul.f32 %v17151_v50, %v6535_v41 }
 0x6de   : > { %8040 = vmatmul.mubr.f32.gmra.mrb[136].mxu1 %v6563_v24  ;;  %v8861_v24 = vsub.s32 4, %v17190_v34 }
 0x6df   : > { %8044 = vmatprep.mubr.f32.mxu1 %v15602_v31  ;;  %v6536_v31 = vld [vmem:[#allocation2 + $0xef] sm:$0xff] }
 0x6e2   : > { %8045 = vmatmul.mubr.f32.gmra.mrb[138].mxu1 %v6532_v29 }
 0x6e3   : > { %8049 = vmatprep.mubr.f32.mxu1 %v15606_v11  ;;  %v6569_v11 = vmul.f32 %v17155_v23, %v6537_v18 }
 0x6e6   : > { %8050 = vmatmul.mubr.f32.gmra.mrb[140].mxu1 %v6565_v57 }
 0x6e7   : > { %8054 = vmatprep.mubr.f32.mxu1 %v15611_v56  ;;  %v6538_v56 = vld [vmem:[#allocation2 + $0xff] sm:$0xff] }
 0x6ea   : > { %8055 = vmatmul.mubr.f32.gmra.mrb[142].mxu1 %v6534_v37 }
 0x6eb   : > { %8059 = vmatprep.mubr.f32.mxu1 %v15615_v48  ;;  %v6571_v48 = vmul.f32 %v16990_v46, %v15344_v19 }
 0x6ee   : > { %8060 = vmatmul.mubr.f32.gmra.mrb[144].mxu1 %v6567_v58 }
 0x6ef   : > { %8064 = vmatprep.mubr.f32.mxu1 %v15620_v17  ;;  %v6541_v17 = vld [vmem:[#allocation2 + $0x117] sm:$0xff] }
 0x6f2   : > { %8065 = vmatmul.mubr.f32.gmra.mrb[146].mxu1 %v6536_v31 }
 0x6f3   : > { %8069 = vmatprep.mubr.f32.mxu1 %v15624_v5  ;;  %v6573_v5 = vmul.f32 %v17158_v53, %v6541_v17 }
 0x6f6   : > { %8070 = vmatmul.mubr.f32.gmra.mrb[148].mxu1 %v6569_v11 }
 0x6f7   : > { %8074 = vmatprep.mubr.f32.mxu1 %v15629_v9  ;;  %v6542_v9 = vld [vmem:[#allocation2 + $0x11f] sm:$0xff] }
 0x6fa   : > { %8075 = vmatmul.mubr.f32.gmra.mrb[150].mxu1 %v6538_v56  ;;  %v8963_v56 = vsub.s32 5, %v17190_v34 }
 0x6fb   : > { %8079 = vmatprep.mubr.f32.mxu1 %v15634_v0  ;;  %v8391_v0 = vld [vmem:[#allocation3 + $0x7] sm:$0xff] }
 0x6fc   : > { %v8423_v36 = vmul.f32 %v17189_v8, %v8391_v0 }
 0x6fe   : > { %8080 = vmatmul.mubr.f32.gmra.mrb[152].mxu1 %v6571_v48  ;;  %v9135_v48 = vsub.s32 7, %v17190_v34 }
 0x6ff   : > { %8084 = vmatprep.mubr.f32.mxu1 %v15639_v35  ;;  %v8389_v35 = vld [vmem:[%s16587_s3] sm:$0xff] }
 0x700   : > { %v15697_v49 = vrot.slane %v8389_v35, %v8457_v20  ;;  %v15700_v3 = vrot.slane %v8389_v35, %v8557_v45  ;;  %v15712_v58 = vrot.slane %v8389_v35, %v8791_v40  ;;  %v15714_v11 = vrot.slane %v8389_v35, %v8861_v24 }
 0x701   : > { %v9065_v20 = vsub.s32 6, %v17190_v34 }
 0x702   : > { %8085 = vmatmul.mubr.f32.gmra.mrb[154].mxu1 %v15356_v63  ;;  %v8459_v39 = vmul.f32 %v15697_v49, %v8423_v36  ;;  %v8559_v51 = vmul.f32 %v11768_v21, %v15700_v3  ;;  %v8460_v37 = vmul.f32 %v15697_v49, %v8392_v7 }
 0x703   : > { %8089 = vmatprep.mubr.f32.mxu1 %v11768_v21  ;;  %v15731_v7 = vrot.slane %v8389_v35, %v9065_v20 }
 0x704   : > { %v8592_v45 = vadd.f32 %v8559_v51, %v8460_v37 }
 0x706   : > { %8090 = vmatmul.mubr.f32.gmra.mrb[156].mxu1 %v6573_v5 }
 0x707   : > { %8094 = vmatprep.mubr.f32.mxu1 %v11768_v21 }
 0x70a   : > { %8095 = vmatmul.mubr.f32.gmra.mrb[158].mxu1 %v6542_v9 }
 0x761   : > { %v7941_v19 = vpop.f32.mrb[96].mxu1 }
 0x762   : > { %v8167_v63 = vadd.f32 %v15341_v15, %v7941_v19  ;;  %v7943_v2 = vpop.f32.mrb[97].mxu1  ;;  %v15705_v15 = vrot.slane %v8389_v35, %v8689_v1  ;;  %v15724_v1 = vrot.slane %v8389_v35, %v8963_v56 }
 0x764   : > { %v8325_v14 = vmax.f32 %v8167_v63, 0.0  ;;  %v8691_v57 = vmul.f32 %v15705_v15, %v8623_v10 }
 0x765   : > { %v7946_v38 = vpop.f32.mrb[98].mxu1 }
 0x766   : > { %8357 = vst [vmem:[#allocation3 + $0x18] sm:$0xff] %v8325_v14  ;;  %v8172_v55 = vadd.f32 %v15337_v61, %v7946_v38  ;;  %v7948_v28 = vpop.f32.mrb[99].mxu1  ;;  %v8591_v61 = vadd.f32 %v8559_v51, %v8459_v39  ;;  %v15726_v38 = vrot.slane %v8389_v35, %v9135_v48  ;;  %v8863_v51 = vmul.f32 %v15714_v11, %v8325_v14 }
 0x767   : > { %v17191_v28 = vld [vmem:[#allocation29_spill] sm:$0xff] }
 0x768   : > { %v8326_v16 = vmax.f32 %v8172_v55, 0.0  ;;  %v8723_v5 = vadd.f32 %v8691_v57, %v8591_v61 }
 0x769   : > { %v7951_v62 = vpop.f32.mrb[100].mxu1 }
 0x76a   : > { %8358 = vst [vmem:[#allocation3 + $0x20] sm:$0xff] %v8326_v16  ;;  %v8177_v29 = vadd.f32 %v15353_v4, %v7951_v62  ;;  %v7953_v33 = vpop.f32.mrb[101].mxu1  ;;  %v8561_v62 = vmul.f32 %v15700_v3, %v8325_v14  ;;  %v8562_v37 = vmul.f32 %v15700_v3, %v8326_v16 }
 0x76c   : > { %v8327_v41 = vmax.f32 %v8177_v29, 0.0 }
 0x76d   : > { %v7956_v31 = vpop.f32.mrb[102].mxu1  ;;  %v8393_v18 = vld [vmem:[#allocation3 + $0x17] sm:$0xff] }
 0x76e   : > { %v8624_v17 = vld [vmem:[#allocation3 + $0x11] sm:$0xff]  ;;  %8359 = vst [vmem:[#allocation3 + $0x28] sm:$0xff] %v8327_v41  ;;  %v8182_v4 = vadd.f32 %v15349_v22, %v7956_v31  ;;  %v7958_v21 = vpop.f32.mrb[103].mxu1  ;;  %v8757_v9 = vmul.f32 %v17189_v8, %v8393_v18  ;;  %v8425_v0 = vmul.f32 %v12372_v47, %v8393_v18  ;;  %v8864_v31 = vmul.f32 %v15714_v11, %v8326_v16 }
 0x76f   : > { %v8656_v19 = vmul.f32 %v17061_v44, %v8624_v17  ;;  %v8563_v48 = vmul.f32 %v15700_v3, %v8327_v41  ;;  %v8865_v14 = vmul.f32 %v15714_v11, %v8327_v41  ;;  %v17192_v21 = vld [vmem:[#allocation10_spill] sm:$0xff] }
 0x770   : > { %v8328_v63 = vmax.f32 %v8182_v4, 0.0  ;;  %v8793_v2 = vmul.f32 %v15712_v58, %v8757_v9  ;;  %v8461_v33 = vmul.f32 %v15697_v49, %v8425_v0 }
 0x771   : > { %v7961_v36 = vpop.f32.mrb[104].mxu1  ;;  %v8394_v22 = vld [vmem:[#allocation3 + $0x1f] sm:$0xff]  ;;  %v8692_v55 = vmul.f32 %v15705_v15, %v8656_v19 }
 0x772   : > { %8360 = vst [vmem:[#allocation3 + $0x30] sm:$0xff] %v8328_v63  ;;  %v8187_v39 = vadd.f32 %v17191_v28, %v7961_v36  ;;  %v7963_v34 = vpop.f32.mrb[105].mxu1  ;;  %v8625_v10 = vld [vmem:[#allocation3 + $0x19] sm:$0xff]  ;;  %v8825_v40 = vadd.f32 %v8793_v2, %v8723_v5  ;;  %v8794_v29 = vmul.f32 %v15712_v58, %v8394_v22  ;;  %v8462_v2 = vmul.f32 %v15697_v49, %v8394_v22 }
 0x773   : > { %v8724_v24 = vadd.f32 %v8692_v55, %v8592_v45  ;;  %v8693_v35 = vmul.f32 %v15705_v15, %v8625_v10  ;;  %v8965_v17 = vmul.f32 %v15724_v1, %v8625_v10  ;;  %v15748_v45 = vpop.f32.mrb[6].mxu0  ;;  %v8593_v55 = vadd.f32 %v8561_v62, %v8461_v33  ;;  %v17195_v62 = vld [vmem:[#allocation34_spill] sm:$0xff] }
 0x774   : > { %v15736_v61 = vmax.f32 %v8187_v39, 0.0  ;;  %v8895_v57 = vadd.f32 %v8863_v51, %v8825_v40  ;;  %17193 = vst [vmem:[#allocation23_spill] sm:$0xff] %v15748_v45  ;;  %v15753_v28 = vpop.f32.mrb[7].mxu0  ;;  %v9137_v10 = vmul.f32 %v15726_v38, %v8327_v41  ;;  %v8564_v40 = vmul.f32 %v15700_v3, %v8328_v63  ;;  %v15768_v41 = vld [vmem:[%s16587_s3 + $0x8] ss:$0 sm:$0xff] }
 0x775   : > { %v7966_v18 = vpop.f32.mrb[106].mxu1  ;;  %v8395_v56 = vld [vmem:[#allocation3 + $0x27] sm:$0xff]  ;;  %v8826_v0 = vadd.f32 %v8794_v29, %v8724_v24  ;;  %17194 = vst [vmem:[#allocation8_spill] sm:$0xff] %v15753_v28 }
 0x776   : > { %v8626_v4 = vld [vmem:[#allocation3 + $0x21] sm:$0xff]  ;;  %8361 = vst [vmem:[#allocation3 + $0x38] sm:$0xff] %v15736_v61  ;;  %v8192_v5 = vadd.f32 %v17192_v21, %v7966_v18  ;;  %v7968_v9 = vpop.f32.mrb[107].mxu1  ;;  %v8427_v20 = vmul.f32 %v12412_v26, %v8395_v56  ;;  %v8759_v16 = vmul.f32 %v12372_v47, %v8395_v56  ;;  %v9031_v19 = vmul.f32 %v17189_v8, %v8395_v56 }
 0x777   : > { %v8930_v36 = vmul.f32 %v17061_v44, %v8626_v4  ;;  %v8997_v34 = vadd.f32 %v8965_v17, %v8895_v57  ;;  %v15771_v17 = vmul.f32 %v15714_v11, %v8328_v63  ;;  %v8896_v21 = vadd.f32 %v8864_v31, %v8826_v0 }
 0x778   : > { %v15755_v39 = vmax.f32 %v8192_v5, 0.0  ;;  %v8463_v24 = vmul.f32 %v15697_v49, %v8427_v20  ;;  %v9067_v29 = vmul.f32 %v15731_v7, %v9031_v19  ;;  %v8795_v18 = vmul.f32 %v15712_v58, %v8759_v16  ;;  %v17196_v20 = vld [vmem:[#allocation13_spill] sm:$0xff] }
 0x779   : > { %v7971_v51 = vpop.f32.mrb[108].mxu1  ;;  %v8396_v8 = vld [vmem:[#allocation3 + $0x2f] sm:$0xff]  ;;  %v8966_v22 = vmul.f32 %v15724_v1, %v8930_v36  ;;  %v9138_v5 = vmul.f32 %v15726_v38, %v8328_v63  ;;  %v8658_v16 = vmul.f32 %v17196_v20, %v8626_v4  ;;  %v8725_v19 = vadd.f32 %v8693_v35, %v8593_v55 }
 0x77a   : > { %8362 = vst [vmem:[#allocation3 + $0x40] sm:$0xff] %v15755_v39  ;;  %v8197_v33 = vadd.f32 %v17195_v62, %v7971_v51  ;;  %v7973_v56 = vpop.f32.mrb[109].mxu1  ;;  %v8627_v57 = vld [vmem:[#allocation3 + $0x29] sm:$0xff]  ;;  %v9099_v9 = vadd.f32 %v9067_v29, %v8997_v34  ;;  %v15775_v36 = vadd.f32 %v8562_v37, %v8462_v2  ;;  %v8565_v27 = vmul.f32 %v15700_v3, %v15736_v61 }
 0x77b   : > { %v8998_v62 = vadd.f32 %v8966_v22, %v8896_v21  ;;  %v9068_v56 = vmul.f32 %v15731_v7, %v8396_v8  ;;  %v8595_v46 = vadd.f32 %v8563_v48, %v8463_v24  ;;  %v9239_v31 = vmul.f32 %v15768_v41, %v8627_v57  ;;  %v17197_v37 = vld [vmem:[#allocation20_spill] sm:$0xff] }
 0x77c   : > { %v15777_v51 = vmax.f32 %v8197_v33, 0.0  ;;  %v9169_v45 = vadd.f32 %v9137_v10, %v9099_v9  ;;  %v8827_v34 = vadd.f32 %v8795_v18, %v8725_v19  ;;  %v8695_v2 = vmul.f32 %v15705_v15, %v8627_v57  ;;  %v17198_v19 = vld [vmem:[#allocation14_spill] sm:$0xff] }
 0x77d   : > { %v7976_v53 = vpop.f32.mrb[110].mxu1  ;;  %v8628_v63 = vld [vmem:[#allocation3 + $0x31] sm:$0xff]  ;;  %v8464_v55 = vmul.f32 %v15697_v49, %v8396_v8  ;;  %v9100_v29 = vadd.f32 %v9068_v56, %v8998_v62  ;;  %v15791_v10 = vmul.f32 %v15714_v11, %v15736_v61  ;;  %v8967_v18 = vmul.f32 %v15724_v1, %v8627_v57 }
 0x77e   : > { %v8397_v0 = vld [vmem:[#allocation3 + $0x37] sm:$0xff]  ;;  %8363 = vst [vmem:[#allocation3 + $0x48] sm:$0xff] %v15777_v51  ;;  %v8202_v35 = vadd.f32 %v17197_v37, %v7976_v53  ;;  %v7978_v4 = vpop.f32.mrb[111].mxu1  ;;  %v9271_v22 = vadd.f32 %v9239_v31, %v9169_v45  ;;  %v9204_v33 = vmul.f32 %v17061_v44, %v8628_v63  ;;  %v8897_v21 = vadd.f32 %v8865_v14, %v8827_v34 }
 0x77f   : > { %v8429_v48 = vmul.f32 %v12459_v32, %v8397_v0  ;;  %v9170_v53 = vadd.f32 %v9138_v5, %v9100_v29  ;;  %v8660_v37 = vmul.f32 %v17198_v19, %v8628_v63  ;;  %v9033_v56 = vmul.f32 %v12372_v47, %v8397_v0 }
 0x780   : > { %v15793_v24 = vmax.f32 %v8202_v35, 0.0  ;;  %9303 = vadd.xlane.f32.xlu0 %v9271_v22  ;;  %v9240_v45 = vmul.f32 %v15768_v41, %v9204_v33  ;;  %v8727_v31 = vadd.f32 %v8695_v2, %v8595_v46  ;;  %v17199_v35 = vld [vmem:[#allocation11_spill] sm:$0xff]  ;;  %v15802_v57 = vadd.f32 %v8564_v40, %v8464_v55 }
 0x781   : > { %v7981_v9 = vpop.f32.mrb[112].mxu1  ;;  %v8465_v44 = vmul.f32 %v15697_v49, %v8429_v48  ;;  %v8629_v62 = vld [vmem:[#allocation3 + $0x39] sm:$0xff]  ;;  %v8796_v14 = vmul.f32 %v15712_v58, %v8396_v8  ;;  %v8999_v34 = vadd.f32 %v8967_v18, %v8897_v21  ;;  %v9069_v29 = vmul.f32 %v15731_v7, %v9033_v56 }
 0x782   : > { %8364 = vst [vmem:[#allocation3 + $0x50] sm:$0xff] %v15793_v24  ;;  %v8207_v4 = vadd.f32 %v17199_v35, %v7981_v9  ;;  %v7983_v28 = vpop.f32.mrb[113].mxu1  ;;  %v9272_v5 = vadd.f32 %v9240_v45, %v9170_v53  ;;  %v9139_v22 = vmul.f32 %v15726_v38, %v15736_v61  ;;  %v8398_v33 = vld [vmem:[#allocation3 + $0x3f] sm:$0xff]  ;;  %v8697_v46 = vmul.f32 %v15705_v15, %v8629_v62  ;;  %v17200_v61 = vld [vmem:[#allocation12_spill] sm:$0xff] }
 0x783   : > { %v8597_v47 = vadd.f32 %v8565_v27, %v8465_v44  ;;  %v8694_v2 = vmul.f32 %v15705_v15, %v8658_v16  ;;  %v8696_v28 = vmul.f32 %v15705_v15, %v8660_v37  ;;  %v8932_v40 = vmul.f32 %v17196_v20, %v8628_v63 }
 0x784   : > { %v15808_v48 = vmax.f32 %v8207_v4, 0.0  ;;  %9305 = vadd.xlane.f32.xlu0 %v9272_v5  ;;  %v8761_v18 = vmul.f32 %v12412_v26, %v8397_v0  ;;  %v9101_v53 = vadd.f32 %v9069_v29, %v8999_v34  ;;  %v8466_v16 = vmul.f32 %v15697_v49, %v8398_v33  ;;  %v17201_v5 = vld [vmem:[#allocation15_spill] sm:$0xff] }
 0x785   : > { %v7986_v8 = vpop.f32.mrb[114].mxu1  ;;  %v8399_v55 = vld [vmem:[#allocation3 + $0x47] sm:$0xff]  ;;  %v8566_v37 = vmul.f32 %v15700_v3, %v15755_v39  ;;  %v8969_v63 = vmul.f32 %v15724_v1, %v8629_v62  ;;  %v9241_v56 = vmul.f32 %v15768_v41, %v8629_v62  ;;  %v8726_v0 = vadd.f32 %v8694_v2, %v15775_v36 }
 0x786   : > { %v8630_v21 = vld [vmem:[#allocation3 + $0x41] sm:$0xff]  ;;  %8365 = vst [vmem:[#allocation3 + $0x58] sm:$0xff] %v15808_v48  ;;  %v8212_v9 = vadd.f32 %v17200_v61, %v7986_v8  ;;  %v7988_v27 = vpop.f32.mrb[115].mxu1  ;;  %v8763_v45 = vmul.f32 %v12459_v32, %v8399_v55  ;;  %v9171_v44 = vadd.f32 %v9139_v22, %v9101_v53  ;;  %v8729_v4 = vadd.f32 %v8697_v46, %v8597_v47  ;;  %v17202_v22 = vld [vmem:[#allocation22_spill] sm:$0xff] }
 0x787   : > { %v8662_v34 = vmul.f32 %v17201_v5, %v8630_v21  ;;  %v8798_v29 = vmul.f32 %v15712_v58, %v8398_v33  ;;  %v8828_v27 = vadd.f32 %v8796_v14, %v8726_v0  ;;  %v8968_v23 = vmul.f32 %v15724_v1, %v8932_v40 }
 0x788   : > { %v15824_v35 = vmax.f32 %v8212_v9, 0.0  ;;  %v9273_v8 = vadd.f32 %v9241_v56, %v9171_v44  ;;  %v8431_v50 = vmul.f32 %v12522_v43, %v8399_v55  ;;  %v8799_v62 = vmul.f32 %v15712_v58, %v8763_v45 }
 0x789   : > { %v7991_v61 = vpop.f32.mrb[116].mxu1  ;;  %v15833_v53 = vadd.f32 %v8566_v37, %v8466_v16  ;;  %v8868_v47 = vmul.f32 %v15714_v11, %v15755_v39  ;;  %v8898_v46 = vadd.f32 %v15771_v17, %v8828_v27  ;;  %v9070_v14 = vmul.f32 %v15731_v7, %v8398_v33  ;;  %v8631_v9 = vld [vmem:[#allocation3 + $0x49] sm:$0xff] }
 0x78a   : > { %8366 = vst [vmem:[#allocation3 + $0x60] sm:$0xff] %v15824_v35  ;;  %v8217_v36 = vadd.f32 %v17202_v22, %v7991_v61  ;;  %v7993_v2 = vpop.f32.mrb[117].mxu1  ;;  %9307 = vadd.xlane.f32.xlu1 %v9273_v8  ;;  %v9206_v40 = vmul.f32 %v17196_v20, %v8630_v21  ;;  %v8797_v44 = vmul.f32 %v15712_v58, %v8761_v18  ;;  %v17203_v18 = vld [vmem:[#allocation31_spill] sm:$0xff] }
 0x78b   : > { %v15844_v45 = vmul.f32 %v15705_v15, %v8662_v34  ;;  %v8934_v16 = vmul.f32 %v17198_v19, %v8630_v21  ;;  %v9035_v37 = vmul.f32 %v12412_v26, %v8399_v55  ;;  %v9000_v0 = vadd.f32 %v8968_v23, %v8898_v46 }
 0x78c   : > { %v15841_v56 = vmax.f32 %v8217_v36, 0.0  ;;  %v9140_v17 = vmul.f32 %v15726_v38, %v15755_v39  ;;  %v8467_v33 = vmul.f32 %v15697_v49, %v8431_v50  ;;  %v8829_v20 = vadd.f32 %v8797_v44, %v8727_v31  ;;  %v8400_v50 = vld [vmem:[#allocation3 + $0x4f] sm:$0xff] }
 0x78d   : > { %v7996_v8 = vpop.f32.mrb[118].mxu1  ;;  %v8831_v61 = vadd.f32 %v8799_v62, %v8729_v4  ;;  %v8567_v34 = vmul.f32 %v15700_v3, %v15777_v51  ;;  %v8699_v21 = vmul.f32 %v15705_v15, %v8631_v9  ;;  %v9102_v26 = vadd.f32 %v9070_v14, %v9000_v0  ;;  %v17204_v0 = vld [vmem:[#allocation18_spill] sm:$0xff] }
 0x78e   : > { %8367 = vst [vmem:[#allocation3 + $0x68] sm:$0xff] %v15841_v56  ;;  %v8222_v27 = vadd.f32 %v17203_v18, %v7996_v8  ;;  %v7998_v22 = vpop.f32.mrb[119].mxu1  ;;  %v9242_v23 = vmul.f32 %v15768_v41, %v9206_v40  ;;  %v8899_v39 = vadd.f32 %v15791_v10, %v8829_v20  ;;  %v9071_v55 = vmul.f32 %v15731_v7, %v9035_v37  ;;  %v8632_v10 = vld [vmem:[#allocation3 + $0x51] sm:$0xff] }
 0x78f   : > { %v8869_v4 = vmul.f32 %v15714_v11, %v15777_v51  ;;  %v8971_v62 = vmul.f32 %v15724_v1, %v8631_v9  ;;  %v8728_v36 = vadd.f32 %v8696_v28, %v15802_v57  ;;  %v9172_v2 = vadd.f32 %v9140_v17, %v9102_v26  ;;  %v8401_v22 = vld [vmem:[#allocation3 + $0x57] sm:$0xff] }
 0x790   : > { %v15859_v31 = vmax.f32 %v8222_v27, 0.0  ;;  %v8599_v46 = vadd.f32 %v8567_v34, %v8467_v33  ;;  %v9001_v44 = vadd.f32 %v8969_v63, %v8899_v39  ;;  %v9141_v14 = vmul.f32 %v15726_v38, %v15777_v51 }
 0x791   : > { %v8001_v40 = vpop.f32.mrb[120].mxu1  ;;  %v9243_v37 = vmul.f32 %v15768_v41, %v8631_v9  ;;  %v8468_v18 = vmul.f32 %v15697_v49, %v8400_v50  ;;  %v8830_v27 = vadd.f32 %v8798_v29, %v8728_v36  ;;  %v9274_v57 = vadd.f32 %v9242_v23, %v9172_v2  ;;  %v17205_v29 = vld [vmem:[#allocation17_spill] sm:$0xff] }
 0x792   : > { %8368 = vst [vmem:[#allocation3 + $0x70] sm:$0xff] %v15859_v31  ;;  %v8227_v8 = vadd.f32 %v17204_v0, %v8001_v40  ;;  %v8003_v20 = vpop.f32.mrb[121].mxu1  ;;  %v9103_v28 = vadd.f32 %v9071_v55, %v9001_v44  ;;  %v8568_v63 = vmul.f32 %v15700_v3, %v15793_v24  ;;  %v8970_v51 = vmul.f32 %v15724_v1, %v8934_v16  ;;  %v17206_v44 = vld [vmem:[#allocation16_spill] sm:$0xff] }
 0x793   : > { %v8900_v33 = vadd.f32 %v8868_v47, %v8830_v27  ;;  %v9072_v34 = vmul.f32 %v15731_v7, %v8400_v50  ;;  %v9208_v9 = vmul.f32 %v17198_v19, %v8632_v10  ;;  %9309 = vadd.xlane.f32.xlu1 %v9274_v57  ;;  %v15878_v26 = vadd.f32 %v8699_v21, %v8599_v46 }
 0x794   : > { %v15874_v17 = vmax.f32 %v8227_v8, 0.0  ;;  %v9173_v39 = vadd.f32 %v9141_v14, %v9103_v28  ;;  %v8664_v36 = vmul.f32 %v17205_v29, %v8632_v10  ;;  %v8433_v55 = vmul.f32 %v16998_v6, %v8401_v22 }
 0x795   : > { %v8006_v23 = vpop.f32.mrb[122].mxu1  ;;  %v15883_v2 = vadd.f32 %v8568_v63, %v8468_v18  ;;  %v8800_v16 = vmul.f32 %v15712_v58, %v8400_v50  ;;  %v9002_v47 = vadd.f32 %v8970_v51, %v8900_v33  ;;  %v9142_v21 = vmul.f32 %v15726_v38, %v15793_v24  ;;  %v8633_v18 = vld [vmem:[#allocation3 + $0x59] sm:$0xff] }
 0x796   : > { %8369 = vst [vmem:[#allocation3 + $0x78] sm:$0xff] %v15874_v17  ;;  %v8232_v40 = vadd.f32 %v17206_v44, %v8006_v23  ;;  %v8008_v0 = vpop.f32.mrb[123].mxu1  ;;  %v9275_v19 = vadd.f32 %v9243_v37, %v9173_v39  ;;  %v8469_v46 = vmul.f32 %v15697_v49, %v8433_v55  ;;  %v8901_v14 = vadd.f32 %v8869_v4, %v8831_v61  ;;  %v8402_v39 = vld [vmem:[#allocation3 + $0x5f] sm:$0xff] }
 0x797   : > { %v9104_v8 = vadd.f32 %v9072_v34, %v9002_v47  ;;  %v9244_v20 = vmul.f32 %v15768_v41, %v9208_v9  ;;  %v9037_v57 = vmul.f32 %v12459_v32, %v8401_v22  ;;  %v15895_v50 = vmul.f32 %v15705_v15, %v8664_v36  ;;  %v17207_v32 = vld [vmem:[#allocation49_spill] sm:$0xff] }
 0x798   : > { %v15891_v27 = vmax.f32 %v8232_v40, 0.0  ;;  %9311 = vadd.xlane.f32.xlu0 %v9275_v19  ;;  %v8870_v37 = vmul.f32 %v15714_v11, %v15793_v24  ;;  %v8936_v28 = vmul.f32 %v17201_v5, %v8632_v10  ;;  %v8569_v61 = vmul.f32 %v15700_v3, %v15808_v48  ;;  %v8634_v10 = vld [vmem:[#allocation3 + $0x61] sm:$0xff] }
 0x799   : > { %v8011_v4 = vpop.f32.mrb[124].mxu1  ;;  %v9174_v63 = vadd.f32 %v9142_v21, %v9104_v8  ;;  %v9003_v51 = vadd.f32 %v8971_v62, %v8901_v14  ;;  %v9073_v33 = vmul.f32 %v15731_v7, %v9037_v57  ;;  %v8701_v23 = vmul.f32 %v15705_v15, %v8633_v18  ;;  %v8403_v14 = vld [vmem:[#allocation3 + $0x67] sm:$0xff] }
 0x79a   : > { %8370 = vst [vmem:[#allocation3 + $0x80] sm:$0xff] %v15891_v27  ;;  %v8237_v34 = vadd.f32 %v17207_v32, %v8011_v4  ;;  %v8013_v9 = vpop.f32.mrb[125].mxu1  ;;  %v8601_v36 = vadd.f32 %v8569_v61, %v8469_v46  ;;  %v8765_v24 = vmul.f32 %v12522_v43, %v8401_v22  ;;  %v8730_v55 = vadd.f32 %v15844_v45, %v15833_v53  ;;  %v17208_v45 = vld [vmem:[#allocation19_spill] sm:$0xff] }
 0x79b   : > { %v9276_v47 = vadd.f32 %v9244_v20, %v9174_v63  ;;  %v9105_v44 = vadd.f32 %v9073_v33, %v9003_v51  ;;  %v9143_v62 = vmul.f32 %v15726_v38, %v15808_v48  ;;  %v8871_v0 = vmul.f32 %v15714_v11, %v15808_v48 }
 0x79c   : > { %v15911_v40 = vmax.f32 %v8237_v34, 0.0  ;;  %v9245_v19 = vmul.f32 %v15768_v41, %v8633_v18  ;;  %v8470_v21 = vmul.f32 %v15697_v49, %v8402_v39  ;;  %v8832_v46 = vadd.f32 %v8800_v16, %v8730_v55  ;;  %v17209_v16 = vld [vmem:[#allocation53_spill] sm:$0xff] }
 0x79d   : > { %v8016_v22 = vpop.f32.mrb[126].mxu1  ;;  %9313 = vadd.xlane.f32.xlu1 %v9276_v47  ;;  %v9175_v8 = vadd.f32 %v9143_v62, %v9105_v44  ;;  %v8570_v53 = vmul.f32 %v15700_v3, %v15824_v35  ;;  %v8666_v20 = vmul.f32 %v17208_v45, %v8634_v10  ;;  %v8972_v57 = vmul.f32 %v15724_v1, %v8936_v28 }
 0x79e   : > { %8371 = vst [vmem:[#allocation3 + $0x88] sm:$0xff] %v15911_v40  ;;  %v8018_v61 = vpop.f32.mrb[127].mxu1  ;;  %v8902_v48 = vadd.f32 %v8870_v37, %v8832_v46  ;;  %v9074_v4 = vmul.f32 %v15731_v7, %v8402_v39  ;;  %v9210_v63 = vmul.f32 %v17201_v5, %v8634_v10  ;;  %v8242_v51 = vadd.f32 %v17209_v16, %v8016_v22 }
 0x79f   : > { %v15925_v33 = vadd.f32 %v8701_v23, %v8601_v36  ;;  %v8973_v32 = vmul.f32 %v15724_v1, %v8633_v18  ;;  %v9277_v34 = vadd.f32 %v9245_v19, %v9175_v8  ;;  %v8435_v9 = vmul.f32 %v17003_v30, %v8403_v14  ;;  %v8635_v23 = vld [vmem:[#allocation3 + $0x69] sm:$0xff]  ;;  %v8636_v61 = vld [vmem:[#allocation3 + $0x71] sm:$0xff] }
 0x7a0   : > { %v15929_v55 = vadd.f32 %v8570_v53, %v8470_v21  ;;  %v8802_v47 = vmul.f32 %v15712_v58, %v8402_v39  ;;  %v9004_v28 = vadd.f32 %v8972_v57, %v8902_v48  ;;  %v15932_v44 = vmax.f32 %v8242_v51, 0.0 }
 0x7a1   : > { %v8021_v37 = vpop.f32.mrb[128].mxu1  ;;  %9315 = vadd.xlane.f32.xlu0 %v9277_v34  ;;  %v15935_v5 = vmul.f32 %v15705_v15, %v8666_v20  ;;  %v8872_v36 = vmul.f32 %v15714_v11, %v15824_v35  ;;  %v9144_v18 = vmul.f32 %v15726_v38, %v15824_v35  ;;  %v8801_v62 = vmul.f32 %v15712_v58, %v8765_v24  ;;  %v17210_v20 = vld [vmem:[#allocation35_spill] sm:$0xff]  ;;  %v8404_v24 = vld [vmem:[#allocation3 + $0x6f] sm:$0xff] }
 0x7a2   : > { %v8023_v19 = vpop.f32.mrb[129].mxu1  ;;  %v9106_v21 = vadd.f32 %v9074_v4, %v9004_v28  ;;  %v9246_v39 = vmul.f32 %v15768_v41, %v9210_v63  ;;  %8372 = vst [vmem:[#allocation3 + $0x90] sm:$0xff] %v15932_v44  ;;  %v8471_v46 = vmul.f32 %v15697_v49, %v8435_v9  ;;  %v9039_v22 = vmul.f32 %v12522_v43, %v8403_v14 }
 0x7a3   : > { %v8938_v8 = vmul.f32 %v17205_v29, %v8634_v10  ;;  %v8571_v53 = vmul.f32 %v15700_v3, %v15841_v56  ;;  %v8833_v35 = vadd.f32 %v8801_v62, %v15878_v26  ;;  %v8247_v57 = vadd.f32 %v17210_v20, %v8021_v37  ;;  %v17211_v62 = vld [vmem:[#allocation21_spill] sm:$0xff] }
 0x7a4   : > { %v9176_v48 = vadd.f32 %v9144_v18, %v9106_v21  ;;  %v8703_v4 = vmul.f32 %v15705_v15, %v8635_v23  ;;  %v8767_v63 = vmul.f32 %v16998_v6, %v8403_v14  ;;  %v8873_v16 = vmul.f32 %v15714_v11, %v15841_v56  ;;  %v8405_v14 = vld [vmem:[#allocation3 + $0x77] sm:$0xff] }
 0x7a5   : > { %v8026_v43 = vpop.f32.mrb[130].mxu1  ;;  %v8903_v51 = vadd.f32 %v8871_v0, %v8833_v35  ;;  %v9075_v10 = vmul.f32 %v15731_v7, %v9039_v22  ;;  %v15956_v34 = vmax.f32 %v8247_v57, 0.0  ;;  %v8732_v26 = vadd.f32 %v15895_v50, %v15883_v2 }
 0x7a6   : > { %v8028_v9 = vpop.f32.mrb[131].mxu1  ;;  %v9278_v28 = vadd.f32 %v9246_v39, %v9176_v48  ;;  %v8603_v37 = vadd.f32 %v8571_v53, %v8471_v46  ;;  %v8472_v18 = vmul.f32 %v15697_v49, %v8404_v24  ;;  %v8668_v19 = vmul.f32 %v17211_v62, %v8636_v61 }
 0x7a7   : > { %v8975_v21 = vmul.f32 %v15724_v1, %v8635_v23  ;;  %v9005_v20 = vadd.f32 %v8973_v32, %v8903_v51  ;;  %v9145_v0 = vmul.f32 %v15726_v38, %v15841_v56  ;;  %8373 = vst [vmem:[#allocation3 + $0x98] sm:$0xff] %v15956_v34  ;;  %v8834_v22 = vadd.f32 %v8802_v47, %v8732_v26  ;;  %v17212_v32 = vld [vmem:[#allocation24_spill] sm:$0xff] }
 0x7a8   : > { %9317 = vadd.xlane.f32.xlu1 %v9278_v28  ;;  %v8572_v2 = vmul.f32 %v15700_v3, %v15859_v31  ;;  %v8974_v50 = vmul.f32 %v15724_v1, %v8938_v8  ;;  %v9076_v39 = vmul.f32 %v15731_v7, %v8404_v24  ;;  %v9212_v46 = vmul.f32 %v17205_v29, %v8636_v61 }
 0x7a9   : > { %v8031_v53 = vpop.f32.mrb[132].mxu1  ;;  %v9107_v35 = vadd.f32 %v9075_v10, %v9005_v20  ;;  %v8904_v57 = vadd.f32 %v8872_v36, %v8834_v22  ;;  %v8252_v48 = vadd.f32 %v17212_v32, %v8026_v43  ;;  %v8437_v56 = vmul.f32 %v17127_v59, %v8405_v14  ;;  %v8637_v43 = vld [vmem:[#allocation3 + $0x79] sm:$0xff] }
 0x7aa   : > { %v8033_v51 = vpop.f32.mrb[133].mxu1  ;;  %v15973_v9 = vadd.f32 %v8703_v4, %v8603_v37  ;;  %v9247_v47 = vmul.f32 %v15768_v41, %v8635_v23  ;;  %v15976_v26 = vadd.f32 %v8572_v2, %v8472_v18  ;;  %v15979_v8 = vmul.f32 %v15705_v15, %v8668_v19 }
 0x7ab   : > { %v9177_v28 = vadd.f32 %v9145_v0, %v9107_v35  ;;  %v8804_v29 = vmul.f32 %v15712_v58, %v8404_v24  ;;  %v9006_v42 = vadd.f32 %v8974_v50, %v8904_v57  ;;  %v15982_v10 = vmax.f32 %v8252_v48, 0.0 }
 0x7ac   : > { %v8874_v36 = vmul.f32 %v15714_v11, %v15859_v31  ;;  %v9146_v4 = vmul.f32 %v15726_v38, %v15859_v31  ;;  %v8803_v23 = vmul.f32 %v15712_v58, %v8767_v63  ;;  %v9041_v37 = vmul.f32 %v16998_v6, %v8405_v14  ;;  %v17213_v63 = vld [vmem:[#allocation37_spill] sm:$0xff]  ;;  %v8406_v6 = vld [vmem:[#allocation3 + $0x7f] sm:$0xff] }
 0x7ad   : > { %v8036_v18 = vpop.f32.mrb[134].mxu1  ;;  %v9279_v19 = vadd.f32 %v9247_v47, %v9177_v28  ;;  %v9108_v20 = vadd.f32 %v9076_v39, %v9006_v42  ;;  %v9248_v0 = vmul.f32 %v15768_v41, %v9212_v46  ;;  %8374 = vst [vmem:[#allocation3 + $0xa0] sm:$0xff] %v15982_v10  ;;  %v8473_v24 = vmul.f32 %v15697_v49, %v8437_v56  ;;  %v8638_v56 = vld [vmem:[#allocation3 + $0x81] sm:$0xff] }
 0x7ae   : > { %v8038_v22 = vpop.f32.mrb[135].mxu1  ;;  %v8940_v2 = vmul.f32 %v17208_v45, %v8636_v61  ;;  %v8573_v31 = vmul.f32 %v15700_v3, %v15874_v17  ;;  %v8835_v50 = vadd.f32 %v8803_v23, %v15925_v33  ;;  %v8257_v35 = vadd.f32 %v17213_v63, %v8031_v53 }
 0x7af   : > { %9319 = vadd.xlane.f32.xlu0 %v9279_v19  ;;  %v9178_v57 = vadd.f32 %v9146_v4, %v9108_v20  ;;  %v8705_v42 = vmul.f32 %v15705_v15, %v8637_v43  ;;  %v8769_v39 = vmul.f32 %v17003_v30, %v8405_v14  ;;  %v8875_v46 = vmul.f32 %v15714_v11, %v15874_v17  ;;  %v8407_v14 = vld [vmem:[#allocation3 + $0x87] sm:$0xff] }
 0x7b0   : > { %v8905_v32 = vadd.f32 %v8873_v16, %v8835_v50  ;;  %v9077_v61 = vmul.f32 %v15731_v7, %v9041_v37  ;;  %v16003_v48 = vmax.f32 %v8257_v35, 0.0  ;;  %v8734_v33 = vadd.f32 %v15935_v5, %v15929_v55 }
 0x7b1   : > { %v8041_v53 = vpop.f32.mrb[136].mxu1  ;;  %v9280_v51 = vadd.f32 %v9248_v0, %v9178_v57  ;;  %v8605_v47 = vadd.f32 %v8573_v31, %v8473_v24  ;;  %v8977_v28 = vmul.f32 %v15724_v1, %v8637_v43  ;;  %v8474_v4 = vmul.f32 %v15697_v49, %v8406_v6  ;;  %v17214_v31 = vld [vmem:[#allocation51_spill] sm:$0xff] }
 0x7b2   : > { %v8043_v23 = vpop.f32.mrb[137].mxu1  ;;  %v9007_v19 = vadd.f32 %v8975_v21, %v8905_v32  ;;  %v9147_v16 = vmul.f32 %v15726_v38, %v15874_v17  ;;  %8375 = vst [vmem:[#allocation3 + $0xa8] sm:$0xff] %v16003_v48  ;;  %v8574_v37 = vmul.f32 %v15700_v3, %v15891_v27  ;;  %v8836_v20 = vadd.f32 %v8804_v29, %v8734_v33 }
 0x7b3   : > { %9321 = vadd.xlane.f32.xlu1 %v9280_v51  ;;  %v8670_v55 = vmul.f32 %v17093_v54, %v8638_v56  ;;  %v8976_v5 = vmul.f32 %v15724_v1, %v8940_v2  ;;  %v9078_v0 = vmul.f32 %v15731_v7, %v8406_v6  ;;  %v9214_v24 = vmul.f32 %v17208_v45, %v8638_v56  ;;  %v8639_v51 = vld [vmem:[#allocation3 + $0x89] sm:$0xff] }
 0x7b4   : > { %v9109_v22 = vadd.f32 %v9077_v61, %v9007_v19  ;;  %v8906_v21 = vadd.f32 %v8874_v36, %v8836_v20  ;;  %v8262_v50 = vadd.f32 %v17214_v31, %v8036_v18  ;;  %v8439_v17 = vmul.f32 %v17132_v25, %v8407_v14 }
 0x7b5   : > { %v8046_v63 = vpop.f32.mrb[138].mxu1  ;;  %v16020_v35 = vadd.f32 %v8705_v42, %v8605_v47  ;;  %v9249_v29 = vmul.f32 %v15768_v41, %v8637_v43  ;;  %v16023_v57 = vadd.f32 %v8574_v37, %v8474_v4  ;;  %v8806_v32 = vmul.f32 %v15712_v58, %v8406_v6 }
 0x7b6   : > { %v8048_v2 = vpop.f32.mrb[139].mxu1  ;;  %v9179_v33 = vadd.f32 %v9147_v16, %v9109_v22  ;;  %v8876_v45 = vmul.f32 %v15714_v11, %v15891_v27  ;;  %v9008_v61 = vadd.f32 %v8976_v5, %v8906_v21  ;;  %v16028_v36 = vmax.f32 %v8262_v50, 0.0  ;;  %v8408_v5 = vld [vmem:[#allocation3 + $0x8f] sm:$0xff] }
 0x7b7   : > { %v16031_v18 = vmul.f32 %v15705_v15, %v8670_v55  ;;  %v9148_v42 = vmul.f32 %v15726_v38, %v15891_v27  ;;  %v8805_v43 = vmul.f32 %v15712_v58, %v8769_v39  ;;  %v9043_v47 = vmul.f32 %v17003_v30, %v8407_v14  ;;  %v17215_v55 = vld [vmem:[#allocation28_spill] sm:$0xff] }
 0x7b8   : > { %v9281_v6 = vadd.f32 %v9249_v29, %v9179_v33  ;;  %v9110_v4 = vadd.f32 %v9078_v0, %v9008_v61  ;;  %v9250_v23 = vmul.f32 %v15768_v41, %v9214_v24  ;;  %8376 = vst [vmem:[#allocation3 + $0xb0] sm:$0xff] %v16028_v36  ;;  %v8475_v19 = vmul.f32 %v15697_v49, %v8439_v17  ;;  %v8640_v17 = vld [vmem:[#allocation3 + $0x91] sm:$0xff] }
 0x7b9   : > { %v8051_v16 = vpop.f32.mrb[140].mxu1  ;;  %v8942_v37 = vmul.f32 %v17211_v62, %v8638_v56  ;;  %v8575_v20 = vmul.f32 %v15700_v3, %v15911_v40  ;;  %v8837_v27 = vadd.f32 %v8805_v43, %v15973_v9  ;;  %v8267_v39 = vadd.f32 %v17215_v55, %v8041_v53  ;;  %v8409_v61 = vld [vmem:[#allocation3 + $0x97] sm:$0xff] }
 0x7ba   : > { %v8053_v30 = vpop.f32.mrb[141].mxu1  ;;  %9323 = vadd.xlane.f32.xlu0 %v9281_v6  ;;  %v9180_v0 = vadd.f32 %v9148_v42, %v9110_v4  ;;  %v8707_v24 = vmul.f32 %v15705_v15, %v8639_v51  ;;  %v8771_v22 = vmul.f32 %v17127_v59, %v8407_v14  ;;  %v8877_v21 = vmul.f32 %v15714_v11, %v15911_v40 }
 0x7bb   : > { %v8907_v31 = vadd.f32 %v8875_v46, %v8837_v27  ;;  %v9079_v56 = vmul.f32 %v15731_v7, %v9043_v47  ;;  %v16050_v50 = vmax.f32 %v8267_v39, 0.0  ;;  %v8736_v9 = vadd.f32 %v15979_v8, %v15976_v26  ;;  %v17216_v8 = vld [vmem:[#allocation26_spill] sm:$0xff]  ;;  %v17217_v27 = vld [vmem:[#allocation48_spill] sm:$0xff] }
 0x7bc   : > { %v9282_v53 = vadd.f32 %v9250_v23, %v9180_v0  ;;  %v8607_v29 = vadd.f32 %v8575_v20, %v8475_v19  ;;  %v8979_v2 = vmul.f32 %v15724_v1, %v8639_v51  ;;  %v8476_v33 = vmul.f32 %v15697_v49, %v8408_v5 }
 0x7bd   : > { %v16056_v14 = vpop.f32.mrb[142].mxu1  ;;  %v9009_v42 = vadd.f32 %v8977_v28, %v8907_v31  ;;  %v9149_v46 = vmul.f32 %v15726_v38, %v15911_v40  ;;  %8377 = vst [vmem:[#allocation3 + $0xb8] sm:$0xff] %v16050_v50  ;;  %v8576_v43 = vmul.f32 %v15700_v3, %v15932_v44  ;;  %v8838_v47 = vadd.f32 %v8806_v32, %v8736_v9 }
 0x7be   : > { %v8058_v26 = vpop.f32.mrb[143].mxu1  ;;  %9325 = vadd.xlane.f32.xlu1 %v9282_v53  ;;  %v8672_v6 = vmul.f32 %v17216_v8, %v8640_v17  ;;  %v8978_v4 = vmul.f32 %v15724_v1, %v8942_v37  ;;  %v9080_v23 = vmul.f32 %v15731_v7, %v8408_v5  ;;  %v9216_v19 = vmul.f32 %v17211_v62, %v8640_v17 }
 0x7bf   : > { %v9111_v28 = vadd.f32 %v9079_v56, %v9009_v42  ;;  %v8908_v20 = vadd.f32 %v8876_v45, %v8838_v47  ;;  %v8272_v40 = vadd.f32 %v17217_v27, %v8046_v63  ;;  %v8441_v55 = vmul.f32 %v17137_v13, %v8409_v61  ;;  %v17218_v26 = vld [vmem:[#allocation32_spill] sm:$0xff] }
 0x7c0   : > { %v16069_v39 = vadd.f32 %v8707_v24, %v8607_v29  ;;  %v9251_v32 = vmul.f32 %v15768_v41, %v8639_v51  ;;  %v16072_v30 = vadd.f32 %v8576_v43, %v8476_v33  ;;  %v8808_v0 = vmul.f32 %v15712_v58, %v8408_v5  ;;  %v8641_v24 = vld [vmem:[#allocation3 + $0x99] sm:$0xff] }
 0x7c1   : > { %v16075_v31 = vpop.f32.mrb[144].mxu1  ;;  %v9181_v37 = vadd.f32 %v9149_v46, %v9111_v28  ;;  %v8878_v62 = vmul.f32 %v15714_v11, %v15932_v44  ;;  %v9010_v56 = vadd.f32 %v8978_v4, %v8908_v20  ;;  %v16079_v45 = vmax.f32 %v8272_v40, 0.0 }
 0x7c2   : > { %v8063_v63 = vpop.f32.mrb[145].mxu1  ;;  %v16082_v9 = vmul.f32 %v15705_v15, %v8672_v6  ;;  %v9150_v51 = vmul.f32 %v15726_v38, %v15932_v44  ;;  %v8807_v53 = vmul.f32 %v15712_v58, %v8771_v22  ;;  %v9045_v5 = vmul.f32 %v17127_v59, %v8409_v61  ;;  %v8410_v22 = vld [vmem:[#allocation3 + $0x9f] sm:$0xff] }
 0x7c3   : > { %v9283_v29 = vadd.f32 %v9251_v32, %v9181_v37  ;;  %v9112_v33 = vadd.f32 %v9080_v23, %v9010_v56  ;;  %v9252_v42 = vmul.f32 %v15768_v41, %v9216_v19  ;;  %8378 = vst [vmem:[#allocation3 + $0xc0] sm:$0xff] %v16079_v45  ;;  %v8477_v46 = vmul.f32 %v15697_v49, %v8441_v55 }
 0x7c4   : > { %v8944_v43 = vmul.f32 %v17093_v54, %v8640_v17  ;;  %v8577_v47 = vmul.f32 %v15700_v3, %v15956_v34  ;;  %v8839_v44 = vadd.f32 %v8807_v53, %v16020_v35  ;;  %v8277_v6 = vadd.f32 %v17218_v26, %v8051_v16  ;;  %v8642_v35 = vld [vmem:[#allocation3 + $0xa1] sm:$0xff] }
 0x7c5   : > { %v16096_v4 = vpop.f32.mrb[146].mxu1  ;;  %9327 = vadd.xlane.f32.xlu0 %v9283_v29  ;;  %v9182_v59 = vadd.f32 %v9150_v51, %v9112_v33  ;;  %v8709_v23 = vmul.f32 %v15705_v15, %v8641_v24  ;;  %v8773_v19 = vmul.f32 %v17132_v25, %v8409_v61  ;;  %v8879_v28 = vmul.f32 %v15714_v11, %v15956_v34  ;;  %v8411_v61 = vld [vmem:[#allocation3 + $0xa7] sm:$0xff] }
 0x7c6   : > { %v8068_v17 = vpop.f32.mrb[147].mxu1  ;;  %v8909_v20 = vadd.f32 %v8877_v21, %v8839_v44  ;;  %v9081_v27 = vmul.f32 %v15731_v7, %v9045_v5  ;;  %v16103_v40 = vmax.f32 %v8277_v6, 0.0  ;;  %v8738_v16 = vadd.f32 %v16031_v18, %v16023_v57  ;;  %v17219_v57 = vld [vmem:[#allocation30_spill] sm:$0xff] }
 0x7c7   : > { %v9284_v55 = vadd.f32 %v9252_v42, %v9182_v59  ;;  %v8609_v32 = vadd.f32 %v8577_v47, %v8477_v46  ;;  %v8981_v37 = vmul.f32 %v15724_v1, %v8641_v24  ;;  %v8478_v56 = vmul.f32 %v15697_v49, %v8410_v22  ;;  %v17220_v47 = vld [vmem:[#allocation46_spill] sm:$0xff] }
 0x7c8   : > { %v9011_v63 = vadd.f32 %v8979_v2, %v8909_v20  ;;  %v9151_v51 = vmul.f32 %v15726_v38, %v15956_v34  ;;  %8379 = vst [vmem:[#allocation3 + $0xc8] sm:$0xff] %v16103_v40  ;;  %v8578_v21 = vmul.f32 %v15700_v3, %v15982_v10  ;;  %v8840_v53 = vadd.f32 %v8808_v0, %v8738_v16 }
 0x7c9   : > { %v16114_v5 = vpop.f32.mrb[148].mxu1  ;;  %9329 = vadd.xlane.f32.xlu1 %v9284_v55  ;;  %v8674_v18 = vmul.f32 %v17219_v57, %v8642_v35  ;;  %v8980_v29 = vmul.f32 %v15724_v1, %v8944_v43  ;;  %v9082_v33 = vmul.f32 %v15731_v7, %v8410_v22  ;;  %v9218_v2 = vmul.f32 %v17093_v54, %v8642_v35 }
 0x7ca   : > { %v8073_v42 = vpop.f32.mrb[149].mxu1  ;;  %v9113_v46 = vadd.f32 %v9081_v27, %v9011_v63  ;;  %v8910_v34 = vadd.f32 %v8878_v62, %v8840_v53  ;;  %v8282_v44 = vadd.f32 %v17220_v47, %v16056_v14  ;;  %v8443_v26 = vmul.f32 %v17142_v60, %v8411_v61 }
 0x7cb   : > { %v16123_v0 = vadd.f32 %v8709_v23, %v8609_v32  ;;  %v9253_v6 = vmul.f32 %v15768_v41, %v8641_v24  ;;  %v16126_v59 = vadd.f32 %v8578_v21, %v8478_v56  ;;  %v8810_v43 = vmul.f32 %v15712_v58, %v8410_v22  ;;  %v8643_v24 = vld [vmem:[#allocation3 + $0xa9] sm:$0xff] }
 0x7cc   : > { %v9183_v17 = vadd.f32 %v9151_v51, %v9113_v46  ;;  %v8880_v54 = vmul.f32 %v15714_v11, %v15982_v10  ;;  %v9012_v20 = vadd.f32 %v8980_v29, %v8910_v34  ;;  %v16131_v27 = vmax.f32 %v8282_v44, 0.0 }
 0x7cd   : > { %v16133_v62 = vpop.f32.mrb[150].mxu1  ;;  %v16136_v14 = vmul.f32 %v15705_v15, %v8674_v18  ;;  %v9152_v23 = vmul.f32 %v15726_v38, %v15982_v10  ;;  %v8809_v16 = vmul.f32 %v15712_v58, %v8773_v19  ;;  %v9047_v22 = vmul.f32 %v17132_v25, %v8411_v61  ;;  %v17221_v19 = vld [vmem:[#allocation55_spill] sm:$0xff]  ;;  %v8412_v25 = vld [vmem:[#allocation3 + $0xaf] sm:$0xff] }
 0x7ce   : > { %v8078_v55 = vpop.f32.mrb[151].mxu1  ;;  %v9285_v32 = vadd.f32 %v9253_v6, %v9183_v17  ;;  %v9114_v56 = vadd.f32 %v9082_v33, %v9012_v20  ;;  %v9254_v63 = vmul.f32 %v15768_v41, %v9218_v2  ;;  %8380 = vst [vmem:[#allocation3 + $0xd0] sm:$0xff] %v16131_v27  ;;  %v8479_v51 = vmul.f32 %v15697_v49, %v8443_v26  ;;  %v8413_v20 = vld [vmem:[#allocation3 + $0xb7] sm:$0xff] }
 0x7cf   : > { %v8946_v21 = vmul.f32 %v17216_v8, %v8642_v35  ;;  %v8579_v53 = vmul.f32 %v15700_v3, %v16003_v48  ;;  %v8841_v10 = vadd.f32 %v8809_v16, %v16069_v39  ;;  %v8287_v18 = vadd.f32 %v17221_v19, %v16075_v31  ;;  %v8644_v39 = vld [vmem:[#allocation3 + $0xb1] sm:$0xff] }
 0x7d0   : > { %9331 = vadd.xlane.f32.xlu0 %v9285_v32  ;;  %v9184_v29 = vadd.f32 %v9152_v23, %v9114_v56  ;;  %v8711_v33 = vmul.f32 %v15705_v15, %v8643_v24  ;;  %v8775_v2 = vmul.f32 %v17137_v13, %v8411_v61  ;;  %v8881_v42 = vmul.f32 %v15714_v11, %v16003_v48 }
 0x7d1   : > { %v16155_v46 = vpop.f32.mrb[152].mxu1  ;;  %v8911_v35 = vadd.f32 %v8879_v28, %v8841_v10  ;;  %v9083_v34 = vmul.f32 %v15731_v7, %v9047_v22  ;;  %v16158_v47 = vmax.f32 %v8287_v18, 0.0  ;;  %v8740_v31 = vadd.f32 %v16082_v9, %v16072_v30 }
 0x7d2   : > { %v8083_v44 = vpop.f32.mrb[153].mxu1  ;;  %v9286_v26 = vadd.f32 %v9254_v63, %v9184_v29  ;;  %v8611_v6 = vadd.f32 %v8579_v53, %v8479_v51  ;;  %v8983_v17 = vmul.f32 %v15724_v1, %v8643_v24  ;;  %v8480_v61 = vmul.f32 %v15697_v49, %v8412_v25 }
 0x7d3   : > { %v9013_v23 = vadd.f32 %v8981_v37, %v8911_v35  ;;  %v9153_v28 = vmul.f32 %v15726_v38, %v16003_v48  ;;  %8381 = vst [vmem:[#allocation3 + $0xd8] sm:$0xff] %v16158_v47  ;;  %v8580_v16 = vmul.f32 %v15700_v3, %v16028_v36  ;;  %v8842_v22 = vadd.f32 %v8810_v43, %v8740_v31  ;;  %v17222_v48 = vld [vmem:[#allocation47_spill] sm:$0xff] }
 0x7d4   : > { %9333 = vadd.xlane.f32.xlu1 %v9286_v26  ;;  %v8676_v30 = vmul.f32 %v17113_v52, %v8644_v39  ;;  %v8982_v9 = vmul.f32 %v15724_v1, %v8946_v21  ;;  %v9084_v55 = vmul.f32 %v15731_v7, %v8412_v25  ;;  %v9220_v32 = vmul.f32 %v17216_v8, %v8644_v39 }
 0x7d5   : > { %v16173_v56 = vpop.f32.mrb[154].mxu1  ;;  %v9115_v37 = vadd.f32 %v9083_v34, %v9013_v23  ;;  %v8912_v63 = vadd.f32 %v8880_v54, %v8842_v22  ;;  %v8292_v51 = vadd.f32 %v17222_v48, %v16096_v4  ;;  %v8445_v53 = vmul.f32 %v17147_v12, %v8413_v20  ;;  %v8645_v34 = vld [vmem:[#allocation3 + $0xb9] sm:$0xff] }
 0x7d6   : > { %v8088_v10 = vpop.f32.mrb[155].mxu1  ;;  %v16178_v43 = vadd.f32 %v8711_v33, %v8611_v6  ;;  %v9255_v19 = vmul.f32 %v15768_v41, %v8643_v24  ;;  %v16181_v18 = vadd.f32 %v8580_v16, %v8480_v61  ;;  %v8812_v21 = vmul.f32 %v15712_v58, %v8412_v25  ;;  %v8414_v22 = vld [vmem:[#allocation3 + $0xbf] sm:$0xff] }
 0x7d7   : > { %v9185_v29 = vadd.f32 %v9153_v28, %v9115_v37  ;;  %v8882_v8 = vmul.f32 %v15714_v11, %v16028_v36  ;;  %v9014_v35 = vadd.f32 %v8982_v9, %v8912_v63  ;;  %v16186_v54 = vmax.f32 %v8292_v51, 0.0  ;;  %v8646_v63 = vld [vmem:[#allocation3 + $0xc1] sm:$0xff] }
 0x7d8   : > { %v16189_v4 = vmul.f32 %v15705_v15, %v8676_v30  ;;  %v9154_v33 = vmul.f32 %v15726_v38, %v16028_v36  ;;  %v8811_v24 = vmul.f32 %v15712_v58, %v8775_v2  ;;  %v9049_v31 = vmul.f32 %v17137_v13, %v8413_v20  ;;  %v17223_v13 = vld [vmem:[#allocation52_spill] sm:$0xff] }
 0x7d9   : > { %v16195_v44 = vpop.f32.mrb[156].mxu1  ;;  %v9287_v25 = vadd.f32 %v9255_v19, %v9185_v29  ;;  %v9116_v26 = vadd.f32 %v9084_v55, %v9014_v35  ;;  %v9256_v6 = vmul.f32 %v15768_v41, %v9220_v32  ;;  %8382 = vst [vmem:[#allocation3 + $0xe0] sm:$0xff] %v16186_v54  ;;  %v8481_v61 = vmul.f32 %v15697_v49, %v8445_v53  ;;  %v8415_v10 = vld [vmem:[#allocation3 + $0xc7] sm:$0xff] }
 0x7da   : > { %v8093_v23 = vpop.f32.mrb[157].mxu1  ;;  %v8948_v28 = vmul.f32 %v17219_v57, %v8644_v39  ;;  %v8581_v36 = vmul.f32 %v15700_v3, %v16050_v50  ;;  %v8843_v2 = vadd.f32 %v8811_v24, %v16123_v0  ;;  %v8297_v16 = vadd.f32 %v17223_v13, %v16114_v5 }
 0x7db   : > { %9335 = vadd.xlane.f32.xlu0 %v9287_v25  ;;  %v9186_v30 = vadd.f32 %v9154_v33, %v9116_v26  ;;  %v8713_v41 = vmul.f32 %v15705_v15, %v8645_v34  ;;  %v8777_v9 = vmul.f32 %v17142_v60, %v8413_v20  ;;  %v8883_v55 = vmul.f32 %v15714_v11, %v16050_v50 }
 0x7dc   : > { %v8913_v32 = vadd.f32 %v8881_v42, %v8843_v2  ;;  %v9085_v39 = vmul.f32 %v15731_v7, %v9049_v31  ;;  %v16211_v37 = vmax.f32 %v8297_v16, 0.0  ;;  %v8742_v0 = vadd.f32 %v16136_v14, %v16126_v59  ;;  %v17224_v14 = vld [vmem:[#allocation39_spill] sm:$0xff] }
 0x7dd   : > { %v16215_v5 = vpop.f32.mrb[158].mxu1  ;;  %v9288_v48 = vadd.f32 %v9256_v6, %v9186_v30  ;;  %v8613_v51 = vadd.f32 %v8581_v36, %v8481_v61  ;;  %v8985_v53 = vmul.f32 %v15724_v1, %v8645_v34  ;;  %v8482_v20 = vmul.f32 %v15697_v49, %v8414_v22  ;;  %v17225_v6 = vld [vmem:[#allocation33_spill] sm:$0xff]  ;;  %v17226_v61 = vld [vmem:[#allocation38_spill] sm:$0xff] }
 0x7de   : > { %v8098_v19 = vpop.f32.mrb[159].mxu1  ;;  %v9015_v29 = vadd.f32 %v8983_v17, %v8913_v32  ;;  %v9155_v42 = vmul.f32 %v15726_v38, %v16050_v50  ;;  %8383 = vst [vmem:[#allocation3 + $0xe8] sm:$0xff] %v16211_v37  ;;  %v8582_v35 = vmul.f32 %v15700_v3, %v16079_v45  ;;  %v8844_v59 = vadd.f32 %v8812_v21, %v8742_v0  ;;  %v16236_v21 = vld [vmem:[%s16587_s3 + $0x8] ss:$0 sm:$0xff]  ;;  %v8647_v32 = vld [vmem:[#allocation3 + $0xc9] sm:$0xff] }
 0x7df   : > { %9337 = vadd.xlane.f32.xlu1 %v9288_v48  ;;  %v8678_v33 = vmul.f32 %v17224_v14, %v8646_v63  ;;  %v8984_v24 = vmul.f32 %v15724_v1, %v8948_v28  ;;  %v9086_v31 = vmul.f32 %v15731_v7, %v8414_v22  ;;  %v9222_v25 = vmul.f32 %v17219_v57, %v8646_v63 }
 0x7e0   : > { %v9117_v26 = vadd.f32 %v9085_v39, %v9015_v29  ;;  %v8914_v17 = vadd.f32 %v8882_v8, %v8844_v59  ;;  %v8302_v50 = vadd.f32 %v17225_v6, %v16133_v62  ;;  %v8447_v23 = vmul.f32 %v17226_v61, %v8415_v10  ;;  %v17227_v29 = vld [vmem:[#allocation54_spill] sm:$0xff] }
 0x7e1   : > { %v16231_v36 = vadd.f32 %v8713_v41, %v8613_v51  ;;  %v9257_v28 = vmul.f32 %v16236_v21, %v8645_v34  ;;  %v16239_v2 = vadd.f32 %v8582_v35, %v8482_v20  ;;  %v8814_v57 = vmul.f32 %v15712_v58, %v8414_v22 }
 0x7e2   : > { %v9187_v13 = vadd.f32 %v9155_v42, %v9117_v26  ;;  %v8884_v8 = vmul.f32 %v15714_v11, %v16079_v45  ;;  %v9016_v62 = vadd.f32 %v8984_v24, %v8914_v17  ;;  %v16244_v16 = vmax.f32 %v8302_v50, 0.0  ;;  %v8416_v42 = vld [vmem:[#allocation3 + $0xcf] sm:$0xff]  ;;  %v8417_v50 = vld [vmem:[#allocation3 + $0xd7] sm:$0xff] }
 0x7e3   : > { %v16247_v30 = vmul.f32 %v15705_v15, %v8678_v33  ;;  %v9156_v41 = vmul.f32 %v15726_v38, %v16079_v45  ;;  %v8813_v34 = vmul.f32 %v15712_v58, %v8777_v9  ;;  %v9051_v39 = vmul.f32 %v17142_v60, %v8415_v10 }
 0x7e4   : > { %v9289_v0 = vadd.f32 %v9257_v28, %v9187_v13  ;;  %v9118_v22 = vadd.f32 %v9086_v31, %v9016_v62  ;;  %v9258_v48 = vmul.f32 %v16236_v21, %v9222_v25  ;;  %8384 = vst [vmem:[#allocation3 + $0xf0] sm:$0xff] %v16244_v16  ;;  %v8483_v51 = vmul.f32 %v15697_v49, %v8447_v23  ;;  %v8648_v25 = vld [vmem:[#allocation3 + $0xd1] sm:$0xff] }
 0x7e5   : > { %v8950_v20 = vmul.f32 %v17113_v52, %v8646_v63  ;;  %v8583_v19 = vmul.f32 %v15700_v3, %v16103_v40  ;;  %v8845_v45 = vadd.f32 %v8813_v34, %v16178_v43  ;;  %v8307_v9 = vadd.f32 %v17227_v29, %v16155_v46  ;;  %v17228_v13 = vld [vmem:[#allocation41_spill] sm:$0xff] }
 0x7e6   : > { %9339 = vadd.xlane.f32.xlu0 %v9289_v0  ;;  %v9188_v60 = vadd.f32 %v9156_v41, %v9118_v22  ;;  %v8715_v35 = vmul.f32 %v15705_v15, %v8647_v32  ;;  %v8779_v59 = vmul.f32 %v17147_v12, %v8415_v10  ;;  %v8885_v33 = vmul.f32 %v15714_v11, %v16103_v40  ;;  %v17230_v0 = vld [vmem:[#allocation40_spill] sm:$0xff] }
 0x7e7   : > { %v8915_v24 = vadd.f32 %v8883_v55, %v8845_v45  ;;  %v9087_v63 = vmul.f32 %v15731_v7, %v9051_v39  ;;  %v16267_v31 = vmax.f32 %v8307_v9, 0.0  ;;  %v8744_v43 = vadd.f32 %v16189_v4, %v16181_v18  ;;  %v17229_v39 = vld [vmem:[#allocation7_spill] sm:$0xff] }
 0x7e8   : > { %v9290_v46 = vadd.f32 %v9258_v48, %v9188_v60  ;;  %v8615_v26 = vadd.f32 %v8583_v19, %v8483_v51  ;;  %v8987_v17 = vmul.f32 %v15724_v1, %v8647_v32  ;;  %v8484_v6 = vmul.f32 %v15697_v49, %v8416_v42  ;;  %v8649_v9 = vld [vmem:[#allocation3 + $0xd9] sm:$0xff] }
 0x7e9   : > { %v9017_v10 = vadd.f32 %v8985_v53, %v8915_v24  ;;  %v9157_v23 = vmul.f32 %v15726_v38, %v16103_v40  ;;  %8385 = vst [vmem:[#allocation3 + $0xf8] sm:$0xff] %v16267_v31  ;;  %v8584_v55 = vmul.f32 %v15700_v3, %v16131_v27  ;;  %v8846_v28 = vadd.f32 %v8814_v57, %v8744_v43 }
 0x7ea   : > { %9341 = vadd.xlane.f32.xlu1 %v9290_v46  ;;  %v8680_v18 = vmul.f32 %v17228_v13, %v8648_v25  ;;  %v8986_v4 = vmul.f32 %v15724_v1, %v8950_v20  ;;  %v9088_v62 = vmul.f32 %v15731_v7, %v8416_v42  ;;  %v9224_v41 = vmul.f32 %v17113_v52, %v8648_v25 }
 0x7eb   : > { %v9119_v34 = vadd.f32 %v9087_v63, %v9017_v10  ;;  %v8916_v53 = vadd.f32 %v8884_v8, %v8846_v28  ;;  %v8312_v40 = vadd.f32 %v17229_v39, %v16173_v56  ;;  %v8449_v22 = vmul.f32 %v17230_v0, %v8417_v50 }
 0x7ec   : > { %v16285_v48 = vadd.f32 %v8715_v35, %v8615_v26  ;;  %v9259_v57 = vmul.f32 %v16236_v21, %v8647_v32  ;;  %v16288_v51 = vadd.f32 %v8584_v55, %v8484_v6  ;;  %v8816_v19 = vmul.f32 %v15712_v58, %v8416_v42  ;;  %v17231_v26 = vld [vmem:[#allocation8_spill] sm:$0xff]  ;;  %v8418_v6 = vld [vmem:[#allocation3 + $0xdf] sm:$0xff] }
 0x7ed   : > { %v9189_v20 = vadd.f32 %v9157_v23, %v9119_v34  ;;  %v8886_v45 = vmul.f32 %v15714_v11, %v16131_v27  ;;  %v9018_v52 = vadd.f32 %v8986_v4, %v8916_v53  ;;  %v16293_v29 = vmax.f32 %v8312_v40, 0.0  ;;  %v8650_v4 = vld [vmem:[#allocation3 + $0xe1] sm:$0xff] }
 0x7ee   : > { %v16296_v8 = vmul.f32 %v15705_v15, %v8680_v18  ;;  %v9158_v56 = vmul.f32 %v15726_v38, %v16131_v27  ;;  %v8815_v32 = vmul.f32 %v15712_v58, %v8779_v59  ;;  %v9053_v60 = vmul.f32 %v17147_v12, %v8417_v50  ;;  %v8419_v53 = vld [vmem:[#allocation3 + $0xe7] sm:$0xff] }
 0x7ef   : > { %v9291_v35 = vadd.f32 %v9259_v57, %v9189_v20  ;;  %v9120_v42 = vadd.f32 %v9088_v62, %v9018_v52  ;;  %v9260_v24 = vmul.f32 %v16236_v21, %v9224_v41  ;;  %8386 = vst [vmem:[#allocation3 + $0x100] sm:$0xff] %v16293_v29  ;;  %v8485_v63 = vmul.f32 %v15697_v49, %v8449_v22  ;;  %v17232_v52 = vld [vmem:[#allocation23_spill] sm:$0xff] }
 0x7f0   : > { %v8952_v43 = vmul.f32 %v17224_v14, %v8648_v25  ;;  %v8585_v46 = vmul.f32 %v15700_v3, %v16158_v47  ;;  %v8847_v27 = vadd.f32 %v8815_v32, %v16231_v36  ;;  %v8317_v59 = vadd.f32 %v17231_v26, %v16195_v44 }
 0x7f1   : > { %9343 = vadd.xlane.f32.xlu0 %v9291_v35  ;;  %v9190_v12 = vadd.f32 %v9158_v56, %v9120_v42  ;;  %v8717_v10 = vmul.f32 %v15705_v15, %v8649_v9  ;;  %v8781_v23 = vmul.f32 %v17226_v61, %v8417_v50  ;;  %v8887_v55 = vmul.f32 %v15714_v11, %v16158_v47  ;;  %v17233_v56 = vld [vmem:[#allocation42_spill] sm:$0xff] }
 0x7f2   : > { %v8917_v28 = vadd.f32 %v8885_v33, %v8847_v27  ;;  %v9089_v25 = vmul.f32 %v15731_v7, %v9053_v60  ;;  %v16316_v18 = vmax.f32 %v8317_v59, 0.0  ;;  %v8746_v36 = vadd.f32 %v16247_v30, %v16239_v2  ;;  %v17234_v60 = vld [vmem:[#allocation43_spill] sm:$0xff] }
 0x7f3   : > { %v9292_v44 = vadd.f32 %v9260_v24, %v9190_v12  ;;  %v8617_v62 = vadd.f32 %v8585_v46, %v8485_v63  ;;  %v8989_v41 = vmul.f32 %v15724_v1, %v8649_v9  ;;  %v8486_v34 = vmul.f32 %v15697_v49, %v8418_v6 }
 0x7f4   : > { %v9019_v50 = vadd.f32 %v8987_v17, %v8917_v28  ;;  %v9159_v39 = vmul.f32 %v15726_v38, %v16158_v47  ;;  %v9261_v33 = vmul.f32 %v16236_v21, %v8649_v9  ;;  %8387 = vst [vmem:[#allocation3 + $0x108] sm:$0xff] %v16316_v18  ;;  %v8848_v40 = vadd.f32 %v8816_v19, %v8746_v36 }
 0x7f5   : > { %9345 = vadd.xlane.f32.xlu1 %v9292_v44  ;;  %v8586_v2 = vmul.f32 %v15700_v3, %v16186_v54  ;;  %v8988_v30 = vmul.f32 %v15724_v1, %v8952_v43  ;;  %v9090_v22 = vmul.f32 %v15731_v7, %v8418_v6  ;;  %v9226_v57 = vmul.f32 %v17224_v14, %v8650_v4 }
 0x7f6   : > { %v9121_v20 = vadd.f32 %v9089_v25, %v9019_v50  ;;  %v8918_v17 = vadd.f32 %v8886_v45, %v8848_v40  ;;  %v8322_v47 = vadd.f32 %v17232_v52, %v16215_v5  ;;  %v8451_v9 = vmul.f32 %v17233_v56, %v8419_v53  ;;  %v8651_v45 = vld [vmem:[#allocation3 + $0xe9] sm:$0xff] }
 0x7f7   : > { %v16334_v32 = vadd.f32 %v8717_v10, %v8617_v62  ;;  %v16336_v19 = vadd.f32 %v8586_v2, %v8486_v34  ;;  %v8682_v35 = vmul.f32 %v17234_v60, %v8650_v4  ;;  %v8818_v42 = vmul.f32 %v15712_v58, %v8418_v6  ;;  %v8420_v62 = vld [vmem:[#allocation3 + $0xef] sm:$0xff] }
 0x7f8   : > { %v9191_v24 = vadd.f32 %v9159_v39, %v9121_v20  ;;  %v9020_v63 = vadd.f32 %v8988_v30, %v8918_v17  ;;  %v16340_v43 = vmax.f32 %v8322_v47, 0.0  ;;  %v8487_v14 = vmul.f32 %v15697_v49, %v8451_v9  ;;  %v17236_v9 = vld [vmem:[#allocation44_spill] sm:$0xff] }
 0x7f9   : > { %v8888_v5 = vmul.f32 %v15714_v11, %v16186_v54  ;;  %v8587_v46 = vmul.f32 %v15700_v3, %v16211_v37  ;;  %v8817_v27 = vmul.f32 %v15712_v58, %v8781_v23  ;;  %v9055_v26 = vmul.f32 %v17226_v61, %v8419_v53 }
 0x7fa   : > { %v9293_v59 = vadd.f32 %v9261_v33, %v9191_v24  ;;  %v9122_v12 = vadd.f32 %v9090_v22, %v9020_v63  ;;  %v9160_v6 = vmul.f32 %v15726_v38, %v16186_v54  ;;  %v9262_v10 = vmul.f32 %v16236_v21, %v9226_v57  ;;  %8388 = vst [vmem:[#allocation3 + $0x110] sm:$0xff] %v16340_v43  ;;  %v8652_v33 = vld [vmem:[#allocation3 + $0xf1] sm:$0xff] }
 0x7fb   : > { %v8954_v28 = vmul.f32 %v17228_v13, %v8650_v4  ;;  %v8619_v25 = vadd.f32 %v8587_v46, %v8487_v14  ;;  %v8719_v36 = vmul.f32 %v15705_v15, %v8651_v45  ;;  %v8849_v44 = vadd.f32 %v8817_v27, %v16285_v48  ;;  %v8421_v48 = vld [vmem:[#allocation3 + $0xf7] sm:$0xff] }
 0x7fc   : > { %9347 = vadd.xlane.f32.xlu0 %v9293_v59  ;;  %v8718_v61 = vmul.f32 %v15705_v15, %v8682_v35  ;;  %v9192_v23 = vadd.f32 %v9160_v6, %v9122_v12  ;;  %v8783_v34 = vmul.f32 %v17230_v0, %v8419_v53  ;;  %v8889_v54 = vmul.f32 %v15714_v11, %v16211_v37 }
 0x7fd   : > { %v8919_v50 = vadd.f32 %v8887_v55, %v8849_v44  ;;  %v8991_v39 = vmul.f32 %v15724_v1, %v8651_v45  ;;  %v9091_v4 = vmul.f32 %v15731_v7, %v9055_v26  ;;  %v8748_v40 = vadd.f32 %v16296_v8, %v16288_v51  ;;  %v17235_v51 = vld [vmem:[#allocation45_spill] sm:$0xff] }
 0x7fe   : > { %v9294_v2 = vadd.f32 %v9262_v10, %v9192_v23  ;;  %v9161_v30 = vmul.f32 %v15726_v38, %v16211_v37  ;;  %v9263_v22 = vmul.f32 %v16236_v21, %v8651_v45  ;;  %v8488_v53 = vmul.f32 %v15697_v49, %v8420_v62  ;;  %v8422_v23 = vld [vmem:[#allocation3 + $0xff] sm:$0xff] }
 0x7ff   : > { %v16368_v57 = vadd.f32 %v8719_v36, %v8619_v25  ;;  %v9021_v55 = vadd.f32 %v8989_v41, %v8919_v50  ;;  %v8850_v20 = vadd.f32 %v8818_v42, %v8748_v40  ;;  %v8990_v17 = vmul.f32 %v15724_v1, %v8954_v28  ;;  %v8653_v41 = vld [vmem:[#allocation3 + $0xf9] sm:$0xff]  ;;  %v8654_v40 = vld [vmem:[#allocation3 + $0x101] sm:$0xff] }
 0x800   : > { %9349 = vadd.xlane.f32.xlu1 %v9294_v2  ;;  %v8588_v52 = vmul.f32 %v15700_v3, %v16244_v16  ;;  %v8684_v8 = vmul.f32 %v17235_v51, %v8652_v33  ;;  %v8820_v47 = vmul.f32 %v15712_v58, %v8420_v62  ;;  %v8453_v37 = vmul.f32 %v17236_v9, %v8421_v48 }
 0x801   : > { %v9123_v35 = vadd.f32 %v9091_v4, %v9021_v55  ;;  %v8920_v24 = vadd.f32 %v8888_v5, %v8850_v20  ;;  %v9092_v63 = vmul.f32 %v15731_v7, %v8420_v62  ;;  %v9228_v14 = vmul.f32 %v17228_v13, %v8652_v33 }
 0x802   : > { %v8620_v42 = vadd.f32 %v8588_v52, %v8488_v53  ;;  %v8890_v45 = vmul.f32 %v15714_v11, %v16244_v16  ;;  %v8489_v46 = vmul.f32 %v15697_v49, %v8453_v37  ;;  %v8819_v27 = vmul.f32 %v15712_v58, %v8783_v34  ;;  %v8755_v52 = vld [vmem:[#allocation3 + $0x107] sm:$0xff] }
 0x803   : > { %v9193_v26 = vadd.f32 %v9161_v30, %v9123_v35  ;;  %v9022_v59 = vadd.f32 %v8990_v17, %v8920_v24  ;;  %v8589_v12 = vmul.f32 %v15700_v3, %v16267_v31  ;;  %v9057_v5 = vmul.f32 %v17230_v0, %v8421_v48  ;;  %v17237_v35 = vld [vmem:[#allocation50_spill] sm:$0xff] }
 0x804   : > { %v8956_v6 = vmul.f32 %v17234_v60, %v8652_v33  ;;  %v9162_v13 = vmul.f32 %v15726_v38, %v16244_v16  ;;  %v8721_v10 = vmul.f32 %v15705_v15, %v8653_v41  ;;  %v8851_v28 = vadd.f32 %v8819_v27, %v16334_v32 }
 0x805   : > { %v9295_v25 = vadd.f32 %v9263_v22, %v9193_v26  ;;  %v9124_v36 = vadd.f32 %v9092_v63, %v9022_v59  ;;  %v9264_v44 = vmul.f32 %v16236_v21, %v9228_v14  ;;  %v8621_v62 = vadd.f32 %v8589_v12, %v8489_v46  ;;  %v8756_v26 = vld [vmem:[#allocation3 + $0x10f] sm:$0xff] }
 0x806   : > { %v8720_v34 = vmul.f32 %v15705_v15, %v8684_v8  ;;  %v8785_v50 = vmul.f32 %v17233_v56, %v8421_v48  ;;  %v8921_v0 = vadd.f32 %v8889_v54, %v8851_v28  ;;  %v9093_v4 = vmul.f32 %v15731_v7, %v9057_v5 }
 0x807   : > { %9351 = vadd.xlane.f32.xlu0 %v9295_v25  ;;  %v9194_v33 = vadd.f32 %v9162_v13, %v9124_v36  ;;  %v8891_v16 = vmul.f32 %v15714_v11, %v16267_v31  ;;  %v8993_v32 = vmul.f32 %v15724_v1, %v8653_v41  ;;  %v8750_v2 = vadd.f32 %v8718_v61, %v16336_v19  ;;  %v9029_v25 = vld [vmem:[#allocation3 + $0x117] sm:$0xff] }
 0x808   : > { %v9023_v30 = vadd.f32 %v8991_v39, %v8921_v0  ;;  %v9163_v22 = vmul.f32 %v15726_v38, %v16267_v31  ;;  %v9265_v53 = vmul.f32 %v16236_v21, %v8653_v41  ;;  %v8490_v54 = vmul.f32 %v15697_v49, %v8422_v23 }
 0x809   : > { %v9296_v48 = vadd.f32 %v9264_v44, %v9194_v33  ;;  %v8753_v55 = vadd.f32 %v8721_v10, %v8621_v62  ;;  %v8852_v20 = vadd.f32 %v8820_v47, %v8750_v2  ;;  %v8992_v17 = vmul.f32 %v15724_v1, %v8956_v6  ;;  %v8927_v62 = vld [vmem:[#allocation3 + $0x109] sm:$0xff] }
 0x80a   : > { %v9125_v8 = vadd.f32 %v9093_v4, %v9023_v30  ;;  %v8590_v37 = vmul.f32 %v15700_v3, %v16293_v29  ;;  %v8686_v19 = vmul.f32 %v17237_v35, %v8654_v40  ;;  %v9230_v61 = vmul.f32 %v17234_v60, %v8654_v40 }
 0x80b   : > { %9353 = vadd.xlane.f32.xlu1 %v9296_v48  ;;  %v8822_v31 = vmul.f32 %v15712_v58, %v8422_v23  ;;  %v8922_v39 = vadd.f32 %v8890_v45, %v8852_v20  ;;  %v9094_v49 = vmul.f32 %v15731_v7, %v8422_v23  ;;  %v8821_v24 = vmul.f32 %v15712_v58, %v8785_v50  ;;  %v9030_v20 = vld [vmem:[#allocation3 + $0x11f] sm:$0xff] }
 0x80c   : > { %v9195_v47 = vadd.f32 %v9163_v22, %v9125_v8  ;;  %v8892_v63 = vmul.f32 %v15714_v11, %v16293_v29  ;;  %v8958_v14 = vmul.f32 %v17235_v51, %v8654_v40  ;;  %v9059_v3 = vmul.f32 %v17233_v56, %v8755_v52  ;;  %v8928_v56 = vld [vmem:[#allocation3 + $0x111] sm:$0xff] }
 0x80d   : > { %v9024_v41 = vadd.f32 %v8992_v17, %v8922_v39  ;;  %v8787_v46 = vmul.f32 %v17236_v9, %v8755_v52  ;;  %v8853_v60 = vadd.f32 %v8821_v24, %v16368_v57  ;;  %v8752_v27 = vadd.f32 %v8720_v34, %v8620_v42  ;;  %v11770_v52 = vld [vmem:[#allocation2] sm:$0xff] }
 0x80e   : > { %v9297_v45 = vadd.f32 %v9265_v53, %v9195_v47  ;;  %v8622_v59 = vadd.f32 %v8590_v37, %v8490_v54  ;;  %v9164_v12 = vmul.f32 %v15726_v38, %v16293_v29  ;;  %v9266_v5 = vmul.f32 %v16236_v21, %v9230_v61  ;;  %v9201_v37 = vld [vmem:[#allocation3 + $0x119] sm:$0xff] }
 0x80f   : > { %v9126_v6 = vadd.f32 %v9094_v49, %v9024_v41  ;;  %v8923_v13 = vadd.f32 %v8891_v16, %v8853_v60  ;;  %v9095_v10 = vmul.f32 %v15731_v7, %v9059_v3  ;;  %v8854_v28 = vadd.f32 %v8822_v31, %v8752_v27 }
 0x810   : > { %9355 = vadd.xlane.f32.xlu0 %v9297_v45  ;;  %v8722_v36 = vmul.f32 %v15705_v15, %v8686_v19  ;;  %v8893_v57 = vmul.f32 %v15714_v11, %v16316_v18  ;;  %v8994_v42 = vmul.f32 %v15724_v1, %v8958_v14  ;;  %v9096_v44 = vmul.f32 %v15731_v7, %v8756_v26 }
 0x811   : > { %v9196_v29 = vadd.f32 %v9164_v12, %v9126_v6  ;;  %v9025_v23 = vadd.f32 %v8993_v32, %v8923_v13  ;;  %v8924_v34 = vadd.f32 %v8892_v63, %v8854_v28  ;;  %v8823_v50 = vmul.f32 %v15712_v58, %v8787_v46  ;;  %v11771_v6 = vld [vmem:[%s11892_s7 + $0x8] sm:$0xff] }
 0x812   : > { %v9165_v0 = vmul.f32 %v15726_v38, %v16316_v18  ;;  %v8824_v4 = vmul.f32 %v15712_v58, %v8756_v26  ;;  %v9232_v15 = vmul.f32 %v17235_v51, %v8928_v56  ;;  %v9061_v33 = vmul.f32 %v17236_v9, %v9029_v25  ;;  %v9202_v9 = vld [vmem:[#allocation3 + $0x121] sm:$0xff] }
 0x813   : > { %v9298_v16 = vadd.f32 %v9266_v5, %v9196_v29  ;;  %v9127_v40 = vadd.f32 %v9095_v10, %v9025_v23  ;;  %v9026_v2 = vadd.f32 %v8994_v42, %v8924_v34  ;;  %v8855_v30 = vadd.f32 %v8823_v50, %v8753_v55  ;;  %v11775_v50 = vld [vmem:[%s11892_s7 + $0x18] sm:$0xff] }
 0x814   : > { %v8995_v22 = vmul.f32 %v15724_v1, %v8927_v62  ;;  %v9267_v32 = vmul.f32 %v16236_v21, %v8927_v62  ;;  %v8960_v53 = vmul.f32 %v17237_v35, %v8928_v56  ;;  %v8754_v54 = vadd.f32 %v8722_v36, %v8622_v59  ;;  %v11774_v62 = vld [vmem:[%s11892_s7 + $0x20] sm:$0xff] }
 0x815   : > { %9357 = vadd.xlane.f32.xlu1 %v9298_v16  ;;  %v9197_v48 = vadd.f32 %v9165_v0, %v9127_v40  ;;  %v9128_v18 = vadd.f32 %v9096_v44, %v9026_v2  ;;  %v9166_v58 = vmul.f32 %v15726_v38, %v16340_v43  ;;  %v8925_v51 = vadd.f32 %v8893_v57, %v8855_v30  ;;  %v11773_v57 = vld [vmem:[%s11892_s7 + $0x10] sm:$0xff]  ;;  %v11777_v40 = vld [vmem:[%s11892_s7 + $0x28] sm:$0xff] }
 0x816   : > { %v8894_v17 = vmul.f32 %v15714_v11, %v16340_v43  ;;  %v9268_v55 = vmul.f32 %v16236_v21, %v9232_v15  ;;  %v9167_v8 = vmul.f32 %v11770_v52, %v15726_v38  ;;  %v8856_v19 = vadd.f32 %v8824_v4, %v8754_v54  ;;  %v11781_v52 = vld [vmem:[%s11892_s7 + $0x50] sm:$0xff] }
 0x817   : > { %v9299_v61 = vadd.f32 %v9267_v32, %v9197_v48  ;;  %v9198_v31 = vadd.f32 %v9166_v58, %v9128_v18  ;;  %v9027_v39 = vadd.f32 %v8995_v22, %v8925_v51  ;;  %v9097_v49 = vmul.f32 %v15731_v7, %v9061_v33  ;;  %v9308_v45 = vpop.xlane.xlu1 %9307  ;;  %v11776_v33 = vld [vmem:[%s11892_s7 + $0x30] sm:$0xff]  ;;  %v11779_v48 = vld [vmem:[%s11892_s7 + $0x40] sm:$0xff] }
 0x818   : > { %v8926_v24 = vadd.f32 %v8894_v17, %v8856_v19  ;;  %v8996_v47 = vmul.f32 %v15724_v1, %v8960_v53  ;;  %v9098_v63 = vmul.f32 %v15731_v7, %v9030_v20  ;;  %v9234_v14 = vmul.f32 %v17237_v35, %v9202_v9  ;;  %v9304_v7 = vpop.xlane.xlu0 %9303  ;;  %v11778_v53 = vld [vmem:[%s11892_s7 + $0x38] sm:$0xff]  ;;  %v11780_v20 = vld [vmem:[%s11892_s7 + $0x48] sm:$0xff] }
 0x819   : > { %9359 = vadd.xlane.f32.xlu0 %v9299_v61  ;;  %v9300_v11 = vadd.f32 %v9268_v55, %v9198_v31  ;;  %v9129_v43 = vadd.f32 %v9097_v49, %v9027_v39  ;;  %v9269_v3 = vmul.f32 %v16236_v21, %v9201_v37  ;;  %v9367_v12 = vmax.f32 %v9304_v7, 0.0  ;;  %v11782_v61 = vld [vmem:[%s11892_s7 + $0x58] sm:$0xff] }
 0x81a   : > { %v9028_v38 = vadd.f32 %v8996_v47, %v8926_v24  ;;  %v9270_v60 = vmul.f32 %v16236_v21, %v9234_v14  ;;  %v9369_v10 = vmax.f32 %v9308_v45, 0.0  ;;  %v11772_v21 = vld [vmem:[%s11892_s7] sm:$0xff] }
 0x81b   : > { %9361 = vadd.xlane.f32.xlu1 %v9300_v11  ;;  %v9199_v41 = vadd.f32 %v9167_v8, %v9129_v43  ;;  %v9399_v56 = vadd.f32 %v11772_v21, %v9367_v12  ;;  %v11783_v24 = vld [vmem:[%s11892_s7 + $0x60] sm:$0xff]  ;;  %v11784_v11 = vld [vmem:[%s11892_s7 + $0x68] sm:$0xff]  ;;  %v11789_v21 = vld [vmem:[%s11892_s7 + $0x90] sm:$0xff] }
 0x81c   : > { %v9130_v46 = vadd.f32 %v9098_v63, %v9028_v38  ;;  %v9306_v35 = vpop.xlane.xlu0 %9305  ;;  %v9401_v42 = vadd.f32 %v11773_v57, %v9369_v10  ;;  %v11787_v45 = vld [vmem:[%s11892_s7 + $0x80] sm:$0xff]  ;;  %v11790_v57 = vld [vmem:[%s11892_s7 + $0x98] sm:$0xff] }
 0x81d   : > { %v9301_v27 = vadd.f32 %v9269_v3, %v9199_v41  ;;  %v9368_v59 = vmax.f32 %v9306_v35, 0.0  ;;  %v11785_v41 = vld [vmem:[%s11892_s7 + $0x70] sm:$0xff] }
 0x81e   : > { %v9200_v26 = vadd.f32 %v9167_v8, %v9130_v46 }
 0x81f   : > { %9363 = vadd.xlane.f32.xlu0 %v9301_v27  ;;  %v9400_v13 = vadd.f32 %v11771_v6, %v9368_v59  ;;  %v11788_v6 = vld [vmem:[%s11892_s7 + $0x88] sm:$0xff] }
 0x820   : > { %v9302_v1 = vadd.f32 %v9270_v60, %v9200_v26  ;;  %v9310_v28 = vpop.xlane.xlu1 %9309  ;;  %v11786_v26 = vld [vmem:[%s11892_s7 + $0x78] sm:$0xff] }
 0x821   : > { %v9370_v44 = vmax.f32 %v9310_v28, 0.0 }
 0x822   : > { %9365 = vadd.xlane.f32.xlu1 %v9302_v1 }
 0x823   : > { %v9402_v0 = vadd.f32 %v11775_v50, %v9370_v44 }
 0x825   : > { %v9312_v5 = vpop.xlane.xlu0 %9311 }
 0x826   : > { %v9371_v25 = vmax.f32 %v9312_v5, 0.0 }
 0x828   : > { %v9403_v23 = vadd.f32 %v11774_v62, %v9371_v25  ;;  %v11791_v62 = vld [vmem:[%s11892_s7 + $0xa0] sm:$0xff] }
 0x82a   : > { %v9314_v29 = vpop.xlane.xlu1 %9313 }
 0x82b   : > { %v9372_v4 = vmax.f32 %v9314_v29, 0.0 }
 0x82d   : > { %v9404_v2 = vadd.f32 %v11777_v40, %v9372_v4 }
 0x82e   : > { %v9316_v36 = vpop.xlane.xlu0 %9315 }
 0x82f   : > { %v9373_v34 = vmax.f32 %v9316_v36, 0.0 }
 0x831   : > { %v9405_v16 = vadd.f32 %v11776_v33, %v9373_v34 }
 0x833   : > { %9465 = vrot.lane.b32.xlu1 %v9400_v13, %s11813_s20 }
 0x835   : > { %9463 = vrot.lane.b32.xlu0 %v9399_v56, %s11813_s20  ;;  %v9318_v15 = vpop.xlane.xlu1 %9317 }
 0x836   : > { %v9374_v30 = vmax.f32 %v9318_v15, 0.0 }
 0x837   : > { %9467 = vrot.lane.b32.xlu1 %v9401_v42, %s11813_s20 }
 0x838   : > { %v9406_v54 = vadd.f32 %v11778_v53, %v9374_v30 }
 0x839   : > { %9471 = vrot.lane.b32.xlu0 %v9403_v23, %s11813_s20 }
 0x83b   : > { %9469 = vrot.lane.b32.xlu1 %v9402_v0, %s11813_s20  ;;  %v11792_v0 = vld [vmem:[%s11892_s7 + $0xa8] sm:$0xff] }
 0x83c   : > { %v9320_v22 = vpop.xlane.xlu0 %9319 }
 0x83d   : > { %9475 = vrot.lane.b32.xlu0 %v9405_v16, %s11813_s20  ;;  %v9375_v32 = vmax.f32 %v9320_v22, 0.0  ;;  %v11793_v16 = vld [vmem:[%s11892_s7 + $0xb0] sm:$0xff]  ;;  %v11794_v22 = vld [vmem:[%s11892_s7 + $0xb8] sm:$0xff] }
 0x83f   : > { %9473 = vrot.lane.b32.xlu1 %v9404_v2, %s11813_s20  ;;  %v9407_v18 = vadd.f32 %v11779_v48, %v9375_v32  ;;  %v11795_v48 = vld [vmem:[%s11892_s7 + $0xc0] sm:$0xff] }
 0x840   : > { %v9322_v58 = vpop.xlane.xlu1 %9321 }
 0x841   : > { %v9376_v51 = vmax.f32 %v9322_v58, 0.0  ;;  %9479 = vrot.lane.b32.xlu0 %v9407_v18, %s11813_s20 }
 0x843   : > { %9477 = vrot.lane.b32.xlu1 %v9406_v54, %s11813_s20  ;;  %v9408_v9 = vadd.f32 %v11780_v20, %v9376_v51  ;;  %v11796_v20 = vld [vmem:[%s11892_s7 + $0xc8] sm:$0xff] }
 0x847   : > { %v9324_v17 = vpop.xlane.xlu0 %9323  ;;  %9481 = vrot.lane.b32.xlu1 %v9408_v9, %s11813_s20 }
 0x848   : > { %v9377_v55 = vmax.f32 %v9324_v17, 0.0 }
 0x84a   : > { %v9409_v8 = vadd.f32 %v11781_v52, %v9377_v55  ;;  %v11797_v52 = vld [vmem:[%s11892_s7 + $0xd0] sm:$0xff] }
 0x84b   : > { %v9326_v37 = vpop.xlane.xlu1 %9325 }
 0x84c   : > { %v9378_v19 = vmax.f32 %v9326_v37, 0.0  ;;  %9483 = vrot.lane.b32.xlu0 %v9409_v8, %s11813_s20 }
 0x84e   : > { %v9410_v31 = vadd.f32 %v11782_v61, %v9378_v19  ;;  %v11798_v61 = vld [vmem:[%s11892_s7 + $0xd8] sm:$0xff] }
 0x850   : > { %9485 = vrot.lane.b32.xlu1 %v9410_v31, %s11813_s20 }
 0x852   : > { %v9328_v39 = vpop.xlane.xlu0 %9327 }
 0x853   : > { %v9379_v49 = vmax.f32 %v9328_v39, 0.0 }
 0x855   : > { %v9411_v47 = vadd.f32 %v11783_v24, %v9379_v49 }
 0x856   : > { %v9330_v63 = vpop.xlane.xlu1 %9329 }
 0x857   : > { %v9380_v14 = vmax.f32 %v9330_v63, 0.0  ;;  %9487 = vrot.lane.b32.xlu0 %v9411_v47, %s11813_s20  ;;  %v11799_v47 = vld [vmem:[%s11892_s7 + $0xe0] sm:$0xff] }
 0x859   : > { %v9412_v43 = vadd.f32 %v11784_v11, %v9380_v14  ;;  %v11800_v11 = vld [vmem:[%s11892_s7 + $0xe8] sm:$0xff] }
 0x85b   : > { %9489 = vrot.lane.b32.xlu1 %v9412_v43, %s11813_s20 }
 0x85d   : > { %v9332_v3 = vpop.xlane.xlu0 %9331 }
 0x85e   : > { %v9381_v38 = vmax.f32 %v9332_v3, 0.0 }
 0x860   : > { %v9413_v46 = vadd.f32 %v11785_v41, %v9381_v38  ;;  %v11801_v41 = vld [vmem:[%s11892_s7 + $0xf0] sm:$0xff] }
 0x861   : > { %v9334_v60 = vpop.xlane.xlu1 %9333 }
 0x862   : > { %v9382_v27 = vmax.f32 %v9334_v60, 0.0  ;;  %9491 = vrot.lane.b32.xlu0 %v9413_v46, %s11813_s20 }
 0x864   : > { %v9414_v1 = vadd.f32 %v11786_v26, %v9382_v27 }
 0x866   : > { %9493 = vrot.lane.b32.xlu1 %v9414_v1, %s11813_s20  ;;  %v11802_v1 = vld [vmem:[%s11892_s7 + $0xf8] sm:$0xff] }
 0x868   : > { %v9336_v7 = vpop.xlane.xlu0 %9335 }
 0x869   : > { %v9383_v35 = vmax.f32 %v9336_v7, 0.0 }
 0x86b   : > { %v9415_v59 = vadd.f32 %v11787_v45, %v9383_v35 }
 0x86c   : > { %v9338_v12 = vpop.xlane.xlu1 %9337 }
 0x86d   : > { %v9384_v5 = vmax.f32 %v9338_v12, 0.0  ;;  %9495 = vrot.lane.b32.xlu0 %v9415_v59, %s11813_s20 }
 0x86f   : > { %v9416_v13 = vadd.f32 %v11788_v6, %v9384_v5 }
 0x871   : > { %9497 = vrot.lane.b32.xlu1 %v9416_v13, %s11813_s20 }
 0x873   : > { %v9340_v10 = vpop.xlane.xlu0 %9339 }
 0x874   : > { %v9385_v28 = vmax.f32 %v9340_v10, 0.0 }
 0x876   : > { %v9417_v56 = vadd.f32 %v11789_v21, %v9385_v28 }
 0x877   : > { %v9342_v25 = vpop.xlane.xlu1 %9341 }
 0x878   : > { %v9386_v36 = vmax.f32 %v9342_v25, 0.0  ;;  %9499 = vrot.lane.b32.xlu0 %v9417_v56, %s11813_s20 }
 0x87a   : > { %v9418_v42 = vadd.f32 %v11790_v57, %v9386_v36 }
 0x87c   : > { %9501 = vrot.lane.b32.xlu1 %v9418_v42, %s11813_s20 }
 0x87e   : > { %v9344_v44 = vpop.xlane.xlu0 %9343 }
 0x87f   : > { %v9387_v29 = vmax.f32 %v9344_v44, 0.0 }
 0x881   : > { %v9419_v23 = vadd.f32 %v11791_v62, %v9387_v29 }
 0x882   : > { %v9346_v34 = vpop.xlane.xlu1 %9345 }
 0x883   : > { %v9388_v50 = vmax.f32 %v9346_v34, 0.0  ;;  %9503 = vrot.lane.b32.xlu0 %v9419_v23, %s11813_s20 }
 0x885   : > { %v9420_v4 = vadd.f32 %v11792_v0, %v9388_v50 }
 0x887   : > { %9505 = vrot.lane.b32.xlu1 %v9420_v4, %s11813_s20 }
 0x889   : > { %v9348_v15 = vpop.xlane.xlu0 %9347 }
 0x88a   : > { %v9389_v33 = vmax.f32 %v9348_v15, 0.0 }
 0x88c   : > { %v9421_v40 = vadd.f32 %v11793_v16, %v9389_v33 }
 0x88d   : > { %v9350_v2 = vpop.xlane.xlu1 %9349 }
 0x88e   : > { %v9390_v30 = vmax.f32 %v9350_v2, 0.0  ;;  %9507 = vrot.lane.b32.xlu0 %v9421_v40, %s11813_s20 }
 0x890   : > { %v9422_v32 = vadd.f32 %v11794_v22, %v9390_v30 }
 0x892   : > { %9509 = vrot.lane.b32.xlu1 %v9422_v32, %s11813_s20 }
 0x894   : > { %v9352_v53 = vpop.xlane.xlu0 %9351 }
 0x895   : > { %v9391_v54 = vmax.f32 %v9352_v53, 0.0 }
 0x897   : > { %v9423_v18 = vadd.f32 %v11795_v48, %v9391_v54 }
 0x898   : > { %v9354_v58 = vpop.xlane.xlu1 %9353 }
 0x899   : > { %v9392_v51 = vmax.f32 %v9354_v58, 0.0  ;;  %9511 = vrot.lane.b32.xlu0 %v9423_v18, %s11813_s20 }
 0x89b   : > { %v9424_v9 = vadd.f32 %v11796_v20, %v9392_v51 }
 0x89d   : > { %v9356_v17 = vpop.xlane.xlu0 %9355  ;;  %9513 = vrot.lane.b32.xlu1 %v9424_v9, %s11813_s20 }
 0x89e   : > { %v9393_v55 = vmax.f32 %v9356_v17, 0.0 }
 0x8a0   : > { %v9425_v8 = vadd.f32 %v11797_v52, %v9393_v55 }
 0x8a2   : > { %v9358_v37 = vpop.xlane.xlu1 %9357  ;;  %9515 = vrot.lane.b32.xlu0 %v9425_v8, %s11813_s20 }
 0x8a3   : > { %v9394_v19 = vmax.f32 %v9358_v37, 0.0 }
 0x8a5   : > { %v9426_v31 = vadd.f32 %v11798_v61, %v9394_v19 }
 0x8a6   : > { %v9360_v39 = vpop.xlane.xlu0 %9359 }
 0x8a7   : > { %v9395_v49 = vmax.f32 %v9360_v39, 0.0  ;;  %9517 = vrot.lane.b32.xlu1 %v9426_v31, %s11813_s20 }
 0x8a8   : > { %v9362_v24 = vpop.xlane.xlu1 %9361 }
 0x8a9   : > { %v9427_v63 = vadd.f32 %v11799_v47, %v9395_v49  ;;  %v9396_v14 = vmax.f32 %v9362_v24, 0.0 }
 0x8ab   : > { %v9428_v43 = vadd.f32 %v11800_v11, %v9396_v14  ;;  %9519 = vrot.lane.b32.xlu0 %v9427_v63, %s11813_s20 }
 0x8ac   : > { %v9364_v3 = vpop.xlane.xlu0 %9363 }
 0x8ad   : > { %v9397_v38 = vmax.f32 %v9364_v3, 0.0  ;;  %9521 = vrot.lane.b32.xlu1 %v9428_v43, %s11813_s20 }
 0x8af   : > { %v9429_v46 = vadd.f32 %v11801_v41, %v9397_v38  ;;  %v9366_v60 = vpop.xlane.xlu1 %9365 }
 0x8b0   : > { %v9398_v27 = vmax.f32 %v9366_v60, 0.0  ;;  %v9464_v26 = vpop.permute.xlu0 %9463 }
 0x8b1   : > { %9560 = vst.msk [vmem:[%s16511_s23] sm:$0xff] %vm9559_vm0, %v9464_v26  ;;  %9523 = vrot.lane.b32.xlu0 %v9429_v46, %s11813_s20 }
 0x8b2   : > { %v9430_v7 = vadd.f32 %v11802_v1, %v9398_v27 }
 0x8b3   : > { %v9466_v35 = vpop.permute.xlu1 %9465 }
 0x8b4   : > { %9561 = vst.msk [vmem:[%s16511_s23 + $0x8] sm:$0xff] %vm9559_vm0, %v9466_v35  ;;  %9525 = vrot.lane.b32.xlu1 %v9430_v7, %s11813_s20  ;;  %v9472_v45 = vpop.permute.xlu0 %9471 }
 0x8b5   : > { %9564 = vst.msk [vmem:[%s16511_s23 + $0x20] sm:$0xff] %vm9559_vm0, %v9472_v45 }
 0x8b7   : > { %v9468_v59 = vpop.permute.xlu1 %9467 }
 0x8b8   : > { %9562 = vst.msk [vmem:[%s16511_s23 + $0x10] sm:$0xff] %vm9559_vm0, %v9468_v59  ;;  %v9476_v12 = vpop.permute.xlu0 %9475 }
 0x8b9   : > { %9566 = vst.msk [vmem:[%s16511_s23 + $0x30] sm:$0xff] %vm9559_vm0, %v9476_v12 }
 0x8bb   : > { %v9470_v5 = vpop.permute.xlu1 %9469 }
 0x8bc   : > { %9563 = vst.msk [vmem:[%s16511_s23 + $0x18] sm:$0xff] %vm9559_vm0, %v9470_v5  ;;  %v9480_v6 = vpop.permute.xlu0 %9479 }
 0x8bd   : > { %9568 = vst.msk [vmem:[%s16511_s23 + $0x40] sm:$0xff] %vm9559_vm0, %v9480_v6 }
 0x8bf   : > { %v9474_v13 = vpop.permute.xlu1 %9473 }
 0x8c0   : > { %9565 = vst.msk [vmem:[%s16511_s23 + $0x28] sm:$0xff] %vm9559_vm0, %v9474_v13  ;;  %v9484_v10 = vpop.permute.xlu0 %9483 }
 0x8c1   : > { %9570 = vst.msk [vmem:[%s16511_s23 + $0x50] sm:$0xff] %vm9559_vm0, %v9484_v10 }
 0x8c3   : > { %v9478_v28 = vpop.permute.xlu1 %9477 }
 0x8c4   : > { %9567 = vst.msk [vmem:[%s16511_s23 + $0x38] sm:$0xff] %vm9559_vm0, %v9478_v28 }
 0x8c7   : > { %v9482_v21 = vpop.permute.xlu1 %9481 }
 0x8c8   : > { %9569 = vst.msk [vmem:[%s16511_s23 + $0x48] sm:$0xff] %vm9559_vm0, %v9482_v21 }
 0x8c9   : > { %v9488_v56 = vpop.permute.xlu0 %9487 }
 0x8ca   : > { %9572 = vst.msk [vmem:[%s16511_s23 + $0x60] sm:$0xff] %vm9559_vm0, %v9488_v56 }
 0x8cb   : > { %v9486_v25 = vpop.permute.xlu1 %9485 }
 0x8cc   : > { %9571 = vst.msk [vmem:[%s16511_s23 + $0x58] sm:$0xff] %vm9559_vm0, %v9486_v25 }
 0x8cf   : > { %v9490_v36 = vpop.permute.xlu1 %9489 }
 0x8d0   : > { %9573 = vst.msk [vmem:[%s16511_s23 + $0x68] sm:$0xff] %vm9559_vm0, %v9490_v36 }
 0x8d4   : > { %v9492_v57 = vpop.permute.xlu0 %9491 }
 0x8d5   : > { %9574 = vst.msk [vmem:[%s16511_s23 + $0x70] sm:$0xff] %vm9559_vm0, %v9492_v57 }
 0x8d8   : > { %v9494_v42 = vpop.permute.xlu1 %9493 }
 0x8d9   : > { %9575 = vst.msk [vmem:[%s16511_s23 + $0x78] sm:$0xff] %vm9559_vm0, %v9494_v42 }
 0x8df   : > { %v9496_v44 = vpop.permute.xlu0 %9495 }
 0x8e0   : > { %9576 = vst.msk [vmem:[%s16511_s23 + $0x80] sm:$0xff] %vm9559_vm0, %v9496_v44 }
 0x8e3   : > { %v9498_v29 = vpop.permute.xlu1 %9497 }
 0x8e4   : > { %9577 = vst.msk [vmem:[%s16511_s23 + $0x88] sm:$0xff] %vm9559_vm0, %v9498_v29 }
 0x8ea   : > { %v9500_v62 = vpop.permute.xlu0 %9499 }
 0x8eb   : > { %9578 = vst.msk [vmem:[%s16511_s23 + $0x90] sm:$0xff] %vm9559_vm0, %v9500_v62 }
 0x8ee   : > { %v9502_v23 = vpop.permute.xlu1 %9501 }
 0x8ef   : > { %9579 = vst.msk [vmem:[%s16511_s23 + $0x98] sm:$0xff] %vm9559_vm0, %v9502_v23 }
 0x8f5   : > { %v9504_v34 = vpop.permute.xlu0 %9503 }
 0x8f6   : > { %9580 = vst.msk [vmem:[%s16511_s23 + $0xa0] sm:$0xff] %vm9559_vm0, %v9504_v34 }
 0x8f9   : > { %v9506_v50 = vpop.permute.xlu1 %9505 }
 0x8fa   : > { %9581 = vst.msk [vmem:[%s16511_s23 + $0xa8] sm:$0xff] %vm9559_vm0, %v9506_v50 }
 0x900   : > { %v9508_v0 = vpop.permute.xlu0 %9507 }
 0x901   : > { %9582 = vst.msk [vmem:[%s16511_s23 + $0xb0] sm:$0xff] %vm9559_vm0, %v9508_v0 }
 0x904   : > { %v9510_v4 = vpop.permute.xlu1 %9509 }
 0x905   : > { %9583 = vst.msk [vmem:[%s16511_s23 + $0xb8] sm:$0xff] %vm9559_vm0, %v9510_v4 }
 0x90b   : > { %v9512_v15 = vpop.permute.xlu0 %9511 }
 0x90c   : > { %9584 = vst.msk [vmem:[%s16511_s23 + $0xc0] sm:$0xff] %vm9559_vm0, %v9512_v15 }
 0x90f   : > { %v9514_v33 = vpop.permute.xlu1 %9513 }
 0x910   : > { %9585 = vst.msk [vmem:[%s16511_s23 + $0xc8] sm:$0xff] %vm9559_vm0, %v9514_v33 }
 0x914   : > { %v9516_v16 = vpop.permute.xlu0 %9515 }
 0x915   : > { %9586 = vst.msk [vmem:[%s16511_s23 + $0xd0] sm:$0xff] %vm9559_vm0, %v9516_v16 }
 0x919   : > { %v9518_v40 = vpop.permute.xlu1 %9517 }
 0x91a   : > { %9587 = vst.msk [vmem:[%s16511_s23 + $0xd8] sm:$0xff] %vm9559_vm0, %v9518_v40 }
 0x91d   : > { %v9520_v2 = vpop.permute.xlu0 %9519 }
 0x91e   : > { %9588 = vst.msk [vmem:[%s16511_s23 + $0xe0] sm:$0xff] %vm9559_vm0, %v9520_v2 }
 0x91f   : > { %v9522_v30 = vpop.permute.xlu1 %9521 }
 0x920   : > { %9589 = vst.msk [vmem:[%s16511_s23 + $0xe8] sm:$0xff] %vm9559_vm0, %v9522_v30 }
 0x923   : > { %v9524_v22 = vpop.permute.xlu0 %9523 }
 0x924   : > { %9590 = vst.msk [vmem:[%s16511_s23 + $0xf0] sm:$0xff] %vm9559_vm0, %v9524_v22 }
 0x926   : > { %v9526_v32 = vpop.permute.xlu1 %9525 }
 0x927   : > { %9591 = vst.msk [vmem:[%s16511_s23 + $0xf8] sm:$0xff] %vm9559_vm0, %v9526_v32 }
 0x928 PF: > { %s14_s15 = sadd.s32 1, %s11809_s15  }
 0x929   : > { %p11_p4 = scmp.ge.s32.totalorder %s14_s15, 4  }
 0x92b   :  { %13 = sbr.rel (!%p11_p4) target bundleno = 1 (0x1), region = 68 }

</bundles_post_ra>
